<compile_context>
chip_gen: v7x
topology: tpu7x:2x2x1
jax: 0.10.0
libtpu: 0.0.40
codegen_flags: <defaults>
</compile_context>

<pallas_src>
import functools

import jax
import jax.numpy as jnp
import numpy as np
from jax.experimental import pallas as pl
from jax.experimental.pallas import tpu as pltpu


# ----------------------------------------------------------------------------
# helpers
# ----------------------------------------------------------------------------
def _leaky(x):
    return jnp.maximum(x, 0.2 * x)


def _pick_tile(n, target):
    """Largest multiple-of-8 divisor of n that is <= target.

    Falls back to the full extent n (always a legal Pallas block).  Callers guard
    that fallback by raising vmem_limit_bytes when the resulting blocks are large
    (see _cparams), so an awkward n degrades gracefully instead of tripping the
    scoped-VMEM limit.
    """
    t = min(target, n)
    for cand in range(t, 7, -1):
        if n % cand == 0 and cand % 8 == 0:
            return cand
    return n


def _cparams(sem, block_bytes):
    """CompilerParams with the VMEM limit raised only when the tiles need it."""
    need = 2 * block_bytes + (4 << 20)            # double-buffering + slack
    limit = None
    if need > (12 << 20):
        limit = int(min(need + (8 << 20), 48 << 20))
    return pltpu.CompilerParams(dimension_semantics=sem, vmem_limit_bytes=limit)


# ----------------------------------------------------------------------------
# kNN + neighbor gather (glue in plain JAX, k-major output)
# ----------------------------------------------------------------------------
def knn_gather_neighbors(x, k):
    """x: (B, N, C) bf16 -> k-major neighbor features (B, K, N, C) bf16."""
    xf = x.astype(jnp.float32)
    sq = jnp.sum(xf * xf, axis=-1)
    neg_dist = (2.0 * jnp.einsum("bnd,bmd->bnm", xf, xf)
                - sq[:, :, None] - sq[:, None, :])
    _, idx = jax.lax.top_k(neg_dist, k)               # (B, N, K) nearest incl. self
    idx_t = jnp.swapaxes(idx, 1, 2)                   # (B, K, N): k-major gather
    # TODO(synk): fuse this gather into the edge-conv kernel (scalar-prefetch /
    # manual DMA row gather) so the (B, K, N, C) tensor never round-trips HBM.
    return jax.vmap(lambda xb, ib: xb[ib])(x, idx_t)  # (B, K, N, C)


# ----------------------------------------------------------------------------
# Kernel 1: fused edge-conv block, edge feature built in-kernel, running k-max
# ----------------------------------------------------------------------------
def _edge_block_kernel(*refs, k, n_layers, n_extra, cat_cen):
    """refs = (cen, nbr, extras..., wd, wc, b1, [w2, b2]..., out).

    cen:     (1, tile, C)     bf16 center features
    nbr:     (1, K, tile, C)  bf16 neighbor features (k-major)
    wd / wc: (C, C1)          bf16 first-conv weight, diff / center halves
    b1:      (1, C1)          f32 folded BN shift
    w2 / b2: further 1x1 convs applied before the k-max
    out:     (1, tile, c_out) bf16, optionally prefixed with extras / cen (concat fusion)
    """
    cen_ref, nbr_ref = refs[0], refs[1]
    extra_refs = refs[2:2 + n_extra]
    i = 2 + n_extra
    wd, wc, b1 = refs[i][...], refs[i + 1][...], refs[i + 2][...]
    i += 3
    tail = []
    for _ in range(n_layers - 1):
        tail.append((refs[i][...], refs[i + 1][...]))
        i += 2
    o_ref = refs[-1]

    cen = cen_ref[0]                                           # (tile, C) bf16
    cen_b = cen.astype(jnp.bfloat16)
    # Center contribution of the first conv is k-invariant: compute it once.
    base = jnp.dot(cen_b, wc, preferred_element_type=jnp.float32) + b1

    m = None
    for kk in range(k):                                        # small static loop
        d = (nbr_ref[0, kk] - cen).astype(jnp.bfloat16)        # (tile, C)
        h = jnp.dot(d, wd, preferred_element_type=jnp.float32) + base
        h = _leaky(h)
        for (w2, b2) in tail:
            h = jnp.dot(h.astype(jnp.bfloat16), w2,
                        preferred_element_type=jnp.float32) + b2
            h = _leaky(h)
        m = h if m is None else jnp.maximum(m, h)              # running k-max

    m = m.astype(o_ref.dtype)
    if n_extra == 0 and not cat_cen:
        o_ref[0] = m
    else:
        off = 0
        for e_ref in extra_refs:
            v = e_ref[0]
            o_ref[0, :, off:off + v.shape[-1]] = v
            off += v.shape[-1]
        if cat_cen:
            o_ref[0, :, off:off + cen.shape[-1]] = cen
            off += cen.shape[-1]
        o_ref[0, :, off:] = m


def edge_conv_block(x, nbr, layers, extras=(), cat_cen=False, tile_pts=256):
    """Fused edge-conv block: (conv+BN+LeakyReLU) x n -> max over k neighbors.

    x:      (B, N, C) bf16 center features.
    nbr:    (B, K, N, C) bf16 k-major gathered neighbor features.
    layers[0] = (wd, wc, b): first conv with the weight split into the
                (neighbor - center) half and the center half.
    layers[1:] = (w, b).
    extras: (B, N, Ce) bf16 arrays copied in front of the conv output (concat fusion).
    cat_cen: also copy the center features x between extras and the conv output.
    Returns (B, N, sum(Ce) [+ C] + Cout) bf16.
    """
    B, N, C = x.shape
    K = nbr.shape[1]
    c_last = layers[-1][0].shape[1]
    c_extra = sum(int(e.shape[-1]) for e in extras)
    c_out = c_extra + (C if cat_cen else 0) + c_last
    tile = _pick_tile(N, tile_pts)

    in_specs = [
        pl.BlockSpec((1, tile, C), lambda bb, ii: (bb, ii, 0)),
        pl.BlockSpec((1, K, tile, C), lambda bb, ii: (bb, 0, ii, 0)),
    ]
    operands = [x, nbr]
    for e in extras:
        in_specs.append(
            pl.BlockSpec((1, tile, int(e.shape[-1])), lambda bb, ii: (bb, ii, 0)))
        operands.append(e)
    flat_params = []
    for lay in layers:
        flat_params.extend(lay)
    for arr in flat_params:
        in_specs.append(pl.BlockSpec(arr.shape, lambda bb, ii: (0, 0)))
        operands.append(arr)

    block_bytes = (2 * (tile * C * (K + 1) + tile * c_extra + tile * c_out)
                   + sum(a.size * a.dtype.itemsize for a in flat_params))
    out = pl.pallas_call(
        functools.partial(_edge_block_kernel, k=K, n_layers=len(layers),
                          n_extra=len(extras), cat_cen=cat_cen),
        out_shape=jax.ShapeDtypeStruct((B, N, c_out), jnp.bfloat16),
        grid=(B, N // tile),
        in_specs=in_specs,
        out_specs=pl.BlockSpec((1, tile, c_out), lambda bb, ii: (bb, ii, 0)),
        compiler_params=_cparams(("parallel", "parallel"), block_bytes),
    )(*operands)
    return out


# ----------------------------------------------------------------------------
# Kernel 2: pointwise conv + global max over points (row-chunked running max)
# ----------------------------------------------------------------------------
def _conv_max_pts_kernel(x_ref, w_ref, b_ref, o_ref, *, chunk):
    tn = x_ref.shape[1]
    w = w_ref[...]
    bias = b_ref[...]

    m = None
    for c in range(tn // chunk):                     # short static loop (unrolled)
        xc = x_ref[0, c * chunk:(c + 1) * chunk, :].astype(jnp.bfloat16)
        h = jnp.dot(xc, w, preferred_element_type=jnp.float32) + bias
        h = _leaky(h)
        hm = jnp.max(h, axis=0, keepdims=True)        # (1, co)
        m = hm if m is None else jnp.maximum(m, hm)

    @pl.when(pl.program_id(2) == 0)
    def _():
        o_ref[0] = m                                  # first step writes directly

    @pl.when(pl.program_id(2) != 0)
    def _():
        o_ref[0] = jnp.maximum(o_ref[0], m)


def conv_max_points(x, layer, tile_n=512, chunk_target=64, co_split=512):
    """x: (B, N, Cin) bf16 -> (B, Cout) f32: max over points of conv+BN+LeakyReLU."""
    B, N, Cin = x.shape
    w, bias = layer
    Cout = w.shape[1]
    tn = _pick_tile(N, tile_n)
    chunk = _pick_tile(tn, chunk_target)
    co = co_split if (Cout % co_split == 0 and co_split % 128 == 0) else Cout

    block_bytes = tn * Cin * 2 + Cin * co * 2 + co * 4 + co * 4
    out = pl.pallas_call(
        functools.partial(_conv_max_pts_kernel, chunk=chunk),
        out_shape=jax.ShapeDtypeStruct((B, 1, Cout), jnp.float32),
        grid=(B, Cout // co, N // tn),
        in_specs=[
            pl.BlockSpec((1, tn, Cin), lambda bb, j, r: (bb, r, 0)),
            pl.BlockSpec((Cin, co), lambda bb, j, r: (0, j)),
            pl.BlockSpec((1, co), lambda bb, j, r: (0, j)),
        ],
        out_specs=pl.BlockSpec((1, 1, co), lambda bb, j, r: (bb, 0, j)),
        compiler_params=_cparams(("parallel", "parallel", "arbitrary"), block_bytes),
    )(x, w, bias)
    return out.reshape(B, Cout)


# ----------------------------------------------------------------------------
# Kernel 3: fused segmentation head (conv8..conv11), conv8 split global/local
# ----------------------------------------------------------------------------
def _seg_head_kernel(xl_ref, gc_ref, w8_ref, w9_ref, b9_ref, w10_ref, b10_ref,
                     w11_ref, o_ref):
    h = jnp.dot(xl_ref[0].astype(jnp.bfloat16), w8_ref[...],
                preferred_element_type=jnp.float32)
    h = _leaky(h + gc_ref[0])                          # per-batch global part (+ b8)
    # dropout (inference): identity
    h = jnp.dot(h.astype(jnp.bfloat16), w9_ref[...],
                preferred_element_type=jnp.float32) + b9_ref[...]
    h = _leaky(h)
    # dropout (inference): identity
    h = jnp.dot(h.astype(jnp.bfloat16), w10_ref[...],
                preferred_element_type=jnp.float32) + b10_ref[...]
    h = _leaky(h)
    o_ref[0] = jnp.dot(h.astype(jnp.bfloat16), w11_ref[...],
                       preferred_element_type=jnp.float32).astype(o_ref.dtype)


def seg_head(local, glob_c, p, tile_n=128):
    """local: (B, N, 192) bf16, glob_c: (B, 1, 256) f32 -> (B, N, 128) bf16 logits
    (lane-dense, zero-padded past num_classes_part; slice at the final consumer)."""
    B, N, C = local.shape
    tn = _pick_tile(N, tile_n)
    w8 = p["conv8_w_loc"]
    w9, b9 = p["conv9"]
    w10, b10 = p["conv10"]
    w11 = p["conv11_w"]
    co = w11.shape[1]
    block_bytes = (tn * C * 2 + 256 * 4 + tn * co * 2
                   + sum(a.size * a.dtype.itemsize
                         for a in (w8, w9, b9, w10, b10, w11)))
    return pl.pallas_call(
        _seg_head_kernel,
        out_shape=jax.ShapeDtypeStruct((B, N, co), jnp.bfloat16),
        grid=(B, N // tn),
        in_specs=[
            pl.BlockSpec((1, tn, C), lambda bb, j: (bb, j, 0)),
            pl.BlockSpec((1, 1, 256), lambda bb, j: (bb, 0, 0)),
            pl.BlockSpec(w8.shape, lambda bb, j: (0, 0)),
            pl.BlockSpec(w9.shape, lambda bb, j: (0, 0)),
            pl.BlockSpec(b9.shape, lambda bb, j: (0, 0)),
            pl.BlockSpec(w10.shape, lambda bb, j: (0, 0)),
            pl.BlockSpec(b10.shape, lambda bb, j: (0, 0)),
            pl.BlockSpec(w11.shape, lambda bb, j: (0, 0)),
        ],
        out_specs=pl.BlockSpec((1, tn, co), lambda bb, j: (bb, j, 0)),
        compiler_params=_cparams(("parallel", "parallel"), block_bytes),
    )(local, glob_c, w8, w9, b9, w10, b10, w11)


# ----------------------------------------------------------------------------
# Parameters (BN eval-mode folded: scale into weights, shift kept as f32 row)
# ----------------------------------------------------------------------------
def _fold_bn(key, cin, cout):
    kw, kg, kb = jax.random.split(key, 3)
    w = jax.random.normal(kw, (cin, cout), jnp.float32) / np.sqrt(cin)
    gamma = 1.0 + 0.1 * jax.random.normal(kg, (cout,), jnp.float32)
    beta = 0.1 * jax.random.normal(kb, (cout,), jnp.float32)
    run_mean = jnp.zeros((cout,), jnp.float32)
    run_var = jnp.ones((cout,), jnp.float32)
    eps = 1e-5
    scale = gamma / jnp.sqrt(run_var + eps)
    shift = beta - run_mean * scale
    return w * scale[None, :], shift


def make_edge_layer(key, c_half, cout):
    """First conv of an edge block: weight split into diff / center halves."""
    w, shift = _fold_bn(key, 2 * c_half, cout)
    return (w[:c_half].astype(jnp.bfloat16),
            w[c_half:].astype(jnp.bfloat16),
            shift.reshape(1, cout))


def make_kernel_layer(key, cin, cout):
    w, shift = _fold_bn(key, cin, cout)
    return w.astype(jnp.bfloat16), shift.reshape(1, cout)


def make_dense_layer(key, cin, cout):
    return _fold_bn(key, cin, cout)


def make_params(key, num_classes, size_global_feature, num_classes_part):
    keys = iter(jax.random.split(key, 32))
    gf = size_global_feature
    p = {}
    # T-Net
    p["t_conv1"] = make_edge_layer(next(keys), 3, 64)
    p["t_conv2"] = make_kernel_layer(next(keys), 64, 128)
    p["t_conv3"] = make_kernel_layer(next(keys), 128, 1024)
    p["t_fc1"] = make_dense_layer(next(keys), 1024, 512)
    p["t_fc2"] = make_dense_layer(next(keys), 512, 256)
    kw, kb = jax.random.split(next(keys))
    p["t_fc3_w"] = jax.random.normal(kw, (256, 9), jnp.float32) / np.sqrt(256)
    p["t_fc3_b"] = 0.01 * jax.random.normal(kb, (9,), jnp.float32)
    # DGCNN edge convs
    p["conv1"] = make_edge_layer(next(keys), 3, 64)
    p["conv2"] = make_kernel_layer(next(keys), 64, 64)
    p["conv3"] = make_edge_layer(next(keys), 64, 64)
    p["conv4"] = make_kernel_layer(next(keys), 64, 64)
    p["conv5"] = make_edge_layer(next(keys), 64, 64)
    p["conv6"] = make_kernel_layer(next(keys), 192, gf)
    p["conv7"] = make_dense_layer(next(keys), num_classes, 64)
    # conv8: rows split into [global (gf + 64) | local (192 = x1|x2|x3)].
    w8, b8 = _fold_bn(next(keys), gf + 256, 256)
    p["conv8_w_glob"] = w8[: gf + 64]                      # f32, tiny per-batch matmul
    p["conv8_w_loc"] = w8[gf + 64:].astype(jnp.bfloat16)   # (192, 256)
    p["conv8_b"] = b8.reshape(1, 256)
    p["conv9"] = make_kernel_layer(next(keys), 256, 256)
    p["conv10"] = make_kernel_layer(next(keys), 256, 128)
    # conv11: no BN, no bias; Cout padded to 128 for a lane-dense store.
    w11 = jax.random.normal(next(keys), (128, num_classes_part),
                            jnp.float32) / np.sqrt(128)
    w11p = jnp.zeros((128, 128), jnp.float32).at[:, :num_classes_part].set(w11)
    p["conv11_w"] = w11p.astype(jnp.bfloat16)
    return p


# ----------------------------------------------------------------------------
# Forward pass
# ----------------------------------------------------------------------------
def tnet_forward(x_bf, p, k):
    """x_bf: (B, N, 3) bf16 -> (B, 3, 3) f32 transform."""
    nbr = knn_gather_neighbors(x_bf, k)
    h = edge_conv_block(x_bf, nbr, [p["t_conv1"], p["t_conv2"]],
                        tile_pts=512)                           # (B, N, 128)
    hg = conv_max_points(h, p["t_conv3"])                       # (B, 1024) f32
    # tiny-M FC tail in plain XLA (a padded pallas_call here is pure overhead)
    w1, b1 = p["t_fc1"]
    w2, b2 = p["t_fc2"]
    h = _leaky(hg @ w1 + b1)
    h = _leaky(h @ w2 + b2)
    h = h @ p["t_fc3_w"] + p["t_fc3_b"]
    iden = jnp.eye(3, dtype=h.dtype).reshape(1, 9)
    return (h + iden).reshape(-1, 3, 3)


def dgcnn_forward(x, vector_cat, p, *, k, ncp):
    B, N, _ = x.shape

    # T-Net (on raw points) + point transform
    x_bf = x.astype(jnp.bfloat16)
    trans = tnet_forward(x_bf, p, k)
    x_t = jnp.einsum("bnd,bde->bne", x, trans)                  # f32 bmm
    x_tb = x_t.astype(jnp.bfloat16)

    # Edge-conv blocks (edge features built in-kernel, running max over k)
    x1 = edge_conv_block(x_tb, knn_gather_neighbors(x_tb, k),
                         [p["conv1"], p["conv2"]], tile_pts=512)     # (B, N, 64)
    x2 = edge_conv_block(x1, knn_gather_neighbors(x1, k),
                         [p["conv3"], p["conv4"]], tile_pts=256)     # (B, N, 64)
    # Third block writes the concatenated (x1 | x2 | x3) features directly.
    cat = edge_conv_block(x2, knn_gather_neighbors(x2, k),
                          [p["conv5"]], extras=(x1,), cat_cen=True,
                          tile_pts=256)                              # (B, N, 192)

    # Global feature: fused conv6 + max over points (Cout split keeps v7x busy)
    gfeat = conv_max_points(cat, p["conv6"])                         # (B, gf) f32

    # Categorical vector branch (M = B, tiny): plain XLA
    w7, b7 = p["conv7"]
    vcat = _leaky(vector_cat @ w7 + b7)                              # (B, 64)

    # conv8 global half + BN shift folded into one per-batch row (broadcast in-kernel)
    glob = jnp.concatenate([gfeat, vcat], axis=-1)                   # (B, gf + 64)
    glob_c = (glob @ p["conv8_w_glob"] + p["conv8_b"]).reshape(B, 1, 256)

    scores = seg_head(cat, glob_c, p)                                # (B, N, 128) bf16
    return scores[:, :, :ncp].astype(jnp.float32), trans


# ----------------------------------------------------------------------------
if __name__ == "__main__":
    B, N, D = 2, 32, 3
    K_NEIGH = 8
    NUM_CLASSES = 16
    SIZE_GLOBAL = 1024
    NUM_CLASSES_PART = 10

    key = jax.random.PRNGKey(0)
    kx, kc, kp = jax.random.split(key, 3)
    x = jax.random.normal(kx, (B, N, D), jnp.float32)
    cat_ids = jax.random.randint(kc, (B,), 0, NUM_CLASSES)
    vector_cat = jax.nn.one_hot(cat_ids, NUM_CLASSES, dtype=jnp.float32)

    params = make_params(kp, NUM_CLASSES, SIZE_GLOBAL, NUM_CLASSES_PART)

    fwd = jax.jit(functools.partial(dgcnn_forward, k=K_NEIGH, ncp=NUM_CLASSES_PART))
    scores, trans = fwd(x, vector_cat, params)
    jax.block_until_ready((scores, trans))

    assert scores.shape == (B, N, NUM_CLASSES_PART)
    assert trans.shape == (B, 3, 3)
    assert bool(jnp.all(jnp.isfinite(scores)))
    assert bool(jnp.all(jnp.isfinite(trans)))
    print("KERNEL_OK")
</pallas_src>

<mosaic_0001>
module attributes {stable_mosaic.version = 11 : i64} {
  func.func @_conv_max_pts_kernel(%arg0: i32, %arg1: i32, %arg2: i32, %arg3: memref<1x32x128xbf16, #tpu.memory_space<vmem>>, %arg4: memref<128x512xbf16, #tpu.memory_space<vmem>>, %arg5: memref<1x512xf32, #tpu.memory_space<vmem>>, %arg6: memref<1x1x512xf32, #tpu.memory_space<vmem>>) attributes {dimension_semantics = [#tpu.dimension_semantics<parallel>, #tpu.dimension_semantics<parallel>, #tpu.dimension_semantics<arbitrary>], iteration_bounds = array<i64: 2, 2, 1>, scalar_prefetch = 0 : i64, scratch_operands = 0 : i64, tpu.core_type = #tpu.core_type<tc>, window_params = [{transform_indices = @transform_0, window_bounds = array<i64: 1, 32, 128>}, {transform_indices = @transform_1, window_bounds = array<i64: 128, 512>}, {transform_indices = @transform_2, window_bounds = array<i64: 1, 512>}, {transform_indices = @transform_3, window_bounds = array<i64: 1, 1, 512>}]} {
    %c0 = arith.constant 0 : index
    %c0_0 = arith.constant 0 : index
    %0 = vector.load %arg4[%c0, %c0_0] : memref<128x512xbf16, #tpu.memory_space<vmem>>, vector<128x512xbf16>
    %c0_1 = arith.constant 0 : index
    %c0_2 = arith.constant 0 : index
    %1 = vector.load %arg5[%c0_1, %c0_2] : memref<1x512xf32, #tpu.memory_space<vmem>>, vector<1x512xf32>
    %c0_3 = arith.constant 0 : index
    %c0_4 = arith.constant 0 : index
    %c0_5 = arith.constant 0 : index
    %2 = vector.load %arg3[%c0_3, %c0_4, %c0_5] : memref<1x32x128xbf16, #tpu.memory_space<vmem>>, vector<1x32x128xbf16>
    %3 = vector.shape_cast %2 : vector<1x32x128xbf16> to vector<32x128xbf16>
    %cst = arith.constant dense<0.000000e+00> : vector<32x512xf32>
    %4 = tpu.matmul %3, %0, %cst {dimension_numbers = #tpu.dot_dimension_numbers<[1], [0], [0], [1], [0, 0, 1, 1], [], []>} : vector<32x128xbf16>, vector<128x512xbf16>, vector<32x512xf32> -> vector<32x512xf32>
    %5 = vector.broadcast %1 : vector<1x512xf32> to vector<32x512xf32>
    %6 = arith.addf %4, %5 : vector<32x512xf32>
    %cst_6 = arith.constant 2.000000e-01 : f32
    %7 = vector.broadcast %cst_6 : f32 to vector<32x512xf32>
    %8 = arith.mulf %7, %6 : vector<32x512xf32>
    %9 = arith.maximumf %6, %8 : vector<32x512xf32>
    %cst_7 = arith.constant dense<0xFF800000> : vector<512xf32>
    %10 = vector.multi_reduction <maximumf>, %9, %cst_7 [0] : vector<32x512xf32> to vector<512xf32>
    %11 = vector.shape_cast %10 : vector<512xf32> to vector<1x512xf32>
    %c0_i32 = arith.constant 0 : i32
    %12 = arith.cmpi eq, %arg2, %c0_i32 : i32
    %13 = arith.extui %12 : i1 to i32
    %c0_i32_8 = arith.constant 0 : i32
    %14 = arith.cmpi ne, %13, %c0_i32_8 : i32
    scf.if %14 {
      %c0_11 = arith.constant 0 : index
      %c0_12 = arith.constant 0 : index
      %c0_13 = arith.constant 0 : index
      %18 = vector.load %arg6[%c0_11, %c0_12, %c0_13] : memref<1x1x512xf32, #tpu.memory_space<vmem>>, vector<1x1x512xf32>
      %19 = vector.shape_cast %18 : vector<1x1x512xf32> to vector<1x512xf32>
      %20 = vector.shape_cast %11 : vector<1x512xf32> to vector<1x1x512xf32>
      tpu.vector_store %arg6[%c0_11, %c0_12, %c0_13], %20 {strides = array<i32>} : memref<1x1x512xf32, #tpu.memory_space<vmem>>, vector<1x1x512xf32>,
    } else {
    }
    %c0_i32_9 = arith.constant 0 : i32
    %15 = arith.cmpi ne, %arg2, %c0_i32_9 : i32
    %16 = arith.extui %15 : i1 to i32
    %c0_i32_10 = arith.constant 0 : i32
    %17 = arith.cmpi ne, %16, %c0_i32_10 : i32
    scf.if %17 {
      %c0_11 = arith.constant 0 : index
      %c0_12 = arith.constant 0 : index
      %c0_13 = arith.constant 0 : index
      %18 = vector.load %arg6[%c0_11, %c0_12, %c0_13] : memref<1x1x512xf32, #tpu.memory_space<vmem>>, vector<1x1x512xf32>
      %19 = vector.shape_cast %18 : vector<1x1x512xf32> to vector<1x512xf32>
      %20 = arith.maximumf %19, %11 : vector<1x512xf32>
      %c0_14 = arith.constant 0 : index
      %c0_15 = arith.constant 0 : index
      %c0_16 = arith.constant 0 : index
      %21 = vector.load %arg6[%c0_14, %c0_15, %c0_16] : memref<1x1x512xf32, #tpu.memory_space<vmem>>, vector<1x1x512xf32>
      %22 = vector.shape_cast %21 : vector<1x1x512xf32> to vector<1x512xf32>
      %23 = vector.shape_cast %20 : vector<1x512xf32> to vector<1x1x512xf32>
      tpu.vector_store %arg6[%c0_14, %c0_15, %c0_16], %23 {strides = array<i32>} : memref<1x1x512xf32, #tpu.memory_space<vmem>>, vector<1x1x512xf32>,
    } else {
    }
    return
  }
  func.func @transform_0(%arg0: i32, %arg1: i32, %arg2: i32) -> (i32, i32, i32) {
    %c0_i32 = arith.constant 0 : i32
    %c0_i32_0 = arith.constant 0 : i32
    return %arg0, %arg2, %c0_i32 : i32, i32, i32
  }
  func.func @transform_1(%arg0: i32, %arg1: i32, %arg2: i32) -> (i32, i32) {
    %c0_i32 = arith.constant 0 : i32
    %c0_i32_0 = arith.constant 0 : i32
    return %c0_i32, %arg1 : i32, i32
  }
  func.func @transform_2(%arg0: i32, %arg1: i32, %arg2: i32) -> (i32, i32) {
    %c0_i32 = arith.constant 0 : i32
    %c0_i32_0 = arith.constant 0 : i32
    return %c0_i32, %arg1 : i32, i32
  }
  func.func @transform_3(%arg0: i32, %arg1: i32, %arg2: i32) -> (i32, i32, i32) {
    %c0_i32 = arith.constant 0 : i32
    %c0_i32_0 = arith.constant 0 : i32
    return %arg0, %c0_i32, %arg1 : i32, i32, i32
  }
}

module attributes {stable_mosaic.version = 11 : i64} {
  func.func @_edge_block_kernel(%arg0: i32, %arg1: i32, %arg2: memref<1x32x3xbf16, #tpu.memory_space<vmem>>, %arg3: memref<1x8x32x3xbf16, #tpu.memory_space<vmem>>, %arg4: memref<3x64xbf16, #tpu.memory_space<vmem>>, %arg5: memref<3x64xbf16, #tpu.memory_space<vmem>>, %arg6: memref<1x64xf32, #tpu.memory_space<vmem>>, %arg7: memref<64x128xbf16, #tpu.memory_space<vmem>>, %arg8: memref<1x128xf32, #tpu.memory_space<vmem>>, %arg9: memref<1x32x128xbf16, #tpu.memory_space<vmem>>) attributes {dimension_semantics = [#tpu.dimension_semantics<parallel>, #tpu.dimension_semantics<parallel>], iteration_bounds = array<i64: 2, 1>, scalar_prefetch = 0 : i64, scratch_operands = 0 : i64, tpu.core_type = #tpu.core_type<tc>, window_params = [{transform_indices = @transform_0, window_bounds = array<i64: 1, 32, 3>}, {transform_indices = @transform_1, window_bounds = array<i64: 1, 8, 32, 3>}, {pipeline_mode = #tpu.pipeline_mode<synchronous>, transform_indices = @transform_2, window_bounds = array<i64: 3, 64>}, {pipeline_mode = #tpu.pipeline_mode<synchronous>, transform_indices = @transform_3, window_bounds = array<i64: 3, 64>}, {pipeline_mode = #tpu.pipeline_mode<synchronous>, transform_indices = @transform_4, window_bounds = array<i64: 1, 64>}, {pipeline_mode = #tpu.pipeline_mode<synchronous>, transform_indices = @transform_5, window_bounds = array<i64: 64, 128>}, {pipeline_mode = #tpu.pipeline_mode<synchronous>, transform_indices = @transform_6, window_bounds = array<i64: 1, 128>}, {transform_indices = @transform_7, window_bounds = array<i64: 1, 32, 128>}]} {
    %c0 = arith.constant 0 : index
    %c0_0 = arith.constant 0 : index
    %0 = vector.load %arg4[%c0, %c0_0] : memref<3x64xbf16, #tpu.memory_space<vmem>>, vector<3x64xbf16>
    %c0_1 = arith.constant 0 : index
    %c0_2 = arith.constant 0 : index
    %1 = vector.load %arg5[%c0_1, %c0_2] : memref<3x64xbf16, #tpu.memory_space<vmem>>, vector<3x64xbf16>
    %c0_3 = arith.constant 0 : index
    %c0_4 = arith.constant 0 : index
    %2 = vector.load %arg6[%c0_3, %c0_4] : memref<1x64xf32, #tpu.memory_space<vmem>>, vector<1x64xf32>
    %c0_5 = arith.constant 0 : index
    %c0_6 = arith.constant 0 : index
    %3 = vector.load %arg7[%c0_5, %c0_6] : memref<64x128xbf16, #tpu.memory_space<vmem>>, vector<64x128xbf16>
    %c0_7 = arith.constant 0 : index
    %c0_8 = arith.constant 0 : index
    %4 = vector.load %arg8[%c0_7, %c0_8] : memref<1x128xf32, #tpu.memory_space<vmem>>, vector<1x128xf32>
    %c0_9 = arith.constant 0 : index
    %c0_10 = arith.constant 0 : index
    %c0_11 = arith.constant 0 : index
    %5 = vector.load %arg2[%c0_9, %c0_10, %c0_11] : memref<1x32x3xbf16, #tpu.memory_space<vmem>>, vector<1x32x3xbf16>
    %6 = vector.shape_cast %5 : vector<1x32x3xbf16> to vector<32x3xbf16>
    %cst = arith.constant dense<0.000000e+00> : vector<32x64xf32>
    %7 = tpu.matmul %6, %1, %cst {dimension_numbers = #tpu.dot_dimension_numbers<[1], [0], [0], [1], [0, 0, 1, 1], [], []>} : vector<32x3xbf16>, vector<3x64xbf16>, vector<32x64xf32> -> vector<32x64xf32>
    %8 = vector.broadcast %2 : vector<1x64xf32> to vector<32x64xf32>
    %9 = arith.addf %7, %8 : vector<32x64xf32>
    %c0_12 = arith.constant 0 : index
    %c0_13 = arith.constant 0 : index
    %c0_14 = arith.constant 0 : index
    %c0_15 = arith.constant 0 : index
    %10 = vector.load %arg3[%c0_12, %c0_13, %c0_14, %c0_15] : memref<1x8x32x3xbf16, #tpu.memory_space<vmem>>, vector<1x1x32x3xbf16>
    %11 = vector.shape_cast %10 : vector<1x1x32x3xbf16> to vector<32x3xbf16>
    %12 = arith.subf %11, %6 : vector<32x3xbf16>
    %cst_16 = arith.constant dense<0.000000e+00> : vector<32x64xf32>
    %13 = tpu.matmul %12, %0, %cst_16 {dimension_numbers = #tpu.dot_dimension_numbers<[1], [0], [0], [1], [0, 0, 1, 1], [], []>} : vector<32x3xbf16>, vector<3x64xbf16>, vector<32x64xf32> -> vector<32x64xf32>
    %14 = arith.addf %13, %9 : vector<32x64xf32>
    %cst_17 = arith.constant 2.000000e-01 : f32
    %15 = vector.broadcast %cst_17 : f32 to vector<32x64xf32>
    %16 = arith.mulf %15, %14 : vector<32x64xf32>
    %17 = arith.maximumf %14, %16 : vector<32x64xf32>
    %18 = arith.truncf %17 : vector<32x64xf32> to vector<32x64xbf16>
    %cst_18 = arith.constant dense<0.000000e+00> : vector<32x128xf32>
    %19 = tpu.matmul %18, %3, %cst_18 {dimension_numbers = #tpu.dot_dimension_numbers<[1], [0], [0], [1], [0, 0, 1, 1], [], []>} : vector<32x64xbf16>, vector<64x128xbf16>, vector<32x128xf32> -> vector<32x128xf32>
    %20 = vector.broadcast %4 : vector<1x128xf32> to vector<32x128xf32>
    %21 = arith.addf %19, %20 : vector<32x128xf32>
    %cst_19 = arith.constant 2.000000e-01 : f32
    %22 = vector.broadcast %cst_19 : f32 to vector<32x128xf32>
    %23 = arith.mulf %22, %21 : vector<32x128xf32>
    %24 = arith.maximumf %21, %23 : vector<32x128xf32>
    %c0_20 = arith.constant 0 : index
    %c1 = arith.constant 1 : index
    %c0_21 = arith.constant 0 : index
    %c0_22 = arith.constant 0 : index
    %25 = vector.load %arg3[%c0_20, %c1, %c0_21, %c0_22] : memref<1x8x32x3xbf16, #tpu.memory_space<vmem>>, vector<1x1x32x3xbf16>
    %26 = vector.shape_cast %25 : vector<1x1x32x3xbf16> to vector<32x3xbf16>
    %27 = arith.subf %26, %6 : vector<32x3xbf16>
    %cst_23 = arith.constant dense<0.000000e+00> : vector<32x64xf32>
    %28 = tpu.matmul %27, %0, %cst_23 {dimension_numbers = #tpu.dot_dimension_numbers<[1], [0], [0], [1], [0, 0, 1, 1], [], []>} : vector<32x3xbf16>, vector<3x64xbf16>, vector<32x64xf32> -> vector<32x64xf32>
    %29 = arith.addf %28, %9 : vector<32x64xf32>
    %cst_24 = arith.constant 2.000000e-01 : f32
    %30 = vector.broadcast %cst_24 : f32 to vector<32x64xf32>
    %31 = arith.mulf %30, %29 : vector<32x64xf32>
    %32 = arith.maximumf %29, %31 : vector<32x64xf32>
    %33 = arith.truncf %32 : vector<32x64xf32> to vector<32x64xbf16>
    %cst_25 = arith.constant dense<0.000000e+00> : vector<32x128xf32>
    %34 = tpu.matmul %33, %3, %cst_25 {dimension_numbers = #tpu.dot_dimension_numbers<[1], [0], [0], [1], [0, 0, 1, 1], [], []>} : vector<32x64xbf16>, vector<64x128xbf16>, vector<32x128xf32> -> vector<32x128xf32>
    %35 = vector.broadcast %4 : vector<1x128xf32> to vector<32x128xf32>
    %36 = arith.addf %34, %35 : vector<32x128xf32>
    %cst_26 = arith.constant 2.000000e-01 : f32
    %37 = vector.broadcast %cst_26 : f32 to vector<32x128xf32>
    %38 = arith.mulf %37, %36 : vector<32x128xf32>
    %39 = arith.maximumf %36, %38 : vector<32x128xf32>
    %40 = arith.maximumf %24, %39 : vector<32x128xf32>
    %c0_27 = arith.constant 0 : index
    %c2 = arith.constant 2 : index
    %c0_28 = arith.constant 0 : index
    %c0_29 = arith.constant 0 : index
    %41 = vector.load %arg3[%c0_27, %c2, %c0_28, %c0_29] : memref<1x8x32x3xbf16, #tpu.memory_space<vmem>>, vector<1x1x32x3xbf16>
    %42 = vector.shape_cast %41 : vector<1x1x32x3xbf16> to vector<32x3xbf16>
    %43 = arith.subf %42, %6 : vector<32x3xbf16>
    %cst_30 = arith.constant dense<0.000000e+00> : vector<32x64xf32>
    %44 = tpu.matmul %43, %0, %cst_30 {dimension_numbers = #tpu.dot_dimension_numbers<[1], [0], [0], [1], [0, 0, 1, 1], [], []>} : vector<32x3xbf16>, vector<3x64xbf16>, vector<32x64xf32> -> vector<32x64xf32>
    %45 = arith.addf %44, %9 : vector<32x64xf32>
    %cst_31 = arith.constant 2.000000e-01 : f32
    %46 = vector.broadcast %cst_31 : f32 to vector<32x64xf32>
    %47 = arith.mulf %46, %45 : vector<32x64xf32>
    %48 = arith.maximumf %45, %47 : vector<32x64xf32>
    %49 = arith.truncf %48 : vector<32x64xf32> to vector<32x64xbf16>
    %cst_32 = arith.constant dense<0.000000e+00> : vector<32x128xf32>
    %50 = tpu.matmul %49, %3, %cst_32 {dimension_numbers = #tpu.dot_dimension_numbers<[1], [0], [0], [1], [0, 0, 1, 1], [], []>} : vector<32x64xbf16>, vector<64x128xbf16>, vector<32x128xf32> -> vector<32x128xf32>
    %51 = vector.broadcast %4 : vector<1x128xf32> to vector<32x128xf32>
    %52 = arith.addf %50, %51 : vector<32x128xf32>
    %cst_33 = arith.constant 2.000000e-01 : f32
    %53 = vector.broadcast %cst_33 : f32 to vector<32x128xf32>
    %54 = arith.mulf %53, %52 : vector<32x128xf32>
    %55 = arith.maximumf %52, %54 : vector<32x128xf32>
    %56 = arith.maximumf %40, %55 : vector<32x128xf32>
    %c0_34 = arith.constant 0 : index
    %c3 = arith.constant 3 : index
    %c0_35 = arith.constant 0 : index
    %c0_36 = arith.constant 0 : index
    %57 = vector.load %arg3[%c0_34, %c3, %c0_35, %c0_36] : memref<1x8x32x3xbf16, #tpu.memory_space<vmem>>, vector<1x1x32x3xbf16>
    %58 = vector.shape_cast %57 : vector<1x1x32x3xbf16> to vector<32x3xbf16>
    %59 = arith.subf %58, %6 : vector<32x3xbf16>
    %cst_37 = arith.constant dense<0.000000e+00> : vector<32x64xf32>
    %60 = tpu.matmul %59, %0, %cst_37 {dimension_numbers = #tpu.dot_dimension_numbers<[1], [0], [0], [1], [0, 0, 1, 1], [], []>} : vector<32x3xbf16>, vector<3x64xbf16>, vector<32x64xf32> -> vector<32x64xf32>
    %61 = arith.addf %60, %9 : vector<32x64xf32>
    %cst_38 = arith.constant 2.000000e-01 : f32
    %62 = vector.broadcast %cst_38 : f32 to vector<32x64xf32>
    %63 = arith.mulf %62, %61 : vector<32x64xf32>
    %64 = arith.maximumf %61, %63 : vector<32x64xf32>
    %65 = arith.truncf %64 : vector<32x64xf32> to vector<32x64xbf16>
    %cst_39 = arith.constant dense<0.000000e+00> : vector<32x128xf32>
    %66 = tpu.matmul %65, %3, %cst_39 {dimension_numbers = #tpu.dot_dimension_numbers<[1], [0], [0], [1], [0, 0, 1, 1], [], []>} : vector<32x64xbf16>, vector<64x128xbf16>, vector<32x128xf32> -> vector<32x128xf32>
    %67 = vector.broadcast %4 : vector<1x128xf32> to vector<32x128xf32>
    %68 = arith.addf %66, %67 : vector<32x128xf32>
    %cst_40 = arith.constant 2.000000e-01 : f32
    %69 = vector.broadcast %cst_40 : f32 to vector<32x128xf32>
    %70 = arith.mulf %69, %68 : vector<32x128xf32>
    %71 = arith.maximumf %68, %70 : vector<32x128xf32>
    %72 = arith.maximumf %56, %71 : vector<32x128xf32>
    %c0_41 = arith.constant 0 : index
    %c4 = arith.constant 4 : index
    %c0_42 = arith.constant 0 : index
    %c0_43 = arith.constant 0 : index
    %73 = vector.load %arg3[%c0_41, %c4, %c0_42, %c0_43] : memref<1x8x32x3xbf16, #tpu.memory_space<vmem>>, vector<1x1x32x3xbf16>
    %74 = vector.shape_cast %73 : vector<1x1x32x3xbf16> to vector<32x3xbf16>
    %75 = arith.subf %74, %6 : vector<32x3xbf16>
    %cst_44 = arith.constant dense<0.000000e+00> : vector<32x64xf32>
    %76 = tpu.matmul %75, %0, %cst_44 {dimension_numbers = #tpu.dot_dimension_numbers<[1], [0], [0], [1], [0, 0, 1, 1], [], []>} : vector<32x3xbf16>, vector<3x64xbf16>, vector<32x64xf32> -> vector<32x64xf32>
    %77 = arith.addf %76, %9 : vector<32x64xf32>
    %cst_45 = arith.constant 2.000000e-01 : f32
    %78 = vector.broadcast %cst_45 : f32 to vector<32x64xf32>
    %79 = arith.mulf %78, %77 : vector<32x64xf32>
    %80 = arith.maximumf %77, %79 : vector<32x64xf32>
    %81 = arith.truncf %80 : vector<32x64xf32> to vector<32x64xbf16>
    %cst_46 = arith.constant dense<0.000000e+00> : vector<32x128xf32>
    %82 = tpu.matmul %81, %3, %cst_46 {dimension_numbers = #tpu.dot_dimension_numbers<[1], [0], [0], [1], [0, 0, 1, 1], [], []>} : vector<32x64xbf16>, vector<64x128xbf16>, vector<32x128xf32> -> vector<32x128xf32>
    %83 = vector.broadcast %4 : vector<1x128xf32> to vector<32x128xf32>
    %84 = arith.addf %82, %83 : vector<32x128xf32>
    %cst_47 = arith.constant 2.000000e-01 : f32
    %85 = vector.broadcast %cst_47 : f32 to vector<32x128xf32>
    %86 = arith.mulf %85, %84 : vector<32x128xf32>
    %87 = arith.maximumf %84, %86 : vector<32x128xf32>
    %88 = arith.maximumf %72, %87 : vector<32x128xf32>
    %c0_48 = arith.constant 0 : index
    %c5 = arith.constant 5 : index
    %c0_49 = arith.constant 0 : index
    %c0_50 = arith.constant 0 : index
    %89 = vector.load %arg3[%c0_48, %c5, %c0_49, %c0_50] : memref<1x8x32x3xbf16, #tpu.memory_space<vmem>>, vector<1x1x32x3xbf16>
    %90 = vector.shape_cast %89 : vector<1x1x32x3xbf16> to vector<32x3xbf16>
    %91 = arith.subf %90, %6 : vector<32x3xbf16>
    %cst_51 = arith.constant dense<0.000000e+00> : vector<32x64xf32>
    %92 = tpu.matmul %91, %0, %cst_51 {dimension_numbers = #tpu.dot_dimension_numbers<[1], [0], [0], [1], [0, 0, 1, 1], [], []>} : vector<32x3xbf16>, vector<3x64xbf16>, vector<32x64xf32> -> vector<32x64xf32>
    %93 = arith.addf %92, %9 : vector<32x64xf32>
    %cst_52 = arith.constant 2.000000e-01 : f32
    %94 = vector.broadcast %cst_52 : f32 to vector<32x64xf32>
    %95 = arith.mulf %94, %93 : vector<32x64xf32>
    %96 = arith.maximumf %93, %95 : vector<32x64xf32>
    %97 = arith.truncf %96 : vector<32x64xf32> to vector<32x64xbf16>
    %cst_53 = arith.constant dense<0.000000e+00> : vector<32x128xf32>
    %98 = tpu.matmul %97, %3, %cst_53 {dimension_numbers = #tpu.dot_dimension_numbers<[1], [0], [0], [1], [0, 0, 1, 1], [], []>} : vector<32x64xbf16>, vector<64x128xbf16>, vector<32x128xf32> -> vector<32x128xf32>
    %99 = vector.broadcast %4 : vector<1x128xf32> to vector<32x128xf32>
    %100 = arith.addf %98, %99 : vector<32x128xf32>
    %cst_54 = arith.constant 2.000000e-01 : f32
    %101 = vector.broadcast %cst_54 : f32 to vector<32x128xf32>
    %102 = arith.mulf %101, %100 : vector<32x128xf32>
    %103 = arith.maximumf %100, %102 : vector<32x128xf32>
    %104 = arith.maximumf %88, %103 : vector<32x128xf32>
    %c0_55 = arith.constant 0 : index
    %c6 = arith.constant 6 : index
    %c0_56 = arith.constant 0 : index
    %c0_57 = arith.constant 0 : index
    %105 = vector.load %arg3[%c0_55, %c6, %c0_56, %c0_57] : memref<1x8x32x3xbf16, #tpu.memory_space<vmem>>, vector<1x1x32x3xbf16>
    %106 = vector.shape_cast %105 : vector<1x1x32x3xbf16> to vector<32x3xbf16>
    %107 = arith.subf %106, %6 : vector<32x3xbf16>
    %cst_58 = arith.constant dense<0.000000e+00> : vector<32x64xf32>
    %108 = tpu.matmul %107, %0, %cst_58 {dimension_numbers = #tpu.dot_dimension_numbers<[1], [0], [0], [1], [0, 0, 1, 1], [], []>} : vector<32x3xbf16>, vector<3x64xbf16>, vector<32x64xf32> -> vector<32x64xf32>
    %109 = arith.addf %108, %9 : vector<32x64xf32>
    %cst_59 = arith.constant 2.000000e-01 : f32
    %110 = vector.broadcast %cst_59 : f32 to vector<32x64xf32>
    %111 = arith.mulf %110, %109 : vector<32x64xf32>
    %112 = arith.maximumf %109, %111 : vector<32x64xf32>
    %113 = arith.truncf %112 : vector<32x64xf32> to vector<32x64xbf16>
    %cst_60 = arith.constant dense<0.000000e+00> : vector<32x128xf32>
    %114 = tpu.matmul %113, %3, %cst_60 {dimension_numbers = #tpu.dot_dimension_numbers<[1], [0], [0], [1], [0, 0, 1, 1], [], []>} : vector<32x64xbf16>, vector<64x128xbf16>, vector<32x128xf32> -> vector<32x128xf32>
    %115 = vector.broadcast %4 : vector<1x128xf32> to vector<32x128xf32>
    %116 = arith.addf %114, %115 : vector<32x128xf32>
    %cst_61 = arith.constant 2.000000e-01 : f32
    %117 = vector.broadcast %cst_61 : f32 to vector<32x128xf32>
    %118 = arith.mulf %117, %116 : vector<32x128xf32>
    %119 = arith.maximumf %116, %118 : vector<32x128xf32>
    %120 = arith.maximumf %104, %119 : vector<32x128xf32>
    %c0_62 = arith.constant 0 : index
    %c7 = arith.constant 7 : index
    %c0_63 = arith.constant 0 : index
    %c0_64 = arith.constant 0 : index
    %121 = vector.load %arg3[%c0_62, %c7, %c0_63, %c0_64] : memref<1x8x32x3xbf16, #tpu.memory_space<vmem>>, vector<1x1x32x3xbf16>
    %122 = vector.shape_cast %121 : vector<1x1x32x3xbf16> to vector<32x3xbf16>
    %123 = arith.subf %122, %6 : vector<32x3xbf16>
    %cst_65 = arith.constant dense<0.000000e+00> : vector<32x64xf32>
    %124 = tpu.matmul %123, %0, %cst_65 {dimension_numbers = #tpu.dot_dimension_numbers<[1], [0], [0], [1], [0, 0, 1, 1], [], []>} : vector<32x3xbf16>, vector<3x64xbf16>, vector<32x64xf32> -> vector<32x64xf32>
    %125 = arith.addf %124, %9 : vector<32x64xf32>
    %cst_66 = arith.constant 2.000000e-01 : f32
    %126 = vector.broadcast %cst_66 : f32 to vector<32x64xf32>
    %127 = arith.mulf %126, %125 : vector<32x64xf32>
    %128 = arith.maximumf %125, %127 : vector<32x64xf32>
    %129 = arith.truncf %128 : vector<32x64xf32> to vector<32x64xbf16>
    %cst_67 = arith.constant dense<0.000000e+00> : vector<32x128xf32>
    %130 = tpu.matmul %129, %3, %cst_67 {dimension_numbers = #tpu.dot_dimension_numbers<[1], [0], [0], [1], [0, 0, 1, 1], [], []>} : vector<32x64xbf16>, vector<64x128xbf16>, vector<32x128xf32> -> vector<32x128xf32>
    %131 = vector.broadcast %4 : vector<1x128xf32> to vector<32x128xf32>
    %132 = arith.addf %130, %131 : vector<32x128xf32>
    %cst_68 = arith.constant 2.000000e-01 : f32
    %133 = vector.broadcast %cst_68 : f32 to vector<32x128xf32>
    %134 = arith.mulf %133, %132 : vector<32x128xf32>
    %135 = arith.maximumf %132, %134 : vector<32x128xf32>
    %136 = arith.maximumf %120, %135 : vector<32x128xf32>
    %137 = arith.truncf %136 : vector<32x128xf32> to vector<32x128xbf16>
    %c0_69 = arith.constant 0 : index
    %c0_70 = arith.constant 0 : index
    %c0_71 = arith.constant 0 : index
    %138 = vector.load %arg9[%c0_69, %c0_70, %c0_71] : memref<1x32x128xbf16, #tpu.memory_space<vmem>>, vector<1x32x128xbf16>
    %139 = vector.shape_cast %138 : vector<1x32x128xbf16> to vector<32x128xbf16>
    %140 = vector.shape_cast %137 : vector<32x128xbf16> to vector<1x32x128xbf16>
    tpu.vector_store %arg9[%c0_69, %c0_70, %c0_71], %140 {strides = array<i32>} : memref<1x32x128xbf16, #tpu.memory_space<vmem>>, vector<1x32x128xbf16>,
    return
  }
  func.func @transform_0(%arg0: i32, %arg1: i32) -> (i32, i32, i32) {
    %c0_i32 = arith.constant 0 : i32
    %c0_i32_0 = arith.constant 0 : i32
    return %arg0, %arg1, %c0_i32 : i32, i32, i32
  }
  func.func @transform_1(%arg0: i32, %arg1: i32) -> (i32, i32, i32, i32) {
    %c0_i32 = arith.constant 0 : i32
    %c0_i32_0 = arith.constant 0 : i32
    %c0_i32_1 = arith.constant 0 : i32
    return %arg0, %c0_i32, %arg1, %c0_i32_0 : i32, i32, i32, i32
  }
  func.func @transform_2(%arg0: i32, %arg1: i32) -> (i32, i32) {
    %c0_i32 = arith.constant 0 : i32
    %c0_i32_0 = arith.constant 0 : i32
    %c0_i32_1 = arith.constant 0 : i32
    return %c0_i32, %c0_i32_0 : i32, i32
  }
  func.func @transform_3(%arg0: i32, %arg1: i32) -> (i32, i32) {
    %c0_i32 = arith.constant 0 : i32
    %c0_i32_0 = arith.constant 0 : i32
    %c0_i32_1 = arith.constant 0 : i32
    return %c0_i32, %c0_i32_0 : i32, i32
  }
  func.func @transform_4(%arg0: i32, %arg1: i32) -> (i32, i32) {
    %c0_i32 = arith.constant 0 : i32
    %c0_i32_0 = arith.constant 0 : i32
    %c0_i32_1 = arith.constant 0 : i32
    return %c0_i32, %c0_i32_0 : i32, i32
  }
  func.func @transform_5(%arg0: i32, %arg1: i32) -> (i32, i32) {
    %c0_i32 = arith.constant 0 : i32
    %c0_i32_0 = arith.constant 0 : i32
    %c0_i32_1 = arith.constant 0 : i32
    return %c0_i32, %c0_i32_0 : i32, i32
  }
  func.func @transform_6(%arg0: i32, %arg1: i32) -> (i32, i32) {
    %c0_i32 = arith.constant 0 : i32
    %c0_i32_0 = arith.constant 0 : i32
    %c0_i32_1 = arith.constant 0 : i32
    return %c0_i32, %c0_i32_0 : i32, i32
  }
  func.func @transform_7(%arg0: i32, %arg1: i32) -> (i32, i32, i32) {
    %c0_i32 = arith.constant 0 : i32
    %c0_i32_0 = arith.constant 0 : i32
    return %arg0, %arg1, %c0_i32 : i32, i32, i32
  }
}

module attributes {stable_mosaic.version = 11 : i64} {
  func.func @_edge_block_kernel(%arg0: i32, %arg1: i32, %arg2: memref<1x32x3xbf16, #tpu.memory_space<vmem>>, %arg3: memref<1x8x32x3xbf16, #tpu.memory_space<vmem>>, %arg4: memref<3x64xbf16, #tpu.memory_space<vmem>>, %arg5: memref<3x64xbf16, #tpu.memory_space<vmem>>, %arg6: memref<1x64xf32, #tpu.memory_space<vmem>>, %arg7: memref<64x64xbf16, #tpu.memory_space<vmem>>, %arg8: memref<1x64xf32, #tpu.memory_space<vmem>>, %arg9: memref<1x32x64xbf16, #tpu.memory_space<vmem>>) attributes {dimension_semantics = [#tpu.dimension_semantics<parallel>, #tpu.dimension_semantics<parallel>], iteration_bounds = array<i64: 2, 1>, scalar_prefetch = 0 : i64, scratch_operands = 0 : i64, tpu.core_type = #tpu.core_type<tc>, window_params = [{transform_indices = @transform_0, window_bounds = array<i64: 1, 32, 3>}, {transform_indices = @transform_1, window_bounds = array<i64: 1, 8, 32, 3>}, {pipeline_mode = #tpu.pipeline_mode<synchronous>, transform_indices = @transform_2, window_bounds = array<i64: 3, 64>}, {pipeline_mode = #tpu.pipeline_mode<synchronous>, transform_indices = @transform_3, window_bounds = array<i64: 3, 64>}, {pipeline_mode = #tpu.pipeline_mode<synchronous>, transform_indices = @transform_4, window_bounds = array<i64: 1, 64>}, {pipeline_mode = #tpu.pipeline_mode<synchronous>, transform_indices = @transform_5, window_bounds = array<i64: 64, 64>}, {pipeline_mode = #tpu.pipeline_mode<synchronous>, transform_indices = @transform_6, window_bounds = array<i64: 1, 64>}, {transform_indices = @transform_7, window_bounds = array<i64: 1, 32, 64>}]} {
    %c0 = arith.constant 0 : index
    %c0_0 = arith.constant 0 : index
    %0 = vector.load %arg4[%c0, %c0_0] : memref<3x64xbf16, #tpu.memory_space<vmem>>, vector<3x64xbf16>
    %c0_1 = arith.constant 0 : index
    %c0_2 = arith.constant 0 : index
    %1 = vector.load %arg5[%c0_1, %c0_2] : memref<3x64xbf16, #tpu.memory_space<vmem>>, vector<3x64xbf16>
    %c0_3 = arith.constant 0 : index
    %c0_4 = arith.constant 0 : index
    %2 = vector.load %arg6[%c0_3, %c0_4] : memref<1x64xf32, #tpu.memory_space<vmem>>, vector<1x64xf32>
    %c0_5 = arith.constant 0 : index
    %c0_6 = arith.constant 0 : index
    %3 = vector.load %arg7[%c0_5, %c0_6] : memref<64x64xbf16, #tpu.memory_space<vmem>>, vector<64x64xbf16>
    %c0_7 = arith.constant 0 : index
    %c0_8 = arith.constant 0 : index
    %4 = vector.load %arg8[%c0_7, %c0_8] : memref<1x64xf32, #tpu.memory_space<vmem>>, vector<1x64xf32>
    %c0_9 = arith.constant 0 : index
    %c0_10 = arith.constant 0 : index
    %c0_11 = arith.constant 0 : index
    %5 = vector.load %arg2[%c0_9, %c0_10, %c0_11] : memref<1x32x3xbf16, #tpu.memory_space<vmem>>, vector<1x32x3xbf16>
    %6 = vector.shape_cast %5 : vector<1x32x3xbf16> to vector<32x3xbf16>
    %cst = arith.constant dense<0.000000e+00> : vector<32x64xf32>
    %7 = tpu.matmul %6, %1, %cst {dimension_numbers = #tpu.dot_dimension_numbers<[1], [0], [0], [1], [0, 0, 1, 1], [], []>} : vector<32x3xbf16>, vector<3x64xbf16>, vector<32x64xf32> -> vector<32x64xf32>
    %8 = vector.broadcast %2 : vector<1x64xf32> to vector<32x64xf32>
    %9 = arith.addf %7, %8 : vector<32x64xf32>
    %c0_12 = arith.constant 0 : index
    %c0_13 = arith.constant 0 : index
    %c0_14 = arith.constant 0 : index
    %c0_15 = arith.constant 0 : index
    %10 = vector.load %arg3[%c0_12, %c0_13, %c0_14, %c0_15] : memref<1x8x32x3xbf16, #tpu.memory_space<vmem>>, vector<1x1x32x3xbf16>
    %11 = vector.shape_cast %10 : vector<1x1x32x3xbf16> to vector<32x3xbf16>
    %12 = arith.subf %11, %6 : vector<32x3xbf16>
    %cst_16 = arith.constant dense<0.000000e+00> : vector<32x64xf32>
    %13 = tpu.matmul %12, %0, %cst_16 {dimension_numbers = #tpu.dot_dimension_numbers<[1], [0], [0], [1], [0, 0, 1, 1], [], []>} : vector<32x3xbf16>, vector<3x64xbf16>, vector<32x64xf32> -> vector<32x64xf32>
    %14 = arith.addf %13, %9 : vector<32x64xf32>
    %cst_17 = arith.constant 2.000000e-01 : f32
    %15 = vector.broadcast %cst_17 : f32 to vector<32x64xf32>
    %16 = arith.mulf %15, %14 : vector<32x64xf32>
    %17 = arith.maximumf %14, %16 : vector<32x64xf32>
    %18 = arith.truncf %17 : vector<32x64xf32> to vector<32x64xbf16>
    %cst_18 = arith.constant dense<0.000000e+00> : vector<32x64xf32>
    %19 = tpu.matmul %18, %3, %cst_18 {dimension_numbers = #tpu.dot_dimension_numbers<[1], [0], [0], [1], [0, 0, 1, 1], [], []>} : vector<32x64xbf16>, vector<64x64xbf16>, vector<32x64xf32> -> vector<32x64xf32>
    %20 = vector.broadcast %4 : vector<1x64xf32> to vector<32x64xf32>
    %21 = arith.addf %19, %20 : vector<32x64xf32>
    %cst_19 = arith.constant 2.000000e-01 : f32
    %22 = vector.broadcast %cst_19 : f32 to vector<32x64xf32>
    %23 = arith.mulf %22, %21 : vector<32x64xf32>
    %24 = arith.maximumf %21, %23 : vector<32x64xf32>
    %c0_20 = arith.constant 0 : index
    %c1 = arith.constant 1 : index
    %c0_21 = arith.constant 0 : index
    %c0_22 = arith.constant 0 : index
    %25 = vector.load %arg3[%c0_20, %c1, %c0_21, %c0_22] : memref<1x8x32x3xbf16, #tpu.memory_space<vmem>>, vector<1x1x32x3xbf16>
    %26 = vector.shape_cast %25 : vector<1x1x32x3xbf16> to vector<32x3xbf16>
    %27 = arith.subf %26, %6 : vector<32x3xbf16>
    %cst_23 = arith.constant dense<0.000000e+00> : vector<32x64xf32>
    %28 = tpu.matmul %27, %0, %cst_23 {dimension_numbers = #tpu.dot_dimension_numbers<[1], [0], [0], [1], [0, 0, 1, 1], [], []>} : vector<32x3xbf16>, vector<3x64xbf16>, vector<32x64xf32> -> vector<32x64xf32>
    %29 = arith.addf %28, %9 : vector<32x64xf32>
    %cst_24 = arith.constant 2.000000e-01 : f32
    %30 = vector.broadcast %cst_24 : f32 to vector<32x64xf32>
    %31 = arith.mulf %30, %29 : vector<32x64xf32>
    %32 = arith.maximumf %29, %31 : vector<32x64xf32>
    %33 = arith.truncf %32 : vector<32x64xf32> to vector<32x64xbf16>
    %cst_25 = arith.constant dense<0.000000e+00> : vector<32x64xf32>
    %34 = tpu.matmul %33, %3, %cst_25 {dimension_numbers = #tpu.dot_dimension_numbers<[1], [0], [0], [1], [0, 0, 1, 1], [], []>} : vector<32x64xbf16>, vector<64x64xbf16>, vector<32x64xf32> -> vector<32x64xf32>
    %35 = vector.broadcast %4 : vector<1x64xf32> to vector<32x64xf32>
    %36 = arith.addf %34, %35 : vector<32x64xf32>
    %cst_26 = arith.constant 2.000000e-01 : f32
    %37 = vector.broadcast %cst_26 : f32 to vector<32x64xf32>
    %38 = arith.mulf %37, %36 : vector<32x64xf32>
    %39 = arith.maximumf %36, %38 : vector<32x64xf32>
    %40 = arith.maximumf %24, %39 : vector<32x64xf32>
    %c0_27 = arith.constant 0 : index
    %c2 = arith.constant 2 : index
    %c0_28 = arith.constant 0 : index
    %c0_29 = arith.constant 0 : index
    %41 = vector.load %arg3[%c0_27, %c2, %c0_28, %c0_29] : memref<1x8x32x3xbf16, #tpu.memory_space<vmem>>, vector<1x1x32x3xbf16>
    %42 = vector.shape_cast %41 : vector<1x1x32x3xbf16> to vector<32x3xbf16>
    %43 = arith.subf %42, %6 : vector<32x3xbf16>
    %cst_30 = arith.constant dense<0.000000e+00> : vector<32x64xf32>
    %44 = tpu.matmul %43, %0, %cst_30 {dimension_numbers = #tpu.dot_dimension_numbers<[1], [0], [0], [1], [0, 0, 1, 1], [], []>} : vector<32x3xbf16>, vector<3x64xbf16>, vector<32x64xf32> -> vector<32x64xf32>
    %45 = arith.addf %44, %9 : vector<32x64xf32>
    %cst_31 = arith.constant 2.000000e-01 : f32
    %46 = vector.broadcast %cst_31 : f32 to vector<32x64xf32>
    %47 = arith.mulf %46, %45 : vector<32x64xf32>
    %48 = arith.maximumf %45, %47 : vector<32x64xf32>
    %49 = arith.truncf %48 : vector<32x64xf32> to vector<32x64xbf16>
    %cst_32 = arith.constant dense<0.000000e+00> : vector<32x64xf32>
    %50 = tpu.matmul %49, %3, %cst_32 {dimension_numbers = #tpu.dot_dimension_numbers<[1], [0], [0], [1], [0, 0, 1, 1], [], []>} : vector<32x64xbf16>, vector<64x64xbf16>, vector<32x64xf32> -> vector<32x64xf32>
    %51 = vector.broadcast %4 : vector<1x64xf32> to vector<32x64xf32>
    %52 = arith.addf %50, %51 : vector<32x64xf32>
    %cst_33 = arith.constant 2.000000e-01 : f32
    %53 = vector.broadcast %cst_33 : f32 to vector<32x64xf32>
    %54 = arith.mulf %53, %52 : vector<32x64xf32>
    %55 = arith.maximumf %52, %54 : vector<32x64xf32>
    %56 = arith.maximumf %40, %55 : vector<32x64xf32>
    %c0_34 = arith.constant 0 : index
    %c3 = arith.constant 3 : index
    %c0_35 = arith.constant 0 : index
    %c0_36 = arith.constant 0 : index
    %57 = vector.load %arg3[%c0_34, %c3, %c0_35, %c0_36] : memref<1x8x32x3xbf16, #tpu.memory_space<vmem>>, vector<1x1x32x3xbf16>
    %58 = vector.shape_cast %57 : vector<1x1x32x3xbf16> to vector<32x3xbf16>
    %59 = arith.subf %58, %6 : vector<32x3xbf16>
    %cst_37 = arith.constant dense<0.000000e+00> : vector<32x64xf32>
    %60 = tpu.matmul %59, %0, %cst_37 {dimension_numbers = #tpu.dot_dimension_numbers<[1], [0], [0], [1], [0, 0, 1, 1], [], []>} : vector<32x3xbf16>, vector<3x64xbf16>, vector<32x64xf32> -> vector<32x64xf32>
    %61 = arith.addf %60, %9 : vector<32x64xf32>
    %cst_38 = arith.constant 2.000000e-01 : f32
    %62 = vector.broadcast %cst_38 : f32 to vector<32x64xf32>
    %63 = arith.mulf %62, %61 : vector<32x64xf32>
    %64 = arith.maximumf %61, %63 : vector<32x64xf32>
    %65 = arith.truncf %64 : vector<32x64xf32> to vector<32x64xbf16>
    %cst_39 = arith.constant dense<0.000000e+00> : vector<32x64xf32>
    %66 = tpu.matmul %65, %3, %cst_39 {dimension_numbers = #tpu.dot_dimension_numbers<[1], [0], [0], [1], [0, 0, 1, 1], [], []>} : vector<32x64xbf16>, vector<64x64xbf16>, vector<32x64xf32> -> vector<32x64xf32>
    %67 = vector.broadcast %4 : vector<1x64xf32> to vector<32x64xf32>
    %68 = arith.addf %66, %67 : vector<32x64xf32>
    %cst_40 = arith.constant 2.000000e-01 : f32
    %69 = vector.broadcast %cst_40 : f32 to vector<32x64xf32>
    %70 = arith.mulf %69, %68 : vector<32x64xf32>
    %71 = arith.maximumf %68, %70 : vector<32x64xf32>
    %72 = arith.maximumf %56, %71 : vector<32x64xf32>
    %c0_41 = arith.constant 0 : index
    %c4 = arith.constant 4 : index
    %c0_42 = arith.constant 0 : index
    %c0_43 = arith.constant 0 : index
    %73 = vector.load %arg3[%c0_41, %c4, %c0_42, %c0_43] : memref<1x8x32x3xbf16, #tpu.memory_space<vmem>>, vector<1x1x32x3xbf16>
    %74 = vector.shape_cast %73 : vector<1x1x32x3xbf16> to vector<32x3xbf16>
    %75 = arith.subf %74, %6 : vector<32x3xbf16>
    %cst_44 = arith.constant dense<0.000000e+00> : vector<32x64xf32>
    %76 = tpu.matmul %75, %0, %cst_44 {dimension_numbers = #tpu.dot_dimension_numbers<[1], [0], [0], [1], [0, 0, 1, 1], [], []>} : vector<32x3xbf16>, vector<3x64xbf16>, vector<32x64xf32> -> vector<32x64xf32>
    %77 = arith.addf %76, %9 : vector<32x64xf32>
    %cst_45 = arith.constant 2.000000e-01 : f32
    %78 = vector.broadcast %cst_45 : f32 to vector<32x64xf32>
    %79 = arith.mulf %78, %77 : vector<32x64xf32>
    %80 = arith.maximumf %77, %79 : vector<32x64xf32>
    %81 = arith.truncf %80 : vector<32x64xf32> to vector<32x64xbf16>
    %cst_46 = arith.constant dense<0.000000e+00> : vector<32x64xf32>
    %82 = tpu.matmul %81, %3, %cst_46 {dimension_numbers = #tpu.dot_dimension_numbers<[1], [0], [0], [1], [0, 0, 1, 1], [], []>} : vector<32x64xbf16>, vector<64x64xbf16>, vector<32x64xf32> -> vector<32x64xf32>
    %83 = vector.broadcast %4 : vector<1x64xf32> to vector<32x64xf32>
    %84 = arith.addf %82, %83 : vector<32x64xf32>
    %cst_47 = arith.constant 2.000000e-01 : f32
    %85 = vector.broadcast %cst_47 : f32 to vector<32x64xf32>
    %86 = arith.mulf %85, %84 : vector<32x64xf32>
    %87 = arith.maximumf %84, %86 : vector<32x64xf32>
    %88 = arith.maximumf %72, %87 : vector<32x64xf32>
    %c0_48 = arith.constant 0 : index
    %c5 = arith.constant 5 : index
    %c0_49 = arith.constant 0 : index
    %c0_50 = arith.constant 0 : index
    %89 = vector.load %arg3[%c0_48, %c5, %c0_49, %c0_50] : memref<1x8x32x3xbf16, #tpu.memory_space<vmem>>, vector<1x1x32x3xbf16>
    %90 = vector.shape_cast %89 : vector<1x1x32x3xbf16> to vector<32x3xbf16>
    %91 = arith.subf %90, %6 : vector<32x3xbf16>
    %cst_51 = arith.constant dense<0.000000e+00> : vector<32x64xf32>
    %92 = tpu.matmul %91, %0, %cst_51 {dimension_numbers = #tpu.dot_dimension_numbers<[1], [0], [0], [1], [0, 0, 1, 1], [], []>} : vector<32x3xbf16>, vector<3x64xbf16>, vector<32x64xf32> -> vector<32x64xf32>
    %93 = arith.addf %92, %9 : vector<32x64xf32>
    %cst_52 = arith.constant 2.000000e-01 : f32
    %94 = vector.broadcast %cst_52 : f32 to vector<32x64xf32>
    %95 = arith.mulf %94, %93 : vector<32x64xf32>
    %96 = arith.maximumf %93, %95 : vector<32x64xf32>
    %97 = arith.truncf %96 : vector<32x64xf32> to vector<32x64xbf16>
    %cst_53 = arith.constant dense<0.000000e+00> : vector<32x64xf32>
    %98 = tpu.matmul %97, %3, %cst_53 {dimension_numbers = #tpu.dot_dimension_numbers<[1], [0], [0], [1], [0, 0, 1, 1], [], []>} : vector<32x64xbf16>, vector<64x64xbf16>, vector<32x64xf32> -> vector<32x64xf32>
    %99 = vector.broadcast %4 : vector<1x64xf32> to vector<32x64xf32>
    %100 = arith.addf %98, %99 : vector<32x64xf32>
    %cst_54 = arith.constant 2.000000e-01 : f32
    %101 = vector.broadcast %cst_54 : f32 to vector<32x64xf32>
    %102 = arith.mulf %101, %100 : vector<32x64xf32>
    %103 = arith.maximumf %100, %102 : vector<32x64xf32>
    %104 = arith.maximumf %88, %103 : vector<32x64xf32>
    %c0_55 = arith.constant 0 : index
    %c6 = arith.constant 6 : index
    %c0_56 = arith.constant 0 : index
    %c0_57 = arith.constant 0 : index
    %105 = vector.load %arg3[%c0_55, %c6, %c0_56, %c0_57] : memref<1x8x32x3xbf16, #tpu.memory_space<vmem>>, vector<1x1x32x3xbf16>
    %106 = vector.shape_cast %105 : vector<1x1x32x3xbf16> to vector<32x3xbf16>
    %107 = arith.subf %106, %6 : vector<32x3xbf16>
    %cst_58 = arith.constant dense<0.000000e+00> : vector<32x64xf32>
    %108 = tpu.matmul %107, %0, %cst_58 {dimension_numbers = #tpu.dot_dimension_numbers<[1], [0], [0], [1], [0, 0, 1, 1], [], []>} : vector<32x3xbf16>, vector<3x64xbf16>, vector<32x64xf32> -> vector<32x64xf32>
    %109 = arith.addf %108, %9 : vector<32x64xf32>
    %cst_59 = arith.constant 2.000000e-01 : f32
    %110 = vector.broadcast %cst_59 : f32 to vector<32x64xf32>
    %111 = arith.mulf %110, %109 : vector<32x64xf32>
    %112 = arith.maximumf %109, %111 : vector<32x64xf32>
    %113 = arith.truncf %112 : vector<32x64xf32> to vector<32x64xbf16>
    %cst_60 = arith.constant dense<0.000000e+00> : vector<32x64xf32>
    %114 = tpu.matmul %113, %3, %cst_60 {dimension_numbers = #tpu.dot_dimension_numbers<[1], [0], [0], [1], [0, 0, 1, 1], [], []>} : vector<32x64xbf16>, vector<64x64xbf16>, vector<32x64xf32> -> vector<32x64xf32>
    %115 = vector.broadcast %4 : vector<1x64xf32> to vector<32x64xf32>
    %116 = arith.addf %114, %115 : vector<32x64xf32>
    %cst_61 = arith.constant 2.000000e-01 : f32
    %117 = vector.broadcast %cst_61 : f32 to vector<32x64xf32>
    %118 = arith.mulf %117, %116 : vector<32x64xf32>
    %119 = arith.maximumf %116, %118 : vector<32x64xf32>
    %120 = arith.maximumf %104, %119 : vector<32x64xf32>
    %c0_62 = arith.constant 0 : index
    %c7 = arith.constant 7 : index
    %c0_63 = arith.constant 0 : index
    %c0_64 = arith.constant 0 : index
    %121 = vector.load %arg3[%c0_62, %c7, %c0_63, %c0_64] : memref<1x8x32x3xbf16, #tpu.memory_space<vmem>>, vector<1x1x32x3xbf16>
    %122 = vector.shape_cast %121 : vector<1x1x32x3xbf16> to vector<32x3xbf16>
    %123 = arith.subf %122, %6 : vector<32x3xbf16>
    %cst_65 = arith.constant dense<0.000000e+00> : vector<32x64xf32>
    %124 = tpu.matmul %123, %0, %cst_65 {dimension_numbers = #tpu.dot_dimension_numbers<[1], [0], [0], [1], [0, 0, 1, 1], [], []>} : vector<32x3xbf16>, vector<3x64xbf16>, vector<32x64xf32> -> vector<32x64xf32>
    %125 = arith.addf %124, %9 : vector<32x64xf32>
    %cst_66 = arith.constant 2.000000e-01 : f32
    %126 = vector.broadcast %cst_66 : f32 to vector<32x64xf32>
    %127 = arith.mulf %126, %125 : vector<32x64xf32>
    %128 = arith.maximumf %125, %127 : vector<32x64xf32>
    %129 = arith.truncf %128 : vector<32x64xf32> to vector<32x64xbf16>
    %cst_67 = arith.constant dense<0.000000e+00> : vector<32x64xf32>
    %130 = tpu.matmul %129, %3, %cst_67 {dimension_numbers = #tpu.dot_dimension_numbers<[1], [0], [0], [1], [0, 0, 1, 1], [], []>} : vector<32x64xbf16>, vector<64x64xbf16>, vector<32x64xf32> -> vector<32x64xf32>
    %131 = vector.broadcast %4 : vector<1x64xf32> to vector<32x64xf32>
    %132 = arith.addf %130, %131 : vector<32x64xf32>
    %cst_68 = arith.constant 2.000000e-01 : f32
    %133 = vector.broadcast %cst_68 : f32 to vector<32x64xf32>
    %134 = arith.mulf %133, %132 : vector<32x64xf32>
    %135 = arith.maximumf %132, %134 : vector<32x64xf32>
    %136 = arith.maximumf %120, %135 : vector<32x64xf32>
    %137 = arith.truncf %136 : vector<32x64xf32> to vector<32x64xbf16>
    %c0_69 = arith.constant 0 : index
    %c0_70 = arith.constant 0 : index
    %c0_71 = arith.constant 0 : index
    %138 = vector.load %arg9[%c0_69, %c0_70, %c0_71] : memref<1x32x64xbf16, #tpu.memory_space<vmem>>, vector<1x32x64xbf16>
    %139 = vector.shape_cast %138 : vector<1x32x64xbf16> to vector<32x64xbf16>
    %140 = vector.shape_cast %137 : vector<32x64xbf16> to vector<1x32x64xbf16>
    tpu.vector_store %arg9[%c0_69, %c0_70, %c0_71], %140 {strides = array<i32>} : memref<1x32x64xbf16, #tpu.memory_space<vmem>>, vector<1x32x64xbf16>,
    return
  }
  func.func @transform_0(%arg0: i32, %arg1: i32) -> (i32, i32, i32) {
    %c0_i32 = arith.constant 0 : i32
    %c0_i32_0 = arith.constant 0 : i32
    return %arg0, %arg1, %c0_i32 : i32, i32, i32
  }
  func.func @transform_1(%arg0: i32, %arg1: i32) -> (i32, i32, i32, i32) {
    %c0_i32 = arith.constant 0 : i32
    %c0_i32_0 = arith.constant 0 : i32
    %c0_i32_1 = arith.constant 0 : i32
    return %arg0, %c0_i32, %arg1, %c0_i32_0 : i32, i32, i32, i32
  }
  func.func @transform_2(%arg0: i32, %arg1: i32) -> (i32, i32) {
    %c0_i32 = arith.constant 0 : i32
    %c0_i32_0 = arith.constant 0 : i32
    %c0_i32_1 = arith.constant 0 : i32
    return %c0_i32, %c0_i32_0 : i32, i32
  }
  func.func @transform_3(%arg0: i32, %arg1: i32) -> (i32, i32) {
    %c0_i32 = arith.constant 0 : i32
    %c0_i32_0 = arith.constant 0 : i32
    %c0_i32_1 = arith.constant 0 : i32
    return %c0_i32, %c0_i32_0 : i32, i32
  }
  func.func @transform_4(%arg0: i32, %arg1: i32) -> (i32, i32) {
    %c0_i32 = arith.constant 0 : i32
    %c0_i32_0 = arith.constant 0 : i32
    %c0_i32_1 = arith.constant 0 : i32
    return %c0_i32, %c0_i32_0 : i32, i32
  }
  func.func @transform_5(%arg0: i32, %arg1: i32) -> (i32, i32) {
    %c0_i32 = arith.constant 0 : i32
    %c0_i32_0 = arith.constant 0 : i32
    %c0_i32_1 = arith.constant 0 : i32
    return %c0_i32, %c0_i32_0 : i32, i32
  }
  func.func @transform_6(%arg0: i32, %arg1: i32) -> (i32, i32) {
    %c0_i32 = arith.constant 0 : i32
    %c0_i32_0 = arith.constant 0 : i32
    %c0_i32_1 = arith.constant 0 : i32
    return %c0_i32, %c0_i32_0 : i32, i32
  }
  func.func @transform_7(%arg0: i32, %arg1: i32) -> (i32, i32, i32) {
    %c0_i32 = arith.constant 0 : i32
    %c0_i32_0 = arith.constant 0 : i32
    return %arg0, %arg1, %c0_i32 : i32, i32, i32
  }
}

module attributes {stable_mosaic.version = 11 : i64} {
  func.func @_edge_block_kernel(%arg0: i32, %arg1: i32, %arg2: memref<1x32x64xbf16, #tpu.memory_space<vmem>>, %arg3: memref<1x8x32x64xbf16, #tpu.memory_space<vmem>>, %arg4: memref<64x64xbf16, #tpu.memory_space<vmem>>, %arg5: memref<64x64xbf16, #tpu.memory_space<vmem>>, %arg6: memref<1x64xf32, #tpu.memory_space<vmem>>, %arg7: memref<64x64xbf16, #tpu.memory_space<vmem>>, %arg8: memref<1x64xf32, #tpu.memory_space<vmem>>, %arg9: memref<1x32x64xbf16, #tpu.memory_space<vmem>>) attributes {dimension_semantics = [#tpu.dimension_semantics<parallel>, #tpu.dimension_semantics<parallel>], iteration_bounds = array<i64: 2, 1>, scalar_prefetch = 0 : i64, scratch_operands = 0 : i64, tpu.core_type = #tpu.core_type<tc>, window_params = [{transform_indices = @transform_0, window_bounds = array<i64: 1, 32, 64>}, {transform_indices = @transform_1, window_bounds = array<i64: 1, 8, 32, 64>}, {pipeline_mode = #tpu.pipeline_mode<synchronous>, transform_indices = @transform_2, window_bounds = array<i64: 64, 64>}, {pipeline_mode = #tpu.pipeline_mode<synchronous>, transform_indices = @transform_3, window_bounds = array<i64: 64, 64>}, {pipeline_mode = #tpu.pipeline_mode<synchronous>, transform_indices = @transform_4, window_bounds = array<i64: 1, 64>}, {pipeline_mode = #tpu.pipeline_mode<synchronous>, transform_indices = @transform_5, window_bounds = array<i64: 64, 64>}, {pipeline_mode = #tpu.pipeline_mode<synchronous>, transform_indices = @transform_6, window_bounds = array<i64: 1, 64>}, {transform_indices = @transform_7, window_bounds = array<i64: 1, 32, 64>}]} {
    %c0 = arith.constant 0 : index
    %c0_0 = arith.constant 0 : index
    %0 = vector.load %arg4[%c0, %c0_0] : memref<64x64xbf16, #tpu.memory_space<vmem>>, vector<64x64xbf16>
    %c0_1 = arith.constant 0 : index
    %c0_2 = arith.constant 0 : index
    %1 = vector.load %arg5[%c0_1, %c0_2] : memref<64x64xbf16, #tpu.memory_space<vmem>>, vector<64x64xbf16>
    %c0_3 = arith.constant 0 : index
    %c0_4 = arith.constant 0 : index
    %2 = vector.load %arg6[%c0_3, %c0_4] : memref<1x64xf32, #tpu.memory_space<vmem>>, vector<1x64xf32>
    %c0_5 = arith.constant 0 : index
    %c0_6 = arith.constant 0 : index
    %3 = vector.load %arg7[%c0_5, %c0_6] : memref<64x64xbf16, #tpu.memory_space<vmem>>, vector<64x64xbf16>
    %c0_7 = arith.constant 0 : index
    %c0_8 = arith.constant 0 : index
    %4 = vector.load %arg8[%c0_7, %c0_8] : memref<1x64xf32, #tpu.memory_space<vmem>>, vector<1x64xf32>
    %c0_9 = arith.constant 0 : index
    %c0_10 = arith.constant 0 : index
    %c0_11 = arith.constant 0 : index
    %5 = vector.load %arg2[%c0_9, %c0_10, %c0_11] : memref<1x32x64xbf16, #tpu.memory_space<vmem>>, vector<1x32x64xbf16>
    %6 = vector.shape_cast %5 : vector<1x32x64xbf16> to vector<32x64xbf16>
    %cst = arith.constant dense<0.000000e+00> : vector<32x64xf32>
    %7 = tpu.matmul %6, %1, %cst {dimension_numbers = #tpu.dot_dimension_numbers<[1], [0], [0], [1], [0, 0, 1, 1], [], []>} : vector<32x64xbf16>, vector<64x64xbf16>, vector<32x64xf32> -> vector<32x64xf32>
    %8 = vector.broadcast %2 : vector<1x64xf32> to vector<32x64xf32>
    %9 = arith.addf %7, %8 : vector<32x64xf32>
    %c0_12 = arith.constant 0 : index
    %c0_13 = arith.constant 0 : index
    %c0_14 = arith.constant 0 : index
    %c0_15 = arith.constant 0 : index
    %10 = vector.load %arg3[%c0_12, %c0_13, %c0_14, %c0_15] : memref<1x8x32x64xbf16, #tpu.memory_space<vmem>>, vector<1x1x32x64xbf16>
    %11 = vector.shape_cast %10 : vector<1x1x32x64xbf16> to vector<32x64xbf16>
    %12 = arith.subf %11, %6 : vector<32x64xbf16>
    %cst_16 = arith.constant dense<0.000000e+00> : vector<32x64xf32>
    %13 = tpu.matmul %12, %0, %cst_16 {dimension_numbers = #tpu.dot_dimension_numbers<[1], [0], [0], [1], [0, 0, 1, 1], [], []>} : vector<32x64xbf16>, vector<64x64xbf16>, vector<32x64xf32> -> vector<32x64xf32>
    %14 = arith.addf %13, %9 : vector<32x64xf32>
    %cst_17 = arith.constant 2.000000e-01 : f32
    %15 = vector.broadcast %cst_17 : f32 to vector<32x64xf32>
    %16 = arith.mulf %15, %14 : vector<32x64xf32>
    %17 = arith.maximumf %14, %16 : vector<32x64xf32>
    %18 = arith.truncf %17 : vector<32x64xf32> to vector<32x64xbf16>
    %cst_18 = arith.constant dense<0.000000e+00> : vector<32x64xf32>
    %19 = tpu.matmul %18, %3, %cst_18 {dimension_numbers = #tpu.dot_dimension_numbers<[1], [0], [0], [1], [0, 0, 1, 1], [], []>} : vector<32x64xbf16>, vector<64x64xbf16>, vector<32x64xf32> -> vector<32x64xf32>
    %20 = vector.broadcast %4 : vector<1x64xf32> to vector<32x64xf32>
    %21 = arith.addf %19, %20 : vector<32x64xf32>
    %cst_19 = arith.constant 2.000000e-01 : f32
    %22 = vector.broadcast %cst_19 : f32 to vector<32x64xf32>
    %23 = arith.mulf %22, %21 : vector<32x64xf32>
    %24 = arith.maximumf %21, %23 : vector<32x64xf32>
    %c0_20 = arith.constant 0 : index
    %c1 = arith.constant 1 : index
    %c0_21 = arith.constant 0 : index
    %c0_22 = arith.constant 0 : index
    %25 = vector.load %arg3[%c0_20, %c1, %c0_21, %c0_22] : memref<1x8x32x64xbf16, #tpu.memory_space<vmem>>, vector<1x1x32x64xbf16>
    %26 = vector.shape_cast %25 : vector<1x1x32x64xbf16> to vector<32x64xbf16>
    %27 = arith.subf %26, %6 : vector<32x64xbf16>
    %cst_23 = arith.constant dense<0.000000e+00> : vector<32x64xf32>
    %28 = tpu.matmul %27, %0, %cst_23 {dimension_numbers = #tpu.dot_dimension_numbers<[1], [0], [0], [1], [0, 0, 1, 1], [], []>} : vector<32x64xbf16>, vector<64x64xbf16>, vector<32x64xf32> -> vector<32x64xf32>
    %29 = arith.addf %28, %9 : vector<32x64xf32>
    %cst_24 = arith.constant 2.000000e-01 : f32
    %30 = vector.broadcast %cst_24 : f32 to vector<32x64xf32>
    %31 = arith.mulf %30, %29 : vector<32x64xf32>
    %32 = arith.maximumf %29, %31 : vector<32x64xf32>
    %33 = arith.truncf %32 : vector<32x64xf32> to vector<32x64xbf16>
    %cst_25 = arith.constant dense<0.000000e+00> : vector<32x64xf32>
    %34 = tpu.matmul %33, %3, %cst_25 {dimension_numbers = #tpu.dot_dimension_numbers<[1], [0], [0], [1], [0, 0, 1, 1], [], []>} : vector<32x64xbf16>, vector<64x64xbf16>, vector<32x64xf32> -> vector<32x64xf32>
    %35 = vector.broadcast %4 : vector<1x64xf32> to vector<32x64xf32>
    %36 = arith.addf %34, %35 : vector<32x64xf32>
    %cst_26 = arith.constant 2.000000e-01 : f32
    %37 = vector.broadcast %cst_26 : f32 to vector<32x64xf32>
    %38 = arith.mulf %37, %36 : vector<32x64xf32>
    %39 = arith.maximumf %36, %38 : vector<32x64xf32>
    %40 = arith.maximumf %24, %39 : vector<32x64xf32>
    %c0_27 = arith.constant 0 : index
    %c2 = arith.constant 2 : index
    %c0_28 = arith.constant 0 : index
    %c0_29 = arith.constant 0 : index
    %41 = vector.load %arg3[%c0_27, %c2, %c0_28, %c0_29] : memref<1x8x32x64xbf16, #tpu.memory_space<vmem>>, vector<1x1x32x64xbf16>
    %42 = vector.shape_cast %41 : vector<1x1x32x64xbf16> to vector<32x64xbf16>
    %43 = arith.subf %42, %6 : vector<32x64xbf16>
    %cst_30 = arith.constant dense<0.000000e+00> : vector<32x64xf32>
    %44 = tpu.matmul %43, %0, %cst_30 {dimension_numbers = #tpu.dot_dimension_numbers<[1], [0], [0], [1], [0, 0, 1, 1], [], []>} : vector<32x64xbf16>, vector<64x64xbf16>, vector<32x64xf32> -> vector<32x64xf32>
    %45 = arith.addf %44, %9 : vector<32x64xf32>
    %cst_31 = arith.constant 2.000000e-01 : f32
    %46 = vector.broadcast %cst_31 : f32 to vector<32x64xf32>
    %47 = arith.mulf %46, %45 : vector<32x64xf32>
    %48 = arith.maximumf %45, %47 : vector<32x64xf32>
    %49 = arith.truncf %48 : vector<32x64xf32> to vector<32x64xbf16>
    %cst_32 = arith.constant dense<0.000000e+00> : vector<32x64xf32>
    %50 = tpu.matmul %49, %3, %cst_32 {dimension_numbers = #tpu.dot_dimension_numbers<[1], [0], [0], [1], [0, 0, 1, 1], [], []>} : vector<32x64xbf16>, vector<64x64xbf16>, vector<32x64xf32> -> vector<32x64xf32>
    %51 = vector.broadcast %4 : vector<1x64xf32> to vector<32x64xf32>
    %52 = arith.addf %50, %51 : vector<32x64xf32>
    %cst_33 = arith.constant 2.000000e-01 : f32
    %53 = vector.broadcast %cst_33 : f32 to vector<32x64xf32>
    %54 = arith.mulf %53, %52 : vector<32x64xf32>
    %55 = arith.maximumf %52, %54 : vector<32x64xf32>
    %56 = arith.maximumf %40, %55 : vector<32x64xf32>
    %c0_34 = arith.constant 0 : index
    %c3 = arith.constant 3 : index
    %c0_35 = arith.constant 0 : index
    %c0_36 = arith.constant 0 : index
    %57 = vector.load %arg3[%c0_34, %c3, %c0_35, %c0_36] : memref<1x8x32x64xbf16, #tpu.memory_space<vmem>>, vector<1x1x32x64xbf16>
    %58 = vector.shape_cast %57 : vector<1x1x32x64xbf16> to vector<32x64xbf16>
    %59 = arith.subf %58, %6 : vector<32x64xbf16>
    %cst_37 = arith.constant dense<0.000000e+00> : vector<32x64xf32>
    %60 = tpu.matmul %59, %0, %cst_37 {dimension_numbers = #tpu.dot_dimension_numbers<[1], [0], [0], [1], [0, 0, 1, 1], [], []>} : vector<32x64xbf16>, vector<64x64xbf16>, vector<32x64xf32> -> vector<32x64xf32>
    %61 = arith.addf %60, %9 : vector<32x64xf32>
    %cst_38 = arith.constant 2.000000e-01 : f32
    %62 = vector.broadcast %cst_38 : f32 to vector<32x64xf32>
    %63 = arith.mulf %62, %61 : vector<32x64xf32>
    %64 = arith.maximumf %61, %63 : vector<32x64xf32>
    %65 = arith.truncf %64 : vector<32x64xf32> to vector<32x64xbf16>
    %cst_39 = arith.constant dense<0.000000e+00> : vector<32x64xf32>
    %66 = tpu.matmul %65, %3, %cst_39 {dimension_numbers = #tpu.dot_dimension_numbers<[1], [0], [0], [1], [0, 0, 1, 1], [], []>} : vector<32x64xbf16>, vector<64x64xbf16>, vector<32x64xf32> -> vector<32x64xf32>
    %67 = vector.broadcast %4 : vector<1x64xf32> to vector<32x64xf32>
    %68 = arith.addf %66, %67 : vector<32x64xf32>
    %cst_40 = arith.constant 2.000000e-01 : f32
    %69 = vector.broadcast %cst_40 : f32 to vector<32x64xf32>
    %70 = arith.mulf %69, %68 : vector<32x64xf32>
    %71 = arith.maximumf %68, %70 : vector<32x64xf32>
    %72 = arith.maximumf %56, %71 : vector<32x64xf32>
    %c0_41 = arith.constant 0 : index
    %c4 = arith.constant 4 : index
    %c0_42 = arith.constant 0 : index
    %c0_43 = arith.constant 0 : index
    %73 = vector.load %arg3[%c0_41, %c4, %c0_42, %c0_43] : memref<1x8x32x64xbf16, #tpu.memory_space<vmem>>, vector<1x1x32x64xbf16>
    %74 = vector.shape_cast %73 : vector<1x1x32x64xbf16> to vector<32x64xbf16>
    %75 = arith.subf %74, %6 : vector<32x64xbf16>
    %cst_44 = arith.constant dense<0.000000e+00> : vector<32x64xf32>
    %76 = tpu.matmul %75, %0, %cst_44 {dimension_numbers = #tpu.dot_dimension_numbers<[1], [0], [0], [1], [0, 0, 1, 1], [], []>} : vector<32x64xbf16>, vector<64x64xbf16>, vector<32x64xf32> -> vector<32x64xf32>
    %77 = arith.addf %76, %9 : vector<32x64xf32>
    %cst_45 = arith.constant 2.000000e-01 : f32
    %78 = vector.broadcast %cst_45 : f32 to vector<32x64xf32>
    %79 = arith.mulf %78, %77 : vector<32x64xf32>
    %80 = arith.maximumf %77, %79 : vector<32x64xf32>
    %81 = arith.truncf %80 : vector<32x64xf32> to vector<32x64xbf16>
    %cst_46 = arith.constant dense<0.000000e+00> : vector<32x64xf32>
    %82 = tpu.matmul %81, %3, %cst_46 {dimension_numbers = #tpu.dot_dimension_numbers<[1], [0], [0], [1], [0, 0, 1, 1], [], []>} : vector<32x64xbf16>, vector<64x64xbf16>, vector<32x64xf32> -> vector<32x64xf32>
    %83 = vector.broadcast %4 : vector<1x64xf32> to vector<32x64xf32>
    %84 = arith.addf %82, %83 : vector<32x64xf32>
    %cst_47 = arith.constant 2.000000e-01 : f32
    %85 = vector.broadcast %cst_47 : f32 to vector<32x64xf32>
    %86 = arith.mulf %85, %84 : vector<32x64xf32>
    %87 = arith.maximumf %84, %86 : vector<32x64xf32>
    %88 = arith.maximumf %72, %87 : vector<32x64xf32>
    %c0_48 = arith.constant 0 : index
    %c5 = arith.constant 5 : index
    %c0_49 = arith.constant 0 : index
    %c0_50 = arith.constant 0 : index
    %89 = vector.load %arg3[%c0_48, %c5, %c0_49, %c0_50] : memref<1x8x32x64xbf16, #tpu.memory_space<vmem>>, vector<1x1x32x64xbf16>
    %90 = vector.shape_cast %89 : vector<1x1x32x64xbf16> to vector<32x64xbf16>
    %91 = arith.subf %90, %6 : vector<32x64xbf16>
    %cst_51 = arith.constant dense<0.000000e+00> : vector<32x64xf32>
    %92 = tpu.matmul %91, %0, %cst_51 {dimension_numbers = #tpu.dot_dimension_numbers<[1], [0], [0], [1], [0, 0, 1, 1], [], []>} : vector<32x64xbf16>, vector<64x64xbf16>, vector<32x64xf32> -> vector<32x64xf32>
    %93 = arith.addf %92, %9 : vector<32x64xf32>
    %cst_52 = arith.constant 2.000000e-01 : f32
    %94 = vector.broadcast %cst_52 : f32 to vector<32x64xf32>
    %95 = arith.mulf %94, %93 : vector<32x64xf32>
    %96 = arith.maximumf %93, %95 : vector<32x64xf32>
    %97 = arith.truncf %96 : vector<32x64xf32> to vector<32x64xbf16>
    %cst_53 = arith.constant dense<0.000000e+00> : vector<32x64xf32>
    %98 = tpu.matmul %97, %3, %cst_53 {dimension_numbers = #tpu.dot_dimension_numbers<[1], [0], [0], [1], [0, 0, 1, 1], [], []>} : vector<32x64xbf16>, vector<64x64xbf16>, vector<32x64xf32> -> vector<32x64xf32>
    %99 = vector.broadcast %4 : vector<1x64xf32> to vector<32x64xf32>
    %100 = arith.addf %98, %99 : vector<32x64xf32>
    %cst_54 = arith.constant 2.000000e-01 : f32
    %101 = vector.broadcast %cst_54 : f32 to vector<32x64xf32>
    %102 = arith.mulf %101, %100 : vector<32x64xf32>
    %103 = arith.maximumf %100, %102 : vector<32x64xf32>
    %104 = arith.maximumf %88, %103 : vector<32x64xf32>
    %c0_55 = arith.constant 0 : index
    %c6 = arith.constant 6 : index
    %c0_56 = arith.constant 0 : index
    %c0_57 = arith.constant 0 : index
    %105 = vector.load %arg3[%c0_55, %c6, %c0_56, %c0_57] : memref<1x8x32x64xbf16, #tpu.memory_space<vmem>>, vector<1x1x32x64xbf16>
    %106 = vector.shape_cast %105 : vector<1x1x32x64xbf16> to vector<32x64xbf16>
    %107 = arith.subf %106, %6 : vector<32x64xbf16>
    %cst_58 = arith.constant dense<0.000000e+00> : vector<32x64xf32>
    %108 = tpu.matmul %107, %0, %cst_58 {dimension_numbers = #tpu.dot_dimension_numbers<[1], [0], [0], [1], [0, 0, 1, 1], [], []>} : vector<32x64xbf16>, vector<64x64xbf16>, vector<32x64xf32> -> vector<32x64xf32>
    %109 = arith.addf %108, %9 : vector<32x64xf32>
    %cst_59 = arith.constant 2.000000e-01 : f32
    %110 = vector.broadcast %cst_59 : f32 to vector<32x64xf32>
    %111 = arith.mulf %110, %109 : vector<32x64xf32>
    %112 = arith.maximumf %109, %111 : vector<32x64xf32>
    %113 = arith.truncf %112 : vector<32x64xf32> to vector<32x64xbf16>
    %cst_60 = arith.constant dense<0.000000e+00> : vector<32x64xf32>
    %114 = tpu.matmul %113, %3, %cst_60 {dimension_numbers = #tpu.dot_dimension_numbers<[1], [0], [0], [1], [0, 0, 1, 1], [], []>} : vector<32x64xbf16>, vector<64x64xbf16>, vector<32x64xf32> -> vector<32x64xf32>
    %115 = vector.broadcast %4 : vector<1x64xf32> to vector<32x64xf32>
    %116 = arith.addf %114, %115 : vector<32x64xf32>
    %cst_61 = arith.constant 2.000000e-01 : f32
    %117 = vector.broadcast %cst_61 : f32 to vector<32x64xf32>
    %118 = arith.mulf %117, %116 : vector<32x64xf32>
    %119 = arith.maximumf %116, %118 : vector<32x64xf32>
    %120 = arith.maximumf %104, %119 : vector<32x64xf32>
    %c0_62 = arith.constant 0 : index
    %c7 = arith.constant 7 : index
    %c0_63 = arith.constant 0 : index
    %c0_64 = arith.constant 0 : index
    %121 = vector.load %arg3[%c0_62, %c7, %c0_63, %c0_64] : memref<1x8x32x64xbf16, #tpu.memory_space<vmem>>, vector<1x1x32x64xbf16>
    %122 = vector.shape_cast %121 : vector<1x1x32x64xbf16> to vector<32x64xbf16>
    %123 = arith.subf %122, %6 : vector<32x64xbf16>
    %cst_65 = arith.constant dense<0.000000e+00> : vector<32x64xf32>
    %124 = tpu.matmul %123, %0, %cst_65 {dimension_numbers = #tpu.dot_dimension_numbers<[1], [0], [0], [1], [0, 0, 1, 1], [], []>} : vector<32x64xbf16>, vector<64x64xbf16>, vector<32x64xf32> -> vector<32x64xf32>
    %125 = arith.addf %124, %9 : vector<32x64xf32>
    %cst_66 = arith.constant 2.000000e-01 : f32
    %126 = vector.broadcast %cst_66 : f32 to vector<32x64xf32>
    %127 = arith.mulf %126, %125 : vector<32x64xf32>
    %128 = arith.maximumf %125, %127 : vector<32x64xf32>
    %129 = arith.truncf %128 : vector<32x64xf32> to vector<32x64xbf16>
    %cst_67 = arith.constant dense<0.000000e+00> : vector<32x64xf32>
    %130 = tpu.matmul %129, %3, %cst_67 {dimension_numbers = #tpu.dot_dimension_numbers<[1], [0], [0], [1], [0, 0, 1, 1], [], []>} : vector<32x64xbf16>, vector<64x64xbf16>, vector<32x64xf32> -> vector<32x64xf32>
    %131 = vector.broadcast %4 : vector<1x64xf32> to vector<32x64xf32>
    %132 = arith.addf %130, %131 : vector<32x64xf32>
    %cst_68 = arith.constant 2.000000e-01 : f32
    %133 = vector.broadcast %cst_68 : f32 to vector<32x64xf32>
    %134 = arith.mulf %133, %132 : vector<32x64xf32>
    %135 = arith.maximumf %132, %134 : vector<32x64xf32>
    %136 = arith.maximumf %120, %135 : vector<32x64xf32>
    %137 = arith.truncf %136 : vector<32x64xf32> to vector<32x64xbf16>
    %c0_69 = arith.constant 0 : index
    %c0_70 = arith.constant 0 : index
    %c0_71 = arith.constant 0 : index
    %138 = vector.load %arg9[%c0_69, %c0_70, %c0_71] : memref<1x32x64xbf16, #tpu.memory_space<vmem>>, vector<1x32x64xbf16>
    %139 = vector.shape_cast %138 : vector<1x32x64xbf16> to vector<32x64xbf16>
    %140 = vector.shape_cast %137 : vector<32x64xbf16> to vector<1x32x64xbf16>
    tpu.vector_store %arg9[%c0_69, %c0_70, %c0_71], %140 {strides = array<i32>} : memref<1x32x64xbf16, #tpu.memory_space<vmem>>, vector<1x32x64xbf16>,
    return
  }
  func.func @transform_0(%arg0: i32, %arg1: i32) -> (i32, i32, i32) {
    %c0_i32 = arith.constant 0 : i32
    %c0_i32_0 = arith.constant 0 : i32
    return %arg0, %arg1, %c0_i32 : i32, i32, i32
  }
  func.func @transform_1(%arg0: i32, %arg1: i32) -> (i32, i32, i32, i32) {
    %c0_i32 = arith.constant 0 : i32
    %c0_i32_0 = arith.constant 0 : i32
    %c0_i32_1 = arith.constant 0 : i32
    return %arg0, %c0_i32, %arg1, %c0_i32_0 : i32, i32, i32, i32
  }
  func.func @transform_2(%arg0: i32, %arg1: i32) -> (i32, i32) {
    %c0_i32 = arith.constant 0 : i32
    %c0_i32_0 = arith.constant 0 : i32
    %c0_i32_1 = arith.constant 0 : i32
    return %c0_i32, %c0_i32_0 : i32, i32
  }
  func.func @transform_3(%arg0: i32, %arg1: i32) -> (i32, i32) {
    %c0_i32 = arith.constant 0 : i32
    %c0_i32_0 = arith.constant 0 : i32
    %c0_i32_1 = arith.constant 0 : i32
    return %c0_i32, %c0_i32_0 : i32, i32
  }
  func.func @transform_4(%arg0: i32, %arg1: i32) -> (i32, i32) {
    %c0_i32 = arith.constant 0 : i32
    %c0_i32_0 = arith.constant 0 : i32
    %c0_i32_1 = arith.constant 0 : i32
    return %c0_i32, %c0_i32_0 : i32, i32
  }
  func.func @transform_5(%arg0: i32, %arg1: i32) -> (i32, i32) {
    %c0_i32 = arith.constant 0 : i32
    %c0_i32_0 = arith.constant 0 : i32
    %c0_i32_1 = arith.constant 0 : i32
    return %c0_i32, %c0_i32_0 : i32, i32
  }
  func.func @transform_6(%arg0: i32, %arg1: i32) -> (i32, i32) {
    %c0_i32 = arith.constant 0 : i32
    %c0_i32_0 = arith.constant 0 : i32
    %c0_i32_1 = arith.constant 0 : i32
    return %c0_i32, %c0_i32_0 : i32, i32
  }
  func.func @transform_7(%arg0: i32, %arg1: i32) -> (i32, i32, i32) {
    %c0_i32 = arith.constant 0 : i32
    %c0_i32_0 = arith.constant 0 : i32
    return %arg0, %arg1, %c0_i32 : i32, i32, i32
  }
}

module attributes {stable_mosaic.version = 11 : i64} {
  func.func @_edge_block_kernel(%arg0: i32, %arg1: i32, %arg2: memref<1x32x64xbf16, #tpu.memory_space<vmem>>, %arg3: memref<1x8x32x64xbf16, #tpu.memory_space<vmem>>, %arg4: memref<1x32x64xbf16, #tpu.memory_space<vmem>>, %arg5: memref<64x64xbf16, #tpu.memory_space<vmem>>, %arg6: memref<64x64xbf16, #tpu.memory_space<vmem>>, %arg7: memref<1x64xf32, #tpu.memory_space<vmem>>, %arg8: memref<1x32x192xbf16, #tpu.memory_space<vmem>>) attributes {dimension_semantics = [#tpu.dimension_semantics<parallel>, #tpu.dimension_semantics<parallel>], iteration_bounds = array<i64: 2, 1>, scalar_prefetch = 0 : i64, scratch_operands = 0 : i64, tpu.core_type = #tpu.core_type<tc>, window_params = [{transform_indices = @transform_0, window_bounds = array<i64: 1, 32, 64>}, {transform_indices = @transform_1, window_bounds = array<i64: 1, 8, 32, 64>}, {transform_indices = @transform_2, window_bounds = array<i64: 1, 32, 64>}, {pipeline_mode = #tpu.pipeline_mode<synchronous>, transform_indices = @transform_3, window_bounds = array<i64: 64, 64>}, {pipeline_mode = #tpu.pipeline_mode<synchronous>, transform_indices = @transform_4, window_bounds = array<i64: 64, 64>}, {pipeline_mode = #tpu.pipeline_mode<synchronous>, transform_indices = @transform_5, window_bounds = array<i64: 1, 64>}, {transform_indices = @transform_6, window_bounds = array<i64: 1, 32, 192>}]} {
    %c0 = arith.constant 0 : index
    %c0_0 = arith.constant 0 : index
    %0 = vector.load %arg5[%c0, %c0_0] : memref<64x64xbf16, #tpu.memory_space<vmem>>, vector<64x64xbf16>
    %c0_1 = arith.constant 0 : index
    %c0_2 = arith.constant 0 : index
    %1 = vector.load %arg6[%c0_1, %c0_2] : memref<64x64xbf16, #tpu.memory_space<vmem>>, vector<64x64xbf16>
    %c0_3 = arith.constant 0 : index
    %c0_4 = arith.constant 0 : index
    %2 = vector.load %arg7[%c0_3, %c0_4] : memref<1x64xf32, #tpu.memory_space<vmem>>, vector<1x64xf32>
    %c0_5 = arith.constant 0 : index
    %c0_6 = arith.constant 0 : index
    %c0_7 = arith.constant 0 : index
    %3 = vector.load %arg2[%c0_5, %c0_6, %c0_7] : memref<1x32x64xbf16, #tpu.memory_space<vmem>>, vector<1x32x64xbf16>
    %4 = vector.shape_cast %3 : vector<1x32x64xbf16> to vector<32x64xbf16>
    %cst = arith.constant dense<0.000000e+00> : vector<32x64xf32>
    %5 = tpu.matmul %4, %1, %cst {dimension_numbers = #tpu.dot_dimension_numbers<[1], [0], [0], [1], [0, 0, 1, 1], [], []>} : vector<32x64xbf16>, vector<64x64xbf16>, vector<32x64xf32> -> vector<32x64xf32>
    %6 = vector.broadcast %2 : vector<1x64xf32> to vector<32x64xf32>
    %7 = arith.addf %5, %6 : vector<32x64xf32>
    %c0_8 = arith.constant 0 : index
    %c0_9 = arith.constant 0 : index
    %c0_10 = arith.constant 0 : index
    %c0_11 = arith.constant 0 : index
    %8 = vector.load %arg3[%c0_8, %c0_9, %c0_10, %c0_11] : memref<1x8x32x64xbf16, #tpu.memory_space<vmem>>, vector<1x1x32x64xbf16>
    %9 = vector.shape_cast %8 : vector<1x1x32x64xbf16> to vector<32x64xbf16>
    %10 = arith.subf %9, %4 : vector<32x64xbf16>
    %cst_12 = arith.constant dense<0.000000e+00> : vector<32x64xf32>
    %11 = tpu.matmul %10, %0, %cst_12 {dimension_numbers = #tpu.dot_dimension_numbers<[1], [0], [0], [1], [0, 0, 1, 1], [], []>} : vector<32x64xbf16>, vector<64x64xbf16>, vector<32x64xf32> -> vector<32x64xf32>
    %12 = arith.addf %11, %7 : vector<32x64xf32>
    %cst_13 = arith.constant 2.000000e-01 : f32
    %13 = vector.broadcast %cst_13 : f32 to vector<32x64xf32>
    %14 = arith.mulf %13, %12 : vector<32x64xf32>
    %15 = arith.maximumf %12, %14 : vector<32x64xf32>
    %c0_14 = arith.constant 0 : index
    %c1 = arith.constant 1 : index
    %c0_15 = arith.constant 0 : index
    %c0_16 = arith.constant 0 : index
    %16 = vector.load %arg3[%c0_14, %c1, %c0_15, %c0_16] : memref<1x8x32x64xbf16, #tpu.memory_space<vmem>>, vector<1x1x32x64xbf16>
    %17 = vector.shape_cast %16 : vector<1x1x32x64xbf16> to vector<32x64xbf16>
    %18 = arith.subf %17, %4 : vector<32x64xbf16>
    %cst_17 = arith.constant dense<0.000000e+00> : vector<32x64xf32>
    %19 = tpu.matmul %18, %0, %cst_17 {dimension_numbers = #tpu.dot_dimension_numbers<[1], [0], [0], [1], [0, 0, 1, 1], [], []>} : vector<32x64xbf16>, vector<64x64xbf16>, vector<32x64xf32> -> vector<32x64xf32>
    %20 = arith.addf %19, %7 : vector<32x64xf32>
    %cst_18 = arith.constant 2.000000e-01 : f32
    %21 = vector.broadcast %cst_18 : f32 to vector<32x64xf32>
    %22 = arith.mulf %21, %20 : vector<32x64xf32>
    %23 = arith.maximumf %20, %22 : vector<32x64xf32>
    %24 = arith.maximumf %15, %23 : vector<32x64xf32>
    %c0_19 = arith.constant 0 : index
    %c2 = arith.constant 2 : index
    %c0_20 = arith.constant 0 : index
    %c0_21 = arith.constant 0 : index
    %25 = vector.load %arg3[%c0_19, %c2, %c0_20, %c0_21] : memref<1x8x32x64xbf16, #tpu.memory_space<vmem>>, vector<1x1x32x64xbf16>
    %26 = vector.shape_cast %25 : vector<1x1x32x64xbf16> to vector<32x64xbf16>
    %27 = arith.subf %26, %4 : vector<32x64xbf16>
    %cst_22 = arith.constant dense<0.000000e+00> : vector<32x64xf32>
    %28 = tpu.matmul %27, %0, %cst_22 {dimension_numbers = #tpu.dot_dimension_numbers<[1], [0], [0], [1], [0, 0, 1, 1], [], []>} : vector<32x64xbf16>, vector<64x64xbf16>, vector<32x64xf32> -> vector<32x64xf32>
    %29 = arith.addf %28, %7 : vector<32x64xf32>
    %cst_23 = arith.constant 2.000000e-01 : f32
    %30 = vector.broadcast %cst_23 : f32 to vector<32x64xf32>
    %31 = arith.mulf %30, %29 : vector<32x64xf32>
    %32 = arith.maximumf %29, %31 : vector<32x64xf32>
    %33 = arith.maximumf %24, %32 : vector<32x64xf32>
    %c0_24 = arith.constant 0 : index
    %c3 = arith.constant 3 : index
    %c0_25 = arith.constant 0 : index
    %c0_26 = arith.constant 0 : index
    %34 = vector.load %arg3[%c0_24, %c3, %c0_25, %c0_26] : memref<1x8x32x64xbf16, #tpu.memory_space<vmem>>, vector<1x1x32x64xbf16>
    %35 = vector.shape_cast %34 : vector<1x1x32x64xbf16> to vector<32x64xbf16>
    %36 = arith.subf %35, %4 : vector<32x64xbf16>
    %cst_27 = arith.constant dense<0.000000e+00> : vector<32x64xf32>
    %37 = tpu.matmul %36, %0, %cst_27 {dimension_numbers = #tpu.dot_dimension_numbers<[1], [0], [0], [1], [0, 0, 1, 1], [], []>} : vector<32x64xbf16>, vector<64x64xbf16>, vector<32x64xf32> -> vector<32x64xf32>
    %38 = arith.addf %37, %7 : vector<32x64xf32>
    %cst_28 = arith.constant 2.000000e-01 : f32
    %39 = vector.broadcast %cst_28 : f32 to vector<32x64xf32>
    %40 = arith.mulf %39, %38 : vector<32x64xf32>
    %41 = arith.maximumf %38, %40 : vector<32x64xf32>
    %42 = arith.maximumf %33, %41 : vector<32x64xf32>
    %c0_29 = arith.constant 0 : index
    %c4 = arith.constant 4 : index
    %c0_30 = arith.constant 0 : index
    %c0_31 = arith.constant 0 : index
    %43 = vector.load %arg3[%c0_29, %c4, %c0_30, %c0_31] : memref<1x8x32x64xbf16, #tpu.memory_space<vmem>>, vector<1x1x32x64xbf16>
    %44 = vector.shape_cast %43 : vector<1x1x32x64xbf16> to vector<32x64xbf16>
    %45 = arith.subf %44, %4 : vector<32x64xbf16>
    %cst_32 = arith.constant dense<0.000000e+00> : vector<32x64xf32>
    %46 = tpu.matmul %45, %0, %cst_32 {dimension_numbers = #tpu.dot_dimension_numbers<[1], [0], [0], [1], [0, 0, 1, 1], [], []>} : vector<32x64xbf16>, vector<64x64xbf16>, vector<32x64xf32> -> vector<32x64xf32>
    %47 = arith.addf %46, %7 : vector<32x64xf32>
    %cst_33 = arith.constant 2.000000e-01 : f32
    %48 = vector.broadcast %cst_33 : f32 to vector<32x64xf32>
    %49 = arith.mulf %48, %47 : vector<32x64xf32>
    %50 = arith.maximumf %47, %49 : vector<32x64xf32>
    %51 = arith.maximumf %42, %50 : vector<32x64xf32>
    %c0_34 = arith.constant 0 : index
    %c5 = arith.constant 5 : index
    %c0_35 = arith.constant 0 : index
    %c0_36 = arith.constant 0 : index
    %52 = vector.load %arg3[%c0_34, %c5, %c0_35, %c0_36] : memref<1x8x32x64xbf16, #tpu.memory_space<vmem>>, vector<1x1x32x64xbf16>
    %53 = vector.shape_cast %52 : vector<1x1x32x64xbf16> to vector<32x64xbf16>
    %54 = arith.subf %53, %4 : vector<32x64xbf16>
    %cst_37 = arith.constant dense<0.000000e+00> : vector<32x64xf32>
    %55 = tpu.matmul %54, %0, %cst_37 {dimension_numbers = #tpu.dot_dimension_numbers<[1], [0], [0], [1], [0, 0, 1, 1], [], []>} : vector<32x64xbf16>, vector<64x64xbf16>, vector<32x64xf32> -> vector<32x64xf32>
    %56 = arith.addf %55, %7 : vector<32x64xf32>
    %cst_38 = arith.constant 2.000000e-01 : f32
    %57 = vector.broadcast %cst_38 : f32 to vector<32x64xf32>
    %58 = arith.mulf %57, %56 : vector<32x64xf32>
    %59 = arith.maximumf %56, %58 : vector<32x64xf32>
    %60 = arith.maximumf %51, %59 : vector<32x64xf32>
    %c0_39 = arith.constant 0 : index
    %c6 = arith.constant 6 : index
    %c0_40 = arith.constant 0 : index
    %c0_41 = arith.constant 0 : index
    %61 = vector.load %arg3[%c0_39, %c6, %c0_40, %c0_41] : memref<1x8x32x64xbf16, #tpu.memory_space<vmem>>, vector<1x1x32x64xbf16>
    %62 = vector.shape_cast %61 : vector<1x1x32x64xbf16> to vector<32x64xbf16>
    %63 = arith.subf %62, %4 : vector<32x64xbf16>
    %cst_42 = arith.constant dense<0.000000e+00> : vector<32x64xf32>
    %64 = tpu.matmul %63, %0, %cst_42 {dimension_numbers = #tpu.dot_dimension_numbers<[1], [0], [0], [1], [0, 0, 1, 1], [], []>} : vector<32x64xbf16>, vector<64x64xbf16>, vector<32x64xf32> -> vector<32x64xf32>
    %65 = arith.addf %64, %7 : vector<32x64xf32>
    %cst_43 = arith.constant 2.000000e-01 : f32
    %66 = vector.broadcast %cst_43 : f32 to vector<32x64xf32>
    %67 = arith.mulf %66, %65 : vector<32x64xf32>
    %68 = arith.maximumf %65, %67 : vector<32x64xf32>
    %69 = arith.maximumf %60, %68 : vector<32x64xf32>
    %c0_44 = arith.constant 0 : index
    %c7 = arith.constant 7 : index
    %c0_45 = arith.constant 0 : index
    %c0_46 = arith.constant 0 : index
    %70 = vector.load %arg3[%c0_44, %c7, %c0_45, %c0_46] : memref<1x8x32x64xbf16, #tpu.memory_space<vmem>>, vector<1x1x32x64xbf16>
    %71 = vector.shape_cast %70 : vector<1x1x32x64xbf16> to vector<32x64xbf16>
    %72 = arith.subf %71, %4 : vector<32x64xbf16>
    %cst_47 = arith.constant dense<0.000000e+00> : vector<32x64xf32>
    %73 = tpu.matmul %72, %0, %cst_47 {dimension_numbers = #tpu.dot_dimension_numbers<[1], [0], [0], [1], [0, 0, 1, 1], [], []>} : vector<32x64xbf16>, vector<64x64xbf16>, vector<32x64xf32> -> vector<32x64xf32>
    %74 = arith.addf %73, %7 : vector<32x64xf32>
    %cst_48 = arith.constant 2.000000e-01 : f32
    %75 = vector.broadcast %cst_48 : f32 to vector<32x64xf32>
    %76 = arith.mulf %75, %74 : vector<32x64xf32>
    %77 = arith.maximumf %74, %76 : vector<32x64xf32>
    %78 = arith.maximumf %69, %77 : vector<32x64xf32>
    %79 = arith.truncf %78 : vector<32x64xf32> to vector<32x64xbf16>
    %c0_49 = arith.constant 0 : index
    %c0_50 = arith.constant 0 : index
    %c0_51 = arith.constant 0 : index
    %80 = vector.load %arg4[%c0_49, %c0_50, %c0_51] : memref<1x32x64xbf16, #tpu.memory_space<vmem>>, vector<1x32x64xbf16>
    %81 = vector.shape_cast %80 : vector<1x32x64xbf16> to vector<32x64xbf16>
    %c0_52 = arith.constant 0 : index
    %c0_53 = arith.constant 0 : index
    %c0_54 = arith.constant 0 : index
    %82 = vector.load %arg8[%c0_52, %c0_53, %c0_54] : memref<1x32x192xbf16, #tpu.memory_space<vmem>>, vector<1x32x64xbf16>
    %83 = vector.shape_cast %82 : vector<1x32x64xbf16> to vector<32x64xbf16>
    %84 = vector.shape_cast %81 : vector<32x64xbf16> to vector<1x32x64xbf16>
    tpu.vector_store %arg8[%c0_52, %c0_53, %c0_54], %84 {strides = array<i32>} : memref<1x32x192xbf16, #tpu.memory_space<vmem>>, vector<1x32x64xbf16>,
    %c0_55 = arith.constant 0 : index
    %c0_56 = arith.constant 0 : index
    %c64 = arith.constant 64 : index
    %85 = vector.load %arg8[%c0_55, %c0_56, %c64] : memref<1x32x192xbf16, #tpu.memory_space<vmem>>, vector<1x32x64xbf16>
    %86 = vector.shape_cast %85 : vector<1x32x64xbf16> to vector<32x64xbf16>
    %87 = vector.shape_cast %4 : vector<32x64xbf16> to vector<1x32x64xbf16>
    tpu.vector_store %arg8[%c0_55, %c0_56, %c64], %87 {strides = array<i32>} : memref<1x32x192xbf16, #tpu.memory_space<vmem>>, vector<1x32x64xbf16>,
    %c0_57 = arith.constant 0 : index
    %c0_58 = arith.constant 0 : index
    %c128 = arith.constant 128 : index
    %88 = vector.load %arg8[%c0_57, %c0_58, %c128] : memref<1x32x192xbf16, #tpu.memory_space<vmem>>, vector<1x32x64xbf16>
    %89 = vector.shape_cast %88 : vector<1x32x64xbf16> to vector<32x64xbf16>
    %90 = vector.shape_cast %79 : vector<32x64xbf16> to vector<1x32x64xbf16>
    tpu.vector_store %arg8[%c0_57, %c0_58, %c128], %90 {strides = array<i32>} : memref<1x32x192xbf16, #tpu.memory_space<vmem>>, vector<1x32x64xbf16>,
    return
  }
  func.func @transform_0(%arg0: i32, %arg1: i32) -> (i32, i32, i32) {
    %c0_i32 = arith.constant 0 : i32
    %c0_i32_0 = arith.constant 0 : i32
    return %arg0, %arg1, %c0_i32 : i32, i32, i32
  }
  func.func @transform_1(%arg0: i32, %arg1: i32) -> (i32, i32, i32, i32) {
    %c0_i32 = arith.constant 0 : i32
    %c0_i32_0 = arith.constant 0 : i32
    %c0_i32_1 = arith.constant 0 : i32
    return %arg0, %c0_i32, %arg1, %c0_i32_0 : i32, i32, i32, i32
  }
  func.func @transform_2(%arg0: i32, %arg1: i32) -> (i32, i32, i32) {
    %c0_i32 = arith.constant 0 : i32
    %c0_i32_0 = arith.constant 0 : i32
    return %arg0, %arg1, %c0_i32 : i32, i32, i32
  }
  func.func @transform_3(%arg0: i32, %arg1: i32) -> (i32, i32) {
    %c0_i32 = arith.constant 0 : i32
    %c0_i32_0 = arith.constant 0 : i32
    %c0_i32_1 = arith.constant 0 : i32
    return %c0_i32, %c0_i32_0 : i32, i32
  }
  func.func @transform_4(%arg0: i32, %arg1: i32) -> (i32, i32) {
    %c0_i32 = arith.constant 0 : i32
    %c0_i32_0 = arith.constant 0 : i32
    %c0_i32_1 = arith.constant 0 : i32
    return %c0_i32, %c0_i32_0 : i32, i32
  }
  func.func @transform_5(%arg0: i32, %arg1: i32) -> (i32, i32) {
    %c0_i32 = arith.constant 0 : i32
    %c0_i32_0 = arith.constant 0 : i32
    %c0_i32_1 = arith.constant 0 : i32
    return %c0_i32, %c0_i32_0 : i32, i32
  }
  func.func @transform_6(%arg0: i32, %arg1: i32) -> (i32, i32, i32) {
    %c0_i32 = arith.constant 0 : i32
    %c0_i32_0 = arith.constant 0 : i32
    return %arg0, %arg1, %c0_i32 : i32, i32, i32
  }
}

module attributes {stable_mosaic.version = 11 : i64} {
  func.func @_conv_max_pts_kernel(%arg0: i32, %arg1: i32, %arg2: i32, %arg3: memref<1x32x192xbf16, #tpu.memory_space<vmem>>, %arg4: memref<192x512xbf16, #tpu.memory_space<vmem>>, %arg5: memref<1x512xf32, #tpu.memory_space<vmem>>, %arg6: memref<1x1x512xf32, #tpu.memory_space<vmem>>) attributes {dimension_semantics = [#tpu.dimension_semantics<parallel>, #tpu.dimension_semantics<parallel>, #tpu.dimension_semantics<arbitrary>], iteration_bounds = array<i64: 2, 2, 1>, scalar_prefetch = 0 : i64, scratch_operands = 0 : i64, tpu.core_type = #tpu.core_type<tc>, window_params = [{transform_indices = @transform_0, window_bounds = array<i64: 1, 32, 192>}, {transform_indices = @transform_1, window_bounds = array<i64: 192, 512>}, {transform_indices = @transform_2, window_bounds = array<i64: 1, 512>}, {transform_indices = @transform_3, window_bounds = array<i64: 1, 1, 512>}]} {
    %c0 = arith.constant 0 : index
    %c0_0 = arith.constant 0 : index
    %0 = vector.load %arg4[%c0, %c0_0] : memref<192x512xbf16, #tpu.memory_space<vmem>>, vector<192x512xbf16>
    %c0_1 = arith.constant 0 : index
    %c0_2 = arith.constant 0 : index
    %1 = vector.load %arg5[%c0_1, %c0_2] : memref<1x512xf32, #tpu.memory_space<vmem>>, vector<1x512xf32>
    %c0_3 = arith.constant 0 : index
    %c0_4 = arith.constant 0 : index
    %c0_5 = arith.constant 0 : index
    %2 = vector.load %arg3[%c0_3, %c0_4, %c0_5] : memref<1x32x192xbf16, #tpu.memory_space<vmem>>, vector<1x32x192xbf16>
    %3 = vector.shape_cast %2 : vector<1x32x192xbf16> to vector<32x192xbf16>
    %cst = arith.constant dense<0.000000e+00> : vector<32x512xf32>
    %4 = tpu.matmul %3, %0, %cst {dimension_numbers = #tpu.dot_dimension_numbers<[1], [0], [0], [1], [0, 0, 1, 1], [], []>} : vector<32x192xbf16>, vector<192x512xbf16>, vector<32x512xf32> -> vector<32x512xf32>
    %5 = vector.broadcast %1 : vector<1x512xf32> to vector<32x512xf32>
    %6 = arith.addf %4, %5 : vector<32x512xf32>
    %cst_6 = arith.constant 2.000000e-01 : f32
    %7 = vector.broadcast %cst_6 : f32 to vector<32x512xf32>
    %8 = arith.mulf %7, %6 : vector<32x512xf32>
    %9 = arith.maximumf %6, %8 : vector<32x512xf32>
    %cst_7 = arith.constant dense<0xFF800000> : vector<512xf32>
    %10 = vector.multi_reduction <maximumf>, %9, %cst_7 [0] : vector<32x512xf32> to vector<512xf32>
    %11 = vector.shape_cast %10 : vector<512xf32> to vector<1x512xf32>
    %c0_i32 = arith.constant 0 : i32
    %12 = arith.cmpi eq, %arg2, %c0_i32 : i32
    %13 = arith.extui %12 : i1 to i32
    %c0_i32_8 = arith.constant 0 : i32
    %14 = arith.cmpi ne, %13, %c0_i32_8 : i32
    scf.if %14 {
      %c0_11 = arith.constant 0 : index
      %c0_12 = arith.constant 0 : index
      %c0_13 = arith.constant 0 : index
      %18 = vector.load %arg6[%c0_11, %c0_12, %c0_13] : memref<1x1x512xf32, #tpu.memory_space<vmem>>, vector<1x1x512xf32>
      %19 = vector.shape_cast %18 : vector<1x1x512xf32> to vector<1x512xf32>
      %20 = vector.shape_cast %11 : vector<1x512xf32> to vector<1x1x512xf32>
      tpu.vector_store %arg6[%c0_11, %c0_12, %c0_13], %20 {strides = array<i32>} : memref<1x1x512xf32, #tpu.memory_space<vmem>>, vector<1x1x512xf32>,
    } else {
    }
    %c0_i32_9 = arith.constant 0 : i32
    %15 = arith.cmpi ne, %arg2, %c0_i32_9 : i32
    %16 = arith.extui %15 : i1 to i32
    %c0_i32_10 = arith.constant 0 : i32
    %17 = arith.cmpi ne, %16, %c0_i32_10 : i32
    scf.if %17 {
      %c0_11 = arith.constant 0 : index
      %c0_12 = arith.constant 0 : index
      %c0_13 = arith.constant 0 : index
      %18 = vector.load %arg6[%c0_11, %c0_12, %c0_13] : memref<1x1x512xf32, #tpu.memory_space<vmem>>, vector<1x1x512xf32>
      %19 = vector.shape_cast %18 : vector<1x1x512xf32> to vector<1x512xf32>
      %20 = arith.maximumf %19, %11 : vector<1x512xf32>
      %c0_14 = arith.constant 0 : index
      %c0_15 = arith.constant 0 : index
      %c0_16 = arith.constant 0 : index
      %21 = vector.load %arg6[%c0_14, %c0_15, %c0_16] : memref<1x1x512xf32, #tpu.memory_space<vmem>>, vector<1x1x512xf32>
      %22 = vector.shape_cast %21 : vector<1x1x512xf32> to vector<1x512xf32>
      %23 = vector.shape_cast %20 : vector<1x512xf32> to vector<1x1x512xf32>
      tpu.vector_store %arg6[%c0_14, %c0_15, %c0_16], %23 {strides = array<i32>} : memref<1x1x512xf32, #tpu.memory_space<vmem>>, vector<1x1x512xf32>,
    } else {
    }
    return
  }
  func.func @transform_0(%arg0: i32, %arg1: i32, %arg2: i32) -> (i32, i32, i32) {
    %c0_i32 = arith.constant 0 : i32
    %c0_i32_0 = arith.constant 0 : i32
    return %arg0, %arg2, %c0_i32 : i32, i32, i32
  }
  func.func @transform_1(%arg0: i32, %arg1: i32, %arg2: i32) -> (i32, i32) {
    %c0_i32 = arith.constant 0 : i32
    %c0_i32_0 = arith.constant 0 : i32
    return %c0_i32, %arg1 : i32, i32
  }
  func.func @transform_2(%arg0: i32, %arg1: i32, %arg2: i32) -> (i32, i32) {
    %c0_i32 = arith.constant 0 : i32
    %c0_i32_0 = arith.constant 0 : i32
    return %c0_i32, %arg1 : i32, i32
  }
  func.func @transform_3(%arg0: i32, %arg1: i32, %arg2: i32) -> (i32, i32, i32) {
    %c0_i32 = arith.constant 0 : i32
    %c0_i32_0 = arith.constant 0 : i32
    return %arg0, %c0_i32, %arg1 : i32, i32, i32
  }
}

module attributes {stable_mosaic.version = 11 : i64} {
  func.func @_seg_head_kernel(%arg0: i32, %arg1: i32, %arg2: memref<1x32x192xbf16, #tpu.memory_space<vmem>>, %arg3: memref<1x1x256xf32, #tpu.memory_space<vmem>>, %arg4: memref<192x256xbf16, #tpu.memory_space<vmem>>, %arg5: memref<256x256xbf16, #tpu.memory_space<vmem>>, %arg6: memref<1x256xf32, #tpu.memory_space<vmem>>, %arg7: memref<256x128xbf16, #tpu.memory_space<vmem>>, %arg8: memref<1x128xf32, #tpu.memory_space<vmem>>, %arg9: memref<128x128xbf16, #tpu.memory_space<vmem>>, %arg10: memref<1x32x128xbf16, #tpu.memory_space<vmem>>) attributes {dimension_semantics = [#tpu.dimension_semantics<parallel>, #tpu.dimension_semantics<parallel>], iteration_bounds = array<i64: 2, 1>, scalar_prefetch = 0 : i64, scratch_operands = 0 : i64, tpu.core_type = #tpu.core_type<tc>, window_params = [{transform_indices = @transform_0, window_bounds = array<i64: 1, 32, 192>}, {transform_indices = @transform_1, window_bounds = array<i64: 1, 1, 256>}, {pipeline_mode = #tpu.pipeline_mode<synchronous>, transform_indices = @transform_2, window_bounds = array<i64: 192, 256>}, {pipeline_mode = #tpu.pipeline_mode<synchronous>, transform_indices = @transform_3, window_bounds = array<i64: 256, 256>}, {pipeline_mode = #tpu.pipeline_mode<synchronous>, transform_indices = @transform_4, window_bounds = array<i64: 1, 256>}, {pipeline_mode = #tpu.pipeline_mode<synchronous>, transform_indices = @transform_5, window_bounds = array<i64: 256, 128>}, {pipeline_mode = #tpu.pipeline_mode<synchronous>, transform_indices = @transform_6, window_bounds = array<i64: 1, 128>}, {pipeline_mode = #tpu.pipeline_mode<synchronous>, transform_indices = @transform_7, window_bounds = array<i64: 128, 128>}, {transform_indices = @transform_8, window_bounds = array<i64: 1, 32, 128>}]} {
    %c0 = arith.constant 0 : index
    %c0_0 = arith.constant 0 : index
    %c0_1 = arith.constant 0 : index
    %0 = vector.load %arg2[%c0, %c0_0, %c0_1] : memref<1x32x192xbf16, #tpu.memory_space<vmem>>, vector<1x32x192xbf16>
    %1 = vector.shape_cast %0 : vector<1x32x192xbf16> to vector<32x192xbf16>
    %c0_2 = arith.constant 0 : index
    %c0_3 = arith.constant 0 : index
    %2 = vector.load %arg4[%c0_2, %c0_3] : memref<192x256xbf16, #tpu.memory_space<vmem>>, vector<192x256xbf16>
    %cst = arith.constant dense<0.000000e+00> : vector<32x256xf32>
    %3 = tpu.matmul %1, %2, %cst {dimension_numbers = #tpu.dot_dimension_numbers<[1], [0], [0], [1], [0, 0, 1, 1], [], []>} : vector<32x192xbf16>, vector<192x256xbf16>, vector<32x256xf32> -> vector<32x256xf32>
    %c0_4 = arith.constant 0 : index
    %c0_5 = arith.constant 0 : index
    %c0_6 = arith.constant 0 : index
    %4 = vector.load %arg3[%c0_4, %c0_5, %c0_6] : memref<1x1x256xf32, #tpu.memory_space<vmem>>, vector<1x1x256xf32>
    %5 = vector.shape_cast %4 : vector<1x1x256xf32> to vector<1x256xf32>
    %6 = vector.broadcast %5 : vector<1x256xf32> to vector<32x256xf32>
    %7 = arith.addf %3, %6 : vector<32x256xf32>
    %cst_7 = arith.constant 2.000000e-01 : f32
    %8 = vector.broadcast %cst_7 : f32 to vector<32x256xf32>
    %9 = arith.mulf %8, %7 : vector<32x256xf32>
    %10 = arith.maximumf %7, %9 : vector<32x256xf32>
    %11 = arith.truncf %10 : vector<32x256xf32> to vector<32x256xbf16>
    %c0_8 = arith.constant 0 : index
    %c0_9 = arith.constant 0 : index
    %12 = vector.load %arg5[%c0_8, %c0_9] : memref<256x256xbf16, #tpu.memory_space<vmem>>, vector<256x256xbf16>
    %cst_10 = arith.constant dense<0.000000e+00> : vector<32x256xf32>
    %13 = tpu.matmul %11, %12, %cst_10 {dimension_numbers = #tpu.dot_dimension_numbers<[1], [0], [0], [1], [0, 0, 1, 1], [], []>} : vector<32x256xbf16>, vector<256x256xbf16>, vector<32x256xf32> -> vector<32x256xf32>
    %c0_11 = arith.constant 0 : index
    %c0_12 = arith.constant 0 : index
    %14 = vector.load %arg6[%c0_11, %c0_12] : memref<1x256xf32, #tpu.memory_space<vmem>>, vector<1x256xf32>
    %15 = vector.broadcast %14 : vector<1x256xf32> to vector<32x256xf32>
    %16 = arith.addf %13, %15 : vector<32x256xf32>
    %cst_13 = arith.constant 2.000000e-01 : f32
    %17 = vector.broadcast %cst_13 : f32 to vector<32x256xf32>
    %18 = arith.mulf %17, %16 : vector<32x256xf32>
    %19 = arith.maximumf %16, %18 : vector<32x256xf32>
    %20 = arith.truncf %19 : vector<32x256xf32> to vector<32x256xbf16>
    %c0_14 = arith.constant 0 : index
    %c0_15 = arith.constant 0 : index
    %21 = vector.load %arg7[%c0_14, %c0_15] : memref<256x128xbf16, #tpu.memory_space<vmem>>, vector<256x128xbf16>
    %cst_16 = arith.constant dense<0.000000e+00> : vector<32x128xf32>
    %22 = tpu.matmul %20, %21, %cst_16 {dimension_numbers = #tpu.dot_dimension_numbers<[1], [0], [0], [1], [0, 0, 1, 1], [], []>} : vector<32x256xbf16>, vector<256x128xbf16>, vector<32x128xf32> -> vector<32x128xf32>
    %c0_17 = arith.constant 0 : index
    %c0_18 = arith.constant 0 : index
    %23 = vector.load %arg8[%c0_17, %c0_18] : memref<1x128xf32, #tpu.memory_space<vmem>>, vector<1x128xf32>
    %24 = vector.broadcast %23 : vector<1x128xf32> to vector<32x128xf32>
    %25 = arith.addf %22, %24 : vector<32x128xf32>
    %cst_19 = arith.constant 2.000000e-01 : f32
    %26 = vector.broadcast %cst_19 : f32 to vector<32x128xf32>
    %27 = arith.mulf %26, %25 : vector<32x128xf32>
    %28 = arith.maximumf %25, %27 : vector<32x128xf32>
    %29 = arith.truncf %28 : vector<32x128xf32> to vector<32x128xbf16>
    %c0_20 = arith.constant 0 : index
    %c0_21 = arith.constant 0 : index
    %30 = vector.load %arg9[%c0_20, %c0_21] : memref<128x128xbf16, #tpu.memory_space<vmem>>, vector<128x128xbf16>
    %cst_22 = arith.constant dense<0.000000e+00> : vector<32x128xf32>
    %31 = tpu.matmul %29, %30, %cst_22 {dimension_numbers = #tpu.dot_dimension_numbers<[1], [0], [0], [1], [0, 0, 1, 1], [], []>} : vector<32x128xbf16>, vector<128x128xbf16>, vector<32x128xf32> -> vector<32x128xf32>
    %32 = arith.truncf %31 : vector<32x128xf32> to vector<32x128xbf16>
    %c0_23 = arith.constant 0 : index
    %c0_24 = arith.constant 0 : index
    %c0_25 = arith.constant 0 : index
    %33 = vector.load %arg10[%c0_23, %c0_24, %c0_25] : memref<1x32x128xbf16, #tpu.memory_space<vmem>>, vector<1x32x128xbf16>
    %34 = vector.shape_cast %33 : vector<1x32x128xbf16> to vector<32x128xbf16>
    %35 = vector.shape_cast %32 : vector<32x128xbf16> to vector<1x32x128xbf16>
    tpu.vector_store %arg10[%c0_23, %c0_24, %c0_25], %35 {strides = array<i32>} : memref<1x32x128xbf16, #tpu.memory_space<vmem>>, vector<1x32x128xbf16>,
    return
  }
  func.func @transform_0(%arg0: i32, %arg1: i32) -> (i32, i32, i32) {
    %c0_i32 = arith.constant 0 : i32
    %c0_i32_0 = arith.constant 0 : i32
    return %arg0, %arg1, %c0_i32 : i32, i32, i32
  }
  func.func @transform_1(%arg0: i32, %arg1: i32) -> (i32, i32, i32) {
    %c0_i32 = arith.constant 0 : i32
    %c0_i32_0 = arith.constant 0 : i32
    %c0_i32_1 = arith.constant 0 : i32
    return %arg0, %c0_i32, %c0_i32_0 : i32, i32, i32
  }
  func.func @transform_2(%arg0: i32, %arg1: i32) -> (i32, i32) {
    %c0_i32 = arith.constant 0 : i32
    %c0_i32_0 = arith.constant 0 : i32
    %c0_i32_1 = arith.constant 0 : i32
    return %c0_i32, %c0_i32_0 : i32, i32
  }
  func.func @transform_3(%arg0: i32, %arg1: i32) -> (i32, i32) {
    %c0_i32 = arith.constant 0 : i32
    %c0_i32_0 = arith.constant 0 : i32
    %c0_i32_1 = arith.constant 0 : i32
    return %c0_i32, %c0_i32_0 : i32, i32
  }
  func.func @transform_4(%arg0: i32, %arg1: i32) -> (i32, i32) {
    %c0_i32 = arith.constant 0 : i32
    %c0_i32_0 = arith.constant 0 : i32
    %c0_i32_1 = arith.constant 0 : i32
    return %c0_i32, %c0_i32_0 : i32, i32
  }
  func.func @transform_5(%arg0: i32, %arg1: i32) -> (i32, i32) {
    %c0_i32 = arith.constant 0 : i32
    %c0_i32_0 = arith.constant 0 : i32
    %c0_i32_1 = arith.constant 0 : i32
    return %c0_i32, %c0_i32_0 : i32, i32
  }
  func.func @transform_6(%arg0: i32, %arg1: i32) -> (i32, i32) {
    %c0_i32 = arith.constant 0 : i32
    %c0_i32_0 = arith.constant 0 : i32
    %c0_i32_1 = arith.constant 0 : i32
    return %c0_i32, %c0_i32_0 : i32, i32
  }
  func.func @transform_7(%arg0: i32, %arg1: i32) -> (i32, i32) {
    %c0_i32 = arith.constant 0 : i32
    %c0_i32_0 = arith.constant 0 : i32
    %c0_i32_1 = arith.constant 0 : i32
    return %c0_i32, %c0_i32_0 : i32, i32
  }
  func.func @transform_8(%arg0: i32, %arg1: i32) -> (i32, i32, i32) {
    %c0_i32 = arith.constant 0 : i32
    %c0_i32_0 = arith.constant 0 : i32
    return %arg0, %arg1, %c0_i32 : i32, i32, i32
  }
}

</mosaic_0001>

<bundles_post_ra>
// kernel: dgcnn_forward.8
= control target key start
LH: loop header
LB: loop body
LE: loop exit
PB: predicated region body
PF: predicated region fallthrough
CT: control target
= control target key end

     0   :  { %8 = vsyncpa [#allocation4], 0  ;;  %s1519_s0 = inlined_call_operand.vmem [shape: bf16[2,32,128], index: 0, kind: input, shape index: {}]   ;;  %s1520_s1 = inlined_call_operand.vmem [shape: bf16[128,1024], index: 1, kind: input, shape index: {}]   ;;  %s1521_s2 = inlined_call_operand.hbm [shape: f32[1,1024], index: 2, kind: input, shape index: {}]   ;;  %s1522_s3 = inlined_call_operand.vmem [shape: f32[2,1,1024], index: 3, kind: output, shape index: {}]  }
   0x1   :  { %10 = vsyncpa [#allocation4 + $0x1], 0  ;;  %s1261_s12 = smov 0   ;;  %s1263_s13 = smov 0  }
   0x2   :  { %s1265_s14 = smov 0   ;;  %s1267_s15 = smov 0  }
   0x3   :  { %s1269_s16 = smov 0   ;;  %s1271_s17 = smov 0  }
   0x4   :  { %s1273_s18 = smov 0   ;;  %s1275_s19 = smov 0  }
   0x5 LB: > { %s968_s20 = sadd.s32 4294967295, %s1236_s19   ;;  %s31_s21 = sadd.s32 1, %s1228_s17  ;;  %s1236_s19 = sphi %s1275_s19, %s16_s19   ;;  %s1232_s18 = sphi %s1273_s18, %s1533_s18   ;;  %s1228_s17 = sphi %s1271_s17, %s1532_s17   ;;  %s1224_s16 = sphi %s1269_s16, %s1531_s16   ;;  %s1220_s15 = sphi %s1267_s15, %s1530_s15   ;;  %s1216_s14 = sphi %s1265_s14, %s1529_s14   ;;  %s1212_s13 = sphi %s1263_s13, %s1528_s13   ;;  %s1208_s12 = sphi %s1261_s12, %s1527_s12  }
   0x6   : > { %p33_p0 = scmp.ge.s32.totalorder %s31_s21, 2  ;;  %s35_s22 = sadd.s32 1, %s1232_s18 }
   0x7   : > { %s70_s23 = sadd.s32 1, %s1216_s14  ;;  %p77_p1 = scmp.ne.s32.totalorder %s1216_s14, %s1212_s13 }
   0x8   : > { %s1535_s21 = smov (%p33_p0, %s31_s21), 0  ;;  %s1537_s22 = smov (!%p33_p0, %s35_s22), %s1232_s18 }
   0x9   : > { %s67_s24 = ssub.s32 %s1228_s17, %s1535_s21  ;;  %p78_p2 = scmp.eq.s32.totalorder %s1236_s19, 0 }
   0xa   : > { %p37_p3 = scmp.ge.s32.totalorder %s1537_s22, 2  ;;  %p68_p4 = scmp.eq.s32.totalorder %s67_s24, 0 }
   0xb   : > { %p1311_p5 = por %p78_p2, %p77_p1  ;;  %p109_p6 = scmp.ne.s32.totalorder %s1212_s13, %s1208_s12 }
   0xc   : > { %s1539_s22 = smov (%p37_p3, %s1537_s22), 0  ;;  %p110_p7 = scmp.eq.s32.totalorder %s968_s20, 0 }
   0xd   : > { %s1319_s26 = scalar_select %p68_p4, %s1216_s14, %s70_s23  }
   0xe   : > { %p1321_p8 = por %p110_p7, %p109_p6  ;;  %p971_p9 = scmp.ge.s32.totalorder %s1236_s19, 4 }
  0x10   : > { %s1525_s27 = scalar_select %p1321_p8, 1, 0 }
  0x11   : > { %157 = sbr.rel (%p971_p9) target bundleno = 69 (0x45), region = 16 }
  0x18   : > { %173 = sbr.rel (!%p1311_p5) target bundleno = 44 (0x2c), region = 24  ;;  %s175_s28 = sand.u32 (%p1311_p5), 1, %s1216_s14  }
  0x19   : > { %s1021_s29 = sshll.u32 (%p1311_p5), %s1228_s17, 4  ;;  %s972_s30 = sshll.u32 (%p1311_p5), %s175_s28, 8 }
  0x1a   : > { %s1333_s6 = scalar_lea.vmem (%p1311_p5), %s1520_s1, %s1021_s29  ;;  %s1338_s7 = scalar_lea.vmem (%p1311_p5), [#allocation2], %s972_s30 }
  0x1b   : > { %v193_v0 = vld [vmem:[%s1333_s6] sm:$0xff] (%p1311_p5)  ;;  %v195_v1 = vld [vmem:[%s1333_s6 + $0x8] sm:$0xff] (%p1311_p5) }
  0x1c   : > { %v197_v2 = vld [vmem:[%s1333_s6 + $0x20] sm:$0xff] (%p1311_p5)  ;;  %194 = vst [vmem:[%s1338_s7] sm:$0xff] (%p1311_p5), %v193_v0  ;;  %196 = vst [vmem:[%s1338_s7 + $0x8] sm:$0xff] (%p1311_p5), %v195_v1  ;;  %v199_v3 = vld [vmem:[%s1333_s6 + $0x28] sm:$0xff] (%p1311_p5) }
  0x1d   : > { %198 = vst [vmem:[%s1338_s7 + $0x10] sm:$0xff] (%p1311_p5), %v197_v2  ;;  %v201_v4 = vld [vmem:[%s1333_s6 + $0x40] sm:$0xff] (%p1311_p5)  ;;  %v203_v5 = vld [vmem:[%s1333_s6 + $0x48] sm:$0xff] (%p1311_p5)  ;;  %200 = vst [vmem:[%s1338_s7 + $0x18] sm:$0xff] (%p1311_p5), %v199_v3 }
  0x1e   : > { %202 = vst [vmem:[%s1338_s7 + $0x20] sm:$0xff] (%p1311_p5), %v201_v4  ;;  %204 = vst [vmem:[%s1338_s7 + $0x28] sm:$0xff] (%p1311_p5), %v203_v5  ;;  %v205_v6 = vld [vmem:[%s1333_s6 + $0x60] sm:$0xff] (%p1311_p5)  ;;  %v207_v7 = vld [vmem:[%s1333_s6 + $0x68] sm:$0xff] (%p1311_p5) }
  0x1f   : > { %v209_v8 = vld [vmem:[%s1333_s6 + $0x80] sm:$0xff]  ;;  %206 = vst [vmem:[%s1338_s7 + $0x30] sm:$0xff] %v205_v6  ;;  %208 = vst [vmem:[%s1338_s7 + $0x38] sm:$0xff] %v207_v7  ;;  %v211_v9 = vld [vmem:[%s1333_s6 + $0x88] sm:$0xff] }
  0x20   : > { %210 = vst [vmem:[%s1338_s7 + $0x40] sm:$0xff] %v209_v8  ;;  %v213_v10 = vld [vmem:[%s1333_s6 + $0xa0] sm:$0xff]  ;;  %v215_v11 = vld [vmem:[%s1333_s6 + $0xa8] sm:$0xff]  ;;  %212 = vst [vmem:[%s1338_s7 + $0x48] sm:$0xff] %v211_v9 }
  0x21   : > { %214 = vst [vmem:[%s1338_s7 + $0x50] sm:$0xff] %v213_v10  ;;  %216 = vst [vmem:[%s1338_s7 + $0x58] sm:$0xff] %v215_v11  ;;  %v217_v12 = vld [vmem:[%s1333_s6 + $0xc0] sm:$0xff]  ;;  %v219_v13 = vld [vmem:[%s1333_s6 + $0xc8] sm:$0xff] }
  0x22   : > { %v221_v14 = vld [vmem:[%s1333_s6 + $0xe0] sm:$0xff]  ;;  %218 = vst [vmem:[%s1338_s7 + $0x60] sm:$0xff] %v217_v12  ;;  %220 = vst [vmem:[%s1338_s7 + $0x68] sm:$0xff] %v219_v13  ;;  %v223_v15 = vld [vmem:[%s1333_s6 + $0xe8] sm:$0xff] }
  0x23   : > { %222 = vst [vmem:[%s1338_s7 + $0x70] sm:$0xff] %v221_v14  ;;  %v225_v16 = vld [vmem:[%s1333_s6 + $0x100] sm:$0xff]  ;;  %v227_v17 = vld [vmem:[%s1333_s6 + $0x108] sm:$0xff]  ;;  %224 = vst [vmem:[%s1338_s7 + $0x78] sm:$0xff] %v223_v15 }
  0x24   : > { %226 = vst [vmem:[%s1338_s7 + $0x80] sm:$0xff] %v225_v16  ;;  %228 = vst [vmem:[%s1338_s7 + $0x88] sm:$0xff] %v227_v17  ;;  %v229_v18 = vld [vmem:[%s1333_s6 + $0x120] sm:$0xff]  ;;  %v231_v19 = vld [vmem:[%s1333_s6 + $0x128] sm:$0xff] }
  0x25   : > { %v233_v20 = vld [vmem:[%s1333_s6 + $0x140] sm:$0xff]  ;;  %230 = vst [vmem:[%s1338_s7 + $0x90] sm:$0xff] %v229_v18  ;;  %232 = vst [vmem:[%s1338_s7 + $0x98] sm:$0xff] %v231_v19  ;;  %v235_v21 = vld [vmem:[%s1333_s6 + $0x148] sm:$0xff] }
  0x26   : > { %234 = vst [vmem:[%s1338_s7 + $0xa0] sm:$0xff] %v233_v20  ;;  %v237_v22 = vld [vmem:[%s1333_s6 + $0x160] sm:$0xff]  ;;  %v239_v23 = vld [vmem:[%s1333_s6 + $0x168] sm:$0xff]  ;;  %236 = vst [vmem:[%s1338_s7 + $0xa8] sm:$0xff] %v235_v21 }
  0x27   : > { %238 = vst [vmem:[%s1338_s7 + $0xb0] sm:$0xff] %v237_v22  ;;  %240 = vst [vmem:[%s1338_s7 + $0xb8] sm:$0xff] %v239_v23  ;;  %v241_v24 = vld [vmem:[%s1333_s6 + $0x180] sm:$0xff]  ;;  %v243_v25 = vld [vmem:[%s1333_s6 + $0x188] sm:$0xff] }
  0x28   : > { %v245_v26 = vld [vmem:[%s1333_s6 + $0x1a0] sm:$0xff]  ;;  %242 = vst [vmem:[%s1338_s7 + $0xc0] sm:$0xff] %v241_v24  ;;  %244 = vst [vmem:[%s1338_s7 + $0xc8] sm:$0xff] %v243_v25  ;;  %v247_v27 = vld [vmem:[%s1333_s6 + $0x1a8] sm:$0xff] }
  0x29   : > { %246 = vst [vmem:[%s1338_s7 + $0xd0] sm:$0xff] %v245_v26  ;;  %v249_v28 = vld [vmem:[%s1333_s6 + $0x1c0] sm:$0xff]  ;;  %v251_v29 = vld [vmem:[%s1333_s6 + $0x1c8] sm:$0xff]  ;;  %248 = vst [vmem:[%s1338_s7 + $0xd8] sm:$0xff] %v247_v27 }
  0x2a   : > { %250 = vst [vmem:[%s1338_s7 + $0xe0] sm:$0xff] %v249_v28  ;;  %252 = vst [vmem:[%s1338_s7 + $0xe8] sm:$0xff] %v251_v29  ;;  %v253_v30 = vld [vmem:[%s1333_s6 + $0x1e0] sm:$0xff]  ;;  %v255_v31 = vld [vmem:[%s1333_s6 + $0x1e8] sm:$0xff] }
  0x2b   : > { %254 = vst [vmem:[%s1338_s7 + $0xf0] sm:$0xff] %v253_v30  ;;  %256 = vst [vmem:[%s1338_s7 + $0xf8] sm:$0xff] %v255_v31 }
  0x2c PF: > { %s263_s8 = sand.u32 1, %s1216_s14   ;;  %s1022_s9 = sshll.u32 %s1228_s17, 6 }
  0x2d   : > { %s975_s10 = sshll.u32 %s263_s8, 2  ;;  %s1406_s20 = scalar_lea.hbm %s1521_s2, %s1022_s9 }
  0x2e   : > { %s267_s23 = scalar_lea.vmem [#allocation3], %s975_s10  ;;  %s264_s28 = scalar_lea.sflag [#allocation4], %s263_s8 }
  0x2f   : > { %s275_s24 = sshll.u32 %s267_s23, 4  ;;  %s1142_s29 = scalar_lea.hbm %s1406_s20, 64  ;;  %s276_s24 = int_to_ptr.vmem [resolvable:$true] %s275_s24 }
  0x30   : > { %p1143_p10 = scmp.ne.s32.totalorder %s1406_s20, %s1142_s29  ;;  %s1146_s5 = scalar_lea.hbm %s1521_s2, 128 }
  0x31   : > { %p1147_p13 = scmp.lt.u32.totalorder %s1406_s20, %s1521_s2  ;;  %p1148_p0 = scmp.lt.u32.totalorder %s1146_s5, %s1142_s29 }
  0x32   : > { %p1144_p11 = pnand %p1143_p10, %p1311_p5  ;;  %p1150_p2 = scmp.lt.u32.totalorder %s1142_s29, %s1406_s20 }
  0x33   : > { %p1149_p1 = por %p1148_p0, %p1147_p13 }
  0x34   : > { %p1145_p12 = pneg %p1144_p11 }
  0x35   : > { %p1151_p3 = por %p1150_p2, %p1149_p1 }
  0x37   : > { %p1152_p4 = pnand %p1151_p3, %p1145_p12 }
  0x39   : > { %1155 = shalt.err (!%p1152_p4)
}
  0x3a   : > { %s1156_s8 = scalar_lea.vmem %s276_s24, 64  ;;  %s1238_s9 = smov [#allocation3]  }
  0x3b   : > { %p1157_p6 = scmp.ne.s32.totalorder %s276_s24, %s1156_s8  ;;  %s1160_s10 = sshll.u32 %s1238_s9, 4  ;;  %s1161_s10 = int_to_ptr.vmem [resolvable:$false] %s1160_s10 }
  0x3c   : > { %s1162_s11 = scalar_lea.vmem %s1161_s10, 128  ;;  %p1163_p10 = scmp.lt.s32.totalorder %s276_s24, %s1161_s10 }
  0x3d   : > { %p1158_p7 = pnand %p1157_p6, %p1311_p5  ;;  %p1164_p11 = scmp.lt.s32.totalorder %s1162_s11, %s1156_s8 }
  0x3f   : > { %p1159_p9 = pneg %p1158_p7  ;;  %p1165_p8 = por %p1164_p11, %p1163_p10 }
  0x41   : > { %p1166_p0 = pnand %p1165_p8, %p1159_p9 }
  0x43   : > { %1169 = shalt.err (!%p1166_p0)
}
  0x44   : > { %1024 = dma.hbm_to_vmem [thread:$0]  (%p1311_p5), %s1406_s20, 64, %s276_s24, %s264_s28  }
  0x45 PF: > { %p978_p12 = scmp.ge.s32.totalorder %s1236_s19, 1  ;;  %p280_p13 = scmp.lt.s32.totalorder %s1236_s19, 5 }
  0x47   : > { %p281_p1 = pnand %p978_p12, %p280_p13 }
  0x48   : > { %s287_s12 = sand.u32 (!%p281_p1), 1, %s1212_s13   ;;  %p1526_p8 = scmp.ne.s32.totalorder (!%p281_p1), %s1525_s27, 0 }
  0x49   : > { %284 = sbr.rel (%p281_p1) target bundleno = 367 (0x16f), region = 51  ;;  %s979_s23 = sshll.u32 (!%p281_p1), %s287_s12, 8 }
  0x4a   : > { %s980_s29 = sshll.u32 (!%p281_p1), %s287_s12, 2  ;;  %s1428_s30 = scalar_lea.vmem (!%p281_p1), [#allocation2], %s979_s23 }
  0x4b   : > { %s294_s4 = scalar_lea.sflag (!%p281_p1), [#allocation4], %s287_s12  ;;  %s1430_s5 = scalar_lea.vmem (!%p281_p1), [#allocation3], %s980_s29 }
  0x50   : > { %1203 = dma.done.wait (%p1526_p8), %s294_s4, 64  }
  0x51   : > { %1205 = vsyncadd (%p1526_p8), %s294_s4, 4294967232  ;;  %v1239_v32 = vmov 0   ;;  %v1092_v33 = vld [vmem:[%s1428_s30 + $0x4] ss:$16 sps:$4 sm:$0xff]   ;;  %v1094_v34 = vld [vmem:[%s1428_s30 + $0xc] ss:$16 sps:$4 sm:$0xff]   ;;  %v396_v3 = vlaneseq }
  0x52   : > { %620 = vmatprep.mubr.bf16.mxu0 %v1239_v32  ;;  %673 = vmatprep.mubr.bf16.mxu1 %v1239_v32  ;;  %v1096_v35 = vld [vmem:[%s1428_s30] ss:$16 sps:$4 sm:$0xff]   ;;  %v1097_v36 = vld [vmem:[%s1428_s30 + $0x8] ss:$16 sps:$4 sm:$0xff]   ;;  %v1098_v37 = vld [vmem:[%s1428_s30 + $0x24] ss:$16 sps:$4 sm:$0xff]  }
  0x53   : > { %588 = vmatprep.subr.bf16.mxu0 %v1092_v33  ;;  %641 = vmatprep.subr.bf16.mxu1 %v1094_v34  ;;  %v1100_v38 = vld [vmem:[%s1428_s30 + $0x2c] ss:$16 sps:$4 sm:$0xff]   ;;  %v1102_v39 = vld [vmem:[%s1428_s30 + $0x20] ss:$16 sps:$4 sm:$0xff]   ;;  %v1103_v40 = vld [vmem:[%s1428_s30 + $0x28] ss:$16 sps:$4 sm:$0xff]  }
  0x54   : > { %589 = vmatpush1.bf16.msra.mxu0 %v1096_v35  ;;  %642 = vmatpush1.bf16.msra.mxu1 %v1097_v36  ;;  %v1104_v41 = vld [vmem:[%s1428_s30 + $0x44] ss:$16 sps:$4 sm:$0xff]   ;;  %v1106_v42 = vld [vmem:[%s1428_s30 + $0x4c] ss:$16 sps:$4 sm:$0xff]   ;;  %v1108_v43 = vld [vmem:[%s1428_s30 + $0x40] ss:$16 sps:$4 sm:$0xff]  }
  0x55   : > { %590 = vmatprep.subr.bf16.mxu0 %v1098_v37  ;;  %643 = vmatprep.subr.bf16.mxu1 %v1100_v38  ;;  %v1109_v44 = vld [vmem:[%s1428_s30 + $0x48] ss:$16 sps:$4 sm:$0xff]   ;;  %v1110_v45 = vld [vmem:[%s1428_s30 + $0x64] ss:$16 sps:$4 sm:$0xff]   ;;  %v1112_v46 = vld [vmem:[%s1428_s30 + $0x6c] ss:$16 sps:$4 sm:$0xff]  }
  0x56   : > { %p337_p5 = scmp.lt.s32.totalorder %s1224_s16, 1  ;;  %v1114_v47 = vld [vmem:[%s1428_s30 + $0x60] ss:$16 sps:$4 sm:$0xff]   ;;  %v1115_v48 = vld [vmem:[%s1428_s30 + $0x68] ss:$16 sps:$4 sm:$0xff]   ;;  %v1481_v4 = vshrl.u32 %v396_v3, 7 }
  0x57   : > { %v1116_v49 = vld [vmem:[%s1428_s30 + $0x84] ss:$16 sps:$4 sm:$0xff]   ;;  %v1118_v50 = vld [vmem:[%s1428_s30 + $0x8c] ss:$16 sps:$4 sm:$0xff]   ;;  %v1120_v51 = vld [vmem:[%s1428_s30 + $0x80] ss:$16 sps:$4 sm:$0xff]  }
  0x58   : > { %591 = vmatpush1.bf16.msra.mxu0 %v1102_v39  ;;  %644 = vmatpush1.bf16.msra.mxu1 %v1103_v40  ;;  %s1541_s16 = smov (!%p337_p5, %s1224_s16), 1  ;;  %v1121_v52 = vld [vmem:[%s1428_s30 + $0x88] ss:$16 sps:$4 sm:$0xff]   ;;  %v1122_v53 = vld [vmem:[%s1428_s30 + $0xa4] ss:$16 sps:$4 sm:$0xff]   ;;  %v398_v5 = vsub.s32 0, %v1481_v4 }
  0x59   : > { %592 = vmatprep.subr.bf16.mxu0 %v1104_v41  ;;  %645 = vmatprep.subr.bf16.mxu1 %v1106_v42  ;;  %v1124_v54 = vld [vmem:[%s1428_s30 + $0xac] ss:$16 sps:$4 sm:$0xff]   ;;  %s1023_s25 = sshll.u32 %s1541_s16, 4  ;;  %v1126_v55 = vld [vmem:[%s1428_s30 + $0xa0] ss:$16 sps:$4 sm:$0xff]   ;;  %v406_v6 = vsub.s32 2, %v1481_v4 }
  0x5a   : > { %v1127_v56 = vld [vmem:[%s1428_s30 + $0xa8] ss:$16 sps:$4 sm:$0xff]   ;;  %v1128_v57 = vld [vmem:[%s1428_s30 + $0xc4] ss:$16 sps:$4 sm:$0xff]   ;;  %s344_s24 = scalar_lea.vmem %s1519_s0, %s1023_s25  ;;  %v1130_v58 = vld [vmem:[%s1428_s30 + $0xcc] ss:$16 sps:$4 sm:$0xff]  }
  0x5b   : > { %v1132_v59 = vld [vmem:[%s1428_s30 + $0xc0] ss:$16 sps:$4 sm:$0xff]   ;;  %v1133_v60 = vld [vmem:[%s1428_s30 + $0xc8] ss:$16 sps:$4 sm:$0xff]   ;;  %v1134_v61 = vld [vmem:[%s1428_s30 + $0xe4] ss:$16 sps:$4 sm:$0xff]  }
  0x5c   : > { %593 = vmatpush1.bf16.msra.mxu0 %v1108_v43  ;;  %646 = vmatpush1.bf16.msra.mxu1 %v1109_v44  ;;  %v1136_v62 = vld [vmem:[%s1428_s30 + $0xec] ss:$16 sps:$4 sm:$0xff]   ;;  %v1138_v63 = vld [vmem:[%s1428_s30 + $0xe0] ss:$16 sps:$4 sm:$0xff]   ;;  %v1139_v0 = vld [vmem:[%s1428_s30 + $0xe8] ss:$16 sps:$4 sm:$0xff]  }
  0x5d   : > { %594 = vmatprep.subr.bf16.mxu0 %v1110_v45  ;;  %647 = vmatprep.subr.bf16.mxu1 %v1112_v46  ;;  %v1140_v1 = vld [vmem:[%s344_s24] sm:$0xff]   ;;  %v1141_v2 = vld [vmem:[%s344_s24 + $0x8] sm:$0xff]   ;;  %v402_v8 = vsub.s32 1, %v1481_v4  ;;  %v410_v9 = vsub.s32 3, %v1481_v4  ;;  %s983_s28 = sshll.u32 %s1220_s15, 2  ;;  %s984_s15 = sshll.u32 %s1541_s16, 3 }
  0x5e   : > { %v390_v7 = vld [vmem:[%s1430_s5] sm:$0xf]  ;;  %p351_p2 = scmp.lt.s32.totalorder %s983_s28, 7  ;;  %vm797_vm0 = vcmp.lt.s32.totalorder %v396_v3, 512 }
  0x5f   : > { %v399_v10 = vrot.slane %v390_v7, %v398_v5  ;;  %v407_v11 = vrot.slane %v390_v7, %v406_v6  ;;  %v403_v12 = vrot.slane %v390_v7, %v402_v8  ;;  %v411_v13 = vrot.slane %v390_v7, %v410_v9 }
  0x60   : > { %595 = vmatpush1.bf16.msra.mxu0 %v1114_v47  ;;  %648 = vmatpush1.bf16.msra.mxu1 %v1115_v48  ;;  %s1543_s28 = smov (!%p351_p2, %s983_s28), 7 }
  0x61   : > { %596 = vmatprep.subr.bf16.mxu0 %v1116_v49  ;;  %649 = vmatprep.subr.bf16.mxu1 %v1118_v50  ;;  %s354_s6 = sadd.s32 %s984_s15, %s1543_s28 }
  0x62   : > { %s355_s9 = scalar_lea.vmem %s1522_s3, %s354_s6 }
  0x64   : > { %597 = vmatpush1.bf16.msra.mxu0 %v1120_v51  ;;  %650 = vmatpush1.bf16.msra.mxu1 %v1121_v52 }
  0x65   : > { %598 = vmatprep.subr.bf16.mxu0 %v1122_v53  ;;  %651 = vmatprep.subr.bf16.mxu1 %v1124_v54 }
  0x68   : > { %599 = vmatpush1.bf16.msra.mxu0 %v1126_v55  ;;  %652 = vmatpush1.bf16.msra.mxu1 %v1127_v56 }
  0x69   : > { %600 = vmatprep.subr.bf16.mxu0 %v1128_v57  ;;  %653 = vmatprep.subr.bf16.mxu1 %v1130_v58 }
  0x6c   : > { %601 = vmatpush1.bf16.msra.mxu0 %v1132_v59  ;;  %654 = vmatpush1.bf16.msra.mxu1 %v1133_v60 }
  0x6d   : > { %602 = vmatprep.subr.bf16.mxu0 %v1134_v61  ;;  %655 = vmatprep.subr.bf16.mxu1 %v1136_v62 }
  0x70   : > { %603 = vmatpush1.bf16.msra.mxu0 %v1138_v63  ;;  %656 = vmatpush1.bf16.msra.mxu1 %v1139_v0 }
  0x73   : > { %621 = vmatmul.mubr.bf16.vlgmr.msra.gmra.mrb[0].mxu0 %v1140_v1  ;;  %674 = vmatmul.mubr.bf16.vlgmr.msra.gmra.mrb[0].mxu1 %v1140_v1 }
  0x74   : > { %630 = vmatprep.mubr.bf16.mxu0 %v1239_v32  ;;  %683 = vmatprep.mubr.bf16.mxu1 %v1239_v32 }
  0x7b   : > { %631 = vmatmul.mubr.bf16.gmra.mrb[4].mxu0 %v1141_v2  ;;  %684 = vmatmul.mubr.bf16.gmra.mrb[4].mxu1 %v1141_v2 }
 0x146   : > { %v622_v14 = vpop.f32.mrb[0].mxu0  ;;  %v675_v15 = vpop.f32.mrb[0].mxu1 }
 0x147   : > { %v623_v16 = vadd.f32 %v622_v14, %v399_v10  ;;  %v676_v17 = vadd.f32 %v675_v15, %v407_v11  ;;  %v624_v18 = vpop.f32.mrb[1].mxu0  ;;  %v677_v19 = vpop.f32.mrb[1].mxu1 }
 0x148   : > { %v625_v20 = vadd.f32 %v624_v18, %v403_v12  ;;  %v678_v21 = vadd.f32 %v677_v19, %v411_v13  ;;  %v626_v22 = vpop.f32.mrb[2].mxu0  ;;  %v679_v23 = vpop.f32.mrb[2].mxu1 }
 0x149   : > { %v694_v24 = vmul.f32 0.2, %v623_v16  ;;  %v696_v25 = vmul.f32 0.2, %v676_v17  ;;  %v627_v26 = vadd.f32 %v626_v22, %v399_v10  ;;  %v680_v27 = vadd.f32 %v679_v23, %v407_v11  ;;  %v628_v28 = vpop.f32.mrb[3].mxu0  ;;  %v681_v29 = vpop.f32.mrb[3].mxu1 }
 0x14a   : > { %v695_v30 = vmul.f32 0.2, %v625_v20  ;;  %v697_v31 = vmul.f32 0.2, %v678_v21  ;;  %v629_v32 = vadd.f32 %v628_v28, %v403_v12  ;;  %v682_v33 = vadd.f32 %v681_v29, %v411_v13 }
 0x14b   : > { %v698_v34 = vmul.f32 0.2, %v627_v26  ;;  %v700_v35 = vmul.f32 0.2, %v680_v27  ;;  %v710_v38 = vmax.f32 %v623_v16, %v694_v24  ;;  %v712_v39 = vmax.f32 %v676_v17, %v696_v25 }
 0x14c   : > { %v699_v36 = vmul.f32 0.2, %v629_v32  ;;  %v701_v37 = vmul.f32 0.2, %v682_v33  ;;  %v711_v42 = vmax.f32 %v625_v20, %v695_v30  ;;  %v713_v43 = vmax.f32 %v678_v21, %v697_v31 }
 0x14d   : > { %v714_v40 = vmax.f32 %v627_v26, %v698_v34  ;;  %v716_v41 = vmax.f32 %v680_v27, %v700_v35  ;;  %v1240_v35 = vmov 1966171168  }
 0x14e   : > { %v715_v44 = vmax.f32 %v629_v32, %v699_v36  ;;  %v717_v45 = vmax.f32 %v682_v33, %v701_v37  ;;  %v632_v46 = vpop.f32.mrb[4].mxu0  ;;  %v685_v47 = vpop.f32.mrb[4].mxu1  ;;  %v773_v36 = vunpack.c.l.s4 %v1240_v35 }
 0x14f   : > { %v726_v48 = vmax.f32 %v710_v38, %v714_v40  ;;  %v744_v49 = vmax.f32 %v712_v39, %v716_v41  ;;  %v633_v50 = vadd.f32 %v632_v46, %v399_v10  ;;  %v686_v51 = vadd.f32 %v685_v47, %v407_v11  ;;  %v634_v52 = vpop.f32.mrb[5].mxu0  ;;  %v687_v53 = vpop.f32.mrb[5].mxu1 }
 0x150   : > { %v735_v54 = vmax.f32 %v711_v42, %v715_v44  ;;  %v753_v55 = vmax.f32 %v713_v43, %v717_v45  ;;  %v635_v56 = vadd.f32 %v634_v52, %v403_v12  ;;  %v688_v57 = vadd.f32 %v687_v53, %v411_v13  ;;  %v636_v58 = vpop.f32.mrb[6].mxu0  ;;  %v689_v59 = vpop.f32.mrb[6].mxu1 }
 0x151   : > { %v702_v60 = vmul.f32 0.2, %v633_v50  ;;  %v704_v61 = vmul.f32 0.2, %v686_v51  ;;  %v637_v62 = vadd.f32 %v636_v58, %v399_v10  ;;  %v690_v63 = vadd.f32 %v689_v59, %v407_v11  ;;  %v638_v0 = vpop.f32.mrb[7].mxu0  ;;  %v691_v1 = vpop.f32.mrb[7].mxu1 }
 0x152   : > { %v703_v2 = vmul.f32 0.2, %v635_v56  ;;  %v705_v5 = vmul.f32 0.2, %v688_v57  ;;  %v639_v6 = vadd.f32 %v638_v0, %v403_v12  ;;  %v692_v7 = vadd.f32 %v691_v1, %v411_v13 }
 0x153   : > { %v718_v8 = vmax.f32 %v633_v50, %v702_v60  ;;  %v720_v9 = vmax.f32 %v686_v51, %v704_v61  ;;  %v706_v14 = vmul.f32 0.2, %v637_v62  ;;  %v708_v15 = vmul.f32 0.2, %v690_v63 }
 0x154   : > { %v719_v16 = vmax.f32 %v635_v56, %v703_v2  ;;  %v721_v17 = vmax.f32 %v688_v57, %v705_v5  ;;  %v707_v18 = vmul.f32 0.2, %v639_v6  ;;  %v709_v19 = vmul.f32 0.2, %v692_v7 }
 0x155   : > { %v727_v20 = vmax.f32 %v726_v48, %v718_v8  ;;  %v745_v21 = vmax.f32 %v744_v49, %v720_v9  ;;  %v722_v22 = vmax.f32 %v637_v62, %v706_v14  ;;  %v724_v23 = vmax.f32 %v690_v63, %v708_v15 }
 0x156   : > { %v736_v10 = vmax.f32 %v735_v54, %v719_v16  ;;  %v754_v11 = vmax.f32 %v753_v55, %v721_v17  ;;  %v723_v24 = vmax.f32 %v639_v6, %v707_v18  ;;  %v725_v25 = vmax.f32 %v692_v7, %v709_v19 }
 0x157   : > { %v728_v26 = vmax.f32 %v727_v20, %v722_v22  ;;  %v746_v12 = vmax.f32 %v745_v21, %v724_v23  ;;  %v774_v45 = vunpack.c.0.s8 %v773_v36 }
 0x158   : > { %v737_v13 = vmax.f32 %v736_v10, %v723_v24  ;;  %v755_v27 = vmax.f32 %v754_v11, %v725_v25 }
 0x159   : > { %v729_v28 = vrot.slane %v728_v26, 4  ;;  %v747_v29 = vrot.slane %v746_v12, 4  ;;  %v777_v54 = vsub.s32 %v774_v45, %v1481_v4 }
 0x15a   : > { %v738_v30 = vrot.slane %v737_v13, 4  ;;  %v756_v31 = vrot.slane %v755_v27, 4 }
 0x15b   : > { %v730_v32 = vmax.f32 %v728_v26, %v729_v28  ;;  %v748_v33 = vmax.f32 %v746_v12, %v747_v29 }
 0x15c   : > { %v739_v34 = vmax.f32 %v737_v13, %v738_v30  ;;  %v757_v37 = vmax.f32 %v755_v27, %v756_v31 }
 0x15d   : > { %v731_v38 = vrot.slane %v730_v32, 2  ;;  %v749_v39 = vrot.slane %v748_v33, 2 }
 0x15e   : > { %v740_v40 = vrot.slane %v739_v34, 2  ;;  %v758_v41 = vrot.slane %v757_v37, 2 }
 0x15f   : > { %v732_v42 = vmax.f32 %v730_v32, %v731_v38  ;;  %v750_v43 = vmax.f32 %v748_v33, %v749_v39 }
 0x160   : > { %v741_v44 = vmax.f32 %v739_v34, %v740_v40  ;;  %v759_v46 = vmax.f32 %v757_v37, %v758_v41 }
 0x161   : > { %v733_v47 = vrot.slane %v732_v42, 1  ;;  %v751_v48 = vrot.slane %v750_v43, 1 }
 0x162   : > { %v742_v49 = vrot.slane %v741_v44, 1  ;;  %v760_v50 = vrot.slane %v759_v46, 1 }
 0x163   : > { %v734_v51 = vmax.f32 %v732_v42, %v733_v47  ;;  %v752_v52 = vmax.f32 %v750_v43, %v751_v48 }
 0x164   : > { %v743_v53 = vmax.f32 %v741_v44, %v742_v49  ;;  %v761_v55 = vmax.f32 %v759_v46, %v760_v50 }
 0x166   : > { %v770_v56 = vcombine.low %v734_v51, %v743_v53  ;;  %v771_v57 = vcombine.low %v752_v52, %v761_v55 }
 0x168   : > { %v778_v58 = vrot.slane %v770_v56, %v777_v54  ;;  %v785_v59 = vrot.slane %v771_v57, %v777_v54 }
 0x16a   : > { %v786_v60 = vcombine.low %v778_v58, %v785_v59 }
 0x16c   : > { %v793_v61 = vrot.slane %v786_v60, %v777_v54 }
 0x16e   : > { %799 = vst.msk [vmem:[%s355_s9] sm:$0xf] %vm797_vm0, %v793_v61 }
 0x16f PF: > { %s16_s19 = sadd.s32 1, %s1236_s19   ;;  %s1527_s12 = smov %s1212_s13 }
 0x170   : > { %p13_p3 = scmp.ge.s32.totalorder %s16_s19, 6   ;;  %s1528_s13 = smov %s1216_s14 }
 0x171   : > { %s1529_s14 = smov %s1319_s26  ;;  %s1530_s15 = smov %s1228_s17 }
 0x172   : > { %s1531_s16 = smov %s1232_s18  ;;  %s1532_s17 = smov %s1535_s21 }
 0x173   : > { %s1533_s18 = smov %s1539_s22  ;;  %15 = sbr.rel (!%p13_p3) target bundleno = 5 (0x5), region = 114 }
 0x17a   :  { %868 = vsyncpa [#allocation4], 1 }
 0x17b   :  { %870 = vsyncpa [#allocation4 + $0x1], 1 }

// kernel: dgcnn_forward.7
= control target key start
LH: loop header
LB: loop body
LE: loop exit
PB: predicated region body
PF: predicated region fallthrough
CT: control target
= control target key end

     0   :  { %12 = vsyncpa [#allocation3], 0  ;;  %s3077_s0 = inlined_call_operand.vmem [shape: bf16[2,32,3], index: 0, kind: input, shape index: {}]   ;;  %s3078_s1 = inlined_call_operand.vmem [shape: bf16[2,8,32,3], index: 1, kind: input, shape index: {}]   ;;  %s3079_s2 = inlined_call_operand.hbm [shape: bf16[3,64], index: 2, kind: input, shape index: {}]   ;;  %s3080_s3 = inlined_call_operand.hbm [shape: bf16[3,64], index: 3, kind: input, shape index: {}]   ;;  %s3081_s4 = inlined_call_operand.hbm [shape: f32[1,64], index: 4, kind: input, shape index: {}]   ;;  %s3082_s5 = inlined_call_operand.hbm [shape: bf16[64,128], index: 5, kind: input, shape index: {}]   ;;  %s3083_s6 = inlined_call_operand.hbm [shape: f32[1,128], index: 6, kind: input, shape index: {}]   ;;  %s3084_s7 = inlined_call_operand.vmem [shape: bf16[2,32,128], index: 7, kind: output, shape index: {}]  }
   0x1   :  { %13 = vsyncpa [#allocation5], 0 }
   0x2   :  { %14 = vsyncpa [#allocation8], 0  ;;  %s2591_s24 = smov 0   ;;  %s2593_s25 = smov 0  }
   0x3   :  { %s2595_s26 = smov 0  }
   0x4 LB: > { %s2543_s27 = smov [#allocation4]   ;;  %s1927_s29 = sadd.s32 4294967295, %s2541_s26   ;;  %s2541_s26 = sphi %s2595_s26, %s20_s26   ;;  %s2537_s25 = sphi %s2593_s25, %s3095_s25   ;;  %s2533_s24 = sphi %s2591_s24, %s3094_s24  }
   0x5   : > { %s250_s28 = sshll.u32 %s2543_s27, 4  ;;  %p1929_p0 = scmp.ge.s32.totalorder %s2541_s26, 1  ;;  %s251_s28 = int_to_ptr.vmem [resolvable:$true] %s250_s28 }
   0x6   : > { %p226_p1 = scmp.lt.s32.totalorder %s2541_s26, 3  ;;  %p2609_p2 = scmp.eq.s32.totalorder %s1927_s29, 0 }
   0x7   : > { %s2544_s9 = smov [#allocation7]   ;;  %s32_s12 = sadd.s32 1, %s2537_s25 }
   0x8   : > { %s3088_s30 = scalar_select %p2609_p2, 1, 0 }
   0x9   : > { %p2613_p3 = pnand %p1929_p0, %p226_p1  ;;  %s271_s10 = sshll.u32 %s2544_s9, 4  ;;  %s2619_s10 = int_to_ptr.vmem [resolvable:$true] %s271_s10 }
   0xa   : > { %s2367_s15 = scalar_lea.hbm %s3080_s3, 32 }
   0xb   : > { %s3089_s8 = scalar_select %p2613_p3, 1, 0 }
   0xc   : > { %p2303_p4 = pneg %p2613_p3  ;;  %p2368_p6 = scmp.ne.s32.totalorder %s3080_s3, %s2367_s15 }
   0xd   : > { %p2374_p10 = scmp.lt.u32.totalorder %s2367_s15, %s3080_s3 }
   0xe   : > { %p2623_p5 = pnand %p2609_p2, %p2303_p4 }
  0x10   : > { %p2636_p7 = pneg %p2623_p5 }
  0x12   : > { %p2370_p8 = pnand %p2636_p7, %p2368_p6 }
  0x14   : > { %p2371_p9 = pneg %p2370_p8 }
  0x16   : > { %p2376_p11 = pnand %p2374_p10, %p2371_p9 }
  0x18   : > { %2379 = shalt.err (!%p2376_p11)
}
  0x19   : > { %s2380_s21 = scalar_lea.vmem %s251_s28, 32  ;;  %p2388_p1 = scmp.lt.s32.totalorder %s251_s28, %s251_s28 }
  0x1a   : > { %p2381_p12 = scmp.ne.s32.totalorder %s251_s28, %s2380_s21  ;;  %p2389_p4 = scmp.lt.s32.totalorder %s2380_s21, %s2380_s21 }
  0x1c   : > { %p2383_p13 = pnand %p2381_p12, %p2636_p7  ;;  %p2390_p2 = por %p2389_p4, %p2388_p1 }
  0x1e   : > { %p2384_p0 = pneg %p2383_p13 }
  0x20   : > { %p2391_p3 = pnand %p2390_p2, %p2384_p0 }
  0x22   : > { %2394 = shalt.err (!%p2391_p3)
}
  0x23   : > { %2309 = dma.hbm_to_vmem [thread:$0]  (!%p2623_p5), %s3080_s3, 32, %s251_s28, [#allocation5]  }
  0x24   : > { %s2395_s9 = scalar_lea.hbm %s3082_s5, 512 }
  0x25   : > { %p2396_p6 = scmp.ne.s32.totalorder %s3082_s5, %s2395_s9  ;;  %p2402_p2 = scmp.lt.u32.totalorder %s2395_s9, %s3082_s5 }
  0x27   : > { %p2398_p8 = pnand %p2396_p6, %p2636_p7 }
  0x29   : > { %p2399_p9 = pneg %p2398_p8 }
  0x2b   : > { %p2404_p3 = pnand %p2402_p2, %p2399_p9 }
  0x2d   : > { %2407 = shalt.err (!%p2404_p3)
}
  0x2e   : > { %s2408_s28 = scalar_lea.vmem %s2619_s10, 512  ;;  %p2416_p13 = scmp.lt.s32.totalorder %s2619_s10, %s2619_s10 }
  0x2f   : > { %p2409_p10 = scmp.ne.s32.totalorder %s2619_s10, %s2408_s28  ;;  %p2417_p0 = scmp.lt.s32.totalorder %s2408_s28, %s2408_s28 }
  0x31   : > { %p2411_p11 = pnand %p2409_p10, %p2636_p7  ;;  %p2418_p1 = por %p2417_p0, %p2416_p13 }
  0x33   : > { %p2412_p12 = pneg %p2411_p11 }
  0x35   : > { %p2419_p4 = pnand %p2418_p1, %p2412_p12 }
  0x37   : > { %2422 = shalt.err (!%p2419_p4)
}
  0x38   : > { %s2545_s17 = smov 64   ;;  %s2546_s19 = smov 4  }
  0x39   : > { %2315 = dma.hbm_to_vmem [thread:$0]  (!%p2623_p5), %s3082_s5, 512, %s2619_s10, [#allocation8], %s2545_s17, %s2545_s17, %s2546_s19  }
  0x3a   : > { %p34_p6 = scmp.ge.s32.totalorder %s32_s12, 2  ;;  %s2547_s22 = smov [#allocation2]  }
  0x3b   : > { %s239_s23 = sshll.u32 %s2547_s22, 4  ;;  %s2548_s27 = smov [#allocation6]   ;;  %s240_s23 = int_to_ptr.vmem [resolvable:$true] %s239_s23 }
  0x3c   : > { %s3097_s12 = smov (%p34_p6, %s32_s12), 0  ;;  %s261_s29 = sshll.u32 %s2548_s27, 4  ;;  %s262_s29 = int_to_ptr.vmem [resolvable:$true] %s261_s29 }
  0x3d   : > { %s2423_s14 = scalar_lea.hbm %s3079_s2, 32 }
  0x3e   : > { %p2424_p8 = scmp.ne.s32.totalorder %s3079_s2, %s2423_s14  ;;  %p2430_p3 = scmp.lt.u32.totalorder %s2423_s14, %s3079_s2 }
  0x40   : > { %p2426_p9 = pnand %p2424_p8, %p2636_p7 }
  0x42   : > { %p2427_p2 = pneg %p2426_p9 }
  0x44   : > { %p2432_p10 = pnand %p2430_p3, %p2427_p2 }
  0x46   : > { %2435 = shalt.err (!%p2432_p10)
}
  0x47   : > { %s2436_s17 = scalar_lea.vmem %s240_s23, 32  ;;  %p2444_p0 = scmp.lt.s32.totalorder %s240_s23, %s240_s23 }
  0x48   : > { %p2437_p11 = scmp.ne.s32.totalorder %s240_s23, %s2436_s17  ;;  %p2445_p1 = scmp.lt.s32.totalorder %s2436_s17, %s2436_s17 }
  0x4a   : > { %p2439_p12 = pnand %p2437_p11, %p2636_p7  ;;  %p2446_p4 = por %p2445_p1, %p2444_p0 }
  0x4c   : > { %p2440_p13 = pneg %p2439_p12 }
  0x4e   : > { %p2447_p6 = pnand %p2446_p4, %p2440_p13 }
  0x50   : > { %2450 = shalt.err (!%p2447_p6)
}
  0x51   : > { %2306 = dma.hbm_to_vmem [thread:$0]  (!%p2623_p5), %s3079_s2, 32, %s240_s23, [#allocation3]  }
  0x52   : > { %s2451_s27 = scalar_lea.hbm %s3081_s4, 16 }
  0x53   : > { %p2452_p8 = scmp.ne.s32.totalorder %s3081_s4, %s2451_s27  ;;  %p2458_p3 = scmp.lt.u32.totalorder %s2451_s27, %s3081_s4 }
  0x55   : > { %p2454_p9 = pnand %p2452_p8, %p2636_p7 }
  0x57   : > { %p2455_p2 = pneg %p2454_p9 }
  0x59   : > { %p2460_p10 = pnand %p2458_p3, %p2455_p2 }
  0x5b   : > { %2463 = shalt.err (!%p2460_p10)
}
  0x5c   : > { %s2464_s16 = scalar_lea.vmem %s262_s29, 16  ;;  %s2471_s23 = scalar_lea.vmem %s262_s29, 32 }
  0x5d   : > { %p2465_p11 = scmp.ne.s32.totalorder %s262_s29, %s2464_s16  ;;  %p2472_p0 = scmp.lt.s32.totalorder %s262_s29, %s262_s29 }
  0x5e   : > { %p2473_p1 = scmp.lt.s32.totalorder %s2471_s23, %s2464_s16 }
  0x5f   : > { %p2467_p12 = pnand %p2465_p11, %p2636_p7 }
  0x60   : > { %p2474_p4 = por %p2473_p1, %p2472_p0 }
  0x61   : > { %p2468_p13 = pneg %p2467_p12 }
  0x63   : > { %p2475_p6 = pnand %p2474_p4, %p2468_p13 }
  0x65   : > { %2478 = shalt.err (!%p2475_p6)
}
  0x66   : > { %2312 = dma.hbm_to_vmem [thread:$0]  (!%p2623_p5), %s3081_s4, 16, %s262_s29, [#allocation5]  }
  0x67   : > { %s2549_s17 = smov [#allocation9]   ;;  %s2479_s22 = scalar_lea.hbm %s3083_s6, 16 }
  0x68   : > { %s285_s19 = sshll.u32 %s2549_s17, 4  ;;  %p2480_p8 = scmp.ne.s32.totalorder %s3083_s6, %s2479_s22  ;;  %s286_s19 = int_to_ptr.vmem [resolvable:$true] %s285_s19 }
  0x69   : > { %p2486_p3 = scmp.lt.u32.totalorder %s2479_s22, %s3083_s6 }
  0x6a   : > { %p2482_p9 = pnand %p2480_p8, %p2636_p7 }
  0x6c   : > { %p2483_p2 = pneg %p2482_p9 }
  0x6e   : > { %p2488_p10 = pnand %p2486_p3, %p2483_p2 }
  0x70   : > { %2491 = shalt.err (!%p2488_p10)
}
  0x71   : > { %s2492_s29 = scalar_lea.vmem %s286_s19, 16  ;;  %s2499_s15 = scalar_lea.vmem %s286_s19, 32 }
  0x72   : > { %p2493_p11 = scmp.ne.s32.totalorder %s286_s19, %s2492_s29  ;;  %p2500_p0 = scmp.lt.s32.totalorder %s286_s19, %s286_s19 }
  0x73   : > { %p2501_p1 = scmp.lt.s32.totalorder %s2499_s15, %s2492_s29 }
  0x74   : > { %p2495_p12 = pnand %p2493_p11, %p2636_p7 }
  0x75   : > { %p2502_p4 = por %p2501_p1, %p2500_p0 }
  0x76   : > { %p2496_p13 = pneg %p2495_p12 }
  0x78   : > { %p2503_p6 = pnand %p2502_p4, %p2496_p13 }
  0x7a   : > { %2506 = shalt.err (!%p2503_p6)
}
  0x7b   : > { %2318 = dma.hbm_to_vmem [thread:$0]  (!%p2623_p5), %s3083_s6, 16, %s286_s19, [#allocation8]  }
  0x7c   : > { %p3092_p8 = scmp.ne.s32.totalorder %s3089_s8, 0 }
  0x7d   : > { %p3093_p9 = scmp.ne.s32.totalorder (!%p3092_p8), %s3088_s30, 0 }
  0x7e   : > { %324 = sbr.rel (%p3092_p8) target bundleno = 1304 (0x518), region = 48 }
  0x85   : > { %2520 = dma.done.wait (%p3093_p9), [#allocation3], 32  }
  0x86   : > { %2522 = vsyncadd (%p3093_p9), [#allocation3], 4294967264 }
  0x87   : > { %2524 = dma.done.wait (%p3093_p9), [#allocation5], 48  }
  0x88   : > { %2526 = vsyncadd (%p3093_p9), [#allocation5], 4294967248 }
  0x89   : > { %2528 = dma.done.wait (%p3093_p9), [#allocation8], 528  }
  0x8a   : > { %2530 = vsyncadd (%p3093_p9), [#allocation8], 4294966768  ;;  %vm459_vm0 = vcmask 1040384   ;;  %p390_p5 = scmp.lt.s32.totalorder %s2533_s24, 1  ;;  %vm460_vm1 = vcmask 1041408   ;;  %v2550_v0 = vmov 65535  }
  0x8b   : > { %v461_v1 = vsel %vm459_vm0, 4294967295, %v2550_v0  ;;  %vm452_vm2 = vcmask 23552   ;;  %v420_v3 = vld [vmem:[#allocation2] sm:$0x3]  ;;  %v421_v4 = vld [vmem:[#allocation4] sm:$0x3] }
  0x8c   : > { %s3099_s24 = smov (!%p390_p5, %s2533_s24), 1  ;;  %v462_v2 = vsel %vm460_vm1, %v461_v1, 0  ;;  %v2797_v28 = vld [vmem:[#allocation7] sm:$0xff]   ;;  %v2811_v34 = vld [vmem:[#allocation7 + $0x8] sm:$0xff]   ;;  %v2817_v35 = vld [vmem:[#allocation7 + $0x10] sm:$0xff]   ;;  %vm631_vm3 = vcmask 523264  }
  0x8d   : > { %s2040_s8 = sshll.u32 %s3099_s24, 4  ;;  %s2041_s11 = sshll.u32 %s3099_s24, 7  ;;  %v464_v6 = vand.u32 %v462_v2, %v421_v4  ;;  %v2767_v7 = vand.u32 %v462_v2, %v420_v3  ;;  %v2823_v36 = vld [vmem:[#allocation7 + $0x18] sm:$0xff]  }
  0x8e   : > { %s397_s30 = scalar_lea.vmem %s3077_s0, %s2040_s8  ;;  %s2763_s19 = scalar_lea.vmem %s3078_s1, %s2041_s11  ;;  %v1948_v37 = vld [vmem:[#allocation6] ss:$0 sm:$0xff] }
  0x8f   : > { %v2765_v5 = vld [vmem:[%s397_s30] sm:$0xf]  ;;  %v2769_v8 = vld [vmem:[%s397_s30 + $0x4] sm:$0xf]  ;;  %v2777_v14 = vld [vmem:[%s397_s30 + $0x8] sm:$0xf]  ;;  %2133 = vmatprep.subr.bf16.mxu0 %v464_v6  ;;  %2139 = vmatprep.subr.bf16.mxu1 %v2767_v7  ;;  %s417_s22 = scalar_lea.vmem %s3084_s7, %s2040_s8 }
  0x90   : > { %v515_v9 = vld [vmem:[%s2763_s19] sm:$0xf]  ;;  %v516_v10 = vld [vmem:[%s2763_s19 + $0x4] sm:$0xf]  ;;  %v1949_v11 = vcombine.low %v2765_v5, %v2769_v8  ;;  %v2779_v15 = vld [vmem:[%s397_s30 + $0xc] sm:$0xf]  ;;  %2134 = vmatpush3.bf16.msra.mxu0 %v464_v6  ;;  %2140 = vmatpush3.bf16.msra.mxu1 %v2767_v7 }
  0x91   : > { %v519_v12 = vsub.bf16 %v515_v9, %v2765_v5  ;;  %v520_v13 = vsub.bf16 %v516_v10, %v2769_v8  ;;  %v517_v16 = vld [vmem:[%s2763_s19 + $0x8] sm:$0xf]  ;;  %v1950_v17 = vcombine.low %v2777_v14, %v2779_v15  ;;  %v518_v18 = vld [vmem:[%s2763_s19 + $0xc] sm:$0xf]  ;;  %v1964_v20 = vld [vmem:[%s2763_s19 + $0x10] sm:$0xf]  ;;  %2157 = vmatprep.subr.bf16.mxu1 %v2767_v7  ;;  %2145 = vmatprep.subr.bf16.mxu0 %v2797_v28 }
  0x92   : > { %v521_v19 = vsub.bf16 %v517_v16, %v2777_v14  ;;  %v1965_v21 = vld [vmem:[%s2763_s19 + $0x14] sm:$0xf]  ;;  %v522_v23 = vsub.bf16 %v518_v18, %v2779_v15  ;;  %v700_v24 = vsub.bf16 %v1964_v20, %v2765_v5  ;;  %v1966_v25 = vld [vmem:[%s2763_s19 + $0x18] sm:$0xf]  ;;  %v1967_v26 = vld [vmem:[%s2763_s19 + $0x1c] sm:$0xf]  ;;  %2135 = vmatprep.mubr.msk.bf16.mxu0 %vm452_vm2, %v1949_v11 }
  0x93   : > { %v1953_v22 = vcombine.low %v519_v12, %v520_v13  ;;  %v701_v27 = vsub.bf16 %v1965_v21, %v2769_v8  ;;  %2136 = vmatmul.mubr.msk.bf16.vlgmr.msra.gmra.mrb[0].mxu0 %vm452_vm2, %v1950_v17  ;;  %v702_v31 = vsub.bf16 %v1966_v25, %v2777_v14  ;;  %v703_v32 = vsub.bf16 %v1967_v26, %v2779_v15  ;;  %v1974_v54 = vld [vmem:[%s2763_s19 + $0x20] sm:$0xf]  ;;  %v1975_v55 = vld [vmem:[%s2763_s19 + $0x24] sm:$0xf]  ;;  %v1976_v11 = vld [vmem:[%s2763_s19 + $0x28] sm:$0xf] }
  0x94   : > { %v1954_v29 = vcombine.low %v521_v19, %v522_v23  ;;  %2146 = vmatpush3.bf16.msra.mxu0 %v2797_v28  ;;  %v851_v60 = vsub.bf16 %v1974_v54, %v2765_v5  ;;  %v852_v61 = vsub.bf16 %v1975_v55, %v2769_v8  ;;  %v1977_v12 = vld [vmem:[%s2763_s19 + $0x2c] sm:$0xf]  ;;  %v1984_v20 = vld [vmem:[%s2763_s19 + $0x30] sm:$0xf]  ;;  %v1985_v23 = vld [vmem:[%s2763_s19 + $0x34] sm:$0xf]  ;;  %v853_v26 = vsub.bf16 %v1976_v11, %v2777_v14 }
  0x95   : > { %2141 = vmatprep.mubr.msk.bf16.mxu1 %vm452_vm2, %v1953_v22  ;;  %v1968_v30 = vcombine.low %v700_v24, %v701_v27  ;;  %v1969_v33 = vcombine.low %v702_v31, %v703_v32  ;;  %2147 = vmatprep.subr.bf16.mxu0 %v2811_v34  ;;  %v854_v27 = vsub.bf16 %v1977_v12, %v2779_v15 }
  0x96   : > { %2142 = vmatmul.mubr.msk.bf16.vlgmr.msra.gmra.mrb[0].mxu1 %vm452_vm2, %v1954_v29  ;;  %v1978_v19 = vcombine.low %v851_v60, %v852_v61  ;;  %v1002_v29 = vsub.bf16 %v1984_v20, %v2765_v5  ;;  %v1003_v32 = vsub.bf16 %v1985_v23, %v2769_v8  ;;  %v1994_v61 = vld [vmem:[%s2763_s19 + $0x40] sm:$0xf] }
  0x97   : > { %2158 = vmatpush3.bf16.msra.mxu1 %v2767_v7  ;;  %2159 = vmatprep.mubr.msk.bf16.mxu1 %vm452_vm2, %v1968_v30 }
  0x98   : > { %2163 = vmatprep.subr.bf16.mxu1 %v2797_v28  ;;  %2148 = vmatpush3.bf16.msra.mxu0 %v2811_v34 }
  0x99   : > { %2149 = vmatprep.subr.bf16.mxu0 %v2817_v35 }
  0x9c   : > { %2150 = vmatpush3.bf16.msra.mxu0 %v2817_v35 }
  0x9d   : > { %2151 = vmatprep.subr.bf16.mxu0 %v2823_v36 }
  0x9e   : > { %2160 = vmatmul.mubr.msk.bf16.vlgmr.msra.gmra.mrb[4].mxu1 %vm452_vm2, %v1969_v33 }
  0x9f   : > { %2164 = vmatpush3.bf16.msra.mxu1 %v2797_v28 }
  0xa0   : > { %2165 = vmatprep.subr.bf16.mxu1 %v2811_v34  ;;  %2152 = vmatpush3.bf16.msra.mxu0 %v2823_v36 }
  0xa1   : > { %2175 = vmatprep.subr.bf16.mxu0 %v2767_v7 }
  0xa3   : > { %2166 = vmatpush3.bf16.msra.mxu1 %v2811_v34 }
  0xa4   : > { %2167 = vmatprep.subr.bf16.mxu1 %v2817_v35 }
  0xa7   : > { %2168 = vmatpush3.bf16.msra.mxu1 %v2817_v35 }
  0xa8   : > { %2169 = vmatprep.subr.bf16.mxu1 %v2823_v36 }
  0xab   : > { %2170 = vmatpush3.bf16.msra.mxu1 %v2823_v36 }
  0xac   : > { %2193 = vmatprep.subr.bf16.mxu1 %v2767_v7 }
 0x166   : > { %v2137_v38 = vpop.f32.mrb[0].mxu0 }
 0x167   : > { %v2831_v39 = vadd.f32 %v2137_v38, %v1948_v37  ;;  %v500_v41 = vpop.f32.mrb[1].mxu0 }
 0x168   : > { %v2833_v42 = vadd.f32 %v1948_v37, %v500_v41  ;;  %v2138_v44 = vpop.f32.mrb[2].mxu0  ;;  %v1979_v41 = vcombine.low %v853_v26, %v854_v27 }
 0x169   : > { %v2143_v40 = vpop.f32.mrb[0].mxu1  ;;  %v2836_v46 = vadd.f32 %v2138_v44, %v1948_v37  ;;  %v503_v48 = vpop.f32.mrb[3].mxu0  ;;  %v1987_v44 = vld [vmem:[%s2763_s19 + $0x3c] sm:$0xf] }
 0x16a   : > { %v576_v43 = vpop.f32.mrb[1].mxu1  ;;  %v585_v45 = vadd.f32 %v2143_v40, %v2831_v39  ;;  %v2839_v50 = vadd.f32 %v1948_v37, %v503_v48  ;;  %v1005_v48 = vsub.bf16 %v1987_v44, %v2779_v15 }
 0x16b   : > { %v2144_v47 = vpop.f32.mrb[2].mxu1  ;;  %v577_v49 = vadd.f32 %v576_v43, %v2833_v42  ;;  %v1986_v43 = vld [vmem:[%s2763_s19 + $0x38] sm:$0xf] }
 0x16c   : > { %v579_v51 = vpop.f32.mrb[3].mxu1  ;;  %v593_v52 = vmul.f32 0.2, %v585_v45  ;;  %v588_v53 = vadd.f32 %v2144_v47, %v2836_v46  ;;  %v1004_v47 = vsub.bf16 %v1986_v43, %v2777_v14 }
 0x16d   : > { %v591_v56 = vmul.f32 0.2, %v577_v49  ;;  %v580_v57 = vadd.f32 %v579_v51, %v2839_v50  ;;  %v2891_v51 = vld [vmem:[#allocation9] ss:$0 sm:$0xff] }
 0x16e   : > { %v594_v58 = vmul.f32 0.2, %v588_v53  ;;  %v597_v62 = vmax.f32 %v585_v45, %v593_v52  ;;  %v1988_v45 = vcombine.low %v1002_v29, %v1003_v32 }
 0x16f   : > { %v592_v59 = vmul.f32 0.2, %v580_v57  ;;  %v595_v1 = vmax.f32 %v577_v49, %v591_v56  ;;  %v1989_v49 = vcombine.low %v1004_v47, %v1005_v48 }
 0x170   : > { %v598_v63 = vmax.f32 %v588_v53, %v594_v58 }
 0x171   : > { %v2161_v0 = vpop.f32.mrb[4].mxu1  ;;  %v596_v2 = vmax.f32 %v580_v57, %v592_v59 }
 0x172   : > { %v763_v3 = vadd.f32 %v2161_v0, %v2831_v39  ;;  %v754_v4 = vpop.f32.mrb[5].mxu1  ;;  %v600_v6 = vpack.c.bf16 %v598_v63, %v597_v62  ;;  %v1995_v62 = vld [vmem:[%s2763_s19 + $0x44] sm:$0xf] }
 0x173   : > { %v755_v9 = vadd.f32 %v754_v4, %v2833_v42  ;;  %v2162_v10 = vpop.f32.mrb[6].mxu1  ;;  %v599_v13 = vpack.c.bf16 %v596_v2, %v595_v1 }
 0x174   : > { %v771_v16 = vmul.f32 0.2, %v763_v3  ;;  %v766_v17 = vadd.f32 %v2162_v10, %v2836_v46  ;;  %v757_v18 = vpop.f32.mrb[7].mxu1 }
 0x175   : > { %v769_v21 = vmul.f32 0.2, %v755_v9  ;;  %v758_v22 = vadd.f32 %v757_v18, %v2839_v50  ;;  %2153 = vmatprep.mubr.msk.bf16.mxu0 %vm631_vm3, %v599_v13 }
 0x176   : > { %v772_v24 = vmul.f32 0.2, %v766_v17  ;;  %2154 = vmatmul.mubr.msk.bf16.vlgmr.msra.gmra.mrb[4].mxu0 %vm631_vm3, %v600_v6  ;;  %v775_v30 = vmax.f32 %v763_v3, %v771_v16  ;;  %v1153_v6 = vsub.bf16 %v1994_v61, %v2765_v5 }
 0x177   : > { %v770_v25 = vmul.f32 0.2, %v758_v22  ;;  %2176 = vmatpush3.bf16.msra.mxu0 %v2767_v7  ;;  %2177 = vmatprep.mubr.msk.bf16.mxu0 %vm452_vm2, %v1978_v19  ;;  %v773_v33 = vmax.f32 %v755_v9, %v769_v21  ;;  %v1154_v9 = vsub.bf16 %v1995_v62, %v2769_v8 }
 0x178   : > { %v776_v31 = vmax.f32 %v766_v17, %v772_v24  ;;  %2181 = vmatprep.subr.bf16.mxu0 %v2797_v28 }
 0x179   : > { %v774_v37 = vmax.f32 %v758_v22, %v770_v25 }
 0x17a   : > { %v778_v38 = vpack.c.bf16 %v776_v31, %v775_v30 }
 0x17b   : > { %v777_v40 = vpack.c.bf16 %v774_v37, %v773_v33 }
 0x17d   : > { %2171 = vmatprep.mubr.msk.bf16.mxu1 %vm631_vm3, %v777_v40 }
 0x17e   : > { %2172 = vmatmul.mubr.msk.bf16.vlgmr.msra.gmra.mrb[8].mxu1 %vm631_vm3, %v778_v38  ;;  %2178 = vmatmul.mubr.msk.bf16.vlgmr.msra.gmra.mrb[8].mxu0 %vm452_vm2, %v1979_v41 }
 0x17f   : > { %2194 = vmatpush3.bf16.msra.mxu1 %v2767_v7  ;;  %2195 = vmatprep.mubr.msk.bf16.mxu1 %vm452_vm2, %v1988_v45 }
 0x180   : > { %2182 = vmatpush3.bf16.msra.mxu0 %v2797_v28  ;;  %2199 = vmatprep.subr.bf16.mxu1 %v2797_v28 }
 0x181   : > { %2183 = vmatprep.subr.bf16.mxu0 %v2811_v34 }
 0x184   : > { %2184 = vmatpush3.bf16.msra.mxu0 %v2811_v34 }
 0x185   : > { %2185 = vmatprep.subr.bf16.mxu0 %v2817_v35 }
 0x186   : > { %2196 = vmatmul.mubr.msk.bf16.vlgmr.msra.gmra.mrb[12].mxu1 %vm452_vm2, %v1989_v49 }
 0x187   : > { %2200 = vmatpush3.bf16.msra.mxu1 %v2797_v28 }
 0x188   : > { %2186 = vmatpush3.bf16.msra.mxu0 %v2817_v35  ;;  %2201 = vmatprep.subr.bf16.mxu1 %v2811_v34 }
 0x189   : > { %2187 = vmatprep.subr.bf16.mxu0 %v2823_v36 }
 0x18b   : > { %2202 = vmatpush3.bf16.msra.mxu1 %v2811_v34 }
 0x18c   : > { %2188 = vmatpush3.bf16.msra.mxu0 %v2823_v36  ;;  %2203 = vmatprep.subr.bf16.mxu1 %v2817_v35 }
 0x18d   : > { %2211 = vmatprep.subr.bf16.mxu0 %v2767_v7 }
 0x18f   : > { %2204 = vmatpush3.bf16.msra.mxu1 %v2817_v35 }
 0x190   : > { %2205 = vmatprep.subr.bf16.mxu1 %v2823_v36 }
 0x193   : > { %2206 = vmatpush3.bf16.msra.mxu1 %v2823_v36 }
 0x194   : > { %2229 = vmatprep.subr.bf16.mxu1 %v2767_v7 }
 0x249   : > { %v2155_v52 = vpop.f32.mrb[4].mxu0 }
 0x24a   : > { %v681_v53 = vadd.f32 %v2155_v52, %v2891_v51  ;;  %v672_v54 = vpop.f32.mrb[5].mxu0 }
 0x24b   : > { %v673_v55 = vadd.f32 %v2891_v51, %v672_v54  ;;  %v2156_v56 = vpop.f32.mrb[6].mxu0 }
 0x24c   : > { %v675_v57 = vpop.f32.mrb[7].mxu0  ;;  %v689_v58 = vmul.f32 0.2, %v681_v53  ;;  %v684_v60 = vadd.f32 %v2156_v56, %v2891_v51 }
 0x24d   : > { %v687_v59 = vmul.f32 0.2, %v673_v55  ;;  %v676_v63 = vadd.f32 %v2891_v51, %v675_v57 }
 0x24e   : > { %v693_v1 = vmax.f32 %v681_v53, %v689_v58  ;;  %v690_v11 = vmul.f32 0.2, %v684_v60 }
 0x24f   : > { %v691_v10 = vmax.f32 %v673_v55, %v687_v59  ;;  %v688_v18 = vmul.f32 0.2, %v676_v63 }
 0x250   : > { %v694_v37 = vmax.f32 %v684_v60, %v690_v11  ;;  %v1998_v11 = vcombine.low %v1153_v6, %v1154_v9 }
 0x251   : > { %v2173_v0 = vpop.f32.mrb[8].mxu1  ;;  %v2179_v4 = vpop.f32.mrb[8].mxu0  ;;  %v692_v43 = vmax.f32 %v676_v63, %v688_v18 }
 0x252   : > { %v828_v2 = vadd.f32 %v2173_v0, %v2891_v51  ;;  %v819_v3 = vpop.f32.mrb[9].mxu1  ;;  %v914_v16 = vadd.f32 %v2179_v4, %v2831_v39  ;;  %v905_v17 = vpop.f32.mrb[9].mxu0  ;;  %v1996_v0 = vld [vmem:[%s2763_s19 + $0x48] sm:$0xf] }
 0x253   : > { %v820_v12 = vadd.f32 %v2891_v51, %v819_v3  ;;  %v2174_v13 = vpop.f32.mrb[10].mxu1  ;;  %v906_v22 = vadd.f32 %v905_v17, %v2833_v42  ;;  %v2180_v23 = vpop.f32.mrb[10].mxu0  ;;  %v2005_v17 = vld [vmem:[%s2763_s19 + $0x54] sm:$0xf] }
 0x254   : > { %v836_v19 = vmul.f32 0.2, %v828_v2  ;;  %v831_v20 = vadd.f32 %v2174_v13, %v2891_v51  ;;  %v822_v21 = vpop.f32.mrb[11].mxu1  ;;  %v922_v25 = vmul.f32 0.2, %v914_v16  ;;  %v917_v27 = vadd.f32 %v2180_v23, %v2836_v46  ;;  %v908_v29 = vpop.f32.mrb[11].mxu0 }
 0x255   : > { %v834_v24 = vmul.f32 0.2, %v820_v12  ;;  %v823_v26 = vadd.f32 %v2891_v51, %v822_v21  ;;  %v920_v32 = vmul.f32 0.2, %v906_v22  ;;  %v909_v33 = vadd.f32 %v908_v29, %v2839_v50 }
 0x256   : > { %v840_v30 = vmax.f32 %v828_v2, %v836_v19  ;;  %v837_v31 = vmul.f32 0.2, %v831_v20  ;;  %v923_v41 = vmul.f32 0.2, %v917_v27  ;;  %v926_v49 = vmax.f32 %v914_v16, %v922_v25 }
 0x257   : > { %v838_v38 = vmax.f32 %v820_v12, %v834_v24  ;;  %v835_v40 = vmul.f32 0.2, %v823_v26  ;;  %v921_v47 = vmul.f32 0.2, %v909_v33  ;;  %v924_v56 = vmax.f32 %v906_v22, %v920_v32  ;;  %v2004_v12 = vld [vmem:[%s2763_s19 + $0x50] sm:$0xf] }
 0x258   : > { %v2909_v44 = vmax.f32 %v693_v1, %v840_v30  ;;  %v841_v45 = vmax.f32 %v831_v20, %v837_v31  ;;  %v927_v53 = vmax.f32 %v917_v27, %v923_v41  ;;  %v1997_v1 = vld [vmem:[%s2763_s19 + $0x4c] sm:$0xf]  ;;  %v1155_v20 = vsub.bf16 %v1996_v0, %v2777_v14  ;;  %v2006_v30 = vld [vmem:[%s2763_s19 + $0x58] sm:$0xf]  ;;  %v2007_v31 = vld [vmem:[%s2763_s19 + $0x5c] sm:$0xf] }
 0x259   : > { %v2911_v48 = vmax.f32 %v691_v10, %v838_v38  ;;  %v839_v52 = vmax.f32 %v823_v26, %v835_v40  ;;  %v2197_v54 = vpop.f32.mrb[12].mxu1  ;;  %v925_v57 = vmax.f32 %v909_v33, %v921_v47  ;;  %v1156_v21 = vsub.bf16 %v1997_v1, %v2779_v15 }
 0x25a   : > { %v2913_v55 = vmax.f32 %v694_v37, %v841_v45  ;;  %v1065_v58 = vadd.f32 %v2197_v54, %v2831_v39  ;;  %v1056_v59 = vpop.f32.mrb[13].mxu1  ;;  %v929_v61 = vpack.c.bf16 %v927_v53, %v926_v49  ;;  %v1304_v22 = vsub.bf16 %v2004_v12, %v2765_v5 }
 0x25b   : > { %v2916_v60 = vmax.f32 %v692_v43, %v839_v52  ;;  %v1057_v62 = vadd.f32 %v1056_v59, %v2833_v42  ;;  %v2198_v63 = vpop.f32.mrb[14].mxu1  ;;  %v928_v2 = vpack.c.bf16 %v925_v57, %v924_v56  ;;  %v1305_v23 = vsub.bf16 %v2005_v17, %v2769_v8 }
 0x25c   : > { %v1073_v3 = vmul.f32 0.2, %v1065_v58  ;;  %v1068_v4 = vadd.f32 %v2198_v63, %v2836_v46  ;;  %v1059_v10 = vpop.f32.mrb[15].mxu1  ;;  %v1999_v29 = vcombine.low %v1155_v20, %v1156_v21  ;;  %v1306_v33 = vsub.bf16 %v2006_v30, %v2777_v14 }
 0x25d   : > { %v1071_v13 = vmul.f32 0.2, %v1057_v62  ;;  %v1060_v16 = vadd.f32 %v1059_v10, %v2839_v50  ;;  %2189 = vmatprep.mubr.msk.bf16.mxu0 %vm631_vm3, %v928_v2  ;;  %v2008_v32 = vcombine.low %v1304_v22, %v1305_v23  ;;  %v1307_v37 = vsub.bf16 %v2007_v31, %v2779_v15 }
 0x25e   : > { %v1074_v18 = vmul.f32 0.2, %v1068_v4  ;;  %2190 = vmatmul.mubr.msk.bf16.vlgmr.msra.gmra.mrb[12].mxu0 %vm631_vm3, %v929_v61  ;;  %v1077_v6 = vmax.f32 %v1065_v58, %v1073_v3 }
 0x25f   : > { %v1072_v19 = vmul.f32 0.2, %v1060_v16  ;;  %2212 = vmatpush3.bf16.msra.mxu0 %v2767_v7  ;;  %2213 = vmatprep.mubr.msk.bf16.mxu0 %vm452_vm2, %v1998_v11  ;;  %v1075_v24 = vmax.f32 %v1057_v62, %v1071_v13  ;;  %v2009_v38 = vcombine.low %v1306_v33, %v1307_v37 }
 0x260   : > { %v1078_v9 = vmax.f32 %v1068_v4, %v1074_v18  ;;  %2217 = vmatprep.subr.bf16.mxu0 %v2797_v28  ;;  %v2014_v18 = vld [vmem:[%s2763_s19 + $0x60] sm:$0xf] }
 0x261   : > { %v1076_v25 = vmax.f32 %v1060_v16, %v1072_v19  ;;  %v1455_v33 = vsub.bf16 %v2014_v18, %v2765_v5 }
 0x262   : > { %v1080_v26 = vpack.c.bf16 %v1078_v9, %v1077_v6  ;;  %v2015_v6 = vld [vmem:[%s2763_s19 + $0x64] sm:$0xf] }
 0x263   : > { %v1079_v27 = vpack.c.bf16 %v1076_v25, %v1075_v24 }
 0x265   : > { %2207 = vmatprep.mubr.msk.bf16.mxu1 %vm631_vm3, %v1079_v27 }
 0x266   : > { %2208 = vmatmul.mubr.msk.bf16.vlgmr.msra.gmra.mrb[16].mxu1 %vm631_vm3, %v1080_v26  ;;  %2214 = vmatmul.mubr.msk.bf16.vlgmr.msra.gmra.mrb[16].mxu0 %vm452_vm2, %v1999_v29 }
 0x267   : > { %2230 = vmatpush3.bf16.msra.mxu1 %v2767_v7  ;;  %2231 = vmatprep.mubr.msk.bf16.mxu1 %vm452_vm2, %v2008_v32 }
 0x268   : > { %2218 = vmatpush3.bf16.msra.mxu0 %v2797_v28  ;;  %2235 = vmatprep.subr.bf16.mxu1 %v2797_v28 }
 0x269   : > { %2219 = vmatprep.subr.bf16.mxu0 %v2811_v34 }
 0x26c   : > { %2220 = vmatpush3.bf16.msra.mxu0 %v2811_v34 }
 0x26d   : > { %2221 = vmatprep.subr.bf16.mxu0 %v2817_v35 }
 0x26e   : > { %2232 = vmatmul.mubr.msk.bf16.vlgmr.msra.gmra.mrb[20].mxu1 %vm452_vm2, %v2009_v38 }
 0x26f   : > { %2236 = vmatpush3.bf16.msra.mxu1 %v2797_v28 }
 0x270   : > { %2222 = vmatpush3.bf16.msra.mxu0 %v2817_v35  ;;  %2237 = vmatprep.subr.bf16.mxu1 %v2811_v34 }
 0x271   : > { %2223 = vmatprep.subr.bf16.mxu0 %v2823_v36 }
 0x273   : > { %2238 = vmatpush3.bf16.msra.mxu1 %v2811_v34 }
 0x274   : > { %2224 = vmatpush3.bf16.msra.mxu0 %v2823_v36  ;;  %2239 = vmatprep.subr.bf16.mxu1 %v2817_v35 }
 0x275   : > { %2247 = vmatprep.subr.bf16.mxu0 %v2767_v7 }
 0x277   : > { %2240 = vmatpush3.bf16.msra.mxu1 %v2817_v35 }
 0x278   : > { %2241 = vmatprep.subr.bf16.mxu1 %v2823_v36 }
 0x27b   : > { %2242 = vmatpush3.bf16.msra.mxu1 %v2823_v36 }
 0x27c   : > { %2265 = vmatprep.subr.bf16.mxu1 %v2767_v7 }
 0x331   : > { %v2191_v40 = vpop.f32.mrb[12].mxu0 }
 0x332   : > { %v979_v41 = vadd.f32 %v2191_v40, %v2891_v51  ;;  %v970_v43 = vpop.f32.mrb[13].mxu0 }
 0x333   : > { %v971_v45 = vadd.f32 %v2891_v51, %v970_v43  ;;  %v2192_v47 = vpop.f32.mrb[14].mxu0 }
 0x334   : > { %v987_v49 = vmul.f32 0.2, %v979_v41  ;;  %v982_v52 = vadd.f32 %v2192_v47, %v2891_v51  ;;  %v973_v53 = vpop.f32.mrb[15].mxu0 }
 0x335   : > { %v985_v54 = vmul.f32 0.2, %v971_v45  ;;  %v974_v56 = vadd.f32 %v2891_v51, %v973_v53 }
 0x336   : > { %v991_v57 = vmax.f32 %v979_v41, %v987_v49  ;;  %v988_v58 = vmul.f32 0.2, %v982_v52  ;;  %v1456_v41 = vsub.bf16 %v2015_v6, %v2769_v8 }
 0x337   : > { %v989_v59 = vmax.f32 %v971_v45, %v985_v54  ;;  %v986_v61 = vmul.f32 0.2, %v974_v56 }
 0x338   : > { %v995_v62 = vmax.f32 %v2909_v44, %v991_v57  ;;  %v992_v63 = vmax.f32 %v982_v52, %v988_v58 }
 0x339   : > { %v2209_v0 = vpop.f32.mrb[16].mxu1  ;;  %v993_v1 = vmax.f32 %v2911_v48, %v989_v59  ;;  %v990_v2 = vmax.f32 %v974_v56, %v986_v61  ;;  %v2215_v10 = vpop.f32.mrb[16].mxu0 }
 0x33a   : > { %v1130_v3 = vadd.f32 %v2209_v0, %v2891_v51  ;;  %v1121_v4 = vpop.f32.mrb[17].mxu1  ;;  %v996_v11 = vmax.f32 %v2913_v55, %v992_v63  ;;  %v1216_v16 = vadd.f32 %v2215_v10, %v2831_v39  ;;  %v1207_v17 = vpop.f32.mrb[17].mxu0  ;;  %v2016_v0 = vld [vmem:[%s2763_s19 + $0x68] sm:$0xf] }
 0x33b   : > { %v1122_v12 = vadd.f32 %v2891_v51, %v1121_v4  ;;  %v2210_v13 = vpop.f32.mrb[18].mxu1  ;;  %v994_v44 = vmax.f32 %v2916_v60, %v990_v2  ;;  %v1208_v21 = vadd.f32 %v1207_v17, %v2833_v42  ;;  %v2216_v22 = vpop.f32.mrb[18].mxu0  ;;  %v2025_v17 = vld [vmem:[%s2763_s19 + $0x74] sm:$0xf] }
 0x33c   : > { %v1138_v19 = vmul.f32 0.2, %v1130_v3  ;;  %v1133_v48 = vadd.f32 %v2210_v13, %v2891_v51  ;;  %v1124_v20 = vpop.f32.mrb[19].mxu1  ;;  %v1224_v23 = vmul.f32 0.2, %v1216_v16  ;;  %v1219_v24 = vadd.f32 %v2216_v22, %v2836_v46  ;;  %v1210_v25 = vpop.f32.mrb[19].mxu0 }
 0x33d   : > { %v1136_v9 = vmul.f32 0.2, %v1122_v12  ;;  %v1125_v55 = vadd.f32 %v2891_v51, %v1124_v20  ;;  %v1222_v29 = vmul.f32 0.2, %v1208_v21  ;;  %v1211_v60 = vadd.f32 %v1210_v25, %v2839_v50 }
 0x33e   : > { %v1142_v26 = vmax.f32 %v1130_v3, %v1138_v19  ;;  %v1139_v27 = vmul.f32 0.2, %v1133_v48  ;;  %v1225_v32 = vmul.f32 0.2, %v1219_v24  ;;  %v1228_v45 = vmax.f32 %v1216_v16, %v1224_v23 }
 0x33f   : > { %v1140_v30 = vmax.f32 %v1122_v12, %v1136_v9  ;;  %v1137_v31 = vmul.f32 0.2, %v1125_v55  ;;  %v1223_v40 = vmul.f32 0.2, %v1211_v60  ;;  %v1226_v54 = vmax.f32 %v1208_v21, %v1222_v29  ;;  %v2024_v12 = vld [vmem:[%s2763_s19 + $0x70] sm:$0xf] }
 0x340   : > { %v2980_v37 = vmax.f32 %v995_v62, %v1142_v26  ;;  %v1143_v38 = vmax.f32 %v1133_v48, %v1139_v27  ;;  %v1229_v49 = vmax.f32 %v1219_v24, %v1225_v32  ;;  %v1457_v19 = vsub.bf16 %v2016_v0, %v2777_v14  ;;  %v2026_v26 = vld [vmem:[%s2763_s19 + $0x78] sm:$0xf]  ;;  %v2027_v27 = vld [vmem:[%s2763_s19 + $0x7c] sm:$0xf] }
 0x341   : > { %v2983_v43 = vmax.f32 %v993_v1, %v1140_v30  ;;  %v1141_v47 = vmax.f32 %v1125_v55, %v1137_v31  ;;  %v2233_v52 = vpop.f32.mrb[20].mxu1  ;;  %v1227_v56 = vmax.f32 %v1211_v60, %v1223_v40  ;;  %v2017_v1 = vld [vmem:[%s2763_s19 + $0x6c] sm:$0xf]  ;;  %v1606_v20 = vsub.bf16 %v2024_v12, %v2765_v5 }
 0x342   : > { %v2985_v53 = vmax.f32 %v996_v11, %v1143_v38  ;;  %v1367_v57 = vadd.f32 %v2233_v52, %v2831_v39  ;;  %v1358_v58 = vpop.f32.mrb[21].mxu1  ;;  %v1231_v61 = vpack.c.bf16 %v1229_v49, %v1228_v45  ;;  %v2018_v11 = vcombine.low %v1455_v33, %v1456_v41 }
 0x343   : > { %v2988_v59 = vmax.f32 %v994_v44, %v1141_v47  ;;  %v1359_v62 = vadd.f32 %v1358_v58, %v2833_v42  ;;  %v2234_v63 = vpop.f32.mrb[22].mxu1  ;;  %v1230_v2 = vpack.c.bf16 %v1227_v56, %v1226_v54  ;;  %v1458_v48 = vsub.bf16 %v2017_v1, %v2779_v15 }
 0x344   : > { %v1375_v3 = vmul.f32 0.2, %v1367_v57  ;;  %v1370_v4 = vadd.f32 %v2234_v63, %v2836_v46  ;;  %v1361_v10 = vpop.f32.mrb[23].mxu1  ;;  %v1607_v6 = vsub.bf16 %v2025_v17, %v2769_v8  ;;  %v1608_v5 = vsub.bf16 %v2026_v26, %v2777_v14 }
 0x345   : > { %v1373_v13 = vmul.f32 0.2, %v1359_v62  ;;  %v1362_v16 = vadd.f32 %v1361_v10, %v2839_v50  ;;  %2225 = vmatprep.mubr.msk.bf16.mxu0 %vm631_vm3, %v1230_v2  ;;  %v2019_v25 = vcombine.low %v1457_v19, %v1458_v48  ;;  %v1609_v60 = vsub.bf16 %v2027_v27, %v2779_v15 }
 0x346   : > { %v1376_v18 = vmul.f32 0.2, %v1370_v4  ;;  %2226 = vmatmul.mubr.msk.bf16.vlgmr.msra.gmra.mrb[20].mxu0 %vm631_vm3, %v1231_v61  ;;  %v1379_v21 = vmax.f32 %v1367_v57, %v1375_v3  ;;  %v2028_v29 = vcombine.low %v1606_v20, %v1607_v6 }
 0x347   : > { %v1374_v44 = vmul.f32 0.2, %v1362_v16  ;;  %2248 = vmatpush3.bf16.msra.mxu0 %v2767_v7  ;;  %2249 = vmatprep.mubr.msk.bf16.mxu0 %vm452_vm2, %v2018_v11  ;;  %v1377_v9 = vmax.f32 %v1359_v62, %v1373_v13  ;;  %v2029_v8 = vcombine.low %v1608_v5, %v1609_v60 }
 0x348   : > { %v1380_v22 = vmax.f32 %v1370_v4, %v1376_v18  ;;  %2253 = vmatprep.subr.bf16.mxu0 %v2797_v28 }
 0x349   : > { %v1378_v23 = vmax.f32 %v1362_v16, %v1374_v44 }
 0x34a   : > { %v1382_v55 = vpack.c.bf16 %v1380_v22, %v1379_v21 }
 0x34b   : > { %v1381_v24 = vpack.c.bf16 %v1378_v23, %v1377_v9 }
 0x34d   : > { %2243 = vmatprep.mubr.msk.bf16.mxu1 %vm631_vm3, %v1381_v24 }
 0x34e   : > { %2244 = vmatmul.mubr.msk.bf16.vlgmr.msra.gmra.mrb[24].mxu1 %vm631_vm3, %v1382_v55  ;;  %2250 = vmatmul.mubr.msk.bf16.vlgmr.msra.gmra.mrb[24].mxu0 %vm452_vm2, %v2019_v25 }
 0x34f   : > { %2266 = vmatpush3.bf16.msra.mxu1 %v2767_v7  ;;  %2267 = vmatprep.mubr.msk.bf16.mxu1 %vm452_vm2, %v2028_v29 }
 0x350   : > { %2254 = vmatpush3.bf16.msra.mxu0 %v2797_v28  ;;  %2271 = vmatprep.subr.bf16.mxu1 %v2797_v28 }
 0x351   : > { %2255 = vmatprep.subr.bf16.mxu0 %v2811_v34 }
 0x354   : > { %2256 = vmatpush3.bf16.msra.mxu0 %v2811_v34 }
 0x355   : > { %2257 = vmatprep.subr.bf16.mxu0 %v2817_v35 }
 0x356   : > { %2268 = vmatmul.mubr.msk.bf16.vlgmr.msra.gmra.mrb[28].mxu1 %vm452_vm2, %v2029_v8 }
 0x357   : > { %2272 = vmatpush3.bf16.msra.mxu1 %v2797_v28 }
 0x358   : > { %2258 = vmatpush3.bf16.msra.mxu0 %v2817_v35  ;;  %2273 = vmatprep.subr.bf16.mxu1 %v2811_v34 }
 0x359   : > { %2259 = vmatprep.subr.bf16.mxu0 %v2823_v36 }
 0x35b   : > { %2274 = vmatpush3.bf16.msra.mxu1 %v2811_v34 }
 0x35c   : > { %2260 = vmatpush3.bf16.msra.mxu0 %v2823_v36  ;;  %2275 = vmatprep.subr.bf16.mxu1 %v2817_v35 }
 0x35f   : > { %2276 = vmatpush3.bf16.msra.mxu1 %v2817_v35 }
 0x360   : > { %2277 = vmatprep.subr.bf16.mxu1 %v2823_v36 }
 0x363   : > { %2278 = vmatpush3.bf16.msra.mxu1 %v2823_v36 }
 0x419   : > { %v2227_v7 = vpop.f32.mrb[20].mxu0 }
 0x41a   : > { %v1281_v14 = vadd.f32 %v2227_v7, %v2891_v51  ;;  %v1272_v15 = vpop.f32.mrb[21].mxu0 }
 0x41b   : > { %v1273_v28 = vadd.f32 %v2891_v51, %v1272_v15  ;;  %v2228_v30 = vpop.f32.mrb[22].mxu0 }
 0x41c   : > { %v1289_v31 = vmul.f32 0.2, %v1281_v14  ;;  %v1284_v34 = vadd.f32 %v2228_v30, %v2891_v51  ;;  %v1275_v32 = vpop.f32.mrb[23].mxu0 }
 0x41d   : > { %v1287_v33 = vmul.f32 0.2, %v1273_v28  ;;  %v1276_v38 = vadd.f32 %v2891_v51, %v1275_v32 }
 0x41e   : > { %v1293_v40 = vmax.f32 %v1281_v14, %v1289_v31  ;;  %v1290_v35 = vmul.f32 0.2, %v1284_v34 }
 0x41f   : > { %v1291_v41 = vmax.f32 %v1273_v28, %v1287_v33  ;;  %v1288_v45 = vmul.f32 0.2, %v1276_v38 }
 0x420   : > { %v1297_v36 = vmax.f32 %v2980_v37, %v1293_v40  ;;  %v1294_v47 = vmax.f32 %v1284_v34, %v1290_v35 }
 0x421   : > { %v2245_v49 = vpop.f32.mrb[24].mxu1  ;;  %v1295_v52 = vmax.f32 %v2983_v43, %v1291_v41  ;;  %v1292_v54 = vmax.f32 %v1276_v38, %v1288_v45  ;;  %v2251_v58 = vpop.f32.mrb[24].mxu0 }
 0x422   : > { %v1432_v56 = vadd.f32 %v2245_v49, %v2891_v51  ;;  %v1423_v57 = vpop.f32.mrb[25].mxu1  ;;  %v1298_v61 = vmax.f32 %v2985_v53, %v1294_v47  ;;  %v1518_v0 = vadd.f32 %v2251_v58, %v2831_v39  ;;  %v1509_v1 = vpop.f32.mrb[25].mxu0 }
 0x423   : > { %v1424_v62 = vadd.f32 %v2891_v51, %v1423_v57  ;;  %v2246_v63 = vpop.f32.mrb[26].mxu1  ;;  %v1296_v2 = vmax.f32 %v2988_v59, %v1292_v54  ;;  %v1510_v43 = vadd.f32 %v1509_v1, %v2833_v42  ;;  %v2252_v10 = vpop.f32.mrb[26].mxu0 }
 0x424   : > { %v1440_v37 = vmul.f32 0.2, %v1432_v56  ;;  %v1435_v3 = vadd.f32 %v2246_v63, %v2891_v51  ;;  %v1426_v4 = vpop.f32.mrb[27].mxu1  ;;  %v1526_v12 = vmul.f32 0.2, %v1518_v0  ;;  %v1521_v53 = vadd.f32 %v2252_v10, %v2836_v46  ;;  %v1512_v16 = vpop.f32.mrb[27].mxu0 }
 0x425   : > { %v1438_v11 = vmul.f32 0.2, %v1424_v62  ;;  %v1427_v13 = vadd.f32 %v2891_v51, %v1426_v4  ;;  %v1524_v44 = vmul.f32 0.2, %v1510_v43  ;;  %v1513_v19 = vadd.f32 %v1512_v16, %v2839_v50 }
 0x426   : > { %v1444_v17 = vmax.f32 %v1432_v56, %v1440_v37  ;;  %v1441_v18 = vmul.f32 0.2, %v1435_v3  ;;  %v1527_v20 = vmul.f32 0.2, %v1521_v53  ;;  %v1530_v23 = vmax.f32 %v1518_v0, %v1526_v12 }
 0x427   : > { %v1442_v59 = vmax.f32 %v1424_v62, %v1438_v11  ;;  %v1439_v48 = vmul.f32 0.2, %v1427_v13  ;;  %v1525_v6 = vmul.f32 0.2, %v1513_v19  ;;  %v1528_v27 = vmax.f32 %v1510_v43, %v1524_v44 }
 0x428   : > { %v1448_v21 = vmax.f32 %v1297_v36, %v1444_v17  ;;  %v1445_v22 = vmax.f32 %v1435_v3, %v1441_v18  ;;  %v1531_v24 = vmax.f32 %v1521_v53, %v1527_v20 }
 0x429   : > { %v1446_v9 = vmax.f32 %v1295_v52, %v1442_v59  ;;  %v1443_v55 = vmax.f32 %v1427_v13, %v1439_v48  ;;  %v2269_v25 = vpop.f32.mrb[28].mxu1  ;;  %v1529_v29 = vmax.f32 %v1513_v19, %v1525_v6 }
 0x42a   : > { %v1449_v26 = vmax.f32 %v1298_v61, %v1445_v22  ;;  %v1669_v5 = vadd.f32 %v2269_v25, %v2831_v39  ;;  %v1660_v60 = vpop.f32.mrb[29].mxu1  ;;  %v1533_v7 = vpack.c.bf16 %v1531_v24, %v1530_v23 }
 0x42b   : > { %v1447_v8 = vmax.f32 %v1296_v2, %v1443_v55  ;;  %v1661_v14 = vadd.f32 %v1660_v60, %v2833_v42  ;;  %v2270_v15 = vpop.f32.mrb[30].mxu1  ;;  %v1532_v28 = vpack.c.bf16 %v1529_v29, %v1528_v27 }
 0x42c   : > { %v1677_v30 = vmul.f32 0.2, %v1669_v5  ;;  %v1672_v31 = vadd.f32 %v2270_v15, %v2836_v46  ;;  %v1663_v34 = vpop.f32.mrb[31].mxu1 }
 0x42d   : > { %v1675_v32 = vmul.f32 0.2, %v1661_v14  ;;  %v1664_v33 = vadd.f32 %v1663_v34, %v2839_v50  ;;  %2261 = vmatprep.mubr.msk.bf16.mxu0 %vm631_vm3, %v1532_v28 }
 0x42e   : > { %v1678_v38 = vmul.f32 0.2, %v1672_v31  ;;  %2262 = vmatmul.mubr.msk.bf16.vlgmr.msra.gmra.mrb[28].mxu0 %vm631_vm3, %v1533_v7  ;;  %v1681_v39 = vmax.f32 %v1669_v5, %v1677_v30 }
 0x42f   : > { %v1676_v40 = vmul.f32 0.2, %v1664_v33  ;;  %v1679_v41 = vmax.f32 %v1661_v14, %v1675_v32 }
 0x430   : > { %v1682_v35 = vmax.f32 %v1672_v31, %v1678_v38 }
 0x431   : > { %v1680_v45 = vmax.f32 %v1664_v33, %v1676_v40 }
 0x432   : > { %v1684_v42 = vpack.c.bf16 %v1682_v35, %v1681_v39 }
 0x433   : > { %v1683_v36 = vpack.c.bf16 %v1680_v45, %v1679_v41 }
 0x435   : > { %2279 = vmatprep.mubr.msk.bf16.mxu1 %vm631_vm3, %v1683_v36 }
 0x436   : > { %2280 = vmatmul.mubr.msk.bf16.vlgmr.msra.gmra.mrb[32].mxu1 %vm631_vm3, %v1684_v42 }
 0x501   : > { %v2263_v46 = vpop.f32.mrb[28].mxu0 }
 0x502   : > { %v1583_v47 = vadd.f32 %v2263_v46, %v2891_v51  ;;  %v1574_v50 = vpop.f32.mrb[29].mxu0 }
 0x503   : > { %v1575_v49 = vadd.f32 %v2891_v51, %v1574_v50  ;;  %v2264_v52 = vpop.f32.mrb[30].mxu0 }
 0x504   : > { %v1591_v54 = vmul.f32 0.2, %v1583_v47  ;;  %v1586_v56 = vadd.f32 %v2264_v52, %v2891_v51  ;;  %v1577_v57 = vpop.f32.mrb[31].mxu0 }
 0x505   : > { %v1589_v58 = vmul.f32 0.2, %v1575_v49  ;;  %v1578_v61 = vadd.f32 %v2891_v51, %v1577_v57 }
 0x506   : > { %v1595_v62 = vmax.f32 %v1583_v47, %v1591_v54  ;;  %v1592_v63 = vmul.f32 0.2, %v1586_v56 }
 0x507   : > { %v1593_v0 = vmax.f32 %v1575_v49, %v1589_v58  ;;  %v1590_v1 = vmul.f32 0.2, %v1578_v61 }
 0x508   : > { %v1599_v2 = vmax.f32 %v1448_v21, %v1595_v62  ;;  %v1596_v37 = vmax.f32 %v1586_v56, %v1592_v63 }
 0x509   : > { %v2281_v3 = vpop.f32.mrb[32].mxu1  ;;  %v1597_v4 = vmax.f32 %v1446_v9, %v1593_v0  ;;  %v1594_v43 = vmax.f32 %v1578_v61, %v1590_v1 }
 0x50a   : > { %v1734_v10 = vadd.f32 %v2281_v3, %v2891_v51  ;;  %v1725_v11 = vpop.f32.mrb[33].mxu1  ;;  %v1600_v12 = vmax.f32 %v1449_v26, %v1596_v37 }
 0x50b   : > { %v1726_v13 = vadd.f32 %v2891_v51, %v1725_v11  ;;  %v2282_v53 = vpop.f32.mrb[34].mxu1  ;;  %v1598_v16 = vmax.f32 %v1447_v8, %v1594_v43 }
 0x50c   : > { %v1742_v17 = vmul.f32 0.2, %v1734_v10  ;;  %v1737_v18 = vadd.f32 %v2282_v53, %v2891_v51  ;;  %v1728_v44 = vpop.f32.mrb[35].mxu1 }
 0x50d   : > { %v1740_v19 = vmul.f32 0.2, %v1726_v13  ;;  %v1729_v59 = vadd.f32 %v2891_v51, %v1728_v44 }
 0x50e   : > { %v1746_v48 = vmax.f32 %v1734_v10, %v1742_v17  ;;  %v1743_v20 = vmul.f32 0.2, %v1737_v18 }
 0x50f   : > { %v1744_v21 = vmax.f32 %v1726_v13, %v1740_v19  ;;  %v1741_v22 = vmul.f32 0.2, %v1729_v59 }
 0x510   : > { %v1750_v6 = vmax.f32 %v1599_v2, %v1746_v48  ;;  %v1747_v9 = vmax.f32 %v1737_v18, %v1743_v20 }
 0x511   : > { %v1748_v23 = vmax.f32 %v1597_v4, %v1744_v21  ;;  %v1745_v55 = vmax.f32 %v1729_v59, %v1741_v22 }
 0x512   : > { %v1751_v24 = vmax.f32 %v1600_v12, %v1747_v9 }
 0x513   : > { %v1749_v25 = vmax.f32 %v1598_v16, %v1745_v55 }
 0x514   : > { %v2055_v26 = vpack.c.bf16 %v1751_v24, %v1750_v6 }
 0x515   : > { %v2050_v27 = vpack.c.bf16 %v1749_v25, %v1748_v23 }
 0x516   : > { %2057 = vst [vmem:[%s417_s22 + $0x8] sm:$0xff] %v2055_v26  }
 0x517   : > { %2051 = vst [vmem:[%s417_s22] sm:$0xff] %v2050_v27  }
 0x518 PF: > { %s20_s26 = sadd.s32 1, %s2541_s26   ;;  %s3094_s24 = smov %s2537_s25 }
 0x519   : > { %p17_p7 = scmp.ge.s32.totalorder %s20_s26, 4   ;;  %s3095_s25 = smov %s3097_s12 }
 0x51b   :  { %19 = sbr.rel (!%p17_p7) target bundleno = 4 (0x4), region = 109 }
 0x522   :  { %1802 = vsyncpa [#allocation3], 1 }
 0x523   :  { %1804 = vsyncpa [#allocation3 + $0x1], 1 }
 0x524   :  { %1805 = vsyncpa [#allocation5], 1 }
 0x525   :  { %1806 = vsyncpa [#allocation8], 1 }

// kernel: dgcnn_forward.9
= control target key start
LH: loop header
LB: loop body
LE: loop exit
PB: predicated region body
PF: predicated region fallthrough
CT: control target
= control target key end

     0   :  { %s2244_s24 = smov 0   ;;  %s2246_s25 = smov 0   ;;  %s2612_s0 = inlined_call_operand.vmem [shape: bf16[2,32,3], index: 0, kind: input, shape index: {}]   ;;  %s2613_s1 = inlined_call_operand.vmem [shape: bf16[2,8,32,3], index: 1, kind: input, shape index: {}]   ;;  %s2614_s2 = inlined_call_operand.vmem [shape: bf16[3,64], index: 2, kind: input, shape index: {}]   ;;  %s2615_s3 = inlined_call_operand.vmem [shape: bf16[3,64], index: 3, kind: input, shape index: {}]   ;;  %s2616_s4 = inlined_call_operand.vmem [shape: f32[1,64], index: 4, kind: input, shape index: {}]   ;;  %s2617_s5 = inlined_call_operand.vmem [shape: bf16[64,64], index: 5, kind: input, shape index: {}]   ;;  %s2618_s6 = inlined_call_operand.vmem [shape: f32[1,64], index: 6, kind: input, shape index: {}]   ;;  %s2619_s7 = inlined_call_operand.vmem [shape: bf16[2,32,64], index: 7, kind: output, shape index: {}]  }
   0x1   :  { %s2248_s26 = smov 0  }
   0x2 LB: > { %s29_s27 = sadd.s32 1, %s2197_s25  ;;  %p1817_p0 = scmp.ge.s32.totalorder %s2201_s26, 1  ;;  %s2201_s26 = sphi %s2248_s26, %s17_s26   ;;  %s2197_s25 = sphi %s2246_s25, %s2621_s25   ;;  %s2193_s24 = sphi %s2244_s24, %s2620_s24  }
   0x3   : > { %p31_p1 = scmp.ge.s32.totalorder %s29_s27, 2  ;;  %p275_p2 = scmp.lt.s32.totalorder %s2201_s26, 3 }
   0x5   : > { %s2623_s27 = smov (%p31_p1, %s29_s27), 0  ;;  %p276_p3 = pnand %p1817_p0, %p275_p2 }
   0x6   : > { %v355_v0 = vld [vmem:[%s2614_s2] sm:$0x3] (!%p276_p3)  ;;  %vm394_vm0 = vcmask (!%p276_p3), 1040384   ;;  %vm395_vm1 = vcmask (!%p276_p3), 1041408   ;;  %p325_p4 = scmp.lt.s32.totalorder (!%p276_p3), %s2193_s24, 1  ;;  %v2203_v2 = vmov (!%p276_p3), 65535  }
   0x7   : > { %279 = sbr.rel (%p276_p3) target bundleno = 1178 (0x49a), region = 48  ;;  %v356_v1 = vld [vmem:[%s2615_s3] sm:$0x3] (!%p276_p3)  ;;  %v396_v3 = vsel (!%p276_p3), %vm394_vm0, 4294967295, %v2203_v2  ;;  %vm387_vm2 = vcmask (!%p276_p3), 23552   ;;  %v2334_v34 = vld [vmem:[%s2617_s5 + $0x8] sm:$0xff] (!%p276_p3)  }
   0x8   : > { %v2271_v4 = vld [vmem:[%s2617_s5] sm:$0xff] (!%p276_p3)   ;;  %v397_v5 = vsel (!%p276_p3), %vm395_vm1, %v396_v3, 0  ;;  %v2343_v35 = vld [vmem:[%s2617_s5 + $0x10] sm:$0xff] (!%p276_p3)   ;;  %v2352_v36 = vld [vmem:[%s2617_s5 + $0x18] sm:$0xff] (!%p276_p3)   ;;  %vm566_vm3 = vcmask (!%p276_p3), 523264   ;;  %vm1703_vm4 = vcmask (!%p276_p3), 519168  }
   0x9   : > { %v399_v6 = vand.u32 (!%p276_p3), %v397_v5, %v356_v1  ;;  %v2275_v7 = vand.u32 (!%p276_p3), %v397_v5, %v355_v0  ;;  %v1824_v37 = vld [vmem:[%s2616_s4] ss:$0 sm:$0xff] (!%p276_p3) }
   0xb   : > { %1998 = vmatprep.subr.bf16.mxu0 (!%p276_p3), %v399_v6  ;;  %2004 = vmatprep.subr.bf16.mxu1 (!%p276_p3), %v2275_v7 }
   0xc   : > { %1999 = vmatpush3.bf16.msra.mxu0 (!%p276_p3), %v399_v6  ;;  %2005 = vmatpush3.bf16.msra.mxu1 (!%p276_p3), %v2275_v7 }
   0xd   : > { %2022 = vmatprep.subr.bf16.mxu1 (!%p276_p3), %v2275_v7  ;;  %2010 = vmatprep.subr.bf16.mxu0 (!%p276_p3), %v2271_v4 }
   0xe   : > { %s2625_s24 = smov (!%p325_p4, %s2193_s24), 1 }
   0xf   : > { %s1916_s11 = sshll.u32 %s2625_s24, 4  ;;  %s1917_s12 = sshll.u32 %s2625_s24, 7 }
  0x10   : > { %s332_s15 = scalar_lea.vmem %s2612_s0, %s1916_s11  ;;  %s2288_s18 = scalar_lea.vmem %s2613_s1, %s1917_s12 }
  0x11   : > { %v2291_v8 = vld [vmem:[%s332_s15] sm:$0xf]  ;;  %v2293_v9 = vld [vmem:[%s332_s15 + $0x4] sm:$0xf]  ;;  %v2295_v10 = vld [vmem:[%s332_s15 + $0x8] sm:$0xf]  ;;  %s352_s13 = scalar_lea.vmem %s2619_s7, %s1916_s11 }
  0x12   : > { %v1825_v11 = vcombine.low %v2291_v8, %v2293_v9  ;;  %v2299_v12 = vld [vmem:[%s332_s15 + $0xc] sm:$0xf]  ;;  %v450_v13 = vld [vmem:[%s2288_s18] sm:$0xf]  ;;  %v451_v14 = vld [vmem:[%s2288_s18 + $0x4] sm:$0xf] }
  0x13   : > { %v1826_v15 = vcombine.low %v2295_v10, %v2299_v12  ;;  %v454_v16 = vsub.bf16 %v450_v13, %v2291_v8  ;;  %v455_v17 = vsub.bf16 %v451_v14, %v2293_v9  ;;  %v452_v18 = vld [vmem:[%s2288_s18 + $0x8] sm:$0xf]  ;;  %v453_v19 = vld [vmem:[%s2288_s18 + $0xc] sm:$0xf]  ;;  %v1840_v20 = vld [vmem:[%s2288_s18 + $0x10] sm:$0xf] }
  0x14   : > { %2000 = vmatprep.mubr.msk.bf16.mxu0 %vm387_vm2, %v1825_v11  ;;  %v456_v21 = vsub.bf16 %v452_v18, %v2295_v10  ;;  %v457_v22 = vsub.bf16 %v453_v19, %v2299_v12  ;;  %v1841_v23 = vld [vmem:[%s2288_s18 + $0x14] sm:$0xf]  ;;  %v635_v24 = vsub.bf16 %v1840_v20, %v2291_v8  ;;  %v1842_v27 = vld [vmem:[%s2288_s18 + $0x18] sm:$0xf]  ;;  %v1843_v28 = vld [vmem:[%s2288_s18 + $0x1c] sm:$0xf] }
  0x15   : > { %2001 = vmatmul.mubr.msk.bf16.vlgmr.msra.gmra.mrb[0].mxu0 %vm387_vm2, %v1826_v15  ;;  %v1829_v25 = vcombine.low %v454_v16, %v455_v17  ;;  %v636_v26 = vsub.bf16 %v1841_v23, %v2293_v9  ;;  %v637_v31 = vsub.bf16 %v1842_v27, %v2295_v10  ;;  %v638_v32 = vsub.bf16 %v1843_v28, %v2299_v12  ;;  %v1850_v51 = vld [vmem:[%s2288_s18 + $0x20] sm:$0xf]  ;;  %v1851_v55 = vld [vmem:[%s2288_s18 + $0x24] sm:$0xf]  ;;  %v1852_v11 = vld [vmem:[%s2288_s18 + $0x28] sm:$0xf] }
  0x16   : > { %v1830_v29 = vcombine.low %v456_v21, %v457_v22  ;;  %2011 = vmatpush3.bf16.msra.mxu0 %v2271_v4  ;;  %v786_v60 = vsub.bf16 %v1850_v51, %v2291_v8  ;;  %v787_v61 = vsub.bf16 %v1851_v55, %v2293_v9  ;;  %v1853_v17 = vld [vmem:[%s2288_s18 + $0x2c] sm:$0xf]  ;;  %v1860_v18 = vld [vmem:[%s2288_s18 + $0x30] sm:$0xf]  ;;  %v1861_v22 = vld [vmem:[%s2288_s18 + $0x34] sm:$0xf] }
  0x17   : > { %2006 = vmatprep.mubr.msk.bf16.mxu1 %vm387_vm2, %v1829_v25  ;;  %v1844_v30 = vcombine.low %v635_v24, %v636_v26  ;;  %v1845_v33 = vcombine.low %v637_v31, %v638_v32  ;;  %2012 = vmatprep.subr.bf16.mxu0 %v2334_v34  ;;  %v788_v26 = vsub.bf16 %v1852_v11, %v2295_v10  ;;  %v2426_v51 = vld [vmem:[%s2618_s6] ss:$0 sm:$0xff] }
  0x18   : > { %2007 = vmatmul.mubr.msk.bf16.vlgmr.msra.gmra.mrb[0].mxu1 %vm387_vm2, %v1830_v29  ;;  %v1854_v16 = vcombine.low %v786_v60, %v787_v61  ;;  %v789_v27 = vsub.bf16 %v1853_v17, %v2299_v12  ;;  %v937_v29 = vsub.bf16 %v1860_v18, %v2291_v8  ;;  %v1870_v60 = vld [vmem:[%s2288_s18 + $0x40] sm:$0xf]  ;;  %v1871_v61 = vld [vmem:[%s2288_s18 + $0x44] sm:$0xf] }
  0x19   : > { %2023 = vmatpush3.bf16.msra.mxu1 %v2275_v7  ;;  %2024 = vmatprep.mubr.msk.bf16.mxu1 %vm387_vm2, %v1844_v30  ;;  %v938_v30 = vsub.bf16 %v1861_v22, %v2293_v9 }
  0x1a   : > { %2028 = vmatprep.subr.bf16.mxu1 %v2271_v4  ;;  %2013 = vmatpush3.bf16.msra.mxu0 %v2334_v34 }
  0x1b   : > { %2014 = vmatprep.subr.bf16.mxu0 %v2343_v35 }
  0x1e   : > { %2015 = vmatpush3.bf16.msra.mxu0 %v2343_v35 }
  0x1f   : > { %2016 = vmatprep.subr.bf16.mxu0 %v2352_v36 }
  0x20   : > { %2025 = vmatmul.mubr.msk.bf16.vlgmr.msra.gmra.mrb[4].mxu1 %vm387_vm2, %v1845_v33 }
  0x21   : > { %2029 = vmatpush3.bf16.msra.mxu1 %v2271_v4 }
  0x22   : > { %2030 = vmatprep.subr.bf16.mxu1 %v2334_v34  ;;  %2017 = vmatpush3.bf16.msra.mxu0 %v2352_v36 }
  0x23   : > { %2040 = vmatprep.subr.bf16.mxu0 %v2275_v7 }
  0x25   : > { %2031 = vmatpush3.bf16.msra.mxu1 %v2334_v34 }
  0x26   : > { %2032 = vmatprep.subr.bf16.mxu1 %v2343_v35 }
  0x29   : > { %2033 = vmatpush3.bf16.msra.mxu1 %v2343_v35 }
  0x2a   : > { %2034 = vmatprep.subr.bf16.mxu1 %v2352_v36 }
  0x2d   : > { %2035 = vmatpush3.bf16.msra.mxu1 %v2352_v36 }
  0x2e   : > { %2058 = vmatprep.subr.bf16.mxu1 %v2275_v7 }
  0xe8   : > { %v2002_v38 = vpop.f32.mrb[0].mxu0 }
  0xe9   : > { %v2363_v39 = vadd.f32 %v2002_v38, %v1824_v37  ;;  %v435_v40 = vpop.f32.mrb[1].mxu0 }
  0xea   : > { %v2365_v41 = vadd.f32 %v1824_v37, %v435_v40  ;;  %v2003_v42 = vpop.f32.mrb[2].mxu0  ;;  %v1855_v40 = vcombine.low %v788_v26, %v789_v27 }
  0xeb   : > { %v2367_v43 = vadd.f32 %v2003_v42, %v1824_v37  ;;  %v2008_v44 = vpop.f32.mrb[0].mxu1  ;;  %v438_v45 = vpop.f32.mrb[3].mxu0 }
  0xec   : > { %v520_v46 = vadd.f32 %v2008_v44, %v2363_v39  ;;  %v2370_v47 = vadd.f32 %v1824_v37, %v438_v45  ;;  %v511_v48 = vpop.f32.mrb[1].mxu1  ;;  %v1864_v44 = vcombine.low %v937_v29, %v938_v30  ;;  %v1862_v45 = vld [vmem:[%s2288_s18 + $0x38] sm:$0xf] }
  0xed   : > { %v512_v49 = vadd.f32 %v511_v48, %v2365_v41  ;;  %v2009_v50 = vpop.f32.mrb[2].mxu1  ;;  %v939_v48 = vsub.bf16 %v1862_v45, %v2295_v10 }
  0xee   : > { %v528_v52 = vmul.f32 0.2, %v520_v46  ;;  %v523_v53 = vadd.f32 %v2009_v50, %v2367_v43  ;;  %v514_v54 = vpop.f32.mrb[3].mxu1 }
  0xef   : > { %v526_v56 = vmul.f32 0.2, %v512_v49  ;;  %v515_v57 = vadd.f32 %v514_v54, %v2370_v47 }
  0xf0   : > { %v529_v58 = vmul.f32 0.2, %v523_v53  ;;  %v532_v62 = vmax.f32 %v520_v46, %v528_v52  ;;  %v1863_v46 = vld [vmem:[%s2288_s18 + $0x3c] sm:$0xf] }
  0xf1   : > { %v527_v59 = vmul.f32 0.2, %v515_v57  ;;  %v530_v0 = vmax.f32 %v512_v49, %v526_v56  ;;  %v940_v49 = vsub.bf16 %v1863_v46, %v2299_v12 }
  0xf2   : > { %v533_v63 = vmax.f32 %v523_v53, %v529_v58 }
  0xf3   : > { %v531_v1 = vmax.f32 %v515_v57, %v527_v59  ;;  %v2026_v2 = vpop.f32.mrb[4].mxu1  ;;  %v1865_v50 = vcombine.low %v939_v48, %v940_v49 }
  0xf4   : > { %v535_v3 = vpack.c.bf16 %v533_v63, %v532_v62  ;;  %v698_v5 = vadd.f32 %v2026_v2, %v2363_v39  ;;  %v689_v6 = vpop.f32.mrb[5].mxu1  ;;  %v1088_v2 = vsub.bf16 %v1870_v60, %v2291_v8 }
  0xf5   : > { %v534_v13 = vpack.c.bf16 %v531_v1, %v530_v0  ;;  %v690_v14 = vadd.f32 %v689_v6, %v2365_v41  ;;  %v2027_v15 = vpop.f32.mrb[6].mxu1 }
  0xf6   : > { %v706_v19 = vmul.f32 0.2, %v698_v5  ;;  %v701_v20 = vadd.f32 %v2027_v15, %v2367_v43  ;;  %v692_v21 = vpop.f32.mrb[7].mxu1 }
  0xf7   : > { %v704_v23 = vmul.f32 0.2, %v690_v14  ;;  %v693_v24 = vadd.f32 %v692_v21, %v2370_v47  ;;  %2018 = vmatprep.mubr.msk.bf16.mxu0 %vm566_vm3, %v534_v13 }
  0xf8   : > { %v707_v25 = vmul.f32 0.2, %v701_v20  ;;  %2019 = vmatmul.mubr.msk.bf16.vlgmr.msra.gmra.mrb[4].mxu0 %vm566_vm3, %v535_v3  ;;  %v710_v31 = vmax.f32 %v698_v5, %v706_v19  ;;  %v1089_v3 = vsub.bf16 %v1871_v61, %v2293_v9  ;;  %v1872_v61 = vld [vmem:[%s2288_s18 + $0x48] sm:$0xf] }
  0xf9   : > { %v705_v28 = vmul.f32 0.2, %v693_v24  ;;  %2041 = vmatpush3.bf16.msra.mxu0 %v2275_v7  ;;  %2042 = vmatprep.mubr.msk.bf16.mxu0 %vm387_vm2, %v1854_v16  ;;  %v708_v33 = vmax.f32 %v690_v14, %v704_v23 }
  0xfa   : > { %v711_v32 = vmax.f32 %v701_v20, %v707_v25  ;;  %2046 = vmatprep.subr.bf16.mxu0 %v2271_v4 }
  0xfb   : > { %v709_v37 = vmax.f32 %v693_v24, %v705_v28 }
  0xfc   : > { %v713_v38 = vpack.c.bf16 %v711_v32, %v710_v31 }
  0xfd   : > { %v712_v42 = vpack.c.bf16 %v709_v37, %v708_v33 }
  0xff   : > { %2036 = vmatprep.mubr.msk.bf16.mxu1 %vm566_vm3, %v712_v42 }
 0x100   : > { %2037 = vmatmul.mubr.msk.bf16.vlgmr.msra.gmra.mrb[8].mxu1 %vm566_vm3, %v713_v38  ;;  %2043 = vmatmul.mubr.msk.bf16.vlgmr.msra.gmra.mrb[8].mxu0 %vm387_vm2, %v1855_v40 }
 0x101   : > { %2059 = vmatpush3.bf16.msra.mxu1 %v2275_v7  ;;  %2060 = vmatprep.mubr.msk.bf16.mxu1 %vm387_vm2, %v1864_v44 }
 0x102   : > { %2047 = vmatpush3.bf16.msra.mxu0 %v2271_v4  ;;  %2064 = vmatprep.subr.bf16.mxu1 %v2271_v4 }
 0x103   : > { %2048 = vmatprep.subr.bf16.mxu0 %v2334_v34 }
 0x106   : > { %2049 = vmatpush3.bf16.msra.mxu0 %v2334_v34 }
 0x107   : > { %2050 = vmatprep.subr.bf16.mxu0 %v2343_v35 }
 0x108   : > { %2061 = vmatmul.mubr.msk.bf16.vlgmr.msra.gmra.mrb[12].mxu1 %vm387_vm2, %v1865_v50 }
 0x109   : > { %2065 = vmatpush3.bf16.msra.mxu1 %v2271_v4 }
 0x10a   : > { %2051 = vmatpush3.bf16.msra.mxu0 %v2343_v35  ;;  %2066 = vmatprep.subr.bf16.mxu1 %v2334_v34 }
 0x10b   : > { %2052 = vmatprep.subr.bf16.mxu0 %v2352_v36 }
 0x10d   : > { %2067 = vmatpush3.bf16.msra.mxu1 %v2334_v34 }
 0x10e   : > { %2053 = vmatpush3.bf16.msra.mxu0 %v2352_v36  ;;  %2068 = vmatprep.subr.bf16.mxu1 %v2343_v35 }
 0x10f   : > { %2076 = vmatprep.subr.bf16.mxu0 %v2275_v7 }
 0x111   : > { %2069 = vmatpush3.bf16.msra.mxu1 %v2343_v35 }
 0x112   : > { %2070 = vmatprep.subr.bf16.mxu1 %v2352_v36 }
 0x115   : > { %2071 = vmatpush3.bf16.msra.mxu1 %v2352_v36 }
 0x116   : > { %2094 = vmatprep.subr.bf16.mxu1 %v2275_v7 }
 0x1cb   : > { %v2020_v52 = vpop.f32.mrb[4].mxu0 }
 0x1cc   : > { %v616_v53 = vadd.f32 %v2020_v52, %v2426_v51  ;;  %v607_v54 = vpop.f32.mrb[5].mxu0 }
 0x1cd   : > { %v608_v55 = vadd.f32 %v2426_v51, %v607_v54  ;;  %v2021_v56 = vpop.f32.mrb[6].mxu0 }
 0x1ce   : > { %v610_v57 = vpop.f32.mrb[7].mxu0  ;;  %v624_v58 = vmul.f32 0.2, %v616_v53  ;;  %v619_v59 = vadd.f32 %v2021_v56, %v2426_v51 }
 0x1cf   : > { %v622_v62 = vmul.f32 0.2, %v608_v55  ;;  %v611_v63 = vadd.f32 %v2426_v51, %v610_v57 }
 0x1d0   : > { %v628_v5 = vmax.f32 %v616_v53, %v624_v58  ;;  %v625_v6 = vmul.f32 0.2, %v619_v59 }
 0x1d1   : > { %v626_v16 = vmax.f32 %v608_v55, %v622_v62  ;;  %v623_v17 = vmul.f32 0.2, %v611_v63 }
 0x1d2   : > { %v629_v32 = vmax.f32 %v619_v59, %v625_v6  ;;  %v1873_v6 = vld [vmem:[%s2288_s18 + $0x4c] sm:$0xf] }
 0x1d3   : > { %v2038_v0 = vpop.f32.mrb[8].mxu1  ;;  %v2044_v1 = vpop.f32.mrb[8].mxu0  ;;  %v627_v40 = vmax.f32 %v611_v63, %v623_v17 }
 0x1d4   : > { %v763_v11 = vadd.f32 %v2038_v0, %v2426_v51  ;;  %v849_v13 = vadd.f32 %v2044_v1, %v2363_v39  ;;  %v754_v14 = vpop.f32.mrb[9].mxu1  ;;  %v840_v15 = vpop.f32.mrb[9].mxu0 }
 0x1d5   : > { %v755_v18 = vadd.f32 %v2426_v51, %v754_v14  ;;  %v841_v19 = vadd.f32 %v840_v15, %v2365_v41  ;;  %v2039_v20 = vpop.f32.mrb[10].mxu1  ;;  %v2045_v21 = vpop.f32.mrb[10].mxu0 }
 0x1d6   : > { %v771_v22 = vmul.f32 0.2, %v763_v11  ;;  %v857_v23 = vmul.f32 0.2, %v849_v13  ;;  %v766_v24 = vadd.f32 %v2039_v20, %v2426_v51  ;;  %v852_v25 = vadd.f32 %v2045_v21, %v2367_v43  ;;  %v757_v26 = vpop.f32.mrb[11].mxu1  ;;  %v843_v27 = vpop.f32.mrb[11].mxu0 }
 0x1d7   : > { %v769_v28 = vmul.f32 0.2, %v755_v18  ;;  %v855_v29 = vmul.f32 0.2, %v841_v19  ;;  %v758_v30 = vadd.f32 %v2426_v51, %v757_v26  ;;  %v844_v31 = vadd.f32 %v843_v27, %v2370_v47 }
 0x1d8   : > { %v775_v33 = vmax.f32 %v763_v11, %v771_v22  ;;  %v772_v37 = vmul.f32 0.2, %v766_v24  ;;  %v858_v38 = vmul.f32 0.2, %v852_v25  ;;  %v861_v48 = vmax.f32 %v849_v13, %v857_v23  ;;  %v1880_v11 = vld [vmem:[%s2288_s18 + $0x50] sm:$0xf] }
 0x1d9   : > { %v773_v42 = vmax.f32 %v755_v18, %v769_v28  ;;  %v770_v44 = vmul.f32 0.2, %v758_v30  ;;  %v856_v45 = vmul.f32 0.2, %v844_v31  ;;  %v859_v53 = vmax.f32 %v841_v19, %v855_v29 }
 0x1da   : > { %v2444_v46 = vmax.f32 %v628_v5, %v775_v33  ;;  %v776_v49 = vmax.f32 %v766_v24, %v772_v37  ;;  %v862_v50 = vmax.f32 %v852_v25, %v858_v38  ;;  %v1874_v5 = vcombine.low %v1088_v2, %v1089_v3 }
 0x1db   : > { %v2446_v52 = vmax.f32 %v626_v16, %v773_v42  ;;  %v774_v54 = vmax.f32 %v758_v30, %v770_v44  ;;  %v860_v55 = vmax.f32 %v844_v31, %v856_v45  ;;  %v2062_v56 = vpop.f32.mrb[12].mxu1  ;;  %v1881_v16 = vld [vmem:[%s2288_s18 + $0x54] sm:$0xf]  ;;  %v1090_v20 = vsub.bf16 %v1872_v61, %v2295_v10  ;;  %v1882_v31 = vld [vmem:[%s2288_s18 + $0x58] sm:$0xf] }
 0x1dc   : > { %v2448_v57 = vmax.f32 %v629_v32, %v776_v49  ;;  %v864_v58 = vpack.c.bf16 %v862_v50, %v861_v48  ;;  %v1000_v59 = vadd.f32 %v2062_v56, %v2363_v39  ;;  %v991_v60 = vpop.f32.mrb[13].mxu1  ;;  %v1091_v2 = vsub.bf16 %v1873_v6, %v2299_v12  ;;  %v1883_v32 = vld [vmem:[%s2288_s18 + $0x5c] sm:$0xf] }
 0x1dd   : > { %v2452_v62 = vmax.f32 %v627_v40, %v774_v54  ;;  %v863_v63 = vpack.c.bf16 %v860_v55, %v859_v53  ;;  %v992_v0 = vadd.f32 %v991_v60, %v2365_v41  ;;  %v2063_v1 = vpop.f32.mrb[14].mxu1  ;;  %v1239_v21 = vsub.bf16 %v1880_v11, %v2291_v8 }
 0x1de   : > { %v1008_v13 = vmul.f32 0.2, %v1000_v59  ;;  %v1003_v14 = vadd.f32 %v2063_v1, %v2367_v43  ;;  %v994_v15 = vpop.f32.mrb[15].mxu1  ;;  %v1240_v22 = vsub.bf16 %v1881_v16, %v2293_v9  ;;  %v1875_v28 = vcombine.low %v1090_v20, %v1091_v2  ;;  %v1891_v2 = vld [vmem:[%s2288_s18 + $0x64] sm:$0xf] }
 0x1df   : > { %v1006_v17 = vmul.f32 0.2, %v992_v0  ;;  %v995_v18 = vadd.f32 %v994_v15, %v2370_v47  ;;  %2054 = vmatprep.mubr.msk.bf16.mxu0 %vm566_vm3, %v863_v63  ;;  %v1241_v33 = vsub.bf16 %v1882_v31, %v2295_v10  ;;  %v1242_v37 = vsub.bf16 %v1883_v32, %v2299_v12 }
 0x1e0   : > { %v1009_v19 = vmul.f32 0.2, %v1003_v14  ;;  %2055 = vmatmul.mubr.msk.bf16.vlgmr.msra.gmra.mrb[12].mxu0 %vm566_vm3, %v864_v58  ;;  %v1012_v23 = vmax.f32 %v1000_v59, %v1008_v13  ;;  %v1884_v30 = vcombine.low %v1239_v21, %v1240_v22 }
 0x1e1   : > { %v1007_v3 = vmul.f32 0.2, %v995_v18  ;;  %2077 = vmatpush3.bf16.msra.mxu0 %v2275_v7  ;;  %2078 = vmatprep.mubr.msk.bf16.mxu0 %vm387_vm2, %v1874_v5  ;;  %v1010_v25 = vmax.f32 %v992_v0, %v1006_v17  ;;  %v1885_v38 = vcombine.low %v1241_v33, %v1242_v37 }
 0x1e2   : > { %v1013_v24 = vmax.f32 %v1003_v14, %v1009_v19  ;;  %2082 = vmatprep.subr.bf16.mxu0 %v2271_v4 }
 0x1e3   : > { %v1011_v26 = vmax.f32 %v995_v18, %v1007_v3 }
 0x1e4   : > { %v1015_v27 = vpack.c.bf16 %v1013_v24, %v1012_v23 }
 0x1e5   : > { %v1014_v29 = vpack.c.bf16 %v1011_v26, %v1010_v25 }
 0x1e7   : > { %2072 = vmatprep.mubr.msk.bf16.mxu1 %vm566_vm3, %v1014_v29 }
 0x1e8   : > { %2073 = vmatmul.mubr.msk.bf16.vlgmr.msra.gmra.mrb[16].mxu1 %vm566_vm3, %v1015_v27  ;;  %2079 = vmatmul.mubr.msk.bf16.vlgmr.msra.gmra.mrb[16].mxu0 %vm387_vm2, %v1875_v28 }
 0x1e9   : > { %2095 = vmatpush3.bf16.msra.mxu1 %v2275_v7  ;;  %2096 = vmatprep.mubr.msk.bf16.mxu1 %vm387_vm2, %v1884_v30 }
 0x1ea   : > { %2083 = vmatpush3.bf16.msra.mxu0 %v2271_v4  ;;  %2100 = vmatprep.subr.bf16.mxu1 %v2271_v4 }
 0x1eb   : > { %2084 = vmatprep.subr.bf16.mxu0 %v2334_v34 }
 0x1ee   : > { %2085 = vmatpush3.bf16.msra.mxu0 %v2334_v34 }
 0x1ef   : > { %2086 = vmatprep.subr.bf16.mxu0 %v2343_v35 }
 0x1f0   : > { %2097 = vmatmul.mubr.msk.bf16.vlgmr.msra.gmra.mrb[20].mxu1 %vm387_vm2, %v1885_v38  ;;  %v1391_v38 = vsub.bf16 %v1891_v2, %v2293_v9 }
 0x1f1   : > { %2101 = vmatpush3.bf16.msra.mxu1 %v2271_v4 }
 0x1f2   : > { %2087 = vmatpush3.bf16.msra.mxu0 %v2343_v35  ;;  %2102 = vmatprep.subr.bf16.mxu1 %v2334_v34 }
 0x1f3   : > { %2088 = vmatprep.subr.bf16.mxu0 %v2352_v36 }
 0x1f5   : > { %2103 = vmatpush3.bf16.msra.mxu1 %v2334_v34 }
 0x1f6   : > { %2089 = vmatpush3.bf16.msra.mxu0 %v2352_v36  ;;  %2104 = vmatprep.subr.bf16.mxu1 %v2343_v35 }
 0x1f7   : > { %2112 = vmatprep.subr.bf16.mxu0 %v2275_v7 }
 0x1f9   : > { %2105 = vmatpush3.bf16.msra.mxu1 %v2343_v35 }
 0x1fa   : > { %2106 = vmatprep.subr.bf16.mxu1 %v2352_v36 }
 0x1fd   : > { %2107 = vmatpush3.bf16.msra.mxu1 %v2352_v36 }
 0x1fe   : > { %2130 = vmatprep.subr.bf16.mxu1 %v2275_v7 }
 0x2b3   : > { %v2056_v40 = vpop.f32.mrb[12].mxu0 }
 0x2b4   : > { %v914_v42 = vadd.f32 %v2056_v40, %v2426_v51  ;;  %v905_v44 = vpop.f32.mrb[13].mxu0 }
 0x2b5   : > { %v906_v45 = vadd.f32 %v2426_v51, %v905_v44  ;;  %v2057_v48 = vpop.f32.mrb[14].mxu0 }
 0x2b6   : > { %v922_v49 = vmul.f32 0.2, %v914_v42  ;;  %v917_v50 = vadd.f32 %v2057_v48, %v2426_v51  ;;  %v908_v53 = vpop.f32.mrb[15].mxu0 }
 0x2b7   : > { %v920_v54 = vmul.f32 0.2, %v906_v45  ;;  %v909_v55 = vadd.f32 %v2426_v51, %v908_v53 }
 0x2b8   : > { %v926_v56 = vmax.f32 %v914_v42, %v922_v49  ;;  %v923_v58 = vmul.f32 0.2, %v917_v50 }
 0x2b9   : > { %v924_v59 = vmax.f32 %v906_v45, %v920_v54  ;;  %v921_v60 = vmul.f32 0.2, %v909_v55 }
 0x2ba   : > { %v930_v61 = vmax.f32 %v2444_v46, %v926_v56  ;;  %v927_v63 = vmax.f32 %v917_v50, %v923_v58 }
 0x2bb   : > { %v928_v0 = vmax.f32 %v2446_v52, %v924_v59  ;;  %v925_v1 = vmax.f32 %v909_v55, %v921_v60  ;;  %v2074_v5 = vpop.f32.mrb[16].mxu1  ;;  %v2080_v6 = vpop.f32.mrb[16].mxu0  ;;  %v1890_v52 = vld [vmem:[%s2288_s18 + $0x60] sm:$0xf]  ;;  %v1892_v60 = vld [vmem:[%s2288_s18 + $0x68] sm:$0xf] }
 0x2bc   : > { %v931_v11 = vmax.f32 %v2448_v57, %v927_v63  ;;  %v1065_v13 = vadd.f32 %v2074_v5, %v2426_v51  ;;  %v1151_v14 = vadd.f32 %v2080_v6, %v2363_v39  ;;  %v1056_v15 = vpop.f32.mrb[17].mxu1  ;;  %v1142_v16 = vpop.f32.mrb[17].mxu0  ;;  %v1390_v31 = vsub.bf16 %v1890_v52, %v2291_v8  ;;  %v1893_v6 = vld [vmem:[%s2288_s18 + $0x6c] sm:$0xf] }
 0x2bd   : > { %v929_v17 = vmax.f32 %v2452_v62, %v925_v1  ;;  %v1057_v46 = vadd.f32 %v2426_v51, %v1056_v15  ;;  %v1143_v18 = vadd.f32 %v1142_v16, %v2365_v41  ;;  %v2075_v19 = vpop.f32.mrb[18].mxu1  ;;  %v2081_v20 = vpop.f32.mrb[18].mxu0 }
 0x2be   : > { %v1073_v3 = vmul.f32 0.2, %v1065_v13  ;;  %v1159_v21 = vmul.f32 0.2, %v1151_v14  ;;  %v1068_v57 = vadd.f32 %v2075_v19, %v2426_v51  ;;  %v1154_v22 = vadd.f32 %v2081_v20, %v2367_v43  ;;  %v1059_v23 = vpop.f32.mrb[19].mxu1  ;;  %v1145_v24 = vpop.f32.mrb[19].mxu0 }
 0x2bf   : > { %v1071_v25 = vmul.f32 0.2, %v1057_v46  ;;  %v1157_v26 = vmul.f32 0.2, %v1143_v18  ;;  %v1060_v62 = vadd.f32 %v2426_v51, %v1059_v23  ;;  %v1146_v27 = vadd.f32 %v1145_v24, %v2370_v47 }
 0x2c0   : > { %v1077_v28 = vmax.f32 %v1065_v13, %v1073_v3  ;;  %v1074_v29 = vmul.f32 0.2, %v1068_v57  ;;  %v1160_v30 = vmul.f32 0.2, %v1154_v22  ;;  %v1163_v42 = vmax.f32 %v1151_v14, %v1159_v21  ;;  %v1900_v13 = vld [vmem:[%s2288_s18 + $0x70] sm:$0xf] }
 0x2c1   : > { %v1075_v32 = vmax.f32 %v1057_v46, %v1071_v25  ;;  %v1072_v33 = vmul.f32 0.2, %v1060_v62  ;;  %v1158_v37 = vmul.f32 0.2, %v1146_v27  ;;  %v1161_v49 = vmax.f32 %v1143_v18, %v1157_v26 }
 0x2c2   : > { %v2516_v40 = vmax.f32 %v930_v61, %v1077_v28  ;;  %v1078_v44 = vmax.f32 %v1068_v57, %v1074_v29  ;;  %v1164_v45 = vmax.f32 %v1154_v22, %v1160_v30  ;;  %v1894_v5 = vcombine.low %v1390_v31, %v1391_v38  ;;  %v1903_v28 = vld [vmem:[%s2288_s18 + $0x7c] sm:$0xf] }
 0x2c3   : > { %v2518_v48 = vmax.f32 %v928_v0, %v1075_v32  ;;  %v1076_v50 = vmax.f32 %v1060_v62, %v1072_v33  ;;  %v1162_v53 = vmax.f32 %v1146_v27, %v1158_v37  ;;  %v2098_v54 = vpop.f32.mrb[20].mxu1  ;;  %v1393_v20 = vsub.bf16 %v1893_v6, %v2299_v12  ;;  %v1902_v27 = vld [vmem:[%s2288_s18 + $0x78] sm:$0xf] }
 0x2c4   : > { %v2520_v55 = vmax.f32 %v931_v11, %v1078_v44  ;;  %v1166_v56 = vpack.c.bf16 %v1164_v45, %v1163_v42  ;;  %v1302_v58 = vadd.f32 %v2098_v54, %v2363_v39  ;;  %v1293_v59 = vpop.f32.mrb[21].mxu1  ;;  %v1901_v11 = vld [vmem:[%s2288_s18 + $0x74] sm:$0xf]  ;;  %v1541_v2 = vsub.bf16 %v1900_v13, %v2291_v8 }
 0x2c5   : > { %v2524_v61 = vmax.f32 %v929_v17, %v1076_v50  ;;  %v1165_v63 = vpack.c.bf16 %v1162_v53, %v1161_v49  ;;  %v1294_v1 = vadd.f32 %v1293_v59, %v2365_v41  ;;  %v2099_v0 = vpop.f32.mrb[22].mxu1  ;;  %v1392_v17 = vsub.bf16 %v1892_v60, %v2295_v10 }
 0x2c6   : > { %v1310_v14 = vmul.f32 0.2, %v1302_v58  ;;  %v1305_v15 = vadd.f32 %v2099_v0, %v2367_v43  ;;  %v1296_v16 = vpop.f32.mrb[23].mxu1  ;;  %v1542_v3 = vsub.bf16 %v1901_v11, %v2293_v9  ;;  %v1543_v8 = vsub.bf16 %v1902_v27, %v2295_v10 }
 0x2c7   : > { %v1308_v46 = vmul.f32 0.2, %v1294_v1  ;;  %v1297_v18 = vadd.f32 %v1296_v16, %v2370_v47  ;;  %2090 = vmatprep.mubr.msk.bf16.mxu0 %vm566_vm3, %v1165_v63  ;;  %v1895_v25 = vcombine.low %v1392_v17, %v1393_v20  ;;  %v1544_v9 = vsub.bf16 %v1903_v28, %v2299_v12 }
 0x2c8   : > { %v1311_v19 = vmul.f32 0.2, %v1305_v15  ;;  %2091 = vmatmul.mubr.msk.bf16.vlgmr.msra.gmra.mrb[20].mxu0 %vm566_vm3, %v1166_v56  ;;  %v1314_v21 = vmax.f32 %v1302_v58, %v1310_v14  ;;  %v1904_v62 = vcombine.low %v1541_v2, %v1542_v3 }
 0x2c9   : > { %v1309_v52 = vmul.f32 0.2, %v1297_v18  ;;  %2113 = vmatpush3.bf16.msra.mxu0 %v2275_v7  ;;  %2114 = vmatprep.mubr.msk.bf16.mxu0 %vm387_vm2, %v1894_v5  ;;  %v1312_v22 = vmax.f32 %v1294_v1, %v1308_v46  ;;  %v1905_v29 = vcombine.low %v1543_v8, %v1544_v9 }
 0x2ca   : > { %v1315_v57 = vmax.f32 %v1305_v15, %v1311_v19  ;;  %2118 = vmatprep.subr.bf16.mxu0 %v2271_v4 }
 0x2cb   : > { %v1313_v23 = vmax.f32 %v1297_v18, %v1309_v52 }
 0x2cc   : > { %v1317_v24 = vpack.c.bf16 %v1315_v57, %v1314_v21 }
 0x2cd   : > { %v1316_v26 = vpack.c.bf16 %v1313_v23, %v1312_v22 }
 0x2cf   : > { %2108 = vmatprep.mubr.msk.bf16.mxu1 %vm566_vm3, %v1316_v26 }
 0x2d0   : > { %2109 = vmatmul.mubr.msk.bf16.vlgmr.msra.gmra.mrb[24].mxu1 %vm566_vm3, %v1317_v24  ;;  %2115 = vmatmul.mubr.msk.bf16.vlgmr.msra.gmra.mrb[24].mxu0 %vm387_vm2, %v1895_v25 }
 0x2d1   : > { %2131 = vmatpush3.bf16.msra.mxu1 %v2275_v7  ;;  %2132 = vmatprep.mubr.msk.bf16.mxu1 %vm387_vm2, %v1904_v62 }
 0x2d2   : > { %2119 = vmatpush3.bf16.msra.mxu0 %v2271_v4  ;;  %2136 = vmatprep.subr.bf16.mxu1 %v2271_v4 }
 0x2d3   : > { %2120 = vmatprep.subr.bf16.mxu0 %v2334_v34 }
 0x2d6   : > { %2121 = vmatpush3.bf16.msra.mxu0 %v2334_v34 }
 0x2d7   : > { %2122 = vmatprep.subr.bf16.mxu0 %v2343_v35 }
 0x2d8   : > { %2133 = vmatmul.mubr.msk.bf16.vlgmr.msra.gmra.mrb[28].mxu1 %vm387_vm2, %v1905_v29 }
 0x2d9   : > { %2137 = vmatpush3.bf16.msra.mxu1 %v2271_v4 }
 0x2da   : > { %2123 = vmatpush3.bf16.msra.mxu0 %v2343_v35  ;;  %2138 = vmatprep.subr.bf16.mxu1 %v2334_v34 }
 0x2db   : > { %2124 = vmatprep.subr.bf16.mxu0 %v2352_v36 }
 0x2dd   : > { %2139 = vmatpush3.bf16.msra.mxu1 %v2334_v34 }
 0x2de   : > { %2125 = vmatpush3.bf16.msra.mxu0 %v2352_v36  ;;  %2140 = vmatprep.subr.bf16.mxu1 %v2343_v35 }
 0x2e1   : > { %2141 = vmatpush3.bf16.msra.mxu1 %v2343_v35 }
 0x2e2   : > { %2142 = vmatprep.subr.bf16.mxu1 %v2352_v36 }
 0x2e5   : > { %2143 = vmatpush3.bf16.msra.mxu1 %v2352_v36 }
 0x39b   : > { %v2092_v7 = vpop.f32.mrb[20].mxu0 }
 0x39c   : > { %v1216_v4 = vadd.f32 %v2092_v7, %v2426_v51  ;;  %v1207_v10 = vpop.f32.mrb[21].mxu0 }
 0x39d   : > { %v1208_v12 = vadd.f32 %v2426_v51, %v1207_v10  ;;  %v2093_v30 = vpop.f32.mrb[22].mxu0 }
 0x39e   : > { %v1224_v31 = vmul.f32 0.2, %v1216_v4  ;;  %v1219_v34 = vadd.f32 %v2093_v30, %v2426_v51  ;;  %v1210_v32 = vpop.f32.mrb[23].mxu0 }
 0x39f   : > { %v1222_v33 = vmul.f32 0.2, %v1208_v12  ;;  %v1211_v37 = vadd.f32 %v2426_v51, %v1210_v32 }
 0x3a0   : > { %v1228_v38 = vmax.f32 %v1216_v4, %v1224_v31  ;;  %v1225_v35 = vmul.f32 0.2, %v1219_v34 }
 0x3a1   : > { %v1226_v42 = vmax.f32 %v1208_v12, %v1222_v33  ;;  %v1223_v44 = vmul.f32 0.2, %v1211_v37 }
 0x3a2   : > { %v1232_v36 = vmax.f32 %v2516_v40, %v1228_v38  ;;  %v1229_v45 = vmax.f32 %v1219_v34, %v1225_v35 }
 0x3a3   : > { %v1230_v49 = vmax.f32 %v2518_v48, %v1226_v42  ;;  %v1227_v50 = vmax.f32 %v1211_v37, %v1223_v44  ;;  %v2110_v53 = vpop.f32.mrb[24].mxu1  ;;  %v2116_v54 = vpop.f32.mrb[24].mxu0 }
 0x3a4   : > { %v1233_v56 = vmax.f32 %v2520_v55, %v1229_v45  ;;  %v1367_v58 = vadd.f32 %v2110_v53, %v2426_v51  ;;  %v1453_v59 = vadd.f32 %v2116_v54, %v2363_v39  ;;  %v1358_v60 = vpop.f32.mrb[25].mxu1  ;;  %v1444_v63 = vpop.f32.mrb[25].mxu0 }
 0x3a5   : > { %v1231_v1 = vmax.f32 %v2524_v61, %v1227_v50  ;;  %v1359_v0 = vadd.f32 %v2426_v51, %v1358_v60  ;;  %v1445_v40 = vadd.f32 %v1444_v63, %v2365_v41  ;;  %v2111_v5 = vpop.f32.mrb[26].mxu1  ;;  %v2117_v6 = vpop.f32.mrb[26].mxu0 }
 0x3a6   : > { %v1375_v48 = vmul.f32 0.2, %v1367_v58  ;;  %v1461_v13 = vmul.f32 0.2, %v1453_v59  ;;  %v1370_v14 = vadd.f32 %v2111_v5, %v2426_v51  ;;  %v1456_v55 = vadd.f32 %v2117_v6, %v2367_v43  ;;  %v1361_v15 = vpop.f32.mrb[27].mxu1  ;;  %v1447_v16 = vpop.f32.mrb[27].mxu0 }
 0x3a7   : > { %v1373_v11 = vmul.f32 0.2, %v1359_v0  ;;  %v1459_v46 = vmul.f32 0.2, %v1445_v40  ;;  %v1362_v18 = vadd.f32 %v2426_v51, %v1361_v15  ;;  %v1448_v61 = vadd.f32 %v1447_v16, %v2370_v47 }
 0x3a8   : > { %v1379_v19 = vmax.f32 %v1367_v58, %v1375_v48  ;;  %v1376_v17 = vmul.f32 0.2, %v1370_v14  ;;  %v1462_v20 = vmul.f32 0.2, %v1456_v55  ;;  %v1465_v57 = vmax.f32 %v1453_v59, %v1461_v13 }
 0x3a9   : > { %v1377_v52 = vmax.f32 %v1359_v0, %v1373_v11  ;;  %v1374_v2 = vmul.f32 0.2, %v1362_v18  ;;  %v1460_v3 = vmul.f32 0.2, %v1448_v61  ;;  %v1463_v25 = vmax.f32 %v1445_v40, %v1459_v46 }
 0x3aa   : > { %v1383_v21 = vmax.f32 %v1232_v36, %v1379_v19  ;;  %v1380_v22 = vmax.f32 %v1370_v14, %v1376_v17  ;;  %v1466_v23 = vmax.f32 %v1456_v55, %v1462_v20 }
 0x3ab   : > { %v1381_v24 = vmax.f32 %v1230_v49, %v1377_v52  ;;  %v1378_v26 = vmax.f32 %v1362_v18, %v1374_v2  ;;  %v1464_v62 = vmax.f32 %v1448_v61, %v1460_v3  ;;  %v2134_v27 = vpop.f32.mrb[28].mxu1 }
 0x3ac   : > { %v1384_v28 = vmax.f32 %v1233_v56, %v1380_v22  ;;  %v1468_v8 = vpack.c.bf16 %v1466_v23, %v1465_v57  ;;  %v1604_v9 = vadd.f32 %v2134_v27, %v2363_v39  ;;  %v1595_v29 = vpop.f32.mrb[29].mxu1 }
 0x3ad   : > { %v1382_v7 = vmax.f32 %v1231_v1, %v1378_v26  ;;  %v1467_v4 = vpack.c.bf16 %v1464_v62, %v1463_v25  ;;  %v1596_v10 = vadd.f32 %v1595_v29, %v2365_v41  ;;  %v2135_v12 = vpop.f32.mrb[30].mxu1 }
 0x3ae   : > { %v1612_v30 = vmul.f32 0.2, %v1604_v9  ;;  %v1607_v31 = vadd.f32 %v2135_v12, %v2367_v43  ;;  %v1598_v34 = vpop.f32.mrb[31].mxu1 }
 0x3af   : > { %v1610_v32 = vmul.f32 0.2, %v1596_v10  ;;  %v1599_v33 = vadd.f32 %v1598_v34, %v2370_v47  ;;  %2126 = vmatprep.mubr.msk.bf16.mxu0 %vm566_vm3, %v1467_v4 }
 0x3b0   : > { %v1613_v37 = vmul.f32 0.2, %v1607_v31  ;;  %2127 = vmatmul.mubr.msk.bf16.vlgmr.msra.gmra.mrb[28].mxu0 %vm566_vm3, %v1468_v8  ;;  %v1616_v39 = vmax.f32 %v1604_v9, %v1612_v30 }
 0x3b1   : > { %v1611_v38 = vmul.f32 0.2, %v1599_v33  ;;  %v1614_v42 = vmax.f32 %v1596_v10, %v1610_v32 }
 0x3b2   : > { %v1617_v35 = vmax.f32 %v1607_v31, %v1613_v37 }
 0x3b3   : > { %v1615_v44 = vmax.f32 %v1599_v33, %v1611_v38 }
 0x3b4   : > { %v1619_v36 = vpack.c.bf16 %v1617_v35, %v1616_v39 }
 0x3b5   : > { %v1618_v41 = vpack.c.bf16 %v1615_v44, %v1614_v42 }
 0x3b7   : > { %2144 = vmatprep.mubr.msk.bf16.mxu1 %vm566_vm3, %v1618_v41 }
 0x3b8   : > { %2145 = vmatmul.mubr.msk.bf16.vlgmr.msra.gmra.mrb[32].mxu1 %vm566_vm3, %v1619_v36 }
 0x483   : > { %v2128_v43 = vpop.f32.mrb[28].mxu0 }
 0x484   : > { %v1518_v45 = vadd.f32 %v2128_v43, %v2426_v51  ;;  %v1509_v47 = vpop.f32.mrb[29].mxu0 }
 0x485   : > { %v1510_v49 = vadd.f32 %v2426_v51, %v1509_v47  ;;  %v2129_v50 = vpop.f32.mrb[30].mxu0 }
 0x486   : > { %v1526_v53 = vmul.f32 0.2, %v1518_v45  ;;  %v1521_v54 = vadd.f32 %v2129_v50, %v2426_v51  ;;  %v1512_v56 = vpop.f32.mrb[31].mxu0 }
 0x487   : > { %v1524_v58 = vmul.f32 0.2, %v1510_v49  ;;  %v1513_v59 = vadd.f32 %v2426_v51, %v1512_v56 }
 0x488   : > { %v1530_v60 = vmax.f32 %v1518_v45, %v1526_v53  ;;  %v1527_v63 = vmul.f32 0.2, %v1521_v54 }
 0x489   : > { %v1528_v1 = vmax.f32 %v1510_v49, %v1524_v58  ;;  %v1525_v0 = vmul.f32 0.2, %v1513_v59 }
 0x48a   : > { %v1534_v40 = vmax.f32 %v1383_v21, %v1530_v60  ;;  %v1531_v5 = vmax.f32 %v1521_v54, %v1527_v63 }
 0x48b   : > { %v1532_v6 = vmax.f32 %v1381_v24, %v1528_v1  ;;  %v1529_v48 = vmax.f32 %v1513_v59, %v1525_v0  ;;  %v2146_v13 = vpop.f32.mrb[32].mxu1 }
 0x48c   : > { %v1535_v14 = vmax.f32 %v1384_v28, %v1531_v5  ;;  %v1669_v55 = vadd.f32 %v2146_v13, %v2426_v51  ;;  %v1660_v15 = vpop.f32.mrb[33].mxu1 }
 0x48d   : > { %v1533_v16 = vmax.f32 %v1382_v7, %v1529_v48  ;;  %v1661_v11 = vadd.f32 %v2426_v51, %v1660_v15  ;;  %v2147_v46 = vpop.f32.mrb[34].mxu1 }
 0x48e   : > { %v1677_v18 = vmul.f32 0.2, %v1669_v55  ;;  %v1672_v61 = vadd.f32 %v2147_v46, %v2426_v51  ;;  %v1663_v19 = vpop.f32.mrb[35].mxu1 }
 0x48f   : > { %v1675_v17 = vmul.f32 0.2, %v1661_v11  ;;  %v1664_v20 = vadd.f32 %v2426_v51, %v1663_v19 }
 0x490   : > { %v1681_v52 = vmax.f32 %v1669_v55, %v1677_v18  ;;  %v1678_v2 = vmul.f32 0.2, %v1672_v61 }
 0x491   : > { %v1679_v3 = vmax.f32 %v1661_v11, %v1675_v17  ;;  %v1676_v21 = vmul.f32 0.2, %v1664_v20 }
 0x492   : > { %v1685_v57 = vmax.f32 %v1534_v40, %v1681_v52  ;;  %v1682_v22 = vmax.f32 %v1672_v61, %v1678_v2 }
 0x493   : > { %v1683_v23 = vmax.f32 %v1532_v6, %v1679_v3  ;;  %v1680_v24 = vmax.f32 %v1664_v20, %v1676_v21 }
 0x494   : > { %v1921_v25 = vpack.c.bf16 %v1685_v57, %v1685_v57  ;;  %v1686_v26 = vmax.f32 %v1535_v14, %v1682_v22 }
 0x495   : > { %v1919_v62 = vpack.c.bf16 %v1683_v23, %v1683_v23  ;;  %v1684_v27 = vmax.f32 %v1533_v16, %v1680_v24 }
 0x496   : > { %1706 = vst.msk [vmem:[%s352_s13 + $0x8] sm:$0xf] %vm1703_vm4, %v1921_v25  ;;  %v1922_v51 = vpack.c.bf16 %v1686_v26, %v1686_v26 }
 0x497   : > { %1704 = vst.msk [vmem:[%s352_s13] sm:$0xf] %vm1703_vm4, %v1919_v62  ;;  %v1920_v28 = vpack.c.bf16 %v1684_v27, %v1684_v27 }
 0x498   : > { %1707 = vst.msk [vmem:[%s352_s13 + $0xc] sm:$0xf] %vm1703_vm4, %v1922_v51 }
 0x499   : > { %1705 = vst.msk [vmem:[%s352_s13 + $0x4] sm:$0xf] %vm1703_vm4, %v1920_v28 }
 0x49a PF: > { %s17_s26 = sadd.s32 1, %s2201_s26   ;;  %s2620_s24 = smov %s2197_s25 }
 0x49b   : > { %p14_p5 = scmp.ge.s32.totalorder %s17_s26, 4   ;;  %s2621_s25 = smov %s2623_s27 }
 0x49d   :  { %16 = sbr.rel (!%p14_p5) target bundleno = 2 (0x2), region = 88 }

// kernel: dgcnn_forward.10
= control target key start
LH: loop header
LB: loop body
LE: loop exit
PB: predicated region body
PF: predicated region fallthrough
CT: control target
= control target key end

     0   :  { %s2390_s24 = smov 0   ;;  %s2392_s25 = smov 0   ;;  %s2827_s0 = inlined_call_operand.vmem [shape: bf16[2,32,64], index: 0, kind: input, shape index: {}]   ;;  %s2828_s1 = inlined_call_operand.vmem [shape: bf16[2,8,32,64], index: 1, kind: input, shape index: {}]   ;;  %s2829_s2 = inlined_call_operand.vmem [shape: bf16[64,64], index: 2, kind: input, shape index: {}]   ;;  %s2830_s3 = inlined_call_operand.vmem [shape: bf16[64,64], index: 3, kind: input, shape index: {}]   ;;  %s2831_s4 = inlined_call_operand.vmem [shape: f32[1,64], index: 4, kind: input, shape index: {}]   ;;  %s2832_s5 = inlined_call_operand.vmem [shape: bf16[64,64], index: 5, kind: input, shape index: {}]   ;;  %s2833_s6 = inlined_call_operand.vmem [shape: f32[1,64], index: 6, kind: input, shape index: {}]   ;;  %s2834_s7 = inlined_call_operand.vmem [shape: bf16[2,32,64], index: 7, kind: output, shape index: {}]  }
   0x1   :  { %s2394_s26 = smov 0  }
   0x2 LB: > { %s29_s27 = sadd.s32 1, %s2344_s25  ;;  %p1868_p0 = scmp.ge.s32.totalorder %s2348_s26, 1  ;;  %s2348_s26 = sphi %s2394_s26, %s17_s26   ;;  %s2344_s25 = sphi %s2392_s25, %s2836_s25   ;;  %s2340_s24 = sphi %s2390_s24, %s2835_s24  }
   0x3   : > { %p31_p1 = scmp.ge.s32.totalorder %s29_s27, 2  ;;  %p275_p2 = scmp.lt.s32.totalorder %s2348_s26, 3 }
   0x5   : > { %s2838_s27 = smov (%p31_p1, %s29_s27), 0  ;;  %p276_p3 = pnand %p1868_p0, %p275_p2 }
   0x6   : > { %v2312_v0 = vld [vmem:[%s2830_s3] sm:$0xff] (!%p276_p3)   ;;  %p325_p4 = scmp.lt.s32.totalorder (!%p276_p3), %s2340_s24, 1  ;;  %v2314_v2 = vld [vmem:[%s2830_s3 + $0x8] sm:$0xff] (!%p276_p3)   ;;  %v2316_v4 = vld [vmem:[%s2830_s3 + $0x10] sm:$0xff] (!%p276_p3)   ;;  %vm425_vm0 = vcmask (!%p276_p3), 523264   ;;  %vm1754_vm1 = vcmask (!%p276_p3), 519168  }
   0x7   : > { %279 = sbr.rel (%p276_p3) target bundleno = 587 (0x24b), region = 48  ;;  %v2414_v1 = vld [vmem:[%s2829_s2] sm:$0xff] (!%p276_p3)   ;;  %2084 = vmatprep.subr.bf16.mxu0 (!%p276_p3), %v2312_v0  ;;  %v2425_v3 = vld [vmem:[%s2829_s2 + $0x8] sm:$0xff] (!%p276_p3)   ;;  %v2436_v5 = vld [vmem:[%s2829_s2 + $0x10] sm:$0xff] (!%p276_p3)  }
   0x8   : > { %2096 = vmatprep.subr.bf16.mxu1 (!%p276_p3), %v2414_v1  ;;  %2085 = vmatpush3.bf16.msra.mxu0 (!%p276_p3), %v2312_v0  ;;  %v2318_v6 = vld [vmem:[%s2830_s3 + $0x18] sm:$0xff] (!%p276_p3)   ;;  %v2524_v55 = vld [vmem:[%s2832_s5] sm:$0xff] (!%p276_p3)  }
   0x9   : > { %2097 = vmatpush3.bf16.msra.mxu1 (!%p276_p3), %v2414_v1  ;;  %2086 = vmatprep.subr.bf16.mxu0 (!%p276_p3), %v2314_v2  ;;  %v2455_v7 = vld [vmem:[%s2829_s2 + $0x18] sm:$0xff] (!%p276_p3)  }
   0xa   : > { %2098 = vmatprep.subr.bf16.mxu1 (!%p276_p3), %v2425_v3 }
   0xc   : > { %2087 = vmatpush3.bf16.msra.mxu0 (!%p276_p3), %v2314_v2 }
   0xd   : > { %2099 = vmatpush3.bf16.msra.mxu1 (!%p276_p3), %v2425_v3  ;;  %2088 = vmatprep.subr.bf16.mxu0 (!%p276_p3), %v2316_v4 }
   0xe   : > { %s2840_s24 = smov (!%p325_p4, %s2340_s24), 1  ;;  %2100 = vmatprep.subr.bf16.mxu1 %v2436_v5 }
   0xf   : > { %s1975_s15 = sshll.u32 %s2840_s24, 4  ;;  %s1976_s21 = sshll.u32 %s2840_s24, 7 }
  0x10   : > { %s332_s20 = scalar_lea.vmem %s2827_s0, %s1975_s15  ;;  %s2450_s30 = scalar_lea.vmem %s2828_s1, %s1976_s21  ;;  %2089 = vmatpush3.bf16.msra.mxu0 %v2316_v4 }
  0x11   : > { %v2458_v8 = vld [vmem:[%s332_s20] sm:$0xf]  ;;  %v2460_v9 = vld [vmem:[%s332_s20 + $0x4] sm:$0xf]  ;;  %v2468_v14 = vld [vmem:[%s332_s20 + $0x8] sm:$0xf]  ;;  %2101 = vmatpush3.bf16.msra.mxu1 %v2436_v5  ;;  %2090 = vmatprep.subr.bf16.mxu0 %v2318_v6  ;;  %s352_s29 = scalar_lea.vmem %s2834_s7, %s1975_s15 }
  0x12   : > { %v481_v10 = vld [vmem:[%s2450_s30] sm:$0xf]  ;;  %v1876_v11 = vcombine.low %v2458_v8, %v2460_v9  ;;  %v482_v12 = vld [vmem:[%s2450_s30 + $0x4] sm:$0xf]  ;;  %v2470_v15 = vld [vmem:[%s332_s20 + $0xc] sm:$0xf]  ;;  %2102 = vmatprep.subr.bf16.mxu1 %v2455_v7 }
  0x13   : > { %v485_v13 = vsub.bf16 %v481_v10, %v2458_v8  ;;  %v486_v16 = vsub.bf16 %v482_v12, %v2460_v9  ;;  %v483_v17 = vld [vmem:[%s2450_s30 + $0x8] sm:$0xf]  ;;  %v484_v18 = vld [vmem:[%s2450_s30 + $0xc] sm:$0xf]  ;;  %v1899_v19 = vld [vmem:[%s2450_s30 + $0x10] sm:$0xf]  ;;  %v1877_v26 = vcombine.low %v2468_v14, %v2470_v15 }
  0x14   : > { %2092 = vmatprep.mubr.msk.bf16.mxu0 %vm425_vm0, %v1876_v11  ;;  %v487_v20 = vsub.bf16 %v483_v17, %v2468_v14  ;;  %v488_v21 = vsub.bf16 %v484_v18, %v2470_v15  ;;  %v1900_v22 = vld [vmem:[%s2450_s30 + $0x14] sm:$0xf]  ;;  %v686_v24 = vsub.bf16 %v1899_v19, %v2458_v8  ;;  %2091 = vmatpush3.bf16.msra.mxu0 %v2318_v6  ;;  %v1931_v28 = vld [vmem:[%s2450_s30 + $0x48] sm:$0xf]  ;;  %v1932_v29 = vld [vmem:[%s2450_s30 + $0x4c] sm:$0xf] }
  0x15   : > { %v1884_v23 = vcombine.low %v485_v13, %v486_v16  ;;  %v687_v25 = vsub.bf16 %v1900_v22, %v2460_v9  ;;  %2103 = vmatpush3.bf16.msra.mxu1 %v2455_v7  ;;  %v1939_v31 = vld [vmem:[%s2450_s30 + $0x50] sm:$0xf]  ;;  %v1940_v32 = vld [vmem:[%s2450_s30 + $0x54] sm:$0xf]  ;;  %v1941_v33 = vld [vmem:[%s2450_s30 + $0x58] sm:$0xf]  ;;  %v1141_v34 = vsub.bf16 %v1931_v28, %v2468_v14  ;;  %v1142_v35 = vsub.bf16 %v1932_v29, %v2470_v15 }
  0x16   : > { %v1885_v27 = vcombine.low %v487_v20, %v488_v21  ;;  %2120 = vmatprep.subr.bf16.mxu1 %v2414_v1  ;;  %v1290_v36 = vsub.bf16 %v1939_v31, %v2458_v8  ;;  %v1942_v37 = vld [vmem:[%s2450_s30 + $0x5c] sm:$0xf]  ;;  %v1949_v38 = vld [vmem:[%s2450_s30 + $0x60] sm:$0xf]  ;;  %v1950_v39 = vld [vmem:[%s2450_s30 + $0x64] sm:$0xf]  ;;  %v1291_v40 = vsub.bf16 %v1940_v32, %v2460_v9  ;;  %v1292_v41 = vsub.bf16 %v1941_v33, %v2468_v14 }
  0x17   : > { %2104 = vmatprep.mubr.msk.bf16.mxu1 %vm425_vm0, %v1884_v23  ;;  %v1903_v30 = vcombine.low %v686_v24, %v687_v25  ;;  %2093 = vmatmul.mubr.msk.bf16.vlgmr.msra.gmra.mrb[0].mxu0 %vm425_vm0, %v1877_v26  ;;  %v1951_v42 = vld [vmem:[%s2450_s30 + $0x68] sm:$0xf]  ;;  %v1952_v43 = vld [vmem:[%s2450_s30 + $0x6c] sm:$0xf]  ;;  %v1959_v44 = vld [vmem:[%s2450_s30 + $0x70] sm:$0xf]  ;;  %v2507_v45 = vcombine.low %v1141_v34, %v1142_v35  ;;  %v1293_v46 = vsub.bf16 %v1942_v37, %v2470_v15 }
  0x18   : > { %2105 = vmatmul.mubr.msk.bf16.vlgmr.msra.gmra.mrb[0].mxu1 %vm425_vm0, %v1885_v27  ;;  %v1441_v47 = vsub.bf16 %v1949_v38, %v2458_v8  ;;  %v1442_v48 = vsub.bf16 %v1950_v39, %v2460_v9  ;;  %v1960_v49 = vld [vmem:[%s2450_s30 + $0x74] sm:$0xf]  ;;  %v1961_v50 = vld [vmem:[%s2450_s30 + $0x78] sm:$0xf]  ;;  %v1962_v51 = vld [vmem:[%s2450_s30 + $0x7c] sm:$0xf]  ;;  %v2517_v52 = vcombine.low %v1290_v36, %v1291_v40  ;;  %v1443_v53 = vsub.bf16 %v1951_v42, %v2468_v14 }
  0x19   : > { %2121 = vmatpush3.bf16.msra.mxu1 %v2414_v1  ;;  %2128 = vmatprep.mubr.msk.bf16.mxu1 %vm425_vm0, %v1903_v30  ;;  %v1444_v54 = vsub.bf16 %v1952_v43, %v2470_v15  ;;  %v2527_v56 = vcombine.low %v1292_v41, %v1293_v46  ;;  %v1592_v58 = vsub.bf16 %v1959_v44, %v2458_v8  ;;  %v1901_v0 = vld [vmem:[%s2450_s30 + $0x18] sm:$0xf]  ;;  %v1902_v2 = vld [vmem:[%s2450_s30 + $0x1c] sm:$0xf]  ;;  %v1909_v6 = vld [vmem:[%s2450_s30 + $0x20] sm:$0xf] }
  0x1a   : > { %2122 = vmatprep.subr.bf16.mxu1 %v2425_v3  ;;  %v2529_v57 = vcombine.low %v1441_v47, %v1442_v48  ;;  %v1593_v59 = vsub.bf16 %v1960_v49, %v2460_v9  ;;  %v1594_v61 = vsub.bf16 %v1961_v50, %v2468_v14  ;;  %v1595_v62 = vsub.bf16 %v1962_v51, %v2470_v15  ;;  %v1910_v10 = vld [vmem:[%s2450_s30 + $0x24] sm:$0xf]  ;;  %v1911_v19 = vld [vmem:[%s2450_s30 + $0x28] sm:$0xf]  ;;  %v1912_v20 = vld [vmem:[%s2450_s30 + $0x2c] sm:$0xf] }
  0x1b   : > { %v2533_v60 = vcombine.low %v1443_v53, %v1444_v54  ;;  %2108 = vmatprep.subr.bf16.mxu0 %v2524_v55  ;;  %v688_v11 = vsub.bf16 %v1901_v0, %v2468_v14  ;;  %v689_v12 = vsub.bf16 %v1902_v2, %v2470_v15  ;;  %v837_v13 = vsub.bf16 %v1909_v6, %v2458_v8  ;;  %v1919_v21 = vld [vmem:[%s2450_s30 + $0x30] sm:$0xf]  ;;  %v1920_v22 = vld [vmem:[%s2450_s30 + $0x34] sm:$0xf]  ;;  %v1921_v29 = vld [vmem:[%s2450_s30 + $0x38] sm:$0xf] }
  0x1c   : > { %v2538_v63 = vcombine.low %v1592_v58, %v1593_v59  ;;  %2109 = vmatpush3.bf16.msra.mxu0 %v2524_v55  ;;  %v2544_v4 = vcombine.low %v1594_v61, %v1595_v62  ;;  %v838_v16 = vsub.bf16 %v1910_v10, %v2460_v9  ;;  %v839_v23 = vsub.bf16 %v1911_v19, %v2468_v14  ;;  %v1922_v30 = vld [vmem:[%s2450_s30 + $0x3c] sm:$0xf]  ;;  %v1929_v31 = vld [vmem:[%s2450_s30 + $0x40] sm:$0xf]  ;;  %v1930_v32 = vld [vmem:[%s2450_s30 + $0x44] sm:$0xf] }
  0x1d   : > { %2123 = vmatpush3.bf16.msra.mxu1 %v2425_v3  ;;  %v1904_v17 = vcombine.low %v688_v11, %v689_v12  ;;  %v840_v24 = vsub.bf16 %v1912_v20, %v2470_v15  ;;  %v988_v25 = vsub.bf16 %v1919_v21, %v2458_v8  ;;  %v989_v26 = vsub.bf16 %v1920_v22, %v2460_v9 }
  0x1e   : > { %2124 = vmatprep.subr.bf16.mxu1 %v2436_v5  ;;  %v1913_v18 = vcombine.low %v837_v13, %v838_v16  ;;  %v990_v33 = vsub.bf16 %v1921_v29, %v2468_v14  ;;  %v991_v34 = vsub.bf16 %v1922_v30, %v2470_v15  ;;  %v1139_v35 = vsub.bf16 %v1929_v31, %v2458_v8  ;;  %v2624_v8 = vld [vmem:[%s2832_s5 + $0x8] sm:$0xff]   ;;  %v2642_v14 = vld [vmem:[%s2832_s5 + $0x18] sm:$0xff]  }
  0x1f   : > { %v1914_v27 = vcombine.low %v839_v23, %v840_v24  ;;  %v1923_v28 = vcombine.low %v988_v25, %v989_v26  ;;  %v1140_v36 = vsub.bf16 %v1930_v32, %v2460_v9  ;;  %2110 = vmatprep.subr.bf16.mxu0 %v2624_v8  ;;  %v2633_v9 = vld [vmem:[%s2832_s5 + $0x10] sm:$0xff]  }
  0x20   : > { %v1924_v37 = vcombine.low %v990_v33, %v991_v34  ;;  %2111 = vmatpush3.bf16.msra.mxu0 %v2624_v8 }
  0x21   : > { %2125 = vmatpush3.bf16.msra.mxu1 %v2436_v5  ;;  %v1933_v38 = vcombine.low %v1139_v35, %v1140_v36  ;;  %2112 = vmatprep.subr.bf16.mxu0 %v2633_v9 }
  0x22   : > { %2126 = vmatprep.subr.bf16.mxu1 %v2455_v7 }
  0x24   : > { %2113 = vmatpush3.bf16.msra.mxu0 %v2633_v9 }
  0x25   : > { %2127 = vmatpush3.bf16.msra.mxu1 %v2455_v7  ;;  %2114 = vmatprep.subr.bf16.mxu0 %v2642_v14 }
  0x26   : > { %2144 = vmatprep.subr.bf16.mxu1 %v2414_v1 }
  0x28   : > { %2129 = vmatmul.mubr.msk.bf16.vlgmr.msra.gmra.mrb[4].mxu1 %vm425_vm0, %v1904_v17  ;;  %2115 = vmatpush3.bf16.msra.mxu0 %v2642_v14 }
  0x29   : > { %2145 = vmatpush3.bf16.msra.mxu1 %v2414_v1  ;;  %2152 = vmatprep.mubr.msk.bf16.mxu1 %vm425_vm0, %v1913_v18 }
  0x2a   : > { %2146 = vmatprep.subr.bf16.mxu1 %v2425_v3  ;;  %2132 = vmatprep.subr.bf16.mxu0 %v2524_v55 }
  0x2d   : > { %2147 = vmatpush3.bf16.msra.mxu1 %v2425_v3 }
  0x2e   : > { %2148 = vmatprep.subr.bf16.mxu1 %v2436_v5 }
  0x31   : > { %2149 = vmatpush3.bf16.msra.mxu1 %v2436_v5 }
  0x32   : > { %2150 = vmatprep.subr.bf16.mxu1 %v2455_v7 }
  0x35   : > { %2151 = vmatpush3.bf16.msra.mxu1 %v2455_v7 }
  0x36   : > { %2168 = vmatprep.subr.bf16.mxu1 %v2414_v1 }
  0x38   : > { %2153 = vmatmul.mubr.msk.bf16.vlgmr.msra.gmra.mrb[8].mxu1 %vm425_vm0, %v1914_v27 }
  0x39   : > { %2169 = vmatpush3.bf16.msra.mxu1 %v2414_v1  ;;  %2176 = vmatprep.mubr.msk.bf16.mxu1 %vm425_vm0, %v1923_v28 }
  0x3a   : > { %2170 = vmatprep.subr.bf16.mxu1 %v2425_v3 }
  0x3d   : > { %2171 = vmatpush3.bf16.msra.mxu1 %v2425_v3 }
  0x3e   : > { %2172 = vmatprep.subr.bf16.mxu1 %v2436_v5 }
  0x41   : > { %2173 = vmatpush3.bf16.msra.mxu1 %v2436_v5 }
  0x42   : > { %2174 = vmatprep.subr.bf16.mxu1 %v2455_v7 }
  0x45   : > { %2175 = vmatpush3.bf16.msra.mxu1 %v2455_v7 }
  0x46   : > { %2192 = vmatprep.subr.bf16.mxu1 %v2414_v1 }
  0x48   : > { %2177 = vmatmul.mubr.msk.bf16.vlgmr.msra.gmra.mrb[12].mxu1 %vm425_vm0, %v1924_v37 }
  0x49   : > { %2193 = vmatpush3.bf16.msra.mxu1 %v2414_v1  ;;  %2200 = vmatprep.mubr.msk.bf16.mxu1 %vm425_vm0, %v1933_v38 }
  0x4a   : > { %2194 = vmatprep.subr.bf16.mxu1 %v2425_v3 }
  0x4d   : > { %2195 = vmatpush3.bf16.msra.mxu1 %v2425_v3 }
  0x4e   : > { %2196 = vmatprep.subr.bf16.mxu1 %v2436_v5 }
  0x51   : > { %2197 = vmatpush3.bf16.msra.mxu1 %v2436_v5 }
  0x52   : > { %2198 = vmatprep.subr.bf16.mxu1 %v2455_v7 }
  0x55   : > { %2199 = vmatpush3.bf16.msra.mxu1 %v2455_v7 }
  0x56   : > { %2216 = vmatprep.subr.bf16.mxu1 %v2414_v1 }
  0x58   : > { %2201 = vmatmul.mubr.msk.bf16.vlgmr.msra.gmra.mrb[16].mxu1 %vm425_vm0, %v2507_v45 }
  0x59   : > { %2217 = vmatpush3.bf16.msra.mxu1 %v2414_v1  ;;  %2224 = vmatprep.mubr.msk.bf16.mxu1 %vm425_vm0, %v2517_v52 }
  0x5a   : > { %2218 = vmatprep.subr.bf16.mxu1 %v2425_v3 }
  0x5d   : > { %2219 = vmatpush3.bf16.msra.mxu1 %v2425_v3 }
  0x5e   : > { %2220 = vmatprep.subr.bf16.mxu1 %v2436_v5 }
  0x61   : > { %2221 = vmatpush3.bf16.msra.mxu1 %v2436_v5 }
  0x62   : > { %2222 = vmatprep.subr.bf16.mxu1 %v2455_v7 }
  0x65   : > { %2223 = vmatpush3.bf16.msra.mxu1 %v2455_v7 }
  0x66   : > { %2240 = vmatprep.subr.bf16.mxu1 %v2414_v1 }
  0x68   : > { %2225 = vmatmul.mubr.msk.bf16.vlgmr.msra.gmra.mrb[20].mxu1 %vm425_vm0, %v2527_v56 }
  0x69   : > { %2241 = vmatpush3.bf16.msra.mxu1 %v2414_v1  ;;  %2248 = vmatprep.mubr.msk.bf16.mxu1 %vm425_vm0, %v2529_v57 }
  0x6a   : > { %2242 = vmatprep.subr.bf16.mxu1 %v2425_v3 }
  0x6d   : > { %2243 = vmatpush3.bf16.msra.mxu1 %v2425_v3 }
  0x6e   : > { %2244 = vmatprep.subr.bf16.mxu1 %v2436_v5 }
  0x71   : > { %2245 = vmatpush3.bf16.msra.mxu1 %v2436_v5 }
  0x72   : > { %2246 = vmatprep.subr.bf16.mxu1 %v2455_v7 }
  0x75   : > { %2247 = vmatpush3.bf16.msra.mxu1 %v2455_v7 }
  0x76   : > { %2264 = vmatprep.subr.bf16.mxu1 %v2414_v1 }
  0x78   : > { %2249 = vmatmul.mubr.msk.bf16.vlgmr.msra.gmra.mrb[24].mxu1 %vm425_vm0, %v2533_v60 }
  0x79   : > { %2265 = vmatpush3.bf16.msra.mxu1 %v2414_v1  ;;  %2272 = vmatprep.mubr.msk.bf16.mxu1 %vm425_vm0, %v2538_v63  ;;  %v1875_v1 = vld [vmem:[%s2831_s4] ss:$0 sm:$0xff] }
  0x7a   : > { %2266 = vmatprep.subr.bf16.mxu1 %v2425_v3 }
  0x7d   : > { %2267 = vmatpush3.bf16.msra.mxu1 %v2425_v3 }
  0x7e   : > { %2268 = vmatprep.subr.bf16.mxu1 %v2436_v5 }
  0x81   : > { %2269 = vmatpush3.bf16.msra.mxu1 %v2436_v5 }
  0x82   : > { %2270 = vmatprep.subr.bf16.mxu1 %v2455_v7 }
  0x85   : > { %2271 = vmatpush3.bf16.msra.mxu1 %v2455_v7 }
  0x88   : > { %2273 = vmatmul.mubr.msk.bf16.vlgmr.msra.gmra.mrb[28].mxu1 %vm425_vm0, %v2544_v4 }
  0xea   : > { %v2094_v15 = vpop.f32.mrb[0].mxu0 }
  0xeb   : > { %v2665_v39 = vadd.f32 %v2094_v15, %v1875_v1  ;;  %v2106_v40 = vpop.f32.mrb[0].mxu1  ;;  %v466_v3 = vpop.f32.mrb[1].mxu0 }
  0xec   : > { %v2667_v41 = vadd.f32 %v1875_v1, %v466_v3  ;;  %v563_v42 = vpop.f32.mrb[1].mxu1  ;;  %v2095_v5 = vpop.f32.mrb[2].mxu0 }
  0xed   : > { %v572_v43 = vadd.f32 %v2106_v40, %v2665_v39  ;;  %v2670_v44 = vadd.f32 %v2095_v5, %v1875_v1  ;;  %v2107_v7 = vpop.f32.mrb[2].mxu1  ;;  %v469_v45 = vpop.f32.mrb[3].mxu0 }
  0xee   : > { %v564_v46 = vadd.f32 %v563_v42, %v2667_v41  ;;  %v2673_v47 = vadd.f32 %v1875_v1, %v469_v45  ;;  %v566_v48 = vpop.f32.mrb[3].mxu1 }
  0xef   : > { %v580_v49 = vmul.f32 0.2, %v572_v43  ;;  %v575_v50 = vadd.f32 %v2107_v7, %v2670_v44 }
  0xf0   : > { %v578_v51 = vmul.f32 0.2, %v564_v46  ;;  %v567_v52 = vadd.f32 %v566_v48, %v2673_v47 }
  0xf1   : > { %v581_v53 = vmul.f32 0.2, %v575_v50  ;;  %v584_v56 = vmax.f32 %v572_v43, %v580_v49 }
  0xf2   : > { %v579_v54 = vmul.f32 0.2, %v567_v52  ;;  %v582_v58 = vmax.f32 %v564_v46, %v578_v51 }
  0xf3   : > { %v585_v57 = vmax.f32 %v575_v50, %v581_v53 }
  0xf4   : > { %v583_v59 = vmax.f32 %v567_v52, %v579_v54 }
  0xf5   : > { %v587_v60 = vpack.c.bf16 %v585_v57, %v584_v56 }
  0xf6   : > { %v586_v61 = vpack.c.bf16 %v583_v59, %v582_v58 }
  0xf8   : > { %2116 = vmatprep.mubr.msk.bf16.mxu0 %vm425_vm0, %v586_v61 }
  0xf9   : > { %2117 = vmatmul.mubr.msk.bf16.vlgmr.msra.gmra.mrb[4].mxu0 %vm425_vm0, %v587_v60 }
  0xfa   : > { %2133 = vmatpush3.bf16.msra.mxu0 %v2524_v55 }
  0xfb   : > { %v2130_v62 = vpop.f32.mrb[4].mxu1  ;;  %2134 = vmatprep.subr.bf16.mxu0 %v2624_v8 }
  0xfc   : > { %v749_v63 = vadd.f32 %v2130_v62, %v2665_v39  ;;  %v740_v0 = vpop.f32.mrb[5].mxu1 }
  0xfd   : > { %v741_v2 = vadd.f32 %v740_v0, %v2667_v41  ;;  %v2131_v4 = vpop.f32.mrb[6].mxu1 }
  0xfe   : > { %v757_v6 = vmul.f32 0.2, %v749_v63  ;;  %v752_v10 = vadd.f32 %v2131_v4, %v2670_v44  ;;  %v743_v11 = vpop.f32.mrb[7].mxu1  ;;  %2135 = vmatpush3.bf16.msra.mxu0 %v2624_v8 }
  0xff   : > { %v755_v12 = vmul.f32 0.2, %v741_v2  ;;  %v744_v13 = vadd.f32 %v743_v11, %v2673_v47  ;;  %2136 = vmatprep.subr.bf16.mxu0 %v2633_v9 }
 0x100   : > { %v758_v16 = vmul.f32 0.2, %v752_v10  ;;  %v761_v18 = vmax.f32 %v749_v63, %v757_v6 }
 0x101   : > { %v756_v17 = vmul.f32 0.2, %v744_v13  ;;  %v759_v20 = vmax.f32 %v741_v2, %v755_v12 }
 0x102   : > { %v762_v19 = vmax.f32 %v752_v10, %v758_v16  ;;  %2137 = vmatpush3.bf16.msra.mxu0 %v2633_v9 }
 0x103   : > { %v760_v21 = vmax.f32 %v744_v13, %v756_v17  ;;  %2138 = vmatprep.subr.bf16.mxu0 %v2642_v14 }
 0x104   : > { %v764_v22 = vpack.c.bf16 %v762_v19, %v761_v18 }
 0x105   : > { %v763_v23 = vpack.c.bf16 %v760_v21, %v759_v20 }
 0x106   : > { %2139 = vmatpush3.bf16.msra.mxu0 %v2642_v14 }
 0x107   : > { %2140 = vmatprep.mubr.msk.bf16.mxu0 %vm425_vm0, %v763_v23  ;;  %2156 = vmatprep.subr.bf16.mxu0 %v2524_v55 }
 0x109   : > { %2141 = vmatmul.mubr.msk.bf16.vlgmr.msra.gmra.mrb[8].mxu0 %vm425_vm0, %v764_v22 }
 0x10a   : > { %2157 = vmatpush3.bf16.msra.mxu0 %v2524_v55 }
 0x10b   : > { %v2154_v24 = vpop.f32.mrb[8].mxu1  ;;  %2158 = vmatprep.subr.bf16.mxu0 %v2624_v8 }
 0x10c   : > { %v900_v25 = vadd.f32 %v2154_v24, %v2665_v39  ;;  %v891_v26 = vpop.f32.mrb[9].mxu1 }
 0x10d   : > { %v892_v27 = vadd.f32 %v891_v26, %v2667_v41  ;;  %v2155_v28 = vpop.f32.mrb[10].mxu1 }
 0x10e   : > { %v908_v29 = vmul.f32 0.2, %v900_v25  ;;  %v903_v30 = vadd.f32 %v2155_v28, %v2670_v44  ;;  %v894_v31 = vpop.f32.mrb[11].mxu1  ;;  %2159 = vmatpush3.bf16.msra.mxu0 %v2624_v8 }
 0x10f   : > { %v906_v32 = vmul.f32 0.2, %v892_v27  ;;  %v895_v33 = vadd.f32 %v894_v31, %v2673_v47  ;;  %2160 = vmatprep.subr.bf16.mxu0 %v2633_v9 }
 0x110   : > { %v909_v34 = vmul.f32 0.2, %v903_v30  ;;  %v912_v36 = vmax.f32 %v900_v25, %v908_v29 }
 0x111   : > { %v907_v35 = vmul.f32 0.2, %v895_v33  ;;  %v910_v38 = vmax.f32 %v892_v27, %v906_v32 }
 0x112   : > { %v913_v37 = vmax.f32 %v903_v30, %v909_v34  ;;  %2161 = vmatpush3.bf16.msra.mxu0 %v2633_v9 }
 0x113   : > { %v911_v1 = vmax.f32 %v895_v33, %v907_v35  ;;  %2162 = vmatprep.subr.bf16.mxu0 %v2642_v14 }
 0x114   : > { %v915_v15 = vpack.c.bf16 %v913_v37, %v912_v36 }
 0x115   : > { %v914_v40 = vpack.c.bf16 %v911_v1, %v910_v38 }
 0x116   : > { %2163 = vmatpush3.bf16.msra.mxu0 %v2642_v14 }
 0x117   : > { %2164 = vmatprep.mubr.msk.bf16.mxu0 %vm425_vm0, %v914_v40  ;;  %2180 = vmatprep.subr.bf16.mxu0 %v2524_v55 }
 0x119   : > { %2165 = vmatmul.mubr.msk.bf16.vlgmr.msra.gmra.mrb[12].mxu0 %vm425_vm0, %v915_v15 }
 0x11a   : > { %2181 = vmatpush3.bf16.msra.mxu0 %v2524_v55 }
 0x11b   : > { %v2178_v3 = vpop.f32.mrb[12].mxu1  ;;  %2182 = vmatprep.subr.bf16.mxu0 %v2624_v8 }
 0x11c   : > { %v1051_v42 = vadd.f32 %v2178_v3, %v2665_v39  ;;  %v1042_v5 = vpop.f32.mrb[13].mxu1 }
 0x11d   : > { %v1043_v43 = vadd.f32 %v1042_v5, %v2667_v41  ;;  %v2179_v7 = vpop.f32.mrb[14].mxu1 }
 0x11e   : > { %v1059_v45 = vmul.f32 0.2, %v1051_v42  ;;  %v1054_v46 = vadd.f32 %v2179_v7, %v2670_v44  ;;  %v1045_v48 = vpop.f32.mrb[15].mxu1  ;;  %2183 = vmatpush3.bf16.msra.mxu0 %v2624_v8 }
 0x11f   : > { %v1057_v49 = vmul.f32 0.2, %v1043_v43  ;;  %v1046_v50 = vadd.f32 %v1045_v48, %v2673_v47  ;;  %2184 = vmatprep.subr.bf16.mxu0 %v2633_v9 }
 0x120   : > { %v1060_v51 = vmul.f32 0.2, %v1054_v46  ;;  %v1063_v53 = vmax.f32 %v1051_v42, %v1059_v45 }
 0x121   : > { %v1058_v52 = vmul.f32 0.2, %v1046_v50  ;;  %v1061_v56 = vmax.f32 %v1043_v43, %v1057_v49 }
 0x122   : > { %v1064_v54 = vmax.f32 %v1054_v46, %v1060_v51  ;;  %2185 = vmatpush3.bf16.msra.mxu0 %v2633_v9 }
 0x123   : > { %v1062_v57 = vmax.f32 %v1046_v50, %v1058_v52  ;;  %2186 = vmatprep.subr.bf16.mxu0 %v2642_v14 }
 0x124   : > { %v1066_v58 = vpack.c.bf16 %v1064_v54, %v1063_v53 }
 0x125   : > { %v1065_v59 = vpack.c.bf16 %v1062_v57, %v1061_v56 }
 0x126   : > { %2187 = vmatpush3.bf16.msra.mxu0 %v2642_v14 }
 0x127   : > { %2188 = vmatprep.mubr.msk.bf16.mxu0 %vm425_vm0, %v1065_v59  ;;  %2204 = vmatprep.subr.bf16.mxu0 %v2524_v55 }
 0x129   : > { %2189 = vmatmul.mubr.msk.bf16.vlgmr.msra.gmra.mrb[16].mxu0 %vm425_vm0, %v1066_v58 }
 0x12a   : > { %2205 = vmatpush3.bf16.msra.mxu0 %v2524_v55 }
 0x12b   : > { %v2202_v60 = vpop.f32.mrb[16].mxu1  ;;  %2206 = vmatprep.subr.bf16.mxu0 %v2624_v8 }
 0x12c   : > { %v1202_v61 = vadd.f32 %v2202_v60, %v2665_v39  ;;  %v1193_v62 = vpop.f32.mrb[17].mxu1 }
 0x12d   : > { %v1194_v63 = vadd.f32 %v1193_v62, %v2667_v41  ;;  %v2203_v0 = vpop.f32.mrb[18].mxu1 }
 0x12e   : > { %v1210_v2 = vmul.f32 0.2, %v1202_v61  ;;  %v1205_v4 = vadd.f32 %v2203_v0, %v2670_v44  ;;  %v1196_v6 = vpop.f32.mrb[19].mxu1  ;;  %2207 = vmatpush3.bf16.msra.mxu0 %v2624_v8 }
 0x12f   : > { %v1208_v10 = vmul.f32 0.2, %v1194_v63  ;;  %v1197_v11 = vadd.f32 %v1196_v6, %v2673_v47  ;;  %2208 = vmatprep.subr.bf16.mxu0 %v2633_v9 }
 0x130   : > { %v1211_v12 = vmul.f32 0.2, %v1205_v4  ;;  %v1214_v16 = vmax.f32 %v1202_v61, %v1210_v2 }
 0x131   : > { %v1209_v13 = vmul.f32 0.2, %v1197_v11  ;;  %v1212_v18 = vmax.f32 %v1194_v63, %v1208_v10 }
 0x132   : > { %v1215_v17 = vmax.f32 %v1205_v4, %v1211_v12  ;;  %2209 = vmatpush3.bf16.msra.mxu0 %v2633_v9 }
 0x133   : > { %v1213_v19 = vmax.f32 %v1197_v11, %v1209_v13  ;;  %2210 = vmatprep.subr.bf16.mxu0 %v2642_v14 }
 0x134   : > { %v1217_v20 = vpack.c.bf16 %v1215_v17, %v1214_v16 }
 0x135   : > { %v1216_v21 = vpack.c.bf16 %v1213_v19, %v1212_v18 }
 0x136   : > { %2211 = vmatpush3.bf16.msra.mxu0 %v2642_v14 }
 0x137   : > { %2212 = vmatprep.mubr.msk.bf16.mxu0 %vm425_vm0, %v1216_v21  ;;  %2228 = vmatprep.subr.bf16.mxu0 %v2524_v55 }
 0x139   : > { %2213 = vmatmul.mubr.msk.bf16.vlgmr.msra.gmra.mrb[20].mxu0 %vm425_vm0, %v1217_v20 }
 0x13a   : > { %2229 = vmatpush3.bf16.msra.mxu0 %v2524_v55 }
 0x13b   : > { %v2226_v22 = vpop.f32.mrb[20].mxu1  ;;  %2230 = vmatprep.subr.bf16.mxu0 %v2624_v8 }
 0x13c   : > { %v1353_v23 = vadd.f32 %v2226_v22, %v2665_v39  ;;  %v1344_v24 = vpop.f32.mrb[21].mxu1 }
 0x13d   : > { %v1345_v25 = vadd.f32 %v1344_v24, %v2667_v41  ;;  %v2227_v26 = vpop.f32.mrb[22].mxu1 }
 0x13e   : > { %v1361_v27 = vmul.f32 0.2, %v1353_v23  ;;  %v1356_v28 = vadd.f32 %v2227_v26, %v2670_v44  ;;  %v1347_v29 = vpop.f32.mrb[23].mxu1  ;;  %2231 = vmatpush3.bf16.msra.mxu0 %v2624_v8 }
 0x13f   : > { %v1359_v30 = vmul.f32 0.2, %v1345_v25  ;;  %v1348_v31 = vadd.f32 %v1347_v29, %v2673_v47  ;;  %2232 = vmatprep.subr.bf16.mxu0 %v2633_v9 }
 0x140   : > { %v1362_v32 = vmul.f32 0.2, %v1356_v28  ;;  %v1365_v34 = vmax.f32 %v1353_v23, %v1361_v27 }
 0x141   : > { %v1360_v33 = vmul.f32 0.2, %v1348_v31  ;;  %v1363_v36 = vmax.f32 %v1345_v25, %v1359_v30 }
 0x142   : > { %v1366_v35 = vmax.f32 %v1356_v28, %v1362_v32  ;;  %2233 = vmatpush3.bf16.msra.mxu0 %v2633_v9 }
 0x143   : > { %v1364_v37 = vmax.f32 %v1348_v31, %v1360_v33  ;;  %2234 = vmatprep.subr.bf16.mxu0 %v2642_v14 }
 0x144   : > { %v1368_v38 = vpack.c.bf16 %v1366_v35, %v1365_v34 }
 0x145   : > { %v1367_v1 = vpack.c.bf16 %v1364_v37, %v1363_v36 }
 0x146   : > { %2235 = vmatpush3.bf16.msra.mxu0 %v2642_v14 }
 0x147   : > { %2236 = vmatprep.mubr.msk.bf16.mxu0 %vm425_vm0, %v1367_v1  ;;  %2252 = vmatprep.subr.bf16.mxu0 %v2524_v55 }
 0x149   : > { %2237 = vmatmul.mubr.msk.bf16.vlgmr.msra.gmra.mrb[24].mxu0 %vm425_vm0, %v1368_v38 }
 0x14a   : > { %2253 = vmatpush3.bf16.msra.mxu0 %v2524_v55 }
 0x14b   : > { %v2250_v15 = vpop.f32.mrb[24].mxu1  ;;  %2254 = vmatprep.subr.bf16.mxu0 %v2624_v8 }
 0x14c   : > { %v1504_v40 = vadd.f32 %v2250_v15, %v2665_v39  ;;  %v1495_v3 = vpop.f32.mrb[25].mxu1 }
 0x14d   : > { %v1496_v42 = vadd.f32 %v1495_v3, %v2667_v41  ;;  %v2251_v5 = vpop.f32.mrb[26].mxu1 }
 0x14e   : > { %v1512_v43 = vmul.f32 0.2, %v1504_v40  ;;  %v1507_v7 = vadd.f32 %v2251_v5, %v2670_v44  ;;  %v1498_v45 = vpop.f32.mrb[27].mxu1  ;;  %2255 = vmatpush3.bf16.msra.mxu0 %v2624_v8 }
 0x14f   : > { %v1510_v46 = vmul.f32 0.2, %v1496_v42  ;;  %v1499_v48 = vadd.f32 %v1498_v45, %v2673_v47  ;;  %2256 = vmatprep.subr.bf16.mxu0 %v2633_v9 }
 0x150   : > { %v1513_v49 = vmul.f32 0.2, %v1507_v7  ;;  %v1516_v51 = vmax.f32 %v1504_v40, %v1512_v43 }
 0x151   : > { %v1511_v50 = vmul.f32 0.2, %v1499_v48  ;;  %v1514_v53 = vmax.f32 %v1496_v42, %v1510_v46 }
 0x152   : > { %v1517_v52 = vmax.f32 %v1507_v7, %v1513_v49  ;;  %2257 = vmatpush3.bf16.msra.mxu0 %v2633_v9 }
 0x153   : > { %v1515_v54 = vmax.f32 %v1499_v48, %v1511_v50  ;;  %2258 = vmatprep.subr.bf16.mxu0 %v2642_v14 }
 0x154   : > { %v1519_v56 = vpack.c.bf16 %v1517_v52, %v1516_v51 }
 0x155   : > { %v1518_v57 = vpack.c.bf16 %v1515_v54, %v1514_v53 }
 0x156   : > { %2259 = vmatpush3.bf16.msra.mxu0 %v2642_v14 }
 0x157   : > { %2260 = vmatprep.mubr.msk.bf16.mxu0 %vm425_vm0, %v1518_v57  ;;  %2276 = vmatprep.subr.bf16.mxu0 %v2524_v55 }
 0x159   : > { %2261 = vmatmul.mubr.msk.bf16.vlgmr.msra.gmra.mrb[28].mxu0 %vm425_vm0, %v1519_v56 }
 0x15a   : > { %2277 = vmatpush3.bf16.msra.mxu0 %v2524_v55 }
 0x15b   : > { %v2274_v58 = vpop.f32.mrb[28].mxu1  ;;  %2278 = vmatprep.subr.bf16.mxu0 %v2624_v8 }
 0x15c   : > { %v1655_v59 = vadd.f32 %v2274_v58, %v2665_v39  ;;  %v1646_v60 = vpop.f32.mrb[29].mxu1 }
 0x15d   : > { %v1647_v61 = vadd.f32 %v1646_v60, %v2667_v41  ;;  %v2275_v62 = vpop.f32.mrb[30].mxu1 }
 0x15e   : > { %v1663_v63 = vmul.f32 0.2, %v1655_v59  ;;  %v1658_v0 = vadd.f32 %v2275_v62, %v2670_v44  ;;  %v1649_v2 = vpop.f32.mrb[31].mxu1  ;;  %2279 = vmatpush3.bf16.msra.mxu0 %v2624_v8 }
 0x15f   : > { %v1661_v4 = vmul.f32 0.2, %v1647_v61  ;;  %v1650_v6 = vadd.f32 %v1649_v2, %v2673_v47  ;;  %2280 = vmatprep.subr.bf16.mxu0 %v2633_v9 }
 0x160   : > { %v1664_v55 = vmul.f32 0.2, %v1658_v0  ;;  %v1667_v11 = vmax.f32 %v1655_v59, %v1663_v63 }
 0x161   : > { %v1662_v10 = vmul.f32 0.2, %v1650_v6  ;;  %v1665_v39 = vmax.f32 %v1647_v61, %v1661_v4 }
 0x162   : > { %v1668_v12 = vmax.f32 %v1658_v0, %v1664_v55  ;;  %2281 = vmatpush3.bf16.msra.mxu0 %v2633_v9  ;;  %v2779_v9 = vld [vmem:[%s2833_s6] ss:$0 sm:$0xff] }
 0x163   : > { %v1666_v41 = vmax.f32 %v1650_v6, %v1662_v10  ;;  %2282 = vmatprep.subr.bf16.mxu0 %v2642_v14 }
 0x164   : > { %v1670_v13 = vpack.c.bf16 %v1668_v12, %v1667_v11 }
 0x165   : > { %v1669_v44 = vpack.c.bf16 %v1666_v41, %v1665_v39 }
 0x166   : > { %2283 = vmatpush3.bf16.msra.mxu0 %v2642_v14 }
 0x167   : > { %2284 = vmatprep.mubr.msk.bf16.mxu0 %vm425_vm0, %v1669_v44 }
 0x169   : > { %2285 = vmatmul.mubr.msk.bf16.vlgmr.msra.gmra.mrb[32].mxu0 %vm425_vm0, %v1670_v13 }
 0x1cc   : > { %v2118_v8 = vpop.f32.mrb[4].mxu0 }
 0x1cd   : > { %v658_v47 = vpop.f32.mrb[5].mxu0  ;;  %v667_v18 = vadd.f32 %v2118_v8, %v2779_v9 }
 0x1ce   : > { %v2119_v16 = vpop.f32.mrb[6].mxu0  ;;  %v659_v19 = vadd.f32 %v2779_v9, %v658_v47 }
 0x1cf   : > { %v661_v17 = vpop.f32.mrb[7].mxu0  ;;  %v670_v20 = vadd.f32 %v2119_v16, %v2779_v9  ;;  %v675_v22 = vmul.f32 0.2, %v667_v18 }
 0x1d0   : > { %v662_v14 = vadd.f32 %v2779_v9, %v661_v17  ;;  %v673_v25 = vmul.f32 0.2, %v659_v19 }
 0x1d1   : > { %v676_v28 = vmul.f32 0.2, %v670_v20  ;;  %v679_v35 = vmax.f32 %v667_v18, %v675_v22 }
 0x1d2   : > { %v674_v32 = vmul.f32 0.2, %v662_v14  ;;  %v677_v38 = vmax.f32 %v659_v19, %v673_v25 }
 0x1d3   : > { %v680_v40 = vmax.f32 %v670_v20, %v676_v28 }
 0x1d4   : > { %v678_v5 = vmax.f32 %v662_v14, %v674_v32 }
 0x1dc   : > { %v2142_v21 = vpop.f32.mrb[8].mxu0 }
 0x1dd   : > { %v814_v23 = vadd.f32 %v2142_v21, %v2779_v9  ;;  %v805_v24 = vpop.f32.mrb[9].mxu0 }
 0x1de   : > { %v806_v26 = vadd.f32 %v2779_v9, %v805_v24  ;;  %v2143_v27 = vpop.f32.mrb[10].mxu0 }
 0x1df   : > { %v822_v29 = vmul.f32 0.2, %v814_v23  ;;  %v817_v30 = vadd.f32 %v2143_v27, %v2779_v9  ;;  %v808_v31 = vpop.f32.mrb[11].mxu0 }
 0x1e0   : > { %v820_v33 = vmul.f32 0.2, %v806_v26  ;;  %v809_v34 = vadd.f32 %v2779_v9, %v808_v31 }
 0x1e1   : > { %v826_v36 = vmax.f32 %v814_v23, %v822_v29  ;;  %v823_v37 = vmul.f32 0.2, %v817_v30 }
 0x1e2   : > { %v824_v1 = vmax.f32 %v806_v26, %v820_v33  ;;  %v821_v15 = vmul.f32 0.2, %v809_v34 }
 0x1e3   : > { %v830_v3 = vmax.f32 %v679_v35, %v826_v36  ;;  %v827_v42 = vmax.f32 %v817_v30, %v823_v37 }
 0x1e4   : > { %v828_v43 = vmax.f32 %v677_v38, %v824_v1  ;;  %v825_v7 = vmax.f32 %v809_v34, %v821_v15 }
 0x1e5   : > { %v831_v45 = vmax.f32 %v680_v40, %v827_v42 }
 0x1e6   : > { %v829_v46 = vmax.f32 %v678_v5, %v825_v7 }
 0x1ec   : > { %v2166_v48 = vpop.f32.mrb[12].mxu0 }
 0x1ed   : > { %v965_v49 = vadd.f32 %v2166_v48, %v2779_v9  ;;  %v956_v50 = vpop.f32.mrb[13].mxu0 }
 0x1ee   : > { %v957_v51 = vadd.f32 %v2779_v9, %v956_v50  ;;  %v2167_v52 = vpop.f32.mrb[14].mxu0 }
 0x1ef   : > { %v973_v53 = vmul.f32 0.2, %v965_v49  ;;  %v968_v54 = vadd.f32 %v2167_v52, %v2779_v9  ;;  %v959_v56 = vpop.f32.mrb[15].mxu0 }
 0x1f0   : > { %v971_v57 = vmul.f32 0.2, %v957_v51  ;;  %v960_v58 = vadd.f32 %v2779_v9, %v959_v56 }
 0x1f1   : > { %v977_v59 = vmax.f32 %v965_v49, %v973_v53  ;;  %v974_v60 = vmul.f32 0.2, %v968_v54 }
 0x1f2   : > { %v975_v61 = vmax.f32 %v957_v51, %v971_v57  ;;  %v972_v62 = vmul.f32 0.2, %v960_v58 }
 0x1f3   : > { %v981_v63 = vmax.f32 %v830_v3, %v977_v59  ;;  %v978_v0 = vmax.f32 %v968_v54, %v974_v60 }
 0x1f4   : > { %v979_v2 = vmax.f32 %v828_v43, %v975_v61  ;;  %v976_v4 = vmax.f32 %v960_v58, %v972_v62 }
 0x1f5   : > { %v982_v6 = vmax.f32 %v831_v45, %v978_v0 }
 0x1f6   : > { %v980_v55 = vmax.f32 %v829_v46, %v976_v4 }
 0x1fc   : > { %v2190_v10 = vpop.f32.mrb[16].mxu0 }
 0x1fd   : > { %v1116_v11 = vadd.f32 %v2190_v10, %v2779_v9  ;;  %v1107_v12 = vpop.f32.mrb[17].mxu0 }
 0x1fe   : > { %v1108_v39 = vadd.f32 %v2779_v9, %v1107_v12  ;;  %v2191_v41 = vpop.f32.mrb[18].mxu0 }
 0x1ff   : > { %v1124_v13 = vmul.f32 0.2, %v1116_v11  ;;  %v1119_v44 = vadd.f32 %v2191_v41, %v2779_v9  ;;  %v1110_v8 = vpop.f32.mrb[19].mxu0 }
 0x200   : > { %v1122_v47 = vmul.f32 0.2, %v1108_v39  ;;  %v1111_v16 = vadd.f32 %v2779_v9, %v1110_v8 }
 0x201   : > { %v1128_v17 = vmax.f32 %v1116_v11, %v1124_v13  ;;  %v1125_v18 = vmul.f32 0.2, %v1119_v44 }
 0x202   : > { %v1126_v19 = vmax.f32 %v1108_v39, %v1122_v47  ;;  %v1123_v20 = vmul.f32 0.2, %v1111_v16 }
 0x203   : > { %v1132_v14 = vmax.f32 %v981_v63, %v1128_v17  ;;  %v1129_v21 = vmax.f32 %v1119_v44, %v1125_v18 }
 0x204   : > { %v1130_v22 = vmax.f32 %v979_v2, %v1126_v19  ;;  %v1127_v23 = vmax.f32 %v1111_v16, %v1123_v20 }
 0x205   : > { %v1133_v24 = vmax.f32 %v982_v6, %v1129_v21 }
 0x206   : > { %v1131_v25 = vmax.f32 %v980_v55, %v1127_v23 }
 0x20c   : > { %v2214_v26 = vpop.f32.mrb[20].mxu0 }
 0x20d   : > { %v1267_v27 = vadd.f32 %v2214_v26, %v2779_v9  ;;  %v1258_v28 = vpop.f32.mrb[21].mxu0 }
 0x20e   : > { %v1259_v29 = vadd.f32 %v2779_v9, %v1258_v28  ;;  %v2215_v30 = vpop.f32.mrb[22].mxu0 }
 0x20f   : > { %v1275_v31 = vmul.f32 0.2, %v1267_v27  ;;  %v1270_v32 = vadd.f32 %v2215_v30, %v2779_v9  ;;  %v1261_v33 = vpop.f32.mrb[23].mxu0 }
 0x210   : > { %v1273_v34 = vmul.f32 0.2, %v1259_v29  ;;  %v1262_v35 = vadd.f32 %v2779_v9, %v1261_v33 }
 0x211   : > { %v1279_v36 = vmax.f32 %v1267_v27, %v1275_v31  ;;  %v1276_v37 = vmul.f32 0.2, %v1270_v32 }
 0x212   : > { %v1277_v38 = vmax.f32 %v1259_v29, %v1273_v34  ;;  %v1274_v1 = vmul.f32 0.2, %v1262_v35 }
 0x213   : > { %v1283_v15 = vmax.f32 %v1132_v14, %v1279_v36  ;;  %v1280_v40 = vmax.f32 %v1270_v32, %v1276_v37 }
 0x214   : > { %v1281_v3 = vmax.f32 %v1130_v22, %v1277_v38  ;;  %v1278_v42 = vmax.f32 %v1262_v35, %v1274_v1 }
 0x215   : > { %v1284_v5 = vmax.f32 %v1133_v24, %v1280_v40 }
 0x216   : > { %v1282_v43 = vmax.f32 %v1131_v25, %v1278_v42 }
 0x21c   : > { %v2238_v7 = vpop.f32.mrb[24].mxu0 }
 0x21d   : > { %v1418_v45 = vadd.f32 %v2238_v7, %v2779_v9  ;;  %v1409_v46 = vpop.f32.mrb[25].mxu0 }
 0x21e   : > { %v1410_v48 = vadd.f32 %v2779_v9, %v1409_v46  ;;  %v2239_v49 = vpop.f32.mrb[26].mxu0 }
 0x21f   : > { %v1426_v50 = vmul.f32 0.2, %v1418_v45  ;;  %v1421_v51 = vadd.f32 %v2239_v49, %v2779_v9  ;;  %v1412_v52 = vpop.f32.mrb[27].mxu0 }
 0x220   : > { %v1424_v53 = vmul.f32 0.2, %v1410_v48  ;;  %v1413_v54 = vadd.f32 %v2779_v9, %v1412_v52 }
 0x221   : > { %v1430_v56 = vmax.f32 %v1418_v45, %v1426_v50  ;;  %v1427_v57 = vmul.f32 0.2, %v1421_v51 }
 0x222   : > { %v1428_v58 = vmax.f32 %v1410_v48, %v1424_v53  ;;  %v1425_v59 = vmul.f32 0.2, %v1413_v54 }
 0x223   : > { %v1434_v60 = vmax.f32 %v1283_v15, %v1430_v56  ;;  %v1431_v61 = vmax.f32 %v1421_v51, %v1427_v57 }
 0x224   : > { %v1432_v62 = vmax.f32 %v1281_v3, %v1428_v58  ;;  %v1429_v63 = vmax.f32 %v1413_v54, %v1425_v59 }
 0x225   : > { %v1435_v0 = vmax.f32 %v1284_v5, %v1431_v61 }
 0x226   : > { %v1433_v2 = vmax.f32 %v1282_v43, %v1429_v63 }
 0x22c   : > { %v2262_v4 = vpop.f32.mrb[28].mxu0 }
 0x22d   : > { %v1569_v6 = vadd.f32 %v2262_v4, %v2779_v9  ;;  %v1560_v55 = vpop.f32.mrb[29].mxu0 }
 0x22e   : > { %v1561_v10 = vadd.f32 %v2779_v9, %v1560_v55  ;;  %v2263_v11 = vpop.f32.mrb[30].mxu0 }
 0x22f   : > { %v1577_v12 = vmul.f32 0.2, %v1569_v6  ;;  %v1572_v39 = vadd.f32 %v2263_v11, %v2779_v9  ;;  %v1563_v41 = vpop.f32.mrb[31].mxu0 }
 0x230   : > { %v1575_v13 = vmul.f32 0.2, %v1561_v10  ;;  %v1564_v44 = vadd.f32 %v2779_v9, %v1563_v41 }
 0x231   : > { %v1581_v8 = vmax.f32 %v1569_v6, %v1577_v12  ;;  %v1578_v47 = vmul.f32 0.2, %v1572_v39 }
 0x232   : > { %v1579_v16 = vmax.f32 %v1561_v10, %v1575_v13  ;;  %v1576_v17 = vmul.f32 0.2, %v1564_v44 }
 0x233   : > { %v1585_v18 = vmax.f32 %v1434_v60, %v1581_v8  ;;  %v1582_v19 = vmax.f32 %v1572_v39, %v1578_v47 }
 0x234   : > { %v1583_v20 = vmax.f32 %v1432_v62, %v1579_v16  ;;  %v1580_v14 = vmax.f32 %v1564_v44, %v1576_v17 }
 0x235   : > { %v1586_v21 = vmax.f32 %v1435_v0, %v1582_v19 }
 0x236   : > { %v1584_v22 = vmax.f32 %v1433_v2, %v1580_v14 }
 0x23c   : > { %v2286_v23 = vpop.f32.mrb[32].mxu0 }
 0x23d   : > { %v1720_v24 = vadd.f32 %v2286_v23, %v2779_v9  ;;  %v1711_v25 = vpop.f32.mrb[33].mxu0 }
 0x23e   : > { %v1712_v26 = vadd.f32 %v2779_v9, %v1711_v25  ;;  %v2287_v27 = vpop.f32.mrb[34].mxu0 }
 0x23f   : > { %v1728_v28 = vmul.f32 0.2, %v1720_v24  ;;  %v1723_v29 = vadd.f32 %v2287_v27, %v2779_v9  ;;  %v1714_v30 = vpop.f32.mrb[35].mxu0 }
 0x240   : > { %v1726_v31 = vmul.f32 0.2, %v1712_v26  ;;  %v1715_v32 = vadd.f32 %v2779_v9, %v1714_v30 }
 0x241   : > { %v1732_v33 = vmax.f32 %v1720_v24, %v1728_v28  ;;  %v1729_v34 = vmul.f32 0.2, %v1723_v29 }
 0x242   : > { %v1730_v35 = vmax.f32 %v1712_v26, %v1726_v31  ;;  %v1727_v36 = vmul.f32 0.2, %v1715_v32 }
 0x243   : > { %v1736_v37 = vmax.f32 %v1585_v18, %v1732_v33  ;;  %v1733_v38 = vmax.f32 %v1723_v29, %v1729_v34 }
 0x244   : > { %v1734_v1 = vmax.f32 %v1583_v20, %v1730_v35  ;;  %v1731_v15 = vmax.f32 %v1715_v32, %v1727_v36 }
 0x245   : > { %v1980_v40 = vpack.c.bf16 %v1736_v37, %v1736_v37  ;;  %v1737_v3 = vmax.f32 %v1586_v21, %v1733_v38 }
 0x246   : > { %v1978_v42 = vpack.c.bf16 %v1734_v1, %v1734_v1  ;;  %v1735_v5 = vmax.f32 %v1584_v22, %v1731_v15 }
 0x247   : > { %1757 = vst.msk [vmem:[%s352_s29 + $0x8] sm:$0xf] %vm1754_vm1, %v1980_v40  ;;  %v1981_v9 = vpack.c.bf16 %v1737_v3, %v1737_v3 }
 0x248   : > { %1755 = vst.msk [vmem:[%s352_s29] sm:$0xf] %vm1754_vm1, %v1978_v42  ;;  %v1979_v43 = vpack.c.bf16 %v1735_v5, %v1735_v5 }
 0x249   : > { %1758 = vst.msk [vmem:[%s352_s29 + $0xc] sm:$0xf] %vm1754_vm1, %v1981_v9 }
 0x24a   : > { %1756 = vst.msk [vmem:[%s352_s29 + $0x4] sm:$0xf] %vm1754_vm1, %v1979_v43 }
 0x24b PF: > { %s17_s26 = sadd.s32 1, %s2348_s26   ;;  %s2835_s24 = smov %s2344_s25 }
 0x24c   : > { %p14_p5 = scmp.ge.s32.totalorder %s17_s26, 4   ;;  %s2836_s25 = smov %s2838_s27 }
 0x24e   :  { %16 = sbr.rel (!%p14_p5) target bundleno = 2 (0x2), region = 88 }

// kernel: dgcnn_forward.11
= control target key start
LH: loop header
LB: loop body
LE: loop exit
PB: predicated region body
PF: predicated region fallthrough
CT: control target
= control target key end

     0   :  { %s1722_s21 = smov 0   ;;  %s1724_s22 = smov 0   ;;  %s2038_s0 = inlined_call_operand.vmem [shape: bf16[2,32,64], index: 0, kind: input, shape index: {}]   ;;  %s2039_s1 = inlined_call_operand.vmem [shape: bf16[2,8,32,64], index: 1, kind: input, shape index: {}]   ;;  %s2040_s2 = inlined_call_operand.vmem [shape: bf16[2,32,64], index: 2, kind: input, shape index: {}]   ;;  %s2041_s3 = inlined_call_operand.vmem [shape: bf16[64,64], index: 3, kind: input, shape index: {}]   ;;  %s2042_s4 = inlined_call_operand.vmem [shape: bf16[64,64], index: 4, kind: input, shape index: {}]   ;;  %s2043_s5 = inlined_call_operand.vmem [shape: f32[1,64], index: 5, kind: input, shape index: {}]   ;;  %s2044_s6 = inlined_call_operand.vmem [shape: bf16[2,32,192], index: 6, kind: output, shape index: {}]  }
   0x1   :  { %s1726_s23 = smov 0  }
   0x2 LB: > { %s28_s24 = sadd.s32 1, %s1680_s22  ;;  %p1369_p0 = scmp.ge.s32.totalorder %s1684_s23, 1  ;;  %s1684_s23 = sphi %s1726_s23, %s16_s23   ;;  %s1680_s22 = sphi %s1724_s22, %s2046_s22   ;;  %s1676_s21 = sphi %s1722_s21, %s2045_s21  }
   0x3   : > { %p30_p1 = scmp.ge.s32.totalorder %s28_s24, 2  ;;  %p267_p2 = scmp.lt.s32.totalorder %s1684_s23, 3 }
   0x5   : > { %s2048_s24 = smov (%p30_p1, %s28_s24), 0  ;;  %p268_p3 = pnand %p1369_p0, %p267_p2 }
   0x6   : > { %v1652_v0 = vld [vmem:[%s2042_s4] sm:$0xff] (!%p268_p3)   ;;  %p325_p4 = scmp.lt.s32.totalorder (!%p268_p3), %s1676_s21, 1  ;;  %v1654_v2 = vld [vmem:[%s2042_s4 + $0x8] sm:$0xff] (!%p268_p3)   ;;  %v1656_v4 = vld [vmem:[%s2042_s4 + $0x10] sm:$0xff] (!%p268_p3)   ;;  %vm427_vm0 = vcmask (!%p268_p3), 523264   ;;  %s1686_s29 = smov (!%p268_p3), 64  }
   0x7   : > { %271 = sbr.rel (%p268_p3) target bundleno = 313 (0x139), region = 44  ;;  %v1746_v1 = vld [vmem:[%s2041_s3] sm:$0xff] (!%p268_p3)   ;;  %1519 = vmatprep.subr.bf16.mxu0 (!%p268_p3), %v1652_v0  ;;  %v1757_v3 = vld [vmem:[%s2041_s3 + $0x8] sm:$0xff] (!%p268_p3)   ;;  %v1768_v5 = vld [vmem:[%s2041_s3 + $0x10] sm:$0xff] (!%p268_p3)   ;;  %vm1196_vm1 = vcmask (!%p268_p3), 519168   ;;  %vm1213_vm2 = vcmask (!%p268_p3), 1043968  }
   0x8   : > { %1531 = vmatprep.subr.bf16.mxu1 (!%p268_p3), %v1746_v1  ;;  %1520 = vmatpush3.bf16.msra.mxu0 (!%p268_p3), %v1652_v0  ;;  %v1658_v6 = vld [vmem:[%s2042_s4 + $0x18] sm:$0xff] (!%p268_p3)  }
   0x9   : > { %1532 = vmatpush3.bf16.msra.mxu1 (!%p268_p3), %v1746_v1  ;;  %1521 = vmatprep.subr.bf16.mxu0 (!%p268_p3), %v1654_v2  ;;  %v1787_v7 = vld [vmem:[%s2041_s3 + $0x18] sm:$0xff] (!%p268_p3)  }
   0xa   : > { %1533 = vmatprep.subr.bf16.mxu1 (!%p268_p3), %v1757_v3 }
   0xc   : > { %1522 = vmatpush3.bf16.msra.mxu0 (!%p268_p3), %v1654_v2 }
   0xd   : > { %1534 = vmatpush3.bf16.msra.mxu1 (!%p268_p3), %v1757_v3  ;;  %1523 = vmatprep.subr.bf16.mxu0 (!%p268_p3), %v1656_v4 }
   0xe   : > { %s2050_s21 = smov (!%p325_p4, %s1676_s21), 1  ;;  %1535 = vmatprep.subr.bf16.mxu1 %v1768_v5 }
   0xf   : > { %s1457_s11 = sshll.u32 %s2050_s21, 4  ;;  %s1458_s17 = sshll.u32 %s2050_s21, 7 }
  0x10   : > { %s332_s16 = scalar_lea.vmem %s2038_s0, %s1457_s11  ;;  %s1782_s26 = scalar_lea.vmem %s2039_s1, %s1458_s17  ;;  %1524 = vmatpush3.bf16.msra.mxu0 %v1656_v4 }
  0x11   : > { %v1790_v8 = vld [vmem:[%s332_s16] sm:$0xf]  ;;  %v1792_v9 = vld [vmem:[%s332_s16 + $0x4] sm:$0xf]  ;;  %v1794_v10 = vld [vmem:[%s332_s16 + $0x8] sm:$0xf]  ;;  %1536 = vmatpush3.bf16.msra.mxu1 %v1768_v5  ;;  %1525 = vmatprep.subr.bf16.mxu0 %v1658_v6  ;;  %s352_s13 = scalar_lea.vmem %s2040_s2, %s1457_s11 }
  0x12   : > { %v1379_v11 = vcombine.low %v1790_v8, %v1792_v9  ;;  %v1799_v12 = vld [vmem:[%s332_s16 + $0xc] sm:$0xf]  ;;  %v483_v13 = vld [vmem:[%s1782_s26] sm:$0xf]  ;;  %v484_v14 = vld [vmem:[%s1782_s26 + $0x4] sm:$0xf]  ;;  %1205 = vrot.lane.b32.xlu1 %v1794_v10, %s1686_s29  ;;  %1537 = vmatprep.subr.bf16.mxu1 %v1787_v7 }
  0x13   : > { %v487_v15 = vsub.bf16 %v483_v13, %v1790_v8  ;;  %v488_v16 = vsub.bf16 %v484_v14, %v1792_v9  ;;  %v485_v17 = vld [vmem:[%s1782_s26 + $0x8] sm:$0xf]  ;;  %v486_v18 = vld [vmem:[%s1782_s26 + $0xc] sm:$0xf]  ;;  %v1395_v19 = vld [vmem:[%s1782_s26 + $0x10] sm:$0xf]  ;;  %1201 = vrot.lane.b32.xlu0 %v1790_v8, %s1686_s29  ;;  %v1380_v28 = vcombine.low %v1794_v10, %v1799_v12 }
  0x14   : > { %1527 = vmatprep.mubr.msk.bf16.mxu0 %vm427_vm0, %v1379_v11  ;;  %v489_v20 = vsub.bf16 %v485_v17, %v1794_v10  ;;  %v490_v21 = vsub.bf16 %v486_v18, %v1799_v12  ;;  %v1396_v22 = vld [vmem:[%s1782_s26 + $0x14] sm:$0xf]  ;;  %v1403_v23 = vld [vmem:[%s1782_s26 + $0x20] sm:$0xf]  ;;  %v1404_v24 = vld [vmem:[%s1782_s26 + $0x24] sm:$0xf]  ;;  %v593_v26 = vsub.bf16 %v1395_v19, %v1790_v8  ;;  %1526 = vmatpush3.bf16.msra.mxu0 %v1658_v6 }
  0x15   : > { %v1387_v25 = vcombine.low %v487_v15, %v488_v16  ;;  %v594_v27 = vsub.bf16 %v1396_v22, %v1792_v9  ;;  %v679_v29 = vsub.bf16 %v1403_v23, %v1790_v8  ;;  %v680_v30 = vsub.bf16 %v1404_v24, %v1792_v9  ;;  %1538 = vmatpush3.bf16.msra.mxu1 %v1787_v7  ;;  %v1445_v34 = vld [vmem:[%s1782_s26 + $0x78] sm:$0xf]  ;;  %v1446_v35 = vld [vmem:[%s1782_s26 + $0x7c] sm:$0xf]  ;;  %v1405_v40 = vld [vmem:[%s1782_s26 + $0x28] sm:$0xf] }
  0x16   : > { %v1388_v31 = vcombine.low %v489_v20, %v490_v21  ;;  %1543 = vmatprep.subr.bf16.mxu0 %v1746_v1  ;;  %1555 = vmatprep.subr.bf16.mxu1 %v1746_v1  ;;  %v1111_v36 = vsub.bf16 %v1445_v34, %v1794_v10  ;;  %v1397_v37 = vld [vmem:[%s1782_s26 + $0x18] sm:$0xf]  ;;  %v1398_v38 = vld [vmem:[%s1782_s26 + $0x1c] sm:$0xf]  ;;  %v1112_v39 = vsub.bf16 %v1446_v35, %v1799_v12  ;;  %v1406_v41 = vld [vmem:[%s1782_s26 + $0x2c] sm:$0xf] }
  0x17   : > { %1539 = vmatprep.mubr.msk.bf16.mxu1 %vm427_vm0, %v1387_v25  ;;  %v1399_v32 = vcombine.low %v593_v26, %v594_v27  ;;  %1528 = vmatmul.mubr.msk.bf16.vlgmr.msra.gmra.mrb[0].mxu0 %vm427_vm0, %v1380_v28  ;;  %v1407_v33 = vcombine.low %v679_v29, %v680_v30  ;;  %v595_v43 = vsub.bf16 %v1397_v37, %v1794_v10  ;;  %v1411_v45 = vld [vmem:[%s1782_s26 + $0x30] sm:$0xf]  ;;  %v1412_v46 = vld [vmem:[%s1782_s26 + $0x34] sm:$0xf]  ;;  %v1419_v49 = vld [vmem:[%s1782_s26 + $0x40] sm:$0xf] }
  0x18   : > { %1540 = vmatmul.mubr.msk.bf16.vlgmr.msra.gmra.mrb[0].mxu1 %vm427_vm0, %v1388_v31  ;;  %1544 = vmatpush3.bf16.msra.mxu0 %v1746_v1  ;;  %v1852_v42 = vcombine.low %v1111_v36, %v1112_v39  ;;  %v596_v44 = vsub.bf16 %v1398_v38, %v1799_v12  ;;  %v681_v47 = vsub.bf16 %v1405_v40, %v1794_v10  ;;  %v1420_v50 = vld [vmem:[%s1782_s26 + $0x44] sm:$0xf]  ;;  %v1413_v59 = vld [vmem:[%s1782_s26 + $0x38] sm:$0xf]  ;;  %v1414_v60 = vld [vmem:[%s1782_s26 + $0x3c] sm:$0xf] }
  0x19   : > { %1556 = vmatpush3.bf16.msra.mxu1 %v1746_v1  ;;  %1545 = vmatprep.subr.bf16.mxu0 %v1757_v3  ;;  %v682_v48 = vsub.bf16 %v1406_v41, %v1799_v12  ;;  %v765_v51 = vsub.bf16 %v1411_v45, %v1790_v8  ;;  %v766_v52 = vsub.bf16 %v1412_v46, %v1792_v9  ;;  %v1421_v61 = vld [vmem:[%s1782_s26 + $0x48] sm:$0xf]  ;;  %v1422_v62 = vld [vmem:[%s1782_s26 + $0x4c] sm:$0xf]  ;;  %v1427_v2 = vld [vmem:[%s1782_s26 + $0x50] sm:$0xf] }
  0x1a   : > { %1557 = vmatprep.subr.bf16.mxu1 %v1757_v3  ;;  %1551 = vmatprep.mubr.msk.bf16.mxu0 %vm427_vm0, %v1399_v32  ;;  %v1400_v53 = vcombine.low %v595_v43, %v596_v44  ;;  %v851_v54 = vsub.bf16 %v1419_v49, %v1790_v8  ;;  %v852_v55 = vsub.bf16 %v1420_v50, %v1792_v9  ;;  %v1428_v4 = vld [vmem:[%s1782_s26 + $0x54] sm:$0xf]  ;;  %v1435_v13 = vld [vmem:[%s1782_s26 + $0x60] sm:$0xf]  ;;  %v1436_v14 = vld [vmem:[%s1782_s26 + $0x64] sm:$0xf] }
  0x1b   : > { %1563 = vmatprep.mubr.msk.bf16.mxu1 %vm427_vm0, %v1407_v33  ;;  %1207 = vrot.lane.b32.xlu1 %v1799_v12, %s1686_s29  ;;  %v1408_v56 = vcombine.low %v681_v47, %v682_v48  ;;  %v1415_v57 = vcombine.low %v765_v51, %v766_v52  ;;  %v767_v63 = vsub.bf16 %v1413_v59, %v1794_v10  ;;  %v1429_v23 = vld [vmem:[%s1782_s26 + $0x58] sm:$0xf]  ;;  %v1430_v24 = vld [vmem:[%s1782_s26 + $0x5c] sm:$0xf]  ;;  %v1437_v25 = vld [vmem:[%s1782_s26 + $0x68] sm:$0xf] }
  0x1c   : > { %1546 = vmatpush3.bf16.msra.mxu0 %v1757_v3  ;;  %1203 = vrot.lane.b32.xlu0 %v1792_v9, %s1686_s29  ;;  %v1423_v58 = vcombine.low %v851_v54, %v852_v55  ;;  %v768_v0 = vsub.bf16 %v1414_v60, %v1799_v12  ;;  %v853_v6 = vsub.bf16 %v1421_v61, %v1794_v10  ;;  %v1438_v26 = vld [vmem:[%s1782_s26 + $0x6c] sm:$0xf]  ;;  %v1443_v27 = vld [vmem:[%s1782_s26 + $0x70] sm:$0xf]  ;;  %v1444_v28 = vld [vmem:[%s1782_s26 + $0x74] sm:$0xf] }
  0x1d   : > { %1558 = vmatpush3.bf16.msra.mxu1 %v1757_v3  ;;  %1547 = vmatprep.subr.bf16.mxu0 %v1768_v5  ;;  %v854_v11 = vsub.bf16 %v1422_v62, %v1799_v12  ;;  %v937_v15 = vsub.bf16 %v1427_v2, %v1790_v8  ;;  %v938_v16 = vsub.bf16 %v1428_v4, %v1792_v9  ;;  %s1460_s30 = sshll.u32 %s2050_s21, 5  ;;  %v1378_v38 = vld [vmem:[%s2043_s5] ss:$0 sm:$0xff] }
  0x1e   : > { %1559 = vmatprep.subr.bf16.mxu1 %v1768_v5  ;;  %v1416_v17 = vcombine.low %v767_v63, %v768_v0  ;;  %v1023_v18 = vsub.bf16 %v1435_v13, %v1790_v8  ;;  %v1024_v19 = vsub.bf16 %v1436_v14, %v1792_v9  ;;  %v939_v29 = vsub.bf16 %v1429_v23, %v1794_v10  ;;  %s1959_s9 = scalar_lea.vmem %s2044_s6, %s1460_s30 }
  0x1f   : > { %v1424_v20 = vcombine.low %v853_v6, %v854_v11  ;;  %v1431_v21 = vcombine.low %v937_v15, %v938_v16  ;;  %v940_v30 = vsub.bf16 %v1430_v24, %v1799_v12  ;;  %v1025_v31 = vsub.bf16 %v1437_v25, %v1794_v10 }
  0x20   : > { %1548 = vmatpush3.bf16.msra.mxu0 %v1768_v5  ;;  %v1439_v22 = vcombine.low %v1023_v18, %v1024_v19  ;;  %v1026_v32 = vsub.bf16 %v1438_v26, %v1799_v12  ;;  %v1109_v33 = vsub.bf16 %v1443_v27, %v1790_v8  ;;  %v1110_v34 = vsub.bf16 %v1444_v28, %v1792_v9  ;;  %v1195_v8 = vld [vmem:[%s352_s13 + $0xc] sm:$0xf]  ;;  %v1193_v9 = vld [vmem:[%s352_s13 + $0x4] sm:$0xf] }
  0x21   : > { %1560 = vmatpush3.bf16.msra.mxu1 %v1768_v5  ;;  %1549 = vmatprep.subr.bf16.mxu0 %v1787_v7  ;;  %v1432_v35 = vcombine.low %v939_v29, %v940_v30  ;;  %1200 = vst.msk [vmem:[%s1959_s9 + $0x18] sm:$0xf] %vm1196_vm1, %v1195_v8  ;;  %1198 = vst.msk [vmem:[%s1959_s9 + $0x8] sm:$0xf] %vm1196_vm1, %v1193_v9 }
  0x22   : > { %1561 = vmatprep.subr.bf16.mxu1 %v1787_v7  ;;  %v1440_v36 = vcombine.low %v1025_v31, %v1026_v32  ;;  %v1447_v10 = vcombine.low %v1109_v33, %v1110_v34 }
  0x24   : > { %1550 = vmatpush3.bf16.msra.mxu0 %v1787_v7 }
  0x25   : > { %1562 = vmatpush3.bf16.msra.mxu1 %v1787_v7  ;;  %1567 = vmatprep.subr.bf16.mxu0 %v1746_v1 }
  0x26   : > { %1579 = vmatprep.subr.bf16.mxu1 %v1746_v1 }
  0x27   : > { %1552 = vmatmul.mubr.msk.bf16.vlgmr.msra.gmra.mrb[4].mxu0 %vm427_vm0, %v1400_v53 }
  0x28   : > { %1564 = vmatmul.mubr.msk.bf16.vlgmr.msra.gmra.mrb[4].mxu1 %vm427_vm0, %v1408_v56  ;;  %1568 = vmatpush3.bf16.msra.mxu0 %v1746_v1 }
  0x29   : > { %1580 = vmatpush3.bf16.msra.mxu1 %v1746_v1  ;;  %1569 = vmatprep.subr.bf16.mxu0 %v1757_v3 }
  0x2a   : > { %1581 = vmatprep.subr.bf16.mxu1 %v1757_v3  ;;  %1575 = vmatprep.mubr.msk.bf16.mxu0 %vm427_vm0, %v1415_v57 }
  0x2b   : > { %1587 = vmatprep.mubr.msk.bf16.mxu1 %vm427_vm0, %v1423_v58 }
  0x2c   : > { %1570 = vmatpush3.bf16.msra.mxu0 %v1757_v3 }
  0x2d   : > { %1582 = vmatpush3.bf16.msra.mxu1 %v1757_v3  ;;  %1571 = vmatprep.subr.bf16.mxu0 %v1768_v5 }
  0x2e   : > { %1583 = vmatprep.subr.bf16.mxu1 %v1768_v5 }
  0x30   : > { %1572 = vmatpush3.bf16.msra.mxu0 %v1768_v5 }
  0x31   : > { %1584 = vmatpush3.bf16.msra.mxu1 %v1768_v5  ;;  %1573 = vmatprep.subr.bf16.mxu0 %v1787_v7 }
  0x32   : > { %1585 = vmatprep.subr.bf16.mxu1 %v1787_v7 }
  0x34   : > { %1574 = vmatpush3.bf16.msra.mxu0 %v1787_v7 }
  0x35   : > { %1586 = vmatpush3.bf16.msra.mxu1 %v1787_v7  ;;  %1591 = vmatprep.subr.bf16.mxu0 %v1746_v1 }
  0x36   : > { %1603 = vmatprep.subr.bf16.mxu1 %v1746_v1 }
  0x37   : > { %1576 = vmatmul.mubr.msk.bf16.vlgmr.msra.gmra.mrb[8].mxu0 %vm427_vm0, %v1416_v17 }
  0x38   : > { %1588 = vmatmul.mubr.msk.bf16.vlgmr.msra.gmra.mrb[8].mxu1 %vm427_vm0, %v1424_v20  ;;  %1592 = vmatpush3.bf16.msra.mxu0 %v1746_v1 }
  0x39   : > { %1604 = vmatpush3.bf16.msra.mxu1 %v1746_v1  ;;  %1593 = vmatprep.subr.bf16.mxu0 %v1757_v3 }
  0x3a   : > { %1605 = vmatprep.subr.bf16.mxu1 %v1757_v3  ;;  %1599 = vmatprep.mubr.msk.bf16.mxu0 %vm427_vm0, %v1431_v21 }
  0x3b   : > { %1611 = vmatprep.mubr.msk.bf16.mxu1 %vm427_vm0, %v1439_v22 }
  0x3c   : > { %1594 = vmatpush3.bf16.msra.mxu0 %v1757_v3 }
  0x3d   : > { %1606 = vmatpush3.bf16.msra.mxu1 %v1757_v3  ;;  %1595 = vmatprep.subr.bf16.mxu0 %v1768_v5 }
  0x3e   : > { %1607 = vmatprep.subr.bf16.mxu1 %v1768_v5 }
  0x40   : > { %1596 = vmatpush3.bf16.msra.mxu0 %v1768_v5 }
  0x41   : > { %1608 = vmatpush3.bf16.msra.mxu1 %v1768_v5  ;;  %1597 = vmatprep.subr.bf16.mxu0 %v1787_v7 }
  0x42   : > { %1609 = vmatprep.subr.bf16.mxu1 %v1787_v7 }
  0x44   : > { %1598 = vmatpush3.bf16.msra.mxu0 %v1787_v7 }
  0x45   : > { %1610 = vmatpush3.bf16.msra.mxu1 %v1787_v7  ;;  %1615 = vmatprep.subr.bf16.mxu0 %v1746_v1 }
  0x47   : > { %1600 = vmatmul.mubr.msk.bf16.vlgmr.msra.gmra.mrb[12].mxu0 %vm427_vm0, %v1432_v35 }
  0x48   : > { %1612 = vmatmul.mubr.msk.bf16.vlgmr.msra.gmra.mrb[12].mxu1 %vm427_vm0, %v1440_v36  ;;  %1616 = vmatpush3.bf16.msra.mxu0 %v1746_v1  ;;  %v1194_v1 = vld [vmem:[%s352_s13 + $0x8] sm:$0xf] }
  0x49   : > { %1617 = vmatprep.subr.bf16.mxu0 %v1757_v3  ;;  %1623 = vmatprep.mubr.msk.bf16.mxu0 %vm427_vm0, %v1447_v10  ;;  %1199 = vst.msk [vmem:[%s1959_s9 + $0x10] sm:$0xf] %vm1196_vm1, %v1194_v1 }
  0x4c   : > { %1618 = vmatpush3.bf16.msra.mxu0 %v1757_v3  ;;  %v1192_v3 = vld [vmem:[%s352_s13] sm:$0xf] }
  0x4d   : > { %1619 = vmatprep.subr.bf16.mxu0 %v1768_v5  ;;  %1197 = vst.msk [vmem:[%s1959_s9] sm:$0xf] %vm1196_vm1, %v1192_v3 }
  0x50   : > { %1620 = vmatpush3.bf16.msra.mxu0 %v1768_v5 }
  0x51   : > { %1621 = vmatprep.subr.bf16.mxu0 %v1787_v7 }
  0x54   : > { %1622 = vmatpush3.bf16.msra.mxu0 %v1787_v7 }
  0x57   : > { %1624 = vmatmul.mubr.msk.bf16.vlgmr.msra.gmra.mrb[16].mxu0 %vm427_vm0, %v1852_v42 }
  0x84   : > { %v1206_v5 = vpop.permute.xlu1 %1205 }
  0x85   : > { %v1202_v7 = vpop.permute.xlu0 %1201  ;;  %1216 = vst.msk [vmem:[%s1959_s9 + $0x10] sm:$0xf] %vm1213_vm2, %v1206_v5 }
  0x86   : > { %1214 = vst.msk [vmem:[%s1959_s9] sm:$0xf] %vm1213_vm2, %v1202_v7 }
  0x8d   : > { %v1208_v12 = vpop.permute.xlu1 %1207 }
  0x8e   : > { %v1204_v37 = vpop.permute.xlu0 %1203  ;;  %1217 = vst.msk [vmem:[%s1959_s9 + $0x18] sm:$0xf] %vm1213_vm2, %v1208_v12 }
  0x8f   : > { %1215 = vst.msk [vmem:[%s1959_s9 + $0x8] sm:$0xf] %vm1213_vm2, %v1204_v37 }
  0xea   : > { %v1529_v39 = vpop.f32.mrb[0].mxu0 }
  0xeb   : > { %v1981_v40 = vadd.f32 %v1529_v39, %v1378_v38  ;;  %v468_v41 = vpop.f32.mrb[1].mxu0  ;;  %v1541_v42 = vpop.f32.mrb[0].mxu1 }
  0xec   : > { %v1983_v43 = vadd.f32 %v1378_v38, %v468_v41  ;;  %v1530_v44 = vpop.f32.mrb[2].mxu0  ;;  %v565_v45 = vpop.f32.mrb[1].mxu1 }
  0xed   : > { %v1985_v46 = vadd.f32 %v1530_v44, %v1378_v38  ;;  %v574_v47 = vadd.f32 %v1541_v42, %v1981_v40  ;;  %v471_v48 = vpop.f32.mrb[3].mxu0  ;;  %v1542_v49 = vpop.f32.mrb[2].mxu1 }
  0xee   : > { %v1988_v50 = vadd.f32 %v1378_v38, %v471_v48  ;;  %v566_v51 = vadd.f32 %v565_v45, %v1983_v43  ;;  %v568_v52 = vpop.f32.mrb[3].mxu1 }
  0xef   : > { %v577_v53 = vadd.f32 %v1542_v49, %v1985_v46  ;;  %v582_v55 = vmul.f32 0.2, %v574_v47 }
  0xf0   : > { %v569_v54 = vadd.f32 %v568_v52, %v1988_v50  ;;  %v580_v56 = vmul.f32 0.2, %v566_v51 }
  0xf1   : > { %v586_v58 = vmax.f32 %v574_v47, %v582_v55  ;;  %v583_v63 = vmul.f32 0.2, %v577_v53 }
  0xf2   : > { %v584_v62 = vmax.f32 %v566_v51, %v580_v56  ;;  %v581_v11 = vmul.f32 0.2, %v569_v54 }
  0xf3   : > { %v587_v27 = vmax.f32 %v577_v53, %v583_v63 }
  0xf4   : > { %v585_v35 = vmax.f32 %v569_v54, %v581_v11 }
  0xfa   : > { %v1553_v57 = vpop.f32.mrb[4].mxu0 }
  0xfb   : > { %v656_v59 = vadd.f32 %v1553_v57, %v1981_v40  ;;  %v1565_v60 = vpop.f32.mrb[4].mxu1  ;;  %v647_v61 = vpop.f32.mrb[5].mxu0 }
  0xfc   : > { %v742_v0 = vadd.f32 %v1565_v60, %v1981_v40  ;;  %v648_v2 = vadd.f32 %v647_v61, %v1983_v43  ;;  %v733_v4 = vpop.f32.mrb[5].mxu1  ;;  %v1554_v6 = vpop.f32.mrb[6].mxu0 }
  0xfd   : > { %v664_v13 = vmul.f32 0.2, %v656_v59  ;;  %v734_v14 = vadd.f32 %v733_v4, %v1983_v43  ;;  %v659_v15 = vadd.f32 %v1554_v6, %v1985_v46  ;;  %v1566_v16 = vpop.f32.mrb[6].mxu1  ;;  %v650_v17 = vpop.f32.mrb[7].mxu0 }
  0xfe   : > { %v750_v18 = vmul.f32 0.2, %v742_v0  ;;  %v662_v19 = vmul.f32 0.2, %v648_v2  ;;  %v745_v20 = vadd.f32 %v1566_v16, %v1985_v46  ;;  %v651_v21 = vadd.f32 %v650_v17, %v1988_v50  ;;  %v736_v22 = vpop.f32.mrb[7].mxu1 }
  0xff   : > { %v668_v23 = vmax.f32 %v656_v59, %v664_v13  ;;  %v748_v24 = vmul.f32 0.2, %v734_v14  ;;  %v665_v25 = vmul.f32 0.2, %v659_v15  ;;  %v737_v26 = vadd.f32 %v736_v22, %v1988_v50 }
 0x100   : > { %v666_v28 = vmax.f32 %v648_v2, %v662_v19  ;;  %v751_v29 = vmul.f32 0.2, %v745_v20  ;;  %v663_v30 = vmul.f32 0.2, %v651_v21  ;;  %v754_v32 = vmax.f32 %v742_v0, %v750_v18 }
 0x101   : > { %v672_v31 = vmax.f32 %v586_v58, %v668_v23  ;;  %v669_v33 = vmax.f32 %v659_v15, %v665_v25  ;;  %v749_v34 = vmul.f32 0.2, %v737_v26  ;;  %v752_v10 = vmax.f32 %v734_v14, %v748_v24 }
 0x102   : > { %v670_v36 = vmax.f32 %v584_v62, %v666_v28  ;;  %v667_v1 = vmax.f32 %v651_v21, %v663_v30  ;;  %v755_v7 = vmax.f32 %v745_v20, %v751_v29 }
 0x103   : > { %v758_v3 = vmax.f32 %v672_v31, %v754_v32  ;;  %v673_v5 = vmax.f32 %v587_v27, %v669_v33  ;;  %v753_v12 = vmax.f32 %v737_v26, %v749_v34 }
 0x104   : > { %v756_v8 = vmax.f32 %v670_v36, %v752_v10  ;;  %v671_v9 = vmax.f32 %v585_v35, %v667_v1 }
 0x105   : > { %v759_v37 = vmax.f32 %v673_v5, %v755_v7 }
 0x106   : > { %v757_v38 = vmax.f32 %v671_v9, %v753_v12 }
 0x10a   : > { %v1577_v39 = vpop.f32.mrb[8].mxu0 }
 0x10b   : > { %v828_v41 = vadd.f32 %v1577_v39, %v1981_v40  ;;  %v1589_v42 = vpop.f32.mrb[8].mxu1  ;;  %v819_v44 = vpop.f32.mrb[9].mxu0 }
 0x10c   : > { %v914_v45 = vadd.f32 %v1589_v42, %v1981_v40  ;;  %v820_v47 = vadd.f32 %v819_v44, %v1983_v43  ;;  %v905_v48 = vpop.f32.mrb[9].mxu1  ;;  %v1578_v49 = vpop.f32.mrb[10].mxu0 }
 0x10d   : > { %v836_v51 = vmul.f32 0.2, %v828_v41  ;;  %v906_v52 = vadd.f32 %v905_v48, %v1983_v43  ;;  %v831_v53 = vadd.f32 %v1578_v49, %v1985_v46  ;;  %v1590_v54 = vpop.f32.mrb[10].mxu1  ;;  %v822_v55 = vpop.f32.mrb[11].mxu0 }
 0x10e   : > { %v922_v56 = vmul.f32 0.2, %v914_v45  ;;  %v834_v57 = vmul.f32 0.2, %v820_v47  ;;  %v917_v58 = vadd.f32 %v1590_v54, %v1985_v46  ;;  %v823_v59 = vadd.f32 %v822_v55, %v1988_v50  ;;  %v908_v60 = vpop.f32.mrb[11].mxu1 }
 0x10f   : > { %v840_v61 = vmax.f32 %v828_v41, %v836_v51  ;;  %v920_v62 = vmul.f32 0.2, %v906_v52  ;;  %v837_v63 = vmul.f32 0.2, %v831_v53  ;;  %v909_v0 = vadd.f32 %v908_v60, %v1988_v50 }
 0x110   : > { %v838_v2 = vmax.f32 %v820_v47, %v834_v57  ;;  %v923_v4 = vmul.f32 0.2, %v917_v58  ;;  %v835_v6 = vmul.f32 0.2, %v823_v59  ;;  %v926_v13 = vmax.f32 %v914_v45, %v922_v56 }
 0x111   : > { %v844_v11 = vmax.f32 %v758_v3, %v840_v61  ;;  %v841_v14 = vmax.f32 %v831_v53, %v837_v63  ;;  %v921_v15 = vmul.f32 0.2, %v909_v0  ;;  %v924_v17 = vmax.f32 %v906_v52, %v920_v62 }
 0x112   : > { %v842_v16 = vmax.f32 %v756_v8, %v838_v2  ;;  %v839_v18 = vmax.f32 %v823_v59, %v835_v6  ;;  %v927_v21 = vmax.f32 %v917_v58, %v923_v4 }
 0x113   : > { %v930_v19 = vmax.f32 %v844_v11, %v926_v13  ;;  %v845_v20 = vmax.f32 %v759_v37, %v841_v14  ;;  %v925_v24 = vmax.f32 %v909_v0, %v921_v15 }
 0x114   : > { %v928_v22 = vmax.f32 %v842_v16, %v924_v17  ;;  %v843_v23 = vmax.f32 %v757_v38, %v839_v18 }
 0x115   : > { %v931_v25 = vmax.f32 %v845_v20, %v927_v21 }
 0x116   : > { %v929_v26 = vmax.f32 %v843_v23, %v925_v24 }
 0x11a   : > { %v1601_v27 = vpop.f32.mrb[12].mxu0 }
 0x11b   : > { %v1000_v28 = vadd.f32 %v1601_v27, %v1981_v40  ;;  %v1613_v29 = vpop.f32.mrb[12].mxu1  ;;  %v991_v30 = vpop.f32.mrb[13].mxu0 }
 0x11c   : > { %v1086_v31 = vadd.f32 %v1613_v29, %v1981_v40  ;;  %v992_v32 = vadd.f32 %v991_v30, %v1983_v43  ;;  %v1077_v33 = vpop.f32.mrb[13].mxu1  ;;  %v1602_v34 = vpop.f32.mrb[14].mxu0 }
 0x11d   : > { %v1008_v35 = vmul.f32 0.2, %v1000_v28  ;;  %v1078_v36 = vadd.f32 %v1077_v33, %v1983_v43  ;;  %v1003_v10 = vadd.f32 %v1602_v34, %v1985_v46  ;;  %v1614_v1 = vpop.f32.mrb[14].mxu1  ;;  %v994_v3 = vpop.f32.mrb[15].mxu0 }
 0x11e   : > { %v1094_v5 = vmul.f32 0.2, %v1086_v31  ;;  %v1006_v7 = vmul.f32 0.2, %v992_v32  ;;  %v1089_v8 = vadd.f32 %v1614_v1, %v1985_v46  ;;  %v995_v9 = vadd.f32 %v994_v3, %v1988_v50  ;;  %v1080_v12 = vpop.f32.mrb[15].mxu1 }
 0x11f   : > { %v1012_v37 = vmax.f32 %v1000_v28, %v1008_v35  ;;  %v1092_v38 = vmul.f32 0.2, %v1078_v36  ;;  %v1009_v39 = vmul.f32 0.2, %v1003_v10  ;;  %v1081_v41 = vadd.f32 %v1080_v12, %v1988_v50 }
 0x120   : > { %v1010_v42 = vmax.f32 %v992_v32, %v1006_v7  ;;  %v1095_v44 = vmul.f32 0.2, %v1089_v8  ;;  %v1007_v45 = vmul.f32 0.2, %v995_v9  ;;  %v1098_v48 = vmax.f32 %v1086_v31, %v1094_v5 }
 0x121   : > { %v1016_v47 = vmax.f32 %v930_v19, %v1012_v37  ;;  %v1013_v49 = vmax.f32 %v1003_v10, %v1009_v39  ;;  %v1093_v51 = vmul.f32 0.2, %v1081_v41  ;;  %v1096_v53 = vmax.f32 %v1078_v36, %v1092_v38 }
 0x122   : > { %v1014_v52 = vmax.f32 %v928_v22, %v1010_v42  ;;  %v1011_v54 = vmax.f32 %v995_v9, %v1007_v45  ;;  %v1099_v57 = vmax.f32 %v1089_v8, %v1095_v44 }
 0x123   : > { %v1102_v55 = vmax.f32 %v1016_v47, %v1098_v48  ;;  %v1017_v56 = vmax.f32 %v931_v25, %v1013_v49  ;;  %v1097_v60 = vmax.f32 %v1081_v41, %v1093_v51 }
 0x124   : > { %v1100_v58 = vmax.f32 %v1014_v52, %v1096_v53  ;;  %v1015_v59 = vmax.f32 %v929_v26, %v1011_v54 }
 0x125   : > { %v1103_v61 = vmax.f32 %v1017_v56, %v1099_v57 }
 0x126   : > { %v1101_v62 = vmax.f32 %v1015_v59, %v1097_v60 }
 0x12a   : > { %v1625_v63 = vpop.f32.mrb[16].mxu0 }
 0x12b   : > { %v1172_v0 = vadd.f32 %v1625_v63, %v1981_v40  ;;  %v1163_v2 = vpop.f32.mrb[17].mxu0 }
 0x12c   : > { %v1164_v4 = vadd.f32 %v1163_v2, %v1983_v43  ;;  %v1626_v6 = vpop.f32.mrb[18].mxu0 }
 0x12d   : > { %v1180_v11 = vmul.f32 0.2, %v1172_v0  ;;  %v1175_v13 = vadd.f32 %v1626_v6, %v1985_v46  ;;  %v1166_v14 = vpop.f32.mrb[19].mxu0 }
 0x12e   : > { %v1178_v15 = vmul.f32 0.2, %v1164_v4  ;;  %v1167_v16 = vadd.f32 %v1166_v14, %v1988_v50 }
 0x12f   : > { %v1184_v17 = vmax.f32 %v1172_v0, %v1180_v11  ;;  %v1181_v18 = vmul.f32 0.2, %v1175_v13 }
 0x130   : > { %v1182_v19 = vmax.f32 %v1164_v4, %v1178_v15  ;;  %v1179_v20 = vmul.f32 0.2, %v1167_v16 }
 0x131   : > { %v1188_v40 = vmax.f32 %v1102_v55, %v1184_v17  ;;  %v1185_v21 = vmax.f32 %v1175_v13, %v1181_v18 }
 0x132   : > { %v1186_v22 = vmax.f32 %v1100_v58, %v1182_v19  ;;  %v1183_v43 = vmax.f32 %v1167_v16, %v1179_v20 }
 0x133   : > { %v1463_v23 = vpack.c.bf16 %v1188_v40, %v1188_v40  ;;  %v1189_v24 = vmax.f32 %v1103_v61, %v1185_v21 }
 0x134   : > { %v1461_v25 = vpack.c.bf16 %v1186_v22, %v1186_v22  ;;  %v1187_v46 = vmax.f32 %v1101_v62, %v1183_v43 }
 0x135   : > { %1234 = vst.msk [vmem:[%s1959_s9 + $0x14] sm:$0xf] %vm1196_vm1, %v1463_v23  ;;  %v1464_v26 = vpack.c.bf16 %v1189_v24, %v1189_v24 }
 0x136   : > { %1232 = vst.msk [vmem:[%s1959_s9 + $0x4] sm:$0xf] %vm1196_vm1, %v1461_v25  ;;  %v1462_v50 = vpack.c.bf16 %v1187_v46, %v1187_v46 }
 0x137   : > { %1235 = vst.msk [vmem:[%s1959_s9 + $0x1c] sm:$0xf] %vm1196_vm1, %v1464_v26 }
 0x138   : > { %1233 = vst.msk [vmem:[%s1959_s9 + $0xc] sm:$0xf] %vm1196_vm1, %v1462_v50 }
 0x139 PF: > { %s16_s23 = sadd.s32 1, %s1684_s23   ;;  %s2045_s21 = smov %s1680_s22 }
 0x13a   : > { %p13_p5 = scmp.ge.s32.totalorder %s16_s23, 4   ;;  %s2046_s22 = smov %s2048_s24 }
 0x13c   :  { %15 = sbr.rel (!%p13_p5) target bundleno = 2 (0x2), region = 87 }

// kernel: dgcnn_forward.12
= control target key start
LH: loop header
LB: loop body
LE: loop exit
PB: predicated region body
PF: predicated region fallthrough
CT: control target
= control target key end

     0   :  { %s1367_s12 = smov 0   ;;  %s1369_s13 = smov 0   ;;  %s1637_s0 = inlined_call_operand.vmem [shape: bf16[2,32,192], index: 0, kind: input, shape index: {}]   ;;  %s1638_s1 = inlined_call_operand.vmem [shape: bf16[192,1024], index: 1, kind: input, shape index: {}]   ;;  %s1639_s2 = inlined_call_operand.vmem [shape: f32[1,1024], index: 2, kind: input, shape index: {}]   ;;  %s1640_s3 = inlined_call_operand.vmem [shape: f32[2,1,1024], index: 3, kind: output, shape index: {}]  }
   0x1   :  { %s1371_s14 = smov 0   ;;  %s1373_s15 = smov 0  }
   0x2   :  { %s1375_s16 = smov 0   ;;  %s1377_s17 = smov 0  }
   0x3   :  { %s1379_s18 = smov 0  }
   0x4 LB: > { %s28_s19 = sadd.s32 1, %s1336_s16  ;;  %s32_s20 = sadd.s32 1, %s1340_s17  ;;  %s1344_s18 = sphi %s1379_s18, %s13_s18   ;;  %s1340_s17 = sphi %s1377_s17, %s1646_s17   ;;  %s1336_s16 = sphi %s1375_s16, %s1645_s16   ;;  %s1332_s15 = sphi %s1373_s15, %s1644_s15   ;;  %s1328_s14 = sphi %s1371_s14, %s1643_s14   ;;  %s1324_s13 = sphi %s1369_s13, %s1642_s13   ;;  %s1320_s12 = sphi %s1367_s12, %s1641_s12  }
   0x5   : > { %p30_p0 = scmp.ge.s32.totalorder %s28_s19, 2  ;;  %s67_s21 = sadd.s32 1, %s1324_s13 }
   0x6   : > { %p74_p1 = scmp.ne.s32.totalorder %s1324_s13, %s1320_s12  ;;  %p75_p2 = scmp.eq.s32.totalorder %s1344_s18, 0 }
   0x7   : > { %s1648_s19 = smov (%p30_p0, %s28_s19), 0  ;;  %s1650_s20 = smov (!%p30_p0, %s32_s20), %s1340_s17 }
   0x8   : > { %s64_s22 = ssub.s32 %s1336_s16, %s1648_s19  ;;  %p76_p3 = por %p75_p2, %p74_p1 }
   0x9   : > { %p34_p4 = scmp.ge.s32.totalorder %s1650_s20, 2  ;;  %p65_p5 = scmp.eq.s32.totalorder %s64_s22, 0 }
   0xa   : > { %p1084_p6 = scmp.ge.s32.totalorder %s1344_s18, 4 }
   0xb   : > { %s1652_s20 = smov (%p34_p4, %s1650_s20), 0 }
   0xc   : > { %s1416_s23 = scalar_select %p65_p5, %s1324_s13, %s67_s21  }
   0xd   : > { %154 = sbr.rel (%p1084_p6) target bundleno = 48 (0x30), region = 16 }
  0x14   : > { %171 = sbr.rel (!%p76_p3) target bundleno = 48 (0x30), region = 24  ;;  %s173_s24 = sand.u32 (%p76_p3), 1, %s1324_s13  }
  0x15   : > { %s1151_s25 = sshll.u32 (%p76_p3), %s1336_s16, 4  ;;  %s1153_s26 = smul.u32 (%p76_p3), 384, %s173_s24 }
  0x16   : > { %s1424_s29 = scalar_lea.vmem (%p76_p3), %s1638_s1, %s1151_s25 }
  0x17   : > { %v191_v0 = vld [vmem:[%s1424_s29] sm:$0xff] (%p76_p3)  ;;  %v193_v1 = vld [vmem:[%s1424_s29 + $0x8] sm:$0xff] (%p76_p3)  ;;  %s1432_s30 = scalar_lea.vmem (%p76_p3), [#allocation2], %s1153_s26 }
  0x18   : > { %v195_v2 = vld [vmem:[%s1424_s29 + $0x20] sm:$0xff] (%p76_p3)  ;;  %v197_v3 = vld [vmem:[%s1424_s29 + $0x28] sm:$0xff] (%p76_p3)  ;;  %192 = vst [vmem:[%s1432_s30] sm:$0xff] (%p76_p3), %v191_v0  ;;  %194 = vst [vmem:[%s1432_s30 + $0x8] sm:$0xff] (%p76_p3), %v193_v1 }
  0x19   : > { %v199_v4 = vld [vmem:[%s1424_s29 + $0x40] sm:$0xff] (%p76_p3)  ;;  %v201_v5 = vld [vmem:[%s1424_s29 + $0x48] sm:$0xff] (%p76_p3)  ;;  %196 = vst [vmem:[%s1432_s30 + $0x10] sm:$0xff] (%p76_p3), %v195_v2  ;;  %198 = vst [vmem:[%s1432_s30 + $0x18] sm:$0xff] (%p76_p3), %v197_v3 }
  0x1a   : > { %200 = vst [vmem:[%s1432_s30 + $0x20] sm:$0xff] (%p76_p3), %v199_v4  ;;  %202 = vst [vmem:[%s1432_s30 + $0x28] sm:$0xff] (%p76_p3), %v201_v5  ;;  %v203_v6 = vld [vmem:[%s1424_s29 + $0x60] sm:$0xff] (%p76_p3)  ;;  %v205_v7 = vld [vmem:[%s1424_s29 + $0x68] sm:$0xff] (%p76_p3) }
  0x1b   : > { %v207_v8 = vld [vmem:[%s1424_s29 + $0x80] sm:$0xff]  ;;  %204 = vst [vmem:[%s1432_s30 + $0x30] sm:$0xff] %v203_v6  ;;  %206 = vst [vmem:[%s1432_s30 + $0x38] sm:$0xff] %v205_v7  ;;  %v209_v9 = vld [vmem:[%s1424_s29 + $0x88] sm:$0xff] }
  0x1c   : > { %208 = vst [vmem:[%s1432_s30 + $0x40] sm:$0xff] %v207_v8  ;;  %v211_v10 = vld [vmem:[%s1424_s29 + $0xa0] sm:$0xff]  ;;  %v213_v11 = vld [vmem:[%s1424_s29 + $0xa8] sm:$0xff]  ;;  %210 = vst [vmem:[%s1432_s30 + $0x48] sm:$0xff] %v209_v9 }
  0x1d   : > { %212 = vst [vmem:[%s1432_s30 + $0x50] sm:$0xff] %v211_v10  ;;  %214 = vst [vmem:[%s1432_s30 + $0x58] sm:$0xff] %v213_v11  ;;  %v215_v12 = vld [vmem:[%s1424_s29 + $0xc0] sm:$0xff]  ;;  %v217_v13 = vld [vmem:[%s1424_s29 + $0xc8] sm:$0xff] }
  0x1e   : > { %v219_v14 = vld [vmem:[%s1424_s29 + $0xe0] sm:$0xff]  ;;  %216 = vst [vmem:[%s1432_s30 + $0x60] sm:$0xff] %v215_v12  ;;  %218 = vst [vmem:[%s1432_s30 + $0x68] sm:$0xff] %v217_v13  ;;  %v221_v15 = vld [vmem:[%s1424_s29 + $0xe8] sm:$0xff] }
  0x1f   : > { %220 = vst [vmem:[%s1432_s30 + $0x70] sm:$0xff] %v219_v14  ;;  %v223_v16 = vld [vmem:[%s1424_s29 + $0x100] sm:$0xff]  ;;  %v225_v17 = vld [vmem:[%s1424_s29 + $0x108] sm:$0xff]  ;;  %222 = vst [vmem:[%s1432_s30 + $0x78] sm:$0xff] %v221_v15 }
  0x20   : > { %224 = vst [vmem:[%s1432_s30 + $0x80] sm:$0xff] %v223_v16  ;;  %226 = vst [vmem:[%s1432_s30 + $0x88] sm:$0xff] %v225_v17  ;;  %v227_v18 = vld [vmem:[%s1424_s29 + $0x120] sm:$0xff]  ;;  %v229_v19 = vld [vmem:[%s1424_s29 + $0x128] sm:$0xff] }
  0x21   : > { %v231_v20 = vld [vmem:[%s1424_s29 + $0x140] sm:$0xff]  ;;  %228 = vst [vmem:[%s1432_s30 + $0x90] sm:$0xff] %v227_v18  ;;  %230 = vst [vmem:[%s1432_s30 + $0x98] sm:$0xff] %v229_v19  ;;  %v233_v21 = vld [vmem:[%s1424_s29 + $0x148] sm:$0xff] }
  0x22   : > { %232 = vst [vmem:[%s1432_s30 + $0xa0] sm:$0xff] %v231_v20  ;;  %v235_v22 = vld [vmem:[%s1424_s29 + $0x160] sm:$0xff]  ;;  %v237_v23 = vld [vmem:[%s1424_s29 + $0x168] sm:$0xff]  ;;  %234 = vst [vmem:[%s1432_s30 + $0xa8] sm:$0xff] %v233_v21 }
  0x23   : > { %236 = vst [vmem:[%s1432_s30 + $0xb0] sm:$0xff] %v235_v22  ;;  %238 = vst [vmem:[%s1432_s30 + $0xb8] sm:$0xff] %v237_v23  ;;  %v239_v24 = vld [vmem:[%s1424_s29 + $0x180] sm:$0xff]  ;;  %v241_v25 = vld [vmem:[%s1424_s29 + $0x188] sm:$0xff] }
  0x24   : > { %v243_v26 = vld [vmem:[%s1424_s29 + $0x1a0] sm:$0xff]  ;;  %240 = vst [vmem:[%s1432_s30 + $0xc0] sm:$0xff] %v239_v24  ;;  %242 = vst [vmem:[%s1432_s30 + $0xc8] sm:$0xff] %v241_v25  ;;  %v245_v27 = vld [vmem:[%s1424_s29 + $0x1a8] sm:$0xff] }
  0x25   : > { %244 = vst [vmem:[%s1432_s30 + $0xd0] sm:$0xff] %v243_v26  ;;  %v247_v28 = vld [vmem:[%s1424_s29 + $0x1c0] sm:$0xff]  ;;  %v249_v29 = vld [vmem:[%s1424_s29 + $0x1c8] sm:$0xff]  ;;  %246 = vst [vmem:[%s1432_s30 + $0xd8] sm:$0xff] %v245_v27 }
  0x26   : > { %248 = vst [vmem:[%s1432_s30 + $0xe0] sm:$0xff] %v247_v28  ;;  %250 = vst [vmem:[%s1432_s30 + $0xe8] sm:$0xff] %v249_v29  ;;  %v251_v30 = vld [vmem:[%s1424_s29 + $0x1e0] sm:$0xff]  ;;  %v253_v31 = vld [vmem:[%s1424_s29 + $0x1e8] sm:$0xff] }
  0x27   : > { %v255_v32 = vld [vmem:[%s1424_s29 + $0x200] sm:$0xff]  ;;  %252 = vst [vmem:[%s1432_s30 + $0xf0] sm:$0xff] %v251_v30  ;;  %254 = vst [vmem:[%s1432_s30 + $0xf8] sm:$0xff] %v253_v31  ;;  %v257_v33 = vld [vmem:[%s1424_s29 + $0x208] sm:$0xff] }
  0x28   : > { %256 = vst [vmem:[%s1432_s30 + $0x100] sm:$0xff] %v255_v32  ;;  %v259_v34 = vld [vmem:[%s1424_s29 + $0x220] sm:$0xff]  ;;  %v261_v35 = vld [vmem:[%s1424_s29 + $0x228] sm:$0xff]  ;;  %258 = vst [vmem:[%s1432_s30 + $0x108] sm:$0xff] %v257_v33 }
  0x29   : > { %260 = vst [vmem:[%s1432_s30 + $0x110] sm:$0xff] %v259_v34  ;;  %262 = vst [vmem:[%s1432_s30 + $0x118] sm:$0xff] %v261_v35  ;;  %v263_v36 = vld [vmem:[%s1424_s29 + $0x240] sm:$0xff]  ;;  %v265_v37 = vld [vmem:[%s1424_s29 + $0x248] sm:$0xff] }
  0x2a   : > { %v267_v38 = vld [vmem:[%s1424_s29 + $0x260] sm:$0xff]  ;;  %264 = vst [vmem:[%s1432_s30 + $0x120] sm:$0xff] %v263_v36  ;;  %266 = vst [vmem:[%s1432_s30 + $0x128] sm:$0xff] %v265_v37  ;;  %v269_v39 = vld [vmem:[%s1424_s29 + $0x268] sm:$0xff] }
  0x2b   : > { %268 = vst [vmem:[%s1432_s30 + $0x130] sm:$0xff] %v267_v38  ;;  %v271_v40 = vld [vmem:[%s1424_s29 + $0x280] sm:$0xff]  ;;  %v273_v41 = vld [vmem:[%s1424_s29 + $0x288] sm:$0xff]  ;;  %270 = vst [vmem:[%s1432_s30 + $0x138] sm:$0xff] %v269_v39 }
  0x2c   : > { %272 = vst [vmem:[%s1432_s30 + $0x140] sm:$0xff] %v271_v40  ;;  %274 = vst [vmem:[%s1432_s30 + $0x148] sm:$0xff] %v273_v41  ;;  %v275_v42 = vld [vmem:[%s1424_s29 + $0x2a0] sm:$0xff]  ;;  %v277_v43 = vld [vmem:[%s1424_s29 + $0x2a8] sm:$0xff] }
  0x2d   : > { %v279_v44 = vld [vmem:[%s1424_s29 + $0x2c0] sm:$0xff]  ;;  %276 = vst [vmem:[%s1432_s30 + $0x150] sm:$0xff] %v275_v42  ;;  %278 = vst [vmem:[%s1432_s30 + $0x158] sm:$0xff] %v277_v43  ;;  %v281_v45 = vld [vmem:[%s1424_s29 + $0x2c8] sm:$0xff] }
  0x2e   : > { %280 = vst [vmem:[%s1432_s30 + $0x160] sm:$0xff] %v279_v44  ;;  %v283_v46 = vld [vmem:[%s1424_s29 + $0x2e0] sm:$0xff]  ;;  %v285_v47 = vld [vmem:[%s1424_s29 + $0x2e8] sm:$0xff]  ;;  %282 = vst [vmem:[%s1432_s30 + $0x168] sm:$0xff] %v281_v45 }
  0x2f   : > { %284 = vst [vmem:[%s1432_s30 + $0x170] sm:$0xff] %v283_v46  ;;  %286 = vst [vmem:[%s1432_s30 + $0x178] sm:$0xff] %v285_v47 }
  0x30 PF: > { %p1087_p7 = scmp.ge.s32.totalorder %s1344_s18, 1  ;;  %p299_p8 = scmp.lt.s32.totalorder %s1344_s18, 5 }
  0x32   : > { %p300_p9 = pnand %p1087_p7, %p299_p8 }
  0x33   : > { %s306_s4 = sand.u32 (!%p300_p9), 1, %s1320_s12   ;;  %p347_p10 = scmp.lt.s32.totalorder (!%p300_p9), %s1332_s15, 1  ;;  %vm705_vm0 = vcmask (!%p300_p9), 523264   ;;  %v427_v36 = vlaneseq (!%p300_p9) }
  0x34   : > { %303 = sbr.rel (%p300_p9) target bundleno = 357 (0x165), region = 51  ;;  %s1090_s11 = sshll.u32 (!%p300_p9), %s1328_s14, 2 }
  0x35   : > { %s1154_s5 = smul.u32 (!%p300_p9), 384, %s306_s4  ;;  %p359_p11 = scmp.lt.s32.totalorder (!%p300_p9), %s1090_s11, 7  ;;  %v1599_v37 = vshrl.u32 (!%p300_p9), %v427_v36, 7  ;;  %vm921_vm1 = vcmp.lt.s32.totalorder (!%p300_p9), %v427_v36, 512 }
  0x37   : > { %s1527_s6 = scalar_lea.vmem (!%p300_p9), [#allocation2], %s1154_s5  ;;  %v429_v38 = vsub.s32 (!%p300_p9), 0, %v1599_v37  ;;  %v437_v39 = vsub.s32 (!%p300_p9), 2, %v1599_v37  ;;  %v433_v41 = vsub.s32 (!%p300_p9), 1, %v1599_v37  ;;  %v441_v42 = vsub.s32 (!%p300_p9), 3, %v1599_v37 }
  0x38   : > { %v1212_v48 = vld [vmem:[%s1527_s6 + $0x4] ss:$16 sps:$4 sm:$0xff] (!%p300_p9)   ;;  %v1214_v49 = vld [vmem:[%s1527_s6 + $0xc] ss:$16 sps:$4 sm:$0xff] (!%p300_p9)   ;;  %v1216_v50 = vld [vmem:[%s1527_s6] ss:$16 sps:$4 sm:$0xff] (!%p300_p9)  }
  0x39   : > { %712 = vmatprep.subr.bf16.mxu0 (!%p300_p9), %v1212_v48  ;;  %v1217_v51 = vld [vmem:[%s1527_s6 + $0x8] ss:$16 sps:$4 sm:$0xff] (!%p300_p9)   ;;  %765 = vmatprep.subr.bf16.mxu1 (!%p300_p9), %v1214_v49  ;;  %v1218_v52 = vld [vmem:[%s1527_s6 + $0x24] ss:$16 sps:$4 sm:$0xff] (!%p300_p9)   ;;  %v1220_v53 = vld [vmem:[%s1527_s6 + $0x2c] ss:$16 sps:$4 sm:$0xff] (!%p300_p9)  }
  0x3a   : > { %713 = vmatpush1.bf16.msra.mxu0 (!%p300_p9), %v1216_v50  ;;  %766 = vmatpush1.bf16.msra.mxu1 (!%p300_p9), %v1217_v51  ;;  %v1222_v54 = vld [vmem:[%s1527_s6 + $0x20] ss:$16 sps:$4 sm:$0xff] (!%p300_p9)   ;;  %v1223_v55 = vld [vmem:[%s1527_s6 + $0x28] ss:$16 sps:$4 sm:$0xff] (!%p300_p9)   ;;  %v1224_v56 = vld [vmem:[%s1527_s6 + $0x44] ss:$16 sps:$4 sm:$0xff] (!%p300_p9)  }
  0x3b   : > { %714 = vmatprep.subr.bf16.mxu0 %v1218_v52  ;;  %767 = vmatprep.subr.bf16.mxu1 %v1220_v53  ;;  %v1226_v57 = vld [vmem:[%s1527_s6 + $0x4c] ss:$16 sps:$4 sm:$0xff]   ;;  %v1228_v58 = vld [vmem:[%s1527_s6 + $0x40] ss:$16 sps:$4 sm:$0xff]   ;;  %v1229_v59 = vld [vmem:[%s1527_s6 + $0x48] ss:$16 sps:$4 sm:$0xff]  }
  0x3c   : > { %v1230_v60 = vld [vmem:[%s1527_s6 + $0x64] ss:$16 sps:$4 sm:$0xff]   ;;  %v1232_v61 = vld [vmem:[%s1527_s6 + $0x6c] ss:$16 sps:$4 sm:$0xff]   ;;  %v1234_v62 = vld [vmem:[%s1527_s6 + $0x60] ss:$16 sps:$4 sm:$0xff]  }
  0x3d   : > { %v1235_v63 = vld [vmem:[%s1527_s6 + $0x68] ss:$16 sps:$4 sm:$0xff]   ;;  %v1236_v0 = vld [vmem:[%s1527_s6 + $0x84] ss:$16 sps:$4 sm:$0xff]   ;;  %v1238_v1 = vld [vmem:[%s1527_s6 + $0x8c] ss:$16 sps:$4 sm:$0xff]  }
  0x3e   : > { %715 = vmatpush1.bf16.msra.mxu0 %v1222_v54  ;;  %768 = vmatpush1.bf16.msra.mxu1 %v1223_v55  ;;  %v1240_v2 = vld [vmem:[%s1527_s6 + $0x80] ss:$16 sps:$4 sm:$0xff]   ;;  %v1241_v3 = vld [vmem:[%s1527_s6 + $0x88] ss:$16 sps:$4 sm:$0xff]   ;;  %v1242_v4 = vld [vmem:[%s1527_s6 + $0xa4] ss:$16 sps:$4 sm:$0xff]  }
  0x3f   : > { %716 = vmatprep.subr.bf16.mxu0 %v1224_v56  ;;  %769 = vmatprep.subr.bf16.mxu1 %v1226_v57  ;;  %v1244_v5 = vld [vmem:[%s1527_s6 + $0xac] ss:$16 sps:$4 sm:$0xff]   ;;  %v1246_v6 = vld [vmem:[%s1527_s6 + $0xa0] ss:$16 sps:$4 sm:$0xff]   ;;  %v1247_v7 = vld [vmem:[%s1527_s6 + $0xa8] ss:$16 sps:$4 sm:$0xff]  }
  0x40   : > { %v1248_v8 = vld [vmem:[%s1527_s6 + $0xc4] ss:$16 sps:$4 sm:$0xff]   ;;  %v1250_v9 = vld [vmem:[%s1527_s6 + $0xcc] ss:$16 sps:$4 sm:$0xff]   ;;  %v1252_v10 = vld [vmem:[%s1527_s6 + $0xc0] ss:$16 sps:$4 sm:$0xff]  }
  0x41   : > { %v1253_v11 = vld [vmem:[%s1527_s6 + $0xc8] ss:$16 sps:$4 sm:$0xff]   ;;  %s1654_s15 = smov (!%p347_p10, %s1332_s15), 1  ;;  %v1254_v12 = vld [vmem:[%s1527_s6 + $0xe4] ss:$16 sps:$4 sm:$0xff]   ;;  %s1656_s11 = smov (!%p359_p11, %s1090_s11), 7 }
  0x42   : > { %717 = vmatpush1.bf16.msra.mxu0 %v1228_v58  ;;  %770 = vmatpush1.bf16.msra.mxu1 %v1229_v59  ;;  %v1256_v13 = vld [vmem:[%s1527_s6 + $0xec] ss:$16 sps:$4 sm:$0xff]   ;;  %v1258_v14 = vld [vmem:[%s1527_s6 + $0xe0] ss:$16 sps:$4 sm:$0xff]   ;;  %s1152_s7 = sshll.u32 %s1654_s15, 5  ;;  %s361_s22 = scalar_lea.vmem %s1639_s2, %s1656_s11 }
  0x43   : > { %718 = vmatprep.subr.bf16.mxu0 %v1230_v60  ;;  %771 = vmatprep.subr.bf16.mxu1 %v1232_v61  ;;  %v1259_v15 = vld [vmem:[%s1527_s6 + $0xe8] ss:$16 sps:$4 sm:$0xff]   ;;  %v1260_v16 = vld [vmem:[%s1527_s6 + $0x104] ss:$16 sps:$4 sm:$0xff]   ;;  %v1262_v17 = vld [vmem:[%s1527_s6 + $0x10c] ss:$16 sps:$4 sm:$0xff]   ;;  %s1571_s10 = scalar_lea.vmem %s1637_s0, %s1152_s7 }
  0x44   : > { %v1264_v18 = vld [vmem:[%s1527_s6 + $0x100] ss:$16 sps:$4 sm:$0xff]   ;;  %v1265_v19 = vld [vmem:[%s1527_s6 + $0x108] ss:$16 sps:$4 sm:$0xff]   ;;  %v1266_v20 = vld [vmem:[%s1527_s6 + $0x124] ss:$16 sps:$4 sm:$0xff]  }
  0x45   : > { %v1268_v21 = vld [vmem:[%s1527_s6 + $0x12c] ss:$16 sps:$4 sm:$0xff]   ;;  %v1270_v23 = vld [vmem:[%s1527_s6 + $0x120] ss:$16 sps:$4 sm:$0xff]   ;;  %v1271_v24 = vld [vmem:[%s1527_s6 + $0x128] ss:$16 sps:$4 sm:$0xff]  }
  0x46   : > { %719 = vmatpush1.bf16.msra.mxu0 %v1234_v62  ;;  %772 = vmatpush1.bf16.msra.mxu1 %v1235_v63  ;;  %v1286_v22 = vld [vmem:[%s1571_s10 + $0x4] ss:$8 sps:$4 sm:$0xff]   ;;  %v1276_v27 = vld [vmem:[%s1527_s6 + $0x140] ss:$16 sps:$4 sm:$0xff]   ;;  %v1277_v28 = vld [vmem:[%s1527_s6 + $0x148] ss:$16 sps:$4 sm:$0xff]  }
  0x47   : > { %720 = vmatprep.subr.bf16.mxu0 %v1236_v0  ;;  %773 = vmatprep.subr.bf16.mxu1 %v1238_v1  ;;  %v1272_v25 = vld [vmem:[%s1527_s6 + $0x144] ss:$16 sps:$4 sm:$0xff]   ;;  %v1274_v26 = vld [vmem:[%s1527_s6 + $0x14c] ss:$16 sps:$4 sm:$0xff]   ;;  %v1282_v31 = vld [vmem:[%s1527_s6 + $0x160] ss:$16 sps:$4 sm:$0xff]  }
  0x48   : > { %1145 = vmatprep.mubr.msk.bf16.mxu0 %vm705_vm0, %v1286_v22  ;;  %1147 = vmatprep.mubr.msk.bf16.mxu1 %vm705_vm0, %v1286_v22  ;;  %v1278_v29 = vld [vmem:[%s1527_s6 + $0x164] ss:$16 sps:$4 sm:$0xff]   ;;  %v1280_v30 = vld [vmem:[%s1527_s6 + $0x16c] ss:$16 sps:$4 sm:$0xff]   ;;  %v1283_v32 = vld [vmem:[%s1527_s6 + $0x168] ss:$16 sps:$4 sm:$0xff]  }
  0x49   : > { %v1284_v33 = vld [vmem:[%s1571_s10] ss:$8 sps:$4 sm:$0xff]   ;;  %v1287_v34 = vld [vmem:[%s1571_s10 + $0x14] ss:$8 sps:$4 sm:$0xff]   ;;  %v1289_v35 = vld [vmem:[%s1571_s10 + $0x10] ss:$8 sps:$4 sm:$0xff]  }
  0x4a   : > { %721 = vmatpush1.bf16.msra.mxu0 %v1240_v2  ;;  %774 = vmatpush1.bf16.msra.mxu1 %v1241_v3  ;;  %v421_v40 = vld [vmem:[%s361_s22] sm:$0xf]  ;;  %s1092_s14 = sshll.u32 %s1654_s15, 3 }
  0x4b   : > { %722 = vmatprep.subr.bf16.mxu0 %v1242_v4  ;;  %775 = vmatprep.subr.bf16.mxu1 %v1244_v5  ;;  %v430_v43 = vrot.slane %v421_v40, %v429_v38  ;;  %v438_v44 = vrot.slane %v421_v40, %v437_v39  ;;  %v434_v45 = vrot.slane %v421_v40, %v433_v41  ;;  %s369_s24 = sadd.s32 %s1092_s14, %s1656_s11 }
  0x4c   : > { %v442_v46 = vrot.slane %v421_v40, %v441_v42  ;;  %s370_s27 = scalar_lea.vmem %s1640_s3, %s369_s24 }
  0x4e   : > { %723 = vmatpush1.bf16.msra.mxu0 %v1246_v6  ;;  %776 = vmatpush1.bf16.msra.mxu1 %v1247_v7 }
  0x4f   : > { %724 = vmatprep.subr.bf16.mxu0 %v1248_v8  ;;  %777 = vmatprep.subr.bf16.mxu1 %v1250_v9 }
  0x52   : > { %725 = vmatpush1.bf16.msra.mxu0 %v1252_v10  ;;  %778 = vmatpush1.bf16.msra.mxu1 %v1253_v11 }
  0x53   : > { %726 = vmatprep.subr.bf16.mxu0 %v1254_v12  ;;  %779 = vmatprep.subr.bf16.mxu1 %v1256_v13 }
  0x56   : > { %727 = vmatpush1.bf16.msra.mxu0 %v1258_v14  ;;  %780 = vmatpush1.bf16.msra.mxu1 %v1259_v15 }
  0x57   : > { %728 = vmatprep.subr.bf16.mxu0 %v1260_v16  ;;  %781 = vmatprep.subr.bf16.mxu1 %v1262_v17 }
  0x5a   : > { %729 = vmatpush1.bf16.msra.mxu0 %v1264_v18  ;;  %782 = vmatpush1.bf16.msra.mxu1 %v1265_v19 }
  0x5b   : > { %730 = vmatprep.subr.bf16.mxu0 %v1266_v20  ;;  %783 = vmatprep.subr.bf16.mxu1 %v1268_v21 }
  0x5e   : > { %731 = vmatpush1.bf16.msra.mxu0 %v1270_v23  ;;  %784 = vmatpush1.bf16.msra.mxu1 %v1271_v24 }
  0x5f   : > { %732 = vmatprep.subr.bf16.mxu0 %v1272_v25  ;;  %785 = vmatprep.subr.bf16.mxu1 %v1274_v26 }
  0x62   : > { %733 = vmatpush1.bf16.msra.mxu0 %v1276_v27  ;;  %786 = vmatpush1.bf16.msra.mxu1 %v1277_v28 }
  0x63   : > { %734 = vmatprep.subr.bf16.mxu0 %v1278_v29  ;;  %787 = vmatprep.subr.bf16.mxu1 %v1280_v30 }
  0x66   : > { %735 = vmatpush1.bf16.msra.mxu0 %v1282_v31  ;;  %788 = vmatpush1.bf16.msra.mxu1 %v1283_v32 }
  0x69   : > { %745 = vmatmul.mubr.bf16.vlgmr.msra.gmra.mrb[0].mxu0 %v1284_v33  ;;  %798 = vmatmul.mubr.bf16.vlgmr.msra.gmra.mrb[0].mxu1 %v1284_v33 }
  0x6a   : > { %1146 = vmatprep.mubr.msk.bf16.mxu0 %vm705_vm0, %v1287_v34  ;;  %1148 = vmatprep.mubr.msk.bf16.mxu1 %vm705_vm0, %v1287_v34 }
  0x71   : > { %755 = vmatmul.mubr.bf16.gmra.mrb[4].mxu0 %v1289_v35  ;;  %808 = vmatmul.mubr.bf16.gmra.mrb[4].mxu1 %v1289_v35 }
 0x13c   : > { %v746_v47 = vpop.f32.mrb[0].mxu0  ;;  %v799_v48 = vpop.f32.mrb[0].mxu1 }
 0x13d   : > { %v747_v49 = vadd.f32 %v746_v47, %v430_v43  ;;  %v800_v50 = vadd.f32 %v799_v48, %v438_v44  ;;  %v748_v51 = vpop.f32.mrb[1].mxu0  ;;  %v801_v52 = vpop.f32.mrb[1].mxu1 }
 0x13e   : > { %v749_v53 = vadd.f32 %v748_v51, %v434_v45  ;;  %v802_v54 = vadd.f32 %v801_v52, %v442_v46  ;;  %v750_v55 = vpop.f32.mrb[2].mxu0  ;;  %v803_v56 = vpop.f32.mrb[2].mxu1 }
 0x13f   : > { %v818_v57 = vmul.f32 0.2, %v747_v49  ;;  %v820_v58 = vmul.f32 0.2, %v800_v50  ;;  %v751_v59 = vadd.f32 %v750_v55, %v430_v43  ;;  %v804_v60 = vadd.f32 %v803_v56, %v438_v44  ;;  %v752_v61 = vpop.f32.mrb[3].mxu0  ;;  %v805_v62 = vpop.f32.mrb[3].mxu1 }
 0x140   : > { %v819_v63 = vmul.f32 0.2, %v749_v53  ;;  %v821_v0 = vmul.f32 0.2, %v802_v54  ;;  %v753_v1 = vadd.f32 %v752_v61, %v434_v45  ;;  %v806_v2 = vadd.f32 %v805_v62, %v442_v46 }
 0x141   : > { %v822_v3 = vmul.f32 0.2, %v751_v59  ;;  %v824_v4 = vmul.f32 0.2, %v804_v60  ;;  %v834_v7 = vmax.f32 %v747_v49, %v818_v57  ;;  %v836_v8 = vmax.f32 %v800_v50, %v820_v58 }
 0x142   : > { %v823_v5 = vmul.f32 0.2, %v753_v1  ;;  %v825_v6 = vmul.f32 0.2, %v806_v2  ;;  %v835_v11 = vmax.f32 %v749_v53, %v819_v63  ;;  %v837_v12 = vmax.f32 %v802_v54, %v821_v0 }
 0x143   : > { %v838_v9 = vmax.f32 %v751_v59, %v822_v3  ;;  %v840_v10 = vmax.f32 %v804_v60, %v824_v4  ;;  %v1346_v4 = vmov 1966171168  }
 0x144   : > { %v839_v13 = vmax.f32 %v753_v1, %v823_v5  ;;  %v841_v14 = vmax.f32 %v806_v2, %v825_v6  ;;  %v756_v15 = vpop.f32.mrb[4].mxu0  ;;  %v809_v16 = vpop.f32.mrb[4].mxu1  ;;  %v897_v5 = vunpack.c.l.s4 %v1346_v4 }
 0x145   : > { %v850_v17 = vmax.f32 %v834_v7, %v838_v9  ;;  %v868_v18 = vmax.f32 %v836_v8, %v840_v10  ;;  %v757_v19 = vadd.f32 %v756_v15, %v430_v43  ;;  %v810_v20 = vadd.f32 %v809_v16, %v438_v44  ;;  %v758_v21 = vpop.f32.mrb[5].mxu0  ;;  %v811_v22 = vpop.f32.mrb[5].mxu1 }
 0x146   : > { %v859_v23 = vmax.f32 %v835_v11, %v839_v13  ;;  %v877_v24 = vmax.f32 %v837_v12, %v841_v14  ;;  %v759_v25 = vadd.f32 %v758_v21, %v434_v45  ;;  %v812_v26 = vadd.f32 %v811_v22, %v442_v46  ;;  %v760_v27 = vpop.f32.mrb[6].mxu0  ;;  %v813_v28 = vpop.f32.mrb[6].mxu1 }
 0x147   : > { %v826_v29 = vmul.f32 0.2, %v757_v19  ;;  %v828_v30 = vmul.f32 0.2, %v810_v20  ;;  %v761_v31 = vadd.f32 %v760_v27, %v430_v43  ;;  %v814_v32 = vadd.f32 %v813_v28, %v438_v44  ;;  %v762_v33 = vpop.f32.mrb[7].mxu0  ;;  %v815_v34 = vpop.f32.mrb[7].mxu1 }
 0x148   : > { %v827_v35 = vmul.f32 0.2, %v759_v25  ;;  %v829_v38 = vmul.f32 0.2, %v812_v26  ;;  %v763_v39 = vadd.f32 %v762_v33, %v434_v45  ;;  %v816_v40 = vadd.f32 %v815_v34, %v442_v46 }
 0x149   : > { %v842_v41 = vmax.f32 %v757_v19, %v826_v29  ;;  %v844_v42 = vmax.f32 %v810_v20, %v828_v30  ;;  %v830_v47 = vmul.f32 0.2, %v761_v31  ;;  %v832_v48 = vmul.f32 0.2, %v814_v32 }
 0x14a   : > { %v843_v49 = vmax.f32 %v759_v25, %v827_v35  ;;  %v845_v50 = vmax.f32 %v812_v26, %v829_v38  ;;  %v831_v51 = vmul.f32 0.2, %v763_v39  ;;  %v833_v52 = vmul.f32 0.2, %v816_v40 }
 0x14b   : > { %v851_v53 = vmax.f32 %v850_v17, %v842_v41  ;;  %v869_v54 = vmax.f32 %v868_v18, %v844_v42  ;;  %v846_v55 = vmax.f32 %v761_v31, %v830_v47  ;;  %v848_v56 = vmax.f32 %v814_v32, %v832_v48 }
 0x14c   : > { %v860_v43 = vmax.f32 %v859_v23, %v843_v49  ;;  %v878_v44 = vmax.f32 %v877_v24, %v845_v50  ;;  %v847_v57 = vmax.f32 %v763_v39, %v831_v51  ;;  %v849_v58 = vmax.f32 %v816_v40, %v833_v52 }
 0x14d   : > { %v852_v59 = vmax.f32 %v851_v53, %v846_v55  ;;  %v870_v60 = vmax.f32 %v869_v54, %v848_v56  ;;  %v898_v14 = vunpack.c.0.s8 %v897_v5 }
 0x14e   : > { %v861_v45 = vmax.f32 %v860_v43, %v847_v57  ;;  %v879_v46 = vmax.f32 %v878_v44, %v849_v58 }
 0x14f   : > { %v853_v61 = vrot.slane %v852_v59, 4  ;;  %v871_v62 = vrot.slane %v870_v60, 4  ;;  %v901_v23 = vsub.s32 %v898_v14, %v1599_v37 }
 0x150   : > { %v862_v63 = vrot.slane %v861_v45, 4  ;;  %v880_v0 = vrot.slane %v879_v46, 4 }
 0x151   : > { %v854_v1 = vmax.f32 %v852_v59, %v853_v61  ;;  %v872_v2 = vmax.f32 %v870_v60, %v871_v62 }
 0x152   : > { %v863_v3 = vmax.f32 %v861_v45, %v862_v63  ;;  %v881_v6 = vmax.f32 %v879_v46, %v880_v0 }
 0x153   : > { %v855_v7 = vrot.slane %v854_v1, 2  ;;  %v873_v8 = vrot.slane %v872_v2, 2 }
 0x154   : > { %v864_v9 = vrot.slane %v863_v3, 2  ;;  %v882_v10 = vrot.slane %v881_v6, 2 }
 0x155   : > { %v856_v11 = vmax.f32 %v854_v1, %v855_v7  ;;  %v874_v12 = vmax.f32 %v872_v2, %v873_v8 }
 0x156   : > { %v865_v13 = vmax.f32 %v863_v3, %v864_v9  ;;  %v883_v15 = vmax.f32 %v881_v6, %v882_v10 }
 0x157   : > { %v857_v16 = vrot.slane %v856_v11, 1  ;;  %v875_v17 = vrot.slane %v874_v12, 1 }
 0x158   : > { %v866_v18 = vrot.slane %v865_v13, 1  ;;  %v884_v19 = vrot.slane %v883_v15, 1 }
 0x159   : > { %v858_v20 = vmax.f32 %v856_v11, %v857_v16  ;;  %v876_v21 = vmax.f32 %v874_v12, %v875_v17 }
 0x15a   : > { %v867_v22 = vmax.f32 %v865_v13, %v866_v18  ;;  %v885_v24 = vmax.f32 %v883_v15, %v884_v19 }
 0x15c   : > { %v894_v25 = vcombine.low %v858_v20, %v867_v22  ;;  %v895_v26 = vcombine.low %v876_v21, %v885_v24 }
 0x15e   : > { %v902_v27 = vrot.slane %v894_v25, %v901_v23  ;;  %v909_v28 = vrot.slane %v895_v26, %v901_v23 }
 0x160   : > { %v910_v29 = vcombine.low %v902_v27, %v909_v28 }
 0x162   : > { %v917_v30 = vrot.slane %v910_v29, %v901_v23 }
 0x164   : > { %923 = vst.msk [vmem:[%s370_s27] sm:$0xf] %vm921_vm1, %v917_v30 }
 0x165 PF: > { %s13_s18 = sadd.s32 1, %s1344_s18   ;;  %s1641_s12 = smov %s1324_s13 }
 0x166   : > { %p10_p12 = scmp.ge.s32.totalorder %s13_s18, 6   ;;  %s1642_s13 = smov %s1416_s23 }
 0x167   : > { %s1643_s14 = smov %s1336_s16  ;;  %s1644_s15 = smov %s1340_s17 }
 0x168   : > { %s1645_s16 = smov %s1648_s19  ;;  %s1646_s17 = smov %s1652_s20 }
 0x169   :  { %12 = sbr.rel (!%p10_p12) target bundleno = 4 (0x4), region = 104 }

// kernel: dgcnn_forward.13
= control target key start
LH: loop header
LB: loop body
LE: loop exit
PB: predicated region body
PF: predicated region fallthrough
CT: control target
= control target key end

     0   :  { %s1715_s27 = smov 0   ;;  %s1717_s28 = smov 0   ;;  %s2022_s0 = inlined_call_operand.vmem [shape: bf16[2,32,192], index: 0, kind: input, shape index: {}]   ;;  %s2023_s1 = inlined_call_operand.vmem [shape: f32[2,1,256], index: 1, kind: input, shape index: {}]   ;;  %s2024_s2 = inlined_call_operand.vmem [shape: bf16[192,256], index: 2, kind: input, shape index: {}]   ;;  %s2025_s3 = inlined_call_operand.vmem [shape: bf16[256,256], index: 3, kind: input, shape index: {}]   ;;  %s2026_s4 = inlined_call_operand.vmem [shape: f32[1,256], index: 4, kind: input, shape index: {}]   ;;  %s2027_s5 = inlined_call_operand.vmem [shape: bf16[256,128], index: 5, kind: input, shape index: {}]   ;;  %s2028_s6 = inlined_call_operand.vmem [shape: f32[1,128], index: 6, kind: input, shape index: {}]   ;;  %s2029_s7 = inlined_call_operand.vmem [shape: bf16[128,128], index: 7, kind: input, shape index: {}]   ;;  %s2030_s8 = inlined_call_operand.vmem [shape: bf16[2,32,128], index: 8, kind: output, shape index: {}]  }
   0x1   :  { %s1719_s29 = smov 0  }
   0x2 LB: > { %s30_s30 = sadd.s32 1, %s1664_s28  ;;  %p1334_p0 = scmp.ge.s32.totalorder %s1668_s29, 1  ;;  %s1668_s29 = sphi %s1719_s29, %s18_s29   ;;  %s1664_s28 = sphi %s1717_s28, %s2032_s28   ;;  %s1660_s27 = sphi %s1715_s27, %s2031_s27  }
   0x3   : > { %p32_p1 = scmp.ge.s32.totalorder %s30_s30, 2  ;;  %p293_p2 = scmp.lt.s32.totalorder %s1668_s29, 3 }
   0x5   : > { %s2034_s30 = smov (%p32_p1, %s30_s30), 0  ;;  %p294_p3 = pnand %p1334_p0, %p293_p2 }
   0x6   : > { %v1532_v0 = vld [vmem:[%s2024_s2 + $0x4] ss:$8 sps:$4 sm:$0xff] (!%p294_p3)   ;;  %v1534_v1 = vld [vmem:[%s2024_s2] ss:$8 sps:$4 sm:$0xff] (!%p294_p3)   ;;  %v1535_v2 = vld [vmem:[%s2024_s2 + $0x14] ss:$8 sps:$4 sm:$0xff] (!%p294_p3)  }
   0x7   : > { %297 = sbr.rel (%p294_p3) target bundleno = 954 (0x3ba), region = 52  ;;  %551 = vmatprep.subr.bf16.mxu0 (!%p294_p3), %v1532_v0  ;;  %v1537_v3 = vld [vmem:[%s2024_s2 + $0x10] ss:$8 sps:$4 sm:$0xff] (!%p294_p3)   ;;  %p341_p4 = scmp.lt.s32.totalorder (!%p294_p3), %s1660_s27, 1  ;;  %v1538_v4 = vld [vmem:[%s2024_s2 + $0x24] ss:$8 sps:$4 sm:$0xff] (!%p294_p3)  }
   0x8   : > { %552 = vmatpush1.bf16.msra.mxu0 (!%p294_p3), %v1534_v1  ;;  %v1540_v5 = vld [vmem:[%s2024_s2 + $0x20] ss:$8 sps:$4 sm:$0xff] (!%p294_p3)   ;;  %v1541_v6 = vld [vmem:[%s2024_s2 + $0x34] ss:$8 sps:$4 sm:$0xff] (!%p294_p3)   ;;  %v1543_v7 = vld [vmem:[%s2024_s2 + $0x30] ss:$8 sps:$4 sm:$0xff] (!%p294_p3)  }
   0x9   : > { %553 = vmatprep.subr.bf16.mxu0 (!%p294_p3), %v1535_v2  ;;  %v1544_v8 = vld [vmem:[%s2024_s2 + $0x44] ss:$8 sps:$4 sm:$0xff] (!%p294_p3)   ;;  %v1546_v9 = vld [vmem:[%s2024_s2 + $0x40] ss:$8 sps:$4 sm:$0xff] (!%p294_p3)   ;;  %v1547_v10 = vld [vmem:[%s2024_s2 + $0x54] ss:$8 sps:$4 sm:$0xff] (!%p294_p3)  }
   0xa   : > { %vm544_vm0 = vcmask (!%p294_p3), 523264   ;;  %v1549_v12 = vld [vmem:[%s2024_s2 + $0x50] ss:$8 sps:$4 sm:$0xff] (!%p294_p3)   ;;  %v1550_v13 = vld [vmem:[%s2024_s2 + $0x64] ss:$8 sps:$4 sm:$0xff] (!%p294_p3)  }
   0xb   : > { %v1574_v14 = vld [vmem:[%s2025_s3 + $0x4] ss:$8 sps:$4 sm:$0xff] (!%p294_p3)   ;;  %v1576_v15 = vld [vmem:[%s2025_s3] ss:$8 sps:$4 sm:$0xff] (!%p294_p3)   ;;  %v1577_v16 = vld [vmem:[%s2025_s3 + $0x14] ss:$8 sps:$4 sm:$0xff] (!%p294_p3)  }
   0xc   : > { %554 = vmatpush1.bf16.msra.mxu0 (!%p294_p3), %v1537_v3  ;;  %828 = vmatprep.subr.bf16.mxu1 (!%p294_p3), %v1574_v14  ;;  %v1579_v17 = vld [vmem:[%s2025_s3 + $0x10] ss:$8 sps:$4 sm:$0xff] (!%p294_p3)   ;;  %v1552_v18 = vld [vmem:[%s2024_s2 + $0x60] ss:$8 sps:$4 sm:$0xff] (!%p294_p3)   ;;  %v1580_v19 = vld [vmem:[%s2025_s3 + $0x24] ss:$8 sps:$4 sm:$0xff] (!%p294_p3)  }
   0xd   : > { %555 = vmatprep.subr.bf16.mxu0 (!%p294_p3), %v1538_v4  ;;  %829 = vmatpush1.bf16.msra.mxu1 (!%p294_p3), %v1576_v15  ;;  %v1553_v20 = vld [vmem:[%s2024_s2 + $0x74] ss:$8 sps:$4 sm:$0xff] (!%p294_p3)   ;;  %v1582_v21 = vld [vmem:[%s2025_s3 + $0x20] ss:$8 sps:$4 sm:$0xff] (!%p294_p3)   ;;  %v1555_v22 = vld [vmem:[%s2024_s2 + $0x70] ss:$8 sps:$4 sm:$0xff] (!%p294_p3)  }
   0xe   : > { %s2036_s27 = smov (!%p341_p4, %s1660_s27), 1  ;;  %830 = vmatprep.subr.bf16.mxu1 %v1577_v16  ;;  %v1583_v23 = vld [vmem:[%s2025_s3 + $0x34] ss:$8 sps:$4 sm:$0xff]   ;;  %v1556_v24 = vld [vmem:[%s2024_s2 + $0x84] ss:$8 sps:$4 sm:$0xff]  }
   0xf   : > { %s1433_s25 = sshll.u32 %s2036_s27, 5  ;;  %v1585_v25 = vld [vmem:[%s2025_s3 + $0x30] ss:$8 sps:$4 sm:$0xff]   ;;  %v1558_v26 = vld [vmem:[%s2024_s2 + $0x80] ss:$8 sps:$4 sm:$0xff]   ;;  %s1337_s22 = sshll.u32 %s2036_s27, 1 }
  0x10   : > { %556 = vmatpush1.bf16.msra.mxu0 %v1540_v5  ;;  %s1766_s12 = scalar_lea.vmem %s2022_s0, %s1433_s25  ;;  %v1586_v27 = vld [vmem:[%s2025_s3 + $0x44] ss:$8 sps:$4 sm:$0xff]   ;;  %v1559_v28 = vld [vmem:[%s2024_s2 + $0x94] ss:$8 sps:$4 sm:$0xff]   ;;  %v1561_v29 = vld [vmem:[%s2024_s2 + $0x90] ss:$8 sps:$4 sm:$0xff]   ;;  %s354_s25 = scalar_lea.vmem %s2023_s1, %s1337_s22 }
  0x11   : > { %557 = vmatprep.subr.bf16.mxu0 %v1541_v6  ;;  %v1570_v11 = vld [vmem:[%s1766_s12 + $0x4] ss:$8 sps:$4 sm:$0xff]   ;;  %831 = vmatpush1.bf16.msra.mxu1 %v1579_v17  ;;  %v1588_v30 = vld [vmem:[%s2025_s3 + $0x40] ss:$8 sps:$4 sm:$0xff]   ;;  %v1589_v32 = vld [vmem:[%s2025_s3 + $0x54] ss:$8 sps:$4 sm:$0xff]   ;;  %v396_v6 = vlaneseq }
  0x12   : > { %1368 = vmatprep.mubr.msk.bf16.mxu0 %vm544_vm0, %v1570_v11  ;;  %832 = vmatprep.subr.bf16.mxu1 %v1580_v19  ;;  %v1562_v31 = vld [vmem:[%s2024_s2 + $0xa4] ss:$8 sps:$4 sm:$0xff]   ;;  %v1591_v33 = vld [vmem:[%s2025_s3 + $0x50] ss:$8 sps:$4 sm:$0xff]   ;;  %v1564_v34 = vld [vmem:[%s2024_s2 + $0xa0] ss:$8 sps:$4 sm:$0xff]  }
  0x13   : > { %v1592_v35 = vld [vmem:[%s2025_s3 + $0x64] ss:$8 sps:$4 sm:$0xff]   ;;  %v1565_v36 = vld [vmem:[%s2024_s2 + $0xb4] ss:$8 sps:$4 sm:$0xff]   ;;  %v1594_v37 = vld [vmem:[%s2025_s3 + $0x60] ss:$8 sps:$4 sm:$0xff]  }
  0x14   : > { %558 = vmatpush1.bf16.msra.mxu0 %v1543_v7  ;;  %v1567_v38 = vld [vmem:[%s2024_s2 + $0xb0] ss:$8 sps:$4 sm:$0xff]   ;;  %v1595_v39 = vld [vmem:[%s2025_s3 + $0x74] ss:$8 sps:$4 sm:$0xff]   ;;  %v1568_v40 = vld [vmem:[%s1766_s12] ss:$8 sps:$4 sm:$0xff]  }
  0x15   : > { %559 = vmatprep.subr.bf16.mxu0 %v1544_v8  ;;  %833 = vmatpush1.bf16.msra.mxu1 %v1582_v21  ;;  %v1597_v41 = vld [vmem:[%s2025_s3 + $0x70] ss:$8 sps:$4 sm:$0xff]   ;;  %v1571_v42 = vld [vmem:[%s1766_s12 + $0x14] ss:$8 sps:$4 sm:$0xff]   ;;  %v1598_v43 = vld [vmem:[%s2025_s3 + $0x84] ss:$8 sps:$4 sm:$0xff]  }
  0x16   : > { %834 = vmatprep.subr.bf16.mxu1 %v1583_v23  ;;  %v1600_v44 = vld [vmem:[%s2025_s3 + $0x80] ss:$8 sps:$4 sm:$0xff]   ;;  %v1601_v45 = vld [vmem:[%s2025_s3 + $0x94] ss:$8 sps:$4 sm:$0xff]   ;;  %v1573_v46 = vld [vmem:[%s1766_s12 + $0x10] ss:$8 sps:$4 sm:$0xff]  }
  0x17   : > { %v1603_v47 = vld [vmem:[%s2025_s3 + $0x90] ss:$8 sps:$4 sm:$0xff]   ;;  %v1604_v48 = vld [vmem:[%s2025_s3 + $0xa4] ss:$8 sps:$4 sm:$0xff]   ;;  %v1606_v49 = vld [vmem:[%s2025_s3 + $0xa0] ss:$8 sps:$4 sm:$0xff]  }
  0x18   : > { %560 = vmatpush1.bf16.msra.mxu0 %v1546_v9  ;;  %v1607_v50 = vld [vmem:[%s2025_s3 + $0xb4] ss:$8 sps:$4 sm:$0xff]   ;;  %v1609_v51 = vld [vmem:[%s2025_s3 + $0xb0] ss:$8 sps:$4 sm:$0xff]   ;;  %v1610_v52 = vld [vmem:[%s2025_s3 + $0xc4] ss:$8 sps:$4 sm:$0xff]  }
  0x19   : > { %561 = vmatprep.subr.bf16.mxu0 %v1547_v10  ;;  %835 = vmatpush1.bf16.msra.mxu1 %v1585_v25  ;;  %v1612_v53 = vld [vmem:[%s2025_s3 + $0xc0] ss:$8 sps:$4 sm:$0xff]   ;;  %v1613_v54 = vld [vmem:[%s2025_s3 + $0xd4] ss:$8 sps:$4 sm:$0xff]   ;;  %v1615_v55 = vld [vmem:[%s2025_s3 + $0xd0] ss:$8 sps:$4 sm:$0xff]  }
  0x1a   : > { %836 = vmatprep.subr.bf16.mxu1 %v1586_v27  ;;  %v1616_v56 = vld [vmem:[%s2025_s3 + $0xe4] ss:$8 sps:$4 sm:$0xff]   ;;  %v1618_v57 = vld [vmem:[%s2025_s3 + $0xe0] ss:$8 sps:$4 sm:$0xff]   ;;  %v1619_v58 = vld [vmem:[%s2025_s3 + $0xf4] ss:$8 sps:$4 sm:$0xff]  }
  0x1b   : > { %v1621_v59 = vld [vmem:[%s2025_s3 + $0xf0] ss:$8 sps:$4 sm:$0xff]   ;;  %v1622_v60 = vld [vmem:[%s2027_s5 + $0x40] sm:$0xff]   ;;  %v1624_v62 = vld [vmem:[%s2027_s5 + $0x48] sm:$0xff]   ;;  %v1946_v7 = vshrl.u32 %v396_v6, 7  ;;  %s1434_s22 = sshll.u32 %s2036_s27, 4 }
  0x1c   : > { %562 = vmatpush1.bf16.msra.mxu0 %v1549_v12  ;;  %v1623_v61 = vld [vmem:[%s2027_s5] sm:$0xff]   ;;  %v1625_v63 = vld [vmem:[%s2027_s5 + $0x8] sm:$0xff]   ;;  %v1626_v0 = vld [vmem:[%s2027_s5 + $0x50] sm:$0xff]  }
  0x1d   : > { %563 = vmatprep.subr.bf16.mxu0 %v1550_v13  ;;  %837 = vmatpush1.bf16.msra.mxu1 %v1588_v30  ;;  %v1627_v1 = vld [vmem:[%s2027_s5 + $0x10] sm:$0xff]   ;;  %v1628_v2 = vld [vmem:[%s2027_s5 + $0x58] sm:$0xff]   ;;  %v1630_v4 = vld [vmem:[%s2027_s5 + $0x60] sm:$0xff]   ;;  %v398_v8 = vsub.s32 0, %v1946_v7  ;;  %v402_v10 = vsub.s32 1, %v1946_v7 }
  0x1e   : > { %838 = vmatprep.subr.bf16.mxu1 %v1589_v32  ;;  %v1629_v3 = vld [vmem:[%s2027_s5 + $0x18] sm:$0xff]   ;;  %v1631_v5 = vld [vmem:[%s2027_s5 + $0x20] sm:$0xff]  }
  0x1f   : > { %v394_v9 = vld [vmem:[%s354_s25] sm:$0x3]  ;;  %s363_s25 = scalar_lea.vmem %s2030_s8, %s1434_s22 }
  0x20   : > { %564 = vmatpush1.bf16.msra.mxu0 %v1552_v18  ;;  %v399_v11 = vrot.slane %v394_v9, %v398_v8  ;;  %v403_v12 = vrot.slane %v394_v9, %v402_v10 }
  0x21   : > { %565 = vmatprep.subr.bf16.mxu0 %v1553_v20  ;;  %839 = vmatpush1.bf16.msra.mxu1 %v1591_v33 }
  0x22   : > { %840 = vmatprep.subr.bf16.mxu1 %v1592_v35 }
  0x24   : > { %566 = vmatpush1.bf16.msra.mxu0 %v1555_v22 }
  0x25   : > { %567 = vmatprep.subr.bf16.mxu0 %v1556_v24  ;;  %841 = vmatpush1.bf16.msra.mxu1 %v1594_v37 }
  0x26   : > { %842 = vmatprep.subr.bf16.mxu1 %v1595_v39 }
  0x28   : > { %568 = vmatpush1.bf16.msra.mxu0 %v1558_v26 }
  0x29   : > { %569 = vmatprep.subr.bf16.mxu0 %v1559_v28  ;;  %843 = vmatpush1.bf16.msra.mxu1 %v1597_v41 }
  0x2a   : > { %844 = vmatprep.subr.bf16.mxu1 %v1598_v43 }
  0x2c   : > { %570 = vmatpush1.bf16.msra.mxu0 %v1561_v29 }
  0x2d   : > { %571 = vmatprep.subr.bf16.mxu0 %v1562_v31  ;;  %845 = vmatpush1.bf16.msra.mxu1 %v1600_v44 }
  0x2e   : > { %846 = vmatprep.subr.bf16.mxu1 %v1601_v45 }
  0x30   : > { %572 = vmatpush1.bf16.msra.mxu0 %v1564_v34 }
  0x31   : > { %573 = vmatprep.subr.bf16.mxu0 %v1565_v36  ;;  %847 = vmatpush1.bf16.msra.mxu1 %v1603_v47 }
  0x32   : > { %848 = vmatprep.subr.bf16.mxu1 %v1604_v48 }
  0x34   : > { %574 = vmatpush1.bf16.msra.mxu0 %v1567_v38 }
  0x35   : > { %849 = vmatpush1.bf16.msra.mxu1 %v1606_v49  ;;  %1450 = vmatprep.subr.bf16.mxu0 %v1622_v60  ;;  %v1632_v49 = vld [vmem:[%s2027_s5 + $0x68] sm:$0xff]  }
  0x36   : > { %850 = vmatprep.subr.bf16.mxu1 %v1607_v50  ;;  %v1633_v50 = vld [vmem:[%s2027_s5 + $0x28] sm:$0xff]  }
  0x37   : > { %584 = vmatmul.mubr.bf16.vlgmr.msra.gmra.mrb[0].mxu0 %v1568_v40 }
  0x38   : > { %1369 = vmatprep.mubr.msk.bf16.mxu0 %vm544_vm0, %v1571_v42  ;;  %1451 = vmatpush3.bf16.msra.mxu0 %v1623_v61 }
  0x39   : > { %851 = vmatpush1.bf16.msra.mxu1 %v1609_v51  ;;  %1452 = vmatprep.subr.bf16.mxu0 %v1624_v62  ;;  %v1634_v51 = vld [vmem:[%s2027_s5 + $0x70] sm:$0xff]  }
  0x3a   : > { %852 = vmatprep.subr.bf16.mxu1 %v1610_v52  ;;  %v1635_v52 = vld [vmem:[%s2027_s5 + $0x30] sm:$0xff]  }
  0x3c   : > { %1453 = vmatpush3.bf16.msra.mxu0 %v1625_v63 }
  0x3d   : > { %853 = vmatpush1.bf16.msra.mxu1 %v1612_v53  ;;  %1454 = vmatprep.subr.bf16.mxu0 %v1626_v0  ;;  %v1636_v53 = vld [vmem:[%s2027_s5 + $0x78] sm:$0xff]  }
  0x3e   : > { %854 = vmatprep.subr.bf16.mxu1 %v1613_v54  ;;  %v1637_v54 = vld [vmem:[%s2027_s5 + $0x38] sm:$0xff]  }
  0x3f   : > { %594 = vmatmul.mubr.bf16.gmra.mrb[4].mxu0 %v1573_v46 }
  0x40   : > { %1455 = vmatpush3.bf16.msra.mxu0 %v1627_v1 }
  0x41   : > { %855 = vmatpush1.bf16.msra.mxu1 %v1615_v55  ;;  %1456 = vmatprep.subr.bf16.mxu0 %v1628_v2  ;;  %v1638_v55 = vld [vmem:[%s2029_s7] sm:$0xff]  }
  0x42   : > { %856 = vmatprep.subr.bf16.mxu1 %v1616_v56  ;;  %v1639_v56 = vld [vmem:[%s2029_s7 + $0x8] sm:$0xff]  }
  0x44   : > { %1457 = vmatpush3.bf16.msra.mxu0 %v1629_v3 }
  0x45   : > { %857 = vmatpush1.bf16.msra.mxu1 %v1618_v57  ;;  %1458 = vmatprep.subr.bf16.mxu0 %v1630_v4  ;;  %v1640_v57 = vld [vmem:[%s2029_s7 + $0x10] sm:$0xff]  }
  0x46   : > { %858 = vmatprep.subr.bf16.mxu1 %v1619_v58  ;;  %v656_v58 = vld [vmem:[%s2026_s4] sm:$0x3] }
  0x47   : > { %v665_v60 = vrot.slane %v656_v58, %v402_v10 }
  0x48   : > { %1459 = vmatpush3.bf16.msra.mxu0 %v1631_v5 }
  0x49   : > { %859 = vmatpush1.bf16.msra.mxu1 %v1621_v59  ;;  %1460 = vmatprep.subr.bf16.mxu0 %v1632_v49  ;;  %v661_v59 = vrot.slane %v656_v58, %v398_v8 }
  0x4a   : > { %1488 = vmatprep.subr.bf16.mxu1 %v1638_v55 }
  0x4c   : > { %1461 = vmatpush3.bf16.msra.mxu0 %v1633_v50 }
  0x4d   : > { %1462 = vmatprep.subr.bf16.mxu0 %v1634_v51 }
  0x50   : > { %1463 = vmatpush3.bf16.msra.mxu0 %v1635_v52 }
  0x51   : > { %1464 = vmatprep.subr.bf16.mxu0 %v1636_v53 }
  0x54   : > { %1465 = vmatpush3.bf16.msra.mxu0 %v1637_v54 }
 0x10a   : > { %v585_v13 = vpop.f32.mrb[0].mxu0 }
 0x10b   : > { %v586_v14 = vadd.f32 %v585_v13, %v399_v11  ;;  %v587_v15 = vpop.f32.mrb[1].mxu0 }
 0x10c   : > { %v588_v16 = vadd.f32 %v587_v15, %v403_v12  ;;  %v589_v17 = vpop.f32.mrb[2].mxu0 }
 0x10d   : > { %v604_v18 = vmul.f32 0.2, %v586_v14  ;;  %v590_v19 = vadd.f32 %v589_v17, %v399_v11  ;;  %v591_v20 = vpop.f32.mrb[3].mxu0 }
 0x10e   : > { %v605_v21 = vmul.f32 0.2, %v588_v16  ;;  %v592_v22 = vadd.f32 %v591_v20, %v403_v12 }
 0x10f   : > { %v606_v23 = vmul.f32 0.2, %v590_v19  ;;  %v612_v25 = vmax.f32 %v586_v14, %v604_v18 }
 0x110   : > { %v607_v24 = vmul.f32 0.2, %v592_v22  ;;  %v613_v28 = vmax.f32 %v588_v16, %v605_v21 }
 0x111   : > { %v614_v26 = vmax.f32 %v590_v19, %v606_v23 }
 0x112   : > { %v595_v27 = vpop.f32.mrb[4].mxu0  ;;  %v615_v29 = vmax.f32 %v592_v22, %v607_v24 }
 0x113   : > { %v596_v30 = vadd.f32 %v595_v27, %v399_v11  ;;  %v597_v31 = vpop.f32.mrb[5].mxu0  ;;  %v620_v32 = vpack.c.bf16 %v614_v26, %v612_v25 }
 0x114   : > { %v598_v33 = vadd.f32 %v597_v31, %v403_v12  ;;  %v599_v34 = vpop.f32.mrb[6].mxu0  ;;  %v621_v35 = vpack.c.bf16 %v615_v29, %v613_v28 }
 0x115   : > { %v608_v36 = vmul.f32 0.2, %v596_v30  ;;  %v600_v37 = vadd.f32 %v599_v34, %v399_v11  ;;  %v601_v38 = vpop.f32.mrb[7].mxu0  ;;  %v1642_v34 = vld [vmem:[%s2029_s7 + $0x20] sm:$0xff]  }
 0x116   : > { %v609_v39 = vmul.f32 0.2, %v598_v33  ;;  %v602_v40 = vadd.f32 %v601_v38, %v403_v12  ;;  %860 = vmatprep.mubr.bf16.mxu1 %v621_v35  ;;  %v1643_v35 = vld [vmem:[%s2029_s7 + $0x28] sm:$0xff]  }
 0x117   : > { %v610_v41 = vmul.f32 0.2, %v600_v37  ;;  %861 = vmatmul.mubr.bf16.vlgmr.msra.gmra.mrb[0].mxu1 %v620_v32  ;;  %v616_v43 = vmax.f32 %v596_v30, %v608_v36  ;;  %v1644_v36 = vld [vmem:[%s2029_s7 + $0x30] sm:$0xff]  }
 0x118   : > { %v611_v42 = vmul.f32 0.2, %v602_v40  ;;  %v617_v45 = vmax.f32 %v598_v33, %v609_v39  ;;  %1489 = vmatpush3.bf16.msra.mxu1 %v1638_v55  ;;  %v1641_v33 = vld [vmem:[%s2029_s7 + $0x18] sm:$0xff]   ;;  %v1402_v39 = vld [vmem:[%s2028_s6] ss:$0 sm:$0xff] }
 0x119   : > { %v618_v44 = vmax.f32 %v600_v37, %v610_v41  ;;  %1490 = vmatprep.subr.bf16.mxu1 %v1639_v56  ;;  %v1645_v37 = vld [vmem:[%s2029_s7 + $0x38] sm:$0xff]  }
 0x11a   : > { %v619_v46 = vmax.f32 %v602_v40, %v611_v42 }
 0x11b   : > { %v622_v47 = vpack.c.bf16 %v618_v44, %v616_v43 }
 0x11c   : > { %v623_v48 = vpack.c.bf16 %v619_v46, %v617_v45  ;;  %1491 = vmatpush3.bf16.msra.mxu1 %v1639_v56 }
 0x11d   : > { %1492 = vmatprep.subr.bf16.mxu1 %v1640_v57 }
 0x11e   : > { %870 = vmatprep.mubr.bf16.mxu1 %v623_v48 }
 0x11f   : > { %871 = vmatmul.mubr.bf16.gmra.mrb[4].mxu1 %v622_v47 }
 0x120   : > { %1493 = vmatpush3.bf16.msra.mxu1 %v1640_v57 }
 0x121   : > { %1494 = vmatprep.subr.bf16.mxu1 %v1641_v33 }
 0x124   : > { %1495 = vmatpush3.bf16.msra.mxu1 %v1641_v33 }
 0x125   : > { %1496 = vmatprep.subr.bf16.mxu1 %v1642_v34 }
 0x128   : > { %1497 = vmatpush3.bf16.msra.mxu1 %v1642_v34 }
 0x129   : > { %1498 = vmatprep.subr.bf16.mxu1 %v1643_v35 }
 0x12c   : > { %1499 = vmatpush3.bf16.msra.mxu1 %v1643_v35 }
 0x12d   : > { %1500 = vmatprep.subr.bf16.mxu1 %v1644_v36 }
 0x130   : > { %1501 = vmatpush3.bf16.msra.mxu1 %v1644_v36 }
 0x131   : > { %1502 = vmatprep.subr.bf16.mxu1 %v1645_v37 }
 0x134   : > { %1503 = vmatpush3.bf16.msra.mxu1 %v1645_v37 }
 0x1ea   : > { %v862_v61 = vpop.f32.mrb[0].mxu1 }
 0x1eb   : > { %v863_v62 = vadd.f32 %v862_v61, %v661_v59  ;;  %v864_v63 = vpop.f32.mrb[1].mxu1 }
 0x1ec   : > { %v865_v0 = vadd.f32 %v864_v63, %v665_v60  ;;  %v866_v1 = vpop.f32.mrb[2].mxu1 }
 0x1ed   : > { %v881_v2 = vmul.f32 0.2, %v863_v62  ;;  %v867_v3 = vadd.f32 %v866_v1, %v661_v59  ;;  %v868_v4 = vpop.f32.mrb[3].mxu1 }
 0x1ee   : > { %v882_v5 = vmul.f32 0.2, %v865_v0  ;;  %v869_v6 = vadd.f32 %v868_v4, %v665_v60 }
 0x1ef   : > { %v883_v9 = vmul.f32 0.2, %v867_v3  ;;  %v889_v12 = vmax.f32 %v863_v62, %v881_v2 }
 0x1f0   : > { %v884_v11 = vmul.f32 0.2, %v869_v6  ;;  %v890_v14 = vmax.f32 %v865_v0, %v882_v5 }
 0x1f1   : > { %v891_v13 = vmax.f32 %v867_v3, %v883_v9 }
 0x1f2   : > { %v892_v15 = vmax.f32 %v869_v6, %v884_v11  ;;  %v872_v8 = vpop.f32.mrb[4].mxu1 }
 0x1f3   : > { %v897_v16 = vpack.c.bf16 %v891_v13, %v889_v12  ;;  %v873_v7 = vadd.f32 %v872_v8, %v661_v59  ;;  %v874_v10 = vpop.f32.mrb[5].mxu1 }
 0x1f4   : > { %v875_v17 = vadd.f32 %v874_v10, %v665_v60  ;;  %v876_v18 = vpop.f32.mrb[6].mxu1  ;;  %v898_v19 = vpack.c.bf16 %v892_v15, %v890_v14 }
 0x1f5   : > { %v885_v20 = vmul.f32 0.2, %v873_v7  ;;  %v877_v21 = vadd.f32 %v876_v18, %v661_v59  ;;  %v878_v22 = vpop.f32.mrb[7].mxu1 }
 0x1f6   : > { %v886_v23 = vmul.f32 0.2, %v875_v17  ;;  %v879_v24 = vadd.f32 %v878_v22, %v665_v60  ;;  %1068 = vmatprep.mubr.bf16.mxu0 %v898_v19 }
 0x1f7   : > { %v887_v25 = vmul.f32 0.2, %v877_v21  ;;  %1069 = vmatmul.mubr.bf16.vlgmr.msra.gmra.mrb[8].mxu0 %v897_v16  ;;  %v893_v27 = vmax.f32 %v873_v7, %v885_v20 }
 0x1f8   : > { %v888_v26 = vmul.f32 0.2, %v879_v24  ;;  %v894_v29 = vmax.f32 %v875_v17, %v886_v23 }
 0x1f9   : > { %v895_v28 = vmax.f32 %v877_v21, %v887_v25 }
 0x1fa   : > { %v896_v30 = vmax.f32 %v879_v24, %v888_v26 }
 0x1fb   : > { %v899_v31 = vpack.c.bf16 %v895_v28, %v893_v27 }
 0x1fc   : > { %v900_v32 = vpack.c.bf16 %v896_v30, %v894_v29 }
 0x1fe   : > { %1076 = vmatprep.mubr.bf16.mxu0 %v900_v32 }
 0x1ff   : > { %1077 = vmatmul.mubr.bf16.gmra.mrb[12].mxu0 %v899_v31 }
 0x2ca   : > { %v1466_v38 = vpop.f32.mrb[8].mxu0 }
 0x2cb   : > { %v1467_v40 = vpop.f32.mrb[9].mxu0 }
 0x2cc   : > { %v1468_v41 = vadd.f32 %v1467_v40, %v1466_v38  ;;  %v1469_v42 = vpop.f32.mrb[10].mxu0 }
 0x2cd   : > { %v1470_v43 = vpop.f32.mrb[11].mxu0 }
 0x2ce   : > { %v1071_v44 = vadd.f32 %v1468_v41, %v1402_v39  ;;  %v1471_v45 = vadd.f32 %v1470_v43, %v1469_v42 }
 0x2d0   : > { %v1085_v46 = vmul.f32 0.2, %v1071_v44  ;;  %v1074_v47 = vadd.f32 %v1471_v45, %v1402_v39 }
 0x2d2   : > { %v1086_v48 = vmul.f32 0.2, %v1074_v47  ;;  %v1472_v49 = vpop.f32.mrb[12].mxu0  ;;  %v1089_v51 = vmax.f32 %v1071_v44, %v1085_v46 }
 0x2d3   : > { %v1473_v50 = vpop.f32.mrb[13].mxu0 }
 0x2d4   : > { %v1090_v52 = vmax.f32 %v1074_v47, %v1086_v48  ;;  %v1474_v53 = vadd.f32 %v1473_v50, %v1472_v49  ;;  %v1475_v54 = vpop.f32.mrb[14].mxu0 }
 0x2d5   : > { %v1476_v55 = vpop.f32.mrb[15].mxu0 }
 0x2d6   : > { %v1079_v56 = vadd.f32 %v1474_v53, %v1402_v39  ;;  %v1477_v57 = vadd.f32 %v1476_v55, %v1475_v54  ;;  %v1093_v58 = vpack.c.bf16 %v1090_v52, %v1089_v51 }
 0x2d8   : > { %v1087_v59 = vmul.f32 0.2, %v1079_v56  ;;  %v1082_v60 = vadd.f32 %v1477_v57, %v1402_v39  ;;  %1504 = vmatprep.mubr.bf16.mxu1 %v1093_v58 }
 0x2da   : > { %v1088_v61 = vmul.f32 0.2, %v1082_v60  ;;  %v1091_v62 = vmax.f32 %v1079_v56, %v1087_v59 }
 0x2dc   : > { %v1092_v63 = vmax.f32 %v1082_v60, %v1088_v61 }
 0x2de   : > { %v1094_v0 = vpack.c.bf16 %v1092_v63, %v1091_v62 }
 0x2e0   : > { %1505 = vmatmul.mubr.bf16.vlgmr.msra.gmra.mrb[8].mxu1 %v1094_v0 }
 0x3b3   : > { %v1506_v1 = vpop.f32.mrb[8].mxu1 }
 0x3b4   : > { %v1193_v2 = vpop.f32.mrb[9].mxu1 }
 0x3b5   : > { %v1507_v3 = vpop.f32.mrb[10].mxu1 }
 0x3b6   : > { %v1447_v4 = vpack.c.bf16 %v1507_v3, %v1506_v1  ;;  %v1196_v5 = vpop.f32.mrb[11].mxu1 }
 0x3b7   : > { %v1442_v6 = vpack.c.bf16 %v1196_v5, %v1193_v2 }
 0x3b8   : > { %1449 = vst [vmem:[%s363_s25 + $0x8] sm:$0xff] %v1447_v4  }
 0x3b9   : > { %1443 = vst [vmem:[%s363_s25] sm:$0xff] %v1442_v6  }
 0x3ba PF: > { %s18_s29 = sadd.s32 1, %s1668_s29   ;;  %s2031_s27 = smov %s1664_s28 }
 0x3bb   : > { %p15_p5 = scmp.ge.s32.totalorder %s18_s29, 4   ;;  %s2032_s28 = smov %s2034_s30 }
 0x3bd   :  { %17 = sbr.rel (!%p15_p5) target bundleno = 2 (0x2), region = 85 }

</bundles_post_ra>
